<compile_context>
chip_gen: v7x
topology: tpu7x:2x2x1
jax: 0.10.0
libtpu: 0.0.40
codegen_flags: <defaults>
</compile_context>

<pallas_src>
import numpy as np

import jax
import jax.numpy as jnp
from jax.experimental import pallas as pl
from jax.experimental.pallas import tpu as pltpu

X, Y = 8, 8                          # game.get_board_size()
HIDDEN = 32                          # args.hidden
ACTION_SIZE = X * Y + 1              # game.get_action_size() = 65
BATCH = 2
EPS = 1e-5                           # BatchNorm eps

HP, WP = X + 2, Y + 2                # padded spatial dims (10, 10)
NPOS = HP * WP                       # 100 padded positions per image
GUARD = 24                           # top guard rows    (>= (WP+1)*BATCH = 22, 8-aligned)
GUARD_BOT = 48                       # bottom guard rows (>= (2*WP+2)*BATCH = 44, 8-aligned)
CORE = NPOS * BATCH                  # 200 real rows, (position, batch) row order
ROWS = GUARD + CORE + GUARD_BOT      # 272 rows in the guarded buffers
VALID = (X - 2) * (Y - 2)            # 36 valid conv3/conv4 output positions
FLAT = HIDDEN * VALID                # 1152 fc1 input features
FC1, FC2 = 1024, 512
HEAD_N = 128                         # fused head width: [fc3 (65) | fc4 (1) | zero pad]


# ---------------------------------------------------------------------------
# The fused kernel: conv1..conv4 (+folded BN +ReLU), fc1/fc2 (+BN +ReLU),
# fused fc3|fc4 heads, softmax + tanh.  FC weights are manually prefetched
# HBM->VMEM so their DMA overlaps the conv stack.
# ---------------------------------------------------------------------------
def nnet_kernel(x_ref, cvec_ref, cw_ref, mask_ref, fsb_ref,
                f1w_hbm, f2w_hbm, fhw_hbm,
                out_ref,
                act_ref, f1w_vm, f2w_vm, fhw_vm, sem):
    # --- Kick off the FC weight prefetch immediately (overlaps conv stack). --
    cp1 = pltpu.make_async_copy(f1w_hbm, f1w_vm, sem.at[0])
    cp2 = pltpu.make_async_copy(f2w_hbm, f2w_vm, sem.at[1])
    cp3 = pltpu.make_async_copy(fhw_hbm, fhw_vm, sem.at[2])
    cp1.start()
    cp2.start()
    cp3.start()

    # Guards must read as zero for the shifted conv taps.
    act_ref[...] = jnp.zeros_like(act_ref)
    mask = mask_ref[...]                       # (CORE, 1) interior-position mask
    cvec = cvec_ref[...]                       # (17, HIDDEN): conv1 taps + conv scales/biases

    # --- conv1 (3x3, pad=1, Cin=1): input pre-broadcast to HIDDEN lanes, so
    # the 9 taps are plain aligned VPU multiplies. ---------------------------
    acc = jnp.zeros((CORE, HIDDEN), jnp.float32)
    for kh in range(3):
        for kw in range(3):
            d = ((kh - 1) * WP + (kw - 1)) * BATCH
            k = kh * 3 + kw
            acc = acc + x_ref[GUARD + d:GUARD + CORE + d, :] * cvec[k:k + 1, :]
    h = jnp.maximum(acc * cvec[9:10, :] + cvec[10:11, :], 0.0) * mask
    act_ref[GUARD:GUARD + CORE, :] = h

    # --- conv2 (3x3, pad=1): 9 shifted (CORE,32)@(32,32) bf16 MXU dots. ------
    acc = jnp.zeros((CORE, HIDDEN), jnp.float32)
    for kh in range(3):
        for kw in range(3):
            d = ((kh - 1) * WP + (kw - 1)) * BATCH
            k = kh * 3 + kw
            acc = acc + jnp.dot(
                act_ref[GUARD + d:GUARD + CORE + d, :].astype(jnp.bfloat16),
                cw_ref[k * HIDDEN:(k + 1) * HIDDEN, :],
                preferred_element_type=jnp.float32)
    h = jnp.maximum(acc * cvec[11:12, :] + cvec[12:13, :], 0.0) * mask
    act_ref[GUARD:GUARD + CORE, :] = h

    # --- conv3 (3x3, valid): output for valid position (i,j) lands on the
    # padded grid at (i+1, j+1); rows outside that window are finite garbage
    # that is never read by fc1. ----------------------------------------------
    acc = jnp.zeros((CORE, HIDDEN), jnp.float32)
    for kh in range(3):
        for kw in range(3):
            d = (kh * WP + kw) * BATCH
            k = kh * 3 + kw
            acc = acc + jnp.dot(
                act_ref[GUARD + d:GUARD + CORE + d, :].astype(jnp.bfloat16),
                cw_ref[(9 + k) * HIDDEN:(10 + k) * HIDDEN, :],
                preferred_element_type=jnp.float32)
    h = jnp.maximum(acc * cvec[13:14, :] + cvec[14:15, :], 0.0)

    # --- conv4 (1x1). ---------------------------------------------------------
    h = jnp.dot(h.astype(jnp.bfloat16), cw_ref[18 * HIDDEN:19 * HIDDEN, :],
                preferred_element_type=jnp.float32)
    h = jnp.maximum(h * cvec[15:16, :] + cvec[16:17, :], 0.0)
    hb = h.astype(jnp.bfloat16)

    fsb = fsb_ref[...]                          # (8, FC1): FC scales/biases (padded rows)

    # --- fc1 + fc_bn1 + relu: in-kernel flatten via 36 per-position partial
    # dots (no lane<->sublane relayout; each (BATCH,32) block is contiguous
    # because rows are in (position, batch) order). ---------------------------
    cp1.wait()
    acc1 = jnp.zeros((BATCH, FC1), jnp.float32)
    for i in range(X - 2):
        for j in range(Y - 2):
            p = (i + 1) * WP + (j + 1)          # padded-grid position of valid (i, j)
            q = i * (Y - 2) + j                 # f1_w block index, (h, w, c) row order
            acc1 = acc1 + jnp.dot(
                hb[p * BATCH:(p + 1) * BATCH, :],
                f1w_vm[q * HIDDEN:(q + 1) * HIDDEN, :],
                preferred_element_type=jnp.float32)
    h1 = jnp.maximum(acc1 * fsb[0:1, :] + fsb[1:2, :], 0.0)
    # TODO(synk): F.dropout is identity in eval mode; training-mode RNG dropout not implemented.

    # --- fc2 + fc_bn2 + relu. -------------------------------------------------
    cp2.wait()
    h2 = jnp.dot(h1.astype(jnp.bfloat16), f2w_vm[...],
                 preferred_element_type=jnp.float32)
    h2 = jnp.maximum(h2 * fsb[2:3, :FC2] + fsb[3:4, :FC2], 0.0)

    # --- fused heads: one lane-dense (FC2, 128) matmul, cols [0,65)=fc3,
    # col 65=fc4.  Softmax over the first 65 columns; tanh on column 65. ------
    cp3.wait()
    z = jnp.dot(h2.astype(jnp.bfloat16), fhw_vm[...],
                preferred_element_type=jnp.float32) + fsb[4:5, :HEAD_N]

    col = jax.lax.broadcasted_iota(jnp.int32, (BATCH, HEAD_N), 1)
    is_pi = col < ACTION_SIZE
    logits = jnp.where(is_pi, z, -1e30)
    m = jnp.max(logits, axis=-1, keepdims=True)
    e = jnp.where(is_pi, jnp.exp(logits - m), 0.0)
    pvals = e * pl.reciprocal(jnp.sum(e, axis=-1, keepdims=True), approx=True)
    vcol = jnp.tanh(z[:, ACTION_SIZE:ACTION_SIZE + 1])
    # Lane-dense output slab: [softmax(pi) (65) | tanh(v) (1) | zeros].
    out_ref[...] = jnp.where(col == ACTION_SIZE,
                             jnp.broadcast_to(vcol, (BATCH, HEAD_N)),
                             pvals)


# ---------------------------------------------------------------------------
# pallas_call wrapper (no grid: single block; FC weights streamed from HBM).
# ---------------------------------------------------------------------------
def nnet_pallas(params, x_b):
    vmem = pl.BlockSpec(memory_space=pltpu.MemorySpace.VMEM)
    hbm = pl.BlockSpec(memory_space=pl.ANY)
    return pl.pallas_call(
        nnet_kernel,
        out_shape=jax.ShapeDtypeStruct((BATCH, HEAD_N), jnp.float32),
        in_specs=[vmem, vmem, vmem, vmem, vmem, hbm, hbm, hbm],
        out_specs=vmem,
        scratch_shapes=[
            pltpu.VMEM((ROWS, HIDDEN), jnp.float32),     # guarded activation grid
            pltpu.VMEM((FLAT, FC1), jnp.bfloat16),       # fc1 weight landing buffer
            pltpu.VMEM((FC1, FC2), jnp.bfloat16),        # fc2 weight landing buffer
            pltpu.VMEM((FC2, HEAD_N), jnp.bfloat16),     # fused head weight landing buffer
            pltpu.SemaphoreType.DMA((3,)),
        ],
        compiler_params=pltpu.CompilerParams(vmem_limit_bytes=32 * 1024 * 1024),
    )(x_b, params["cvec"], params["cw"], params["mask"], params["fsb"],
      params["f1_w"], params["f2_w"], params["fh_w"])


def nnet_forward(params, s):
    B = s.shape[0]
    assert B == BATCH, "kernel constants are specialized to BATCH"
    # Only wrapper glue: zero-pad the board, lay it out in (position, batch)
    # row order on the guarded grid, and broadcast the single channel to
    # HIDDEN lanes once (hoisted conv1 broadcast).
    x_pad = jnp.pad(s.reshape(B, X, Y).astype(jnp.float32),
                    ((0, 0), (1, 1), (1, 1)))                   # (B, 10, 10)
    x_rows = jnp.transpose(x_pad, (1, 2, 0)).reshape(NPOS * B, 1)
    x_rows = jnp.pad(x_rows, ((GUARD, GUARD_BOT), (0, 0)))      # (ROWS, 1)
    x_b = jnp.broadcast_to(x_rows, (ROWS, HIDDEN))              # (ROWS, HIDDEN)

    out = nnet_pallas(params, x_b)                              # (B, 128)
    return out[:, :ACTION_SIZE], out[:, ACTION_SIZE:ACTION_SIZE + 1]


# ---------------------------------------------------------------------------
# Parameter init (BN folded from running stats), packed slabs, masks.
# ---------------------------------------------------------------------------
def _interior_mask():
    """(CORE, 1) mask: 1.0 where the row's position is on the 8x8 interior."""
    pos = np.arange(CORE) // BATCH            # (position, batch) row order
    hp, wp = pos // WP, pos % WP
    m = ((hp >= 1) & (hp <= X) & (wp >= 1) & (wp <= Y)).astype(np.float32)
    return jnp.asarray(m.reshape(CORE, 1))


def init_params(key):
    ks = iter(jax.random.split(key, 64))

    def nrm(shape, s=0.1):
        return s * jax.random.normal(next(ks), shape, jnp.float32)

    def bn_fold(lin_b, c):
        gamma = 1.0 + nrm((c,))
        beta = nrm((c,))
        rmean = nrm((c,))
        rvar = 1.0 + jnp.abs(nrm((c,)))
        scale = gamma / jnp.sqrt(rvar + EPS)
        bias = (lin_b - rmean) * scale + beta
        return scale, bias

    # Conv weights (tap row order (kh, kw, cin) -- a one-time reorder of
    # PyTorch's (cout, cin, kh, kw)) + folded BN scale/bias.
    c1_w = nrm((9, HIDDEN))
    s1, b1 = bn_fold(nrm((HIDDEN,), 0.01), HIDDEN)
    c2_w = nrm((9 * HIDDEN, HIDDEN))
    s2, b2 = bn_fold(nrm((HIDDEN,), 0.01), HIDDEN)
    c3_w = nrm((9 * HIDDEN, HIDDEN))
    s3, b3 = bn_fold(nrm((HIDDEN,), 0.01), HIDDEN)
    c4_w = nrm((HIDDEN, HIDDEN))
    s4, b4 = bn_fold(nrm((HIDDEN,), 0.01), HIDDEN)

    # Packed f32 slab: rows 0..8 = conv1 taps, rows 9..16 = s1,b1,s2,b2,s3,b3,s4,b4.
    cvec = jnp.concatenate(
        [c1_w] + [v.reshape(1, HIDDEN) for v in (s1, b1, s2, b2, s3, b3, s4, b4)],
        axis=0)
    # Packed bf16 conv-weight slab: [conv2 (288) | conv3 (288) | conv4 (32)] x 32.
    cw = jnp.concatenate([c2_w, c3_w, c4_w], axis=0).astype(jnp.bfloat16)

    # FC weights in bf16 (streamed from HBM, prefetched in-kernel).  f1_w rows
    # are ordered (h, w, c) to match the conv output layout directly; a real
    # PyTorch checkpoint ((c, h, w) input order) would be permuted once at load.
    f1_w = nrm((FLAT, FC1))
    f1_s, f1_b = bn_fold(nrm((FC1,), 0.01), FC1)
    f2_w = nrm((FC1, FC2))
    f2_s, f2_b = bn_fold(nrm((FC2,), 0.01), FC2)

    # Heads fused into one lane-dense (FC2, 128) weight: [fc3 | fc4 | zeros].
    w3 = nrm((FC2, ACTION_SIZE))
    b3h = nrm((ACTION_SIZE,), 0.01)
    w4 = nrm((FC2, 1))
    b4h = nrm((1,), 0.01)
    fh_w = jnp.zeros((FC2, HEAD_N), jnp.float32)
    fh_w = fh_w.at[:, :ACTION_SIZE].set(w3).at[:, ACTION_SIZE:ACTION_SIZE + 1].set(w4)
    fh_b = jnp.zeros((HEAD_N,), jnp.float32)
    fh_b = fh_b.at[:ACTION_SIZE].set(b3h).at[ACTION_SIZE].set(b4h[0])

    # Packed FC scale/bias slab (rows padded to FC1 lanes):
    # 0=f1_s, 1=f1_b, 2=f2_s[:512], 3=f2_b[:512], 4=fh_b[:128], rest zero.
    fsb = jnp.zeros((8, FC1), jnp.float32)
    fsb = fsb.at[0, :].set(f1_s).at[1, :].set(f1_b)
    fsb = fsb.at[2, :FC2].set(f2_s).at[3, :FC2].set(f2_b)
    fsb = fsb.at[4, :HEAD_N].set(fh_b)

    return {
        "cvec": cvec,
        "cw": cw,
        "mask": _interior_mask(),
        "fsb": fsb,
        "f1_w": f1_w.astype(jnp.bfloat16),
        "f2_w": f2_w.astype(jnp.bfloat16),
        "fh_w": fh_w.astype(jnp.bfloat16),
    }


# ---------------------------------------------------------------------------
if __name__ == "__main__":
    key = jax.random.PRNGKey(0)
    kp, kx = jax.random.split(key)
    params = init_params(kp)
    s = jax.random.normal(kx, (BATCH, X, Y), jnp.float32)

    fwd = jax.jit(nnet_forward)
    p, v = fwd(params, s)
    jax.block_until_ready((p, v))

    assert p.shape == (BATCH, ACTION_SIZE)
    assert v.shape == (BATCH, 1)
    assert bool(jnp.all(jnp.isfinite(p))) and bool(jnp.all(jnp.isfinite(v)))
    assert bool(jnp.all(jnp.abs(jnp.sum(p, axis=1) - 1.0) < 5e-3))
    assert bool(jnp.all(jnp.abs(v) <= 1.0))
    print("KERNEL_OK")
</pallas_src>

<mosaic_0001>
module attributes {stable_mosaic.version = 11 : i64} {
  func.func @nnet_kernel(%arg0: memref<272x32xf32, #tpu.memory_space<vmem>>, %arg1: memref<17x32xf32, #tpu.memory_space<vmem>>, %arg2: memref<608x32xbf16, #tpu.memory_space<vmem>>, %arg3: memref<200x1xf32, #tpu.memory_space<vmem>>, %arg4: memref<8x1024xf32, #tpu.memory_space<vmem>>, %arg5: memref<1152x1024xbf16, #tpu.memory_space<any>>, %arg6: memref<1024x512xbf16, #tpu.memory_space<any>>, %arg7: memref<512x128xbf16, #tpu.memory_space<any>>, %arg8: memref<2x128xf32, #tpu.memory_space<vmem>>, %arg9: memref<272x32xf32, #tpu.memory_space<vmem>>, %arg10: memref<1152x1024xbf16, #tpu.memory_space<vmem>>, %arg11: memref<1024x512xbf16, #tpu.memory_space<vmem>>, %arg12: memref<512x128xbf16, #tpu.memory_space<vmem>>, %arg13: memref<3x!tpu.dma_semaphore, #tpu.memory_space<semaphore_mem>>) attributes {dimension_semantics = [], scalar_prefetch = 0 : i64, scratch_operands = 5 : i64, tpu.core_type = #tpu.core_type<tc>} {
    %c0_i32 = arith.constant 0 : i32
    %0 = tpu.memref_slice %arg13[%c0_i32] : memref<3x!tpu.dma_semaphore, #tpu.memory_space<semaphore_mem>> -> memref<1x!tpu.dma_semaphore, #tpu.memory_space<semaphore_mem>>
    %1 = tpu.memref_squeeze %0 : memref<1x!tpu.dma_semaphore, #tpu.memory_space<semaphore_mem>> -> memref<!tpu.dma_semaphore, #tpu.memory_space<semaphore_mem>>
    tpu.enqueue_dma source(%arg5 : memref<1152x1024xbf16, #tpu.memory_space<any>>) target(%arg10 : memref<1152x1024xbf16, #tpu.memory_space<vmem>>) target_semaphore(%1 : memref<!tpu.dma_semaphore, #tpu.memory_space<semaphore_mem>>)
    %c1_i32 = arith.constant 1 : i32
    %2 = tpu.memref_slice %arg13[%c1_i32] : memref<3x!tpu.dma_semaphore, #tpu.memory_space<semaphore_mem>> -> memref<1x!tpu.dma_semaphore, #tpu.memory_space<semaphore_mem>>
    %3 = tpu.memref_squeeze %2 : memref<1x!tpu.dma_semaphore, #tpu.memory_space<semaphore_mem>> -> memref<!tpu.dma_semaphore, #tpu.memory_space<semaphore_mem>>
    tpu.enqueue_dma source(%arg6 : memref<1024x512xbf16, #tpu.memory_space<any>>) target(%arg11 : memref<1024x512xbf16, #tpu.memory_space<vmem>>) target_semaphore(%3 : memref<!tpu.dma_semaphore, #tpu.memory_space<semaphore_mem>>)
    %c2_i32 = arith.constant 2 : i32
    %4 = tpu.memref_slice %arg13[%c2_i32] : memref<3x!tpu.dma_semaphore, #tpu.memory_space<semaphore_mem>> -> memref<1x!tpu.dma_semaphore, #tpu.memory_space<semaphore_mem>>
    %5 = tpu.memref_squeeze %4 : memref<1x!tpu.dma_semaphore, #tpu.memory_space<semaphore_mem>> -> memref<!tpu.dma_semaphore, #tpu.memory_space<semaphore_mem>>
    tpu.enqueue_dma source(%arg7 : memref<512x128xbf16, #tpu.memory_space<any>>) target(%arg12 : memref<512x128xbf16, #tpu.memory_space<vmem>>) target_semaphore(%5 : memref<!tpu.dma_semaphore, #tpu.memory_space<semaphore_mem>>)
    %cst = arith.constant 0.000000e+00 : f32
    %6 = vector.broadcast %cst : f32 to vector<272x32xf32>
    %c0 = arith.constant 0 : index
    %c0_0 = arith.constant 0 : index
    %7 = vector.load %arg9[%c0, %c0_0] : memref<272x32xf32, #tpu.memory_space<vmem>>, vector<272x32xf32>
    tpu.vector_store %arg9[%c0, %c0_0], %6 {strides = array<i32>} : memref<272x32xf32, #tpu.memory_space<vmem>>, vector<272x32xf32>,
    %c0_1 = arith.constant 0 : index
    %c0_2 = arith.constant 0 : index
    %8 = vector.load %arg3[%c0_1, %c0_2] : memref<200x1xf32, #tpu.memory_space<vmem>>, vector<200x1xf32>
    %c0_3 = arith.constant 0 : index
    %c0_4 = arith.constant 0 : index
    %9 = vector.load %arg1[%c0_3, %c0_4] : memref<17x32xf32, #tpu.memory_space<vmem>>, vector<17x32xf32>
    %cst_5 = arith.constant 0.000000e+00 : f32
    %10 = vector.broadcast %cst_5 : f32 to vector<200x32xf32>
    %c2 = arith.constant 2 : index
    %c0_6 = arith.constant 0 : index
    %11 = vector.load %arg0[%c2, %c0_6] : memref<272x32xf32, #tpu.memory_space<vmem>>, vector<200x32xf32>
    %12 = vector.extract_strided_slice %9 {offsets = [0, 0], sizes = [1, 32], strides = [1, 1]} : vector<17x32xf32> to vector<1x32xf32>
    %13 = vector.broadcast %12 : vector<1x32xf32> to vector<200x32xf32>
    %14 = arith.mulf %11, %13 : vector<200x32xf32>
    %15 = arith.addf %10, %14 : vector<200x32xf32>
    %c4 = arith.constant 4 : index
    %c0_7 = arith.constant 0 : index
    %16 = vector.load %arg0[%c4, %c0_7] : memref<272x32xf32, #tpu.memory_space<vmem>>, vector<200x32xf32>
    %17 = vector.extract_strided_slice %9 {offsets = [1, 0], sizes = [1, 32], strides = [1, 1]} : vector<17x32xf32> to vector<1x32xf32>
    %18 = vector.broadcast %17 : vector<1x32xf32> to vector<200x32xf32>
    %19 = arith.mulf %16, %18 : vector<200x32xf32>
    %20 = arith.addf %15, %19 : vector<200x32xf32>
    %c6 = arith.constant 6 : index
    %c0_8 = arith.constant 0 : index
    %21 = vector.load %arg0[%c6, %c0_8] : memref<272x32xf32, #tpu.memory_space<vmem>>, vector<200x32xf32>
    %22 = vector.extract_strided_slice %9 {offsets = [2, 0], sizes = [1, 32], strides = [1, 1]} : vector<17x32xf32> to vector<1x32xf32>
    %23 = vector.broadcast %22 : vector<1x32xf32> to vector<200x32xf32>
    %24 = arith.mulf %21, %23 : vector<200x32xf32>
    %25 = arith.addf %20, %24 : vector<200x32xf32>
    %c22 = arith.constant 22 : index
    %c0_9 = arith.constant 0 : index
    %26 = vector.load %arg0[%c22, %c0_9] : memref<272x32xf32, #tpu.memory_space<vmem>>, vector<200x32xf32>
    %27 = vector.extract_strided_slice %9 {offsets = [3, 0], sizes = [1, 32], strides = [1, 1]} : vector<17x32xf32> to vector<1x32xf32>
    %28 = vector.broadcast %27 : vector<1x32xf32> to vector<200x32xf32>
    %29 = arith.mulf %26, %28 : vector<200x32xf32>
    %30 = arith.addf %25, %29 : vector<200x32xf32>
    %c24 = arith.constant 24 : index
    %c0_10 = arith.constant 0 : index
    %31 = vector.load %arg0[%c24, %c0_10] : memref<272x32xf32, #tpu.memory_space<vmem>>, vector<200x32xf32>
    %32 = vector.extract_strided_slice %9 {offsets = [4, 0], sizes = [1, 32], strides = [1, 1]} : vector<17x32xf32> to vector<1x32xf32>
    %33 = vector.broadcast %32 : vector<1x32xf32> to vector<200x32xf32>
    %34 = arith.mulf %31, %33 : vector<200x32xf32>
    %35 = arith.addf %30, %34 : vector<200x32xf32>
    %c26 = arith.constant 26 : index
    %c0_11 = arith.constant 0 : index
    %36 = vector.load %arg0[%c26, %c0_11] : memref<272x32xf32, #tpu.memory_space<vmem>>, vector<200x32xf32>
    %37 = vector.extract_strided_slice %9 {offsets = [5, 0], sizes = [1, 32], strides = [1, 1]} : vector<17x32xf32> to vector<1x32xf32>
    %38 = vector.broadcast %37 : vector<1x32xf32> to vector<200x32xf32>
    %39 = arith.mulf %36, %38 : vector<200x32xf32>
    %40 = arith.addf %35, %39 : vector<200x32xf32>
    %c42 = arith.constant 42 : index
    %c0_12 = arith.constant 0 : index
    %41 = vector.load %arg0[%c42, %c0_12] : memref<272x32xf32, #tpu.memory_space<vmem>>, vector<200x32xf32>
    %42 = vector.extract_strided_slice %9 {offsets = [6, 0], sizes = [1, 32], strides = [1, 1]} : vector<17x32xf32> to vector<1x32xf32>
    %43 = vector.broadcast %42 : vector<1x32xf32> to vector<200x32xf32>
    %44 = arith.mulf %41, %43 : vector<200x32xf32>
    %45 = arith.addf %40, %44 : vector<200x32xf32>
    %c44 = arith.constant 44 : index
    %c0_13 = arith.constant 0 : index
    %46 = vector.load %arg0[%c44, %c0_13] : memref<272x32xf32, #tpu.memory_space<vmem>>, vector<200x32xf32>
    %47 = vector.extract_strided_slice %9 {offsets = [7, 0], sizes = [1, 32], strides = [1, 1]} : vector<17x32xf32> to vector<1x32xf32>
    %48 = vector.broadcast %47 : vector<1x32xf32> to vector<200x32xf32>
    %49 = arith.mulf %46, %48 : vector<200x32xf32>
    %50 = arith.addf %45, %49 : vector<200x32xf32>
    %c46 = arith.constant 46 : index
    %c0_14 = arith.constant 0 : index
    %51 = vector.load %arg0[%c46, %c0_14] : memref<272x32xf32, #tpu.memory_space<vmem>>, vector<200x32xf32>
    %52 = vector.extract_strided_slice %9 {offsets = [8, 0], sizes = [1, 32], strides = [1, 1]} : vector<17x32xf32> to vector<1x32xf32>
    %53 = vector.broadcast %52 : vector<1x32xf32> to vector<200x32xf32>
    %54 = arith.mulf %51, %53 : vector<200x32xf32>
    %55 = arith.addf %50, %54 : vector<200x32xf32>
    %56 = vector.extract_strided_slice %9 {offsets = [9, 0], sizes = [1, 32], strides = [1, 1]} : vector<17x32xf32> to vector<1x32xf32>
    %57 = vector.broadcast %56 : vector<1x32xf32> to vector<200x32xf32>
    %58 = arith.mulf %55, %57 : vector<200x32xf32>
    %59 = vector.extract_strided_slice %9 {offsets = [10, 0], sizes = [1, 32], strides = [1, 1]} : vector<17x32xf32> to vector<1x32xf32>
    %60 = vector.broadcast %59 : vector<1x32xf32> to vector<200x32xf32>
    %61 = arith.addf %58, %60 : vector<200x32xf32>
    %cst_15 = arith.constant 0.000000e+00 : f32
    %62 = vector.broadcast %cst_15 : f32 to vector<200x32xf32>
    %63 = arith.maximumf %61, %62 : vector<200x32xf32>
    %64 = vector.broadcast %8 : vector<200x1xf32> to vector<200x32xf32>
    %65 = arith.mulf %63, %64 : vector<200x32xf32>
    %c24_16 = arith.constant 24 : index
    %c0_17 = arith.constant 0 : index
    %66 = vector.load %arg9[%c24_16, %c0_17] : memref<272x32xf32, #tpu.memory_space<vmem>>, vector<200x32xf32>
    tpu.vector_store %arg9[%c24_16, %c0_17], %65 {strides = array<i32>} : memref<272x32xf32, #tpu.memory_space<vmem>>, vector<200x32xf32>,
    %cst_18 = arith.constant 0.000000e+00 : f32
    %67 = vector.broadcast %cst_18 : f32 to vector<200x32xf32>
    %c2_19 = arith.constant 2 : index
    %c0_20 = arith.constant 0 : index
    %68 = vector.load %arg9[%c2_19, %c0_20] : memref<272x32xf32, #tpu.memory_space<vmem>>, vector<200x32xf32>
    %69 = arith.truncf %68 : vector<200x32xf32> to vector<200x32xbf16>
    %c0_21 = arith.constant 0 : index
    %c0_22 = arith.constant 0 : index
    %70 = vector.load %arg2[%c0_21, %c0_22] : memref<608x32xbf16, #tpu.memory_space<vmem>>, vector<32x32xbf16>
    %cst_23 = arith.constant dense<0.000000e+00> : vector<200x32xf32>
    %71 = tpu.matmul %69, %70, %cst_23 {dimension_numbers = #tpu.dot_dimension_numbers<[1], [0], [0], [1], [0, 0, 1, 1], [], []>} : vector<200x32xbf16>, vector<32x32xbf16>, vector<200x32xf32> -> vector<200x32xf32>
    %72 = arith.addf %67, %71 : vector<200x32xf32>
    %c4_24 = arith.constant 4 : index
    %c0_25 = arith.constant 0 : index
    %73 = vector.load %arg9[%c4_24, %c0_25] : memref<272x32xf32, #tpu.memory_space<vmem>>, vector<200x32xf32>
    %74 = arith.truncf %73 : vector<200x32xf32> to vector<200x32xbf16>
    %c32 = arith.constant 32 : index
    %c0_26 = arith.constant 0 : index
    %75 = vector.load %arg2[%c32, %c0_26] : memref<608x32xbf16, #tpu.memory_space<vmem>>, vector<32x32xbf16>
    %cst_27 = arith.constant dense<0.000000e+00> : vector<200x32xf32>
    %76 = tpu.matmul %74, %75, %cst_27 {dimension_numbers = #tpu.dot_dimension_numbers<[1], [0], [0], [1], [0, 0, 1, 1], [], []>} : vector<200x32xbf16>, vector<32x32xbf16>, vector<200x32xf32> -> vector<200x32xf32>
    %77 = arith.addf %72, %76 : vector<200x32xf32>
    %c6_28 = arith.constant 6 : index
    %c0_29 = arith.constant 0 : index
    %78 = vector.load %arg9[%c6_28, %c0_29] : memref<272x32xf32, #tpu.memory_space<vmem>>, vector<200x32xf32>
    %79 = arith.truncf %78 : vector<200x32xf32> to vector<200x32xbf16>
    %c64 = arith.constant 64 : index
    %c0_30 = arith.constant 0 : index
    %80 = vector.load %arg2[%c64, %c0_30] : memref<608x32xbf16, #tpu.memory_space<vmem>>, vector<32x32xbf16>
    %cst_31 = arith.constant dense<0.000000e+00> : vector<200x32xf32>
    %81 = tpu.matmul %79, %80, %cst_31 {dimension_numbers = #tpu.dot_dimension_numbers<[1], [0], [0], [1], [0, 0, 1, 1], [], []>} : vector<200x32xbf16>, vector<32x32xbf16>, vector<200x32xf32> -> vector<200x32xf32>
    %82 = arith.addf %77, %81 : vector<200x32xf32>
    %c22_32 = arith.constant 22 : index
    %c0_33 = arith.constant 0 : index
    %83 = vector.load %arg9[%c22_32, %c0_33] : memref<272x32xf32, #tpu.memory_space<vmem>>, vector<200x32xf32>
    %84 = arith.truncf %83 : vector<200x32xf32> to vector<200x32xbf16>
    %c96 = arith.constant 96 : index
    %c0_34 = arith.constant 0 : index
    %85 = vector.load %arg2[%c96, %c0_34] : memref<608x32xbf16, #tpu.memory_space<vmem>>, vector<32x32xbf16>
    %cst_35 = arith.constant dense<0.000000e+00> : vector<200x32xf32>
    %86 = tpu.matmul %84, %85, %cst_35 {dimension_numbers = #tpu.dot_dimension_numbers<[1], [0], [0], [1], [0, 0, 1, 1], [], []>} : vector<200x32xbf16>, vector<32x32xbf16>, vector<200x32xf32> -> vector<200x32xf32>
    %87 = arith.addf %82, %86 : vector<200x32xf32>
    %c24_36 = arith.constant 24 : index
    %c0_37 = arith.constant 0 : index
    %88 = vector.load %arg9[%c24_36, %c0_37] : memref<272x32xf32, #tpu.memory_space<vmem>>, vector<200x32xf32>
    %89 = arith.truncf %88 : vector<200x32xf32> to vector<200x32xbf16>
    %c128 = arith.constant 128 : index
    %c0_38 = arith.constant 0 : index
    %90 = vector.load %arg2[%c128, %c0_38] : memref<608x32xbf16, #tpu.memory_space<vmem>>, vector<32x32xbf16>
    %cst_39 = arith.constant dense<0.000000e+00> : vector<200x32xf32>
    %91 = tpu.matmul %89, %90, %cst_39 {dimension_numbers = #tpu.dot_dimension_numbers<[1], [0], [0], [1], [0, 0, 1, 1], [], []>} : vector<200x32xbf16>, vector<32x32xbf16>, vector<200x32xf32> -> vector<200x32xf32>
    %92 = arith.addf %87, %91 : vector<200x32xf32>
    %c26_40 = arith.constant 26 : index
    %c0_41 = arith.constant 0 : index
    %93 = vector.load %arg9[%c26_40, %c0_41] : memref<272x32xf32, #tpu.memory_space<vmem>>, vector<200x32xf32>
    %94 = arith.truncf %93 : vector<200x32xf32> to vector<200x32xbf16>
    %c160 = arith.constant 160 : index
    %c0_42 = arith.constant 0 : index
    %95 = vector.load %arg2[%c160, %c0_42] : memref<608x32xbf16, #tpu.memory_space<vmem>>, vector<32x32xbf16>
    %cst_43 = arith.constant dense<0.000000e+00> : vector<200x32xf32>
    %96 = tpu.matmul %94, %95, %cst_43 {dimension_numbers = #tpu.dot_dimension_numbers<[1], [0], [0], [1], [0, 0, 1, 1], [], []>} : vector<200x32xbf16>, vector<32x32xbf16>, vector<200x32xf32> -> vector<200x32xf32>
    %97 = arith.addf %92, %96 : vector<200x32xf32>
    %c42_44 = arith.constant 42 : index
    %c0_45 = arith.constant 0 : index
    %98 = vector.load %arg9[%c42_44, %c0_45] : memref<272x32xf32, #tpu.memory_space<vmem>>, vector<200x32xf32>
    %99 = arith.truncf %98 : vector<200x32xf32> to vector<200x32xbf16>
    %c192 = arith.constant 192 : index
    %c0_46 = arith.constant 0 : index
    %100 = vector.load %arg2[%c192, %c0_46] : memref<608x32xbf16, #tpu.memory_space<vmem>>, vector<32x32xbf16>
    %cst_47 = arith.constant dense<0.000000e+00> : vector<200x32xf32>
    %101 = tpu.matmul %99, %100, %cst_47 {dimension_numbers = #tpu.dot_dimension_numbers<[1], [0], [0], [1], [0, 0, 1, 1], [], []>} : vector<200x32xbf16>, vector<32x32xbf16>, vector<200x32xf32> -> vector<200x32xf32>
    %102 = arith.addf %97, %101 : vector<200x32xf32>
    %c44_48 = arith.constant 44 : index
    %c0_49 = arith.constant 0 : index
    %103 = vector.load %arg9[%c44_48, %c0_49] : memref<272x32xf32, #tpu.memory_space<vmem>>, vector<200x32xf32>
    %104 = arith.truncf %103 : vector<200x32xf32> to vector<200x32xbf16>
    %c224 = arith.constant 224 : index
    %c0_50 = arith.constant 0 : index
    %105 = vector.load %arg2[%c224, %c0_50] : memref<608x32xbf16, #tpu.memory_space<vmem>>, vector<32x32xbf16>
    %cst_51 = arith.constant dense<0.000000e+00> : vector<200x32xf32>
    %106 = tpu.matmul %104, %105, %cst_51 {dimension_numbers = #tpu.dot_dimension_numbers<[1], [0], [0], [1], [0, 0, 1, 1], [], []>} : vector<200x32xbf16>, vector<32x32xbf16>, vector<200x32xf32> -> vector<200x32xf32>
    %107 = arith.addf %102, %106 : vector<200x32xf32>
    %c46_52 = arith.constant 46 : index
    %c0_53 = arith.constant 0 : index
    %108 = vector.load %arg9[%c46_52, %c0_53] : memref<272x32xf32, #tpu.memory_space<vmem>>, vector<200x32xf32>
    %109 = arith.truncf %108 : vector<200x32xf32> to vector<200x32xbf16>
    %c256 = arith.constant 256 : index
    %c0_54 = arith.constant 0 : index
    %110 = vector.load %arg2[%c256, %c0_54] : memref<608x32xbf16, #tpu.memory_space<vmem>>, vector<32x32xbf16>
    %cst_55 = arith.constant dense<0.000000e+00> : vector<200x32xf32>
    %111 = tpu.matmul %109, %110, %cst_55 {dimension_numbers = #tpu.dot_dimension_numbers<[1], [0], [0], [1], [0, 0, 1, 1], [], []>} : vector<200x32xbf16>, vector<32x32xbf16>, vector<200x32xf32> -> vector<200x32xf32>
    %112 = arith.addf %107, %111 : vector<200x32xf32>
    %113 = vector.extract_strided_slice %9 {offsets = [11, 0], sizes = [1, 32], strides = [1, 1]} : vector<17x32xf32> to vector<1x32xf32>
    %114 = vector.broadcast %113 : vector<1x32xf32> to vector<200x32xf32>
    %115 = arith.mulf %112, %114 : vector<200x32xf32>
    %116 = vector.extract_strided_slice %9 {offsets = [12, 0], sizes = [1, 32], strides = [1, 1]} : vector<17x32xf32> to vector<1x32xf32>
    %117 = vector.broadcast %116 : vector<1x32xf32> to vector<200x32xf32>
    %118 = arith.addf %115, %117 : vector<200x32xf32>
    %cst_56 = arith.constant 0.000000e+00 : f32
    %119 = vector.broadcast %cst_56 : f32 to vector<200x32xf32>
    %120 = arith.maximumf %118, %119 : vector<200x32xf32>
    %121 = vector.broadcast %8 : vector<200x1xf32> to vector<200x32xf32>
    %122 = arith.mulf %120, %121 : vector<200x32xf32>
    %c24_57 = arith.constant 24 : index
    %c0_58 = arith.constant 0 : index
    %123 = vector.load %arg9[%c24_57, %c0_58] : memref<272x32xf32, #tpu.memory_space<vmem>>, vector<200x32xf32>
    tpu.vector_store %arg9[%c24_57, %c0_58], %122 {strides = array<i32>} : memref<272x32xf32, #tpu.memory_space<vmem>>, vector<200x32xf32>,
    %cst_59 = arith.constant 0.000000e+00 : f32
    %124 = vector.broadcast %cst_59 : f32 to vector<200x32xf32>
    %c24_60 = arith.constant 24 : index
    %c0_61 = arith.constant 0 : index
    %125 = vector.load %arg9[%c24_60, %c0_61] : memref<272x32xf32, #tpu.memory_space<vmem>>, vector<200x32xf32>
    %126 = arith.truncf %125 : vector<200x32xf32> to vector<200x32xbf16>
    %c288 = arith.constant 288 : index
    %c0_62 = arith.constant 0 : index
    %127 = vector.load %arg2[%c288, %c0_62] : memref<608x32xbf16, #tpu.memory_space<vmem>>, vector<32x32xbf16>
    %cst_63 = arith.constant dense<0.000000e+00> : vector<200x32xf32>
    %128 = tpu.matmul %126, %127, %cst_63 {dimension_numbers = #tpu.dot_dimension_numbers<[1], [0], [0], [1], [0, 0, 1, 1], [], []>} : vector<200x32xbf16>, vector<32x32xbf16>, vector<200x32xf32> -> vector<200x32xf32>
    %129 = arith.addf %124, %128 : vector<200x32xf32>
    %c26_64 = arith.constant 26 : index
    %c0_65 = arith.constant 0 : index
    %130 = vector.load %arg9[%c26_64, %c0_65] : memref<272x32xf32, #tpu.memory_space<vmem>>, vector<200x32xf32>
    %131 = arith.truncf %130 : vector<200x32xf32> to vector<200x32xbf16>
    %c320 = arith.constant 320 : index
    %c0_66 = arith.constant 0 : index
    %132 = vector.load %arg2[%c320, %c0_66] : memref<608x32xbf16, #tpu.memory_space<vmem>>, vector<32x32xbf16>
    %cst_67 = arith.constant dense<0.000000e+00> : vector<200x32xf32>
    %133 = tpu.matmul %131, %132, %cst_67 {dimension_numbers = #tpu.dot_dimension_numbers<[1], [0], [0], [1], [0, 0, 1, 1], [], []>} : vector<200x32xbf16>, vector<32x32xbf16>, vector<200x32xf32> -> vector<200x32xf32>
    %134 = arith.addf %129, %133 : vector<200x32xf32>
    %c28 = arith.constant 28 : index
    %c0_68 = arith.constant 0 : index
    %135 = vector.load %arg9[%c28, %c0_68] : memref<272x32xf32, #tpu.memory_space<vmem>>, vector<200x32xf32>
    %136 = arith.truncf %135 : vector<200x32xf32> to vector<200x32xbf16>
    %c352 = arith.constant 352 : index
    %c0_69 = arith.constant 0 : index
    %137 = vector.load %arg2[%c352, %c0_69] : memref<608x32xbf16, #tpu.memory_space<vmem>>, vector<32x32xbf16>
    %cst_70 = arith.constant dense<0.000000e+00> : vector<200x32xf32>
    %138 = tpu.matmul %136, %137, %cst_70 {dimension_numbers = #tpu.dot_dimension_numbers<[1], [0], [0], [1], [0, 0, 1, 1], [], []>} : vector<200x32xbf16>, vector<32x32xbf16>, vector<200x32xf32> -> vector<200x32xf32>
    %139 = arith.addf %134, %138 : vector<200x32xf32>
    %c44_71 = arith.constant 44 : index
    %c0_72 = arith.constant 0 : index
    %140 = vector.load %arg9[%c44_71, %c0_72] : memref<272x32xf32, #tpu.memory_space<vmem>>, vector<200x32xf32>
    %141 = arith.truncf %140 : vector<200x32xf32> to vector<200x32xbf16>
    %c384 = arith.constant 384 : index
    %c0_73 = arith.constant 0 : index
    %142 = vector.load %arg2[%c384, %c0_73] : memref<608x32xbf16, #tpu.memory_space<vmem>>, vector<32x32xbf16>
    %cst_74 = arith.constant dense<0.000000e+00> : vector<200x32xf32>
    %143 = tpu.matmul %141, %142, %cst_74 {dimension_numbers = #tpu.dot_dimension_numbers<[1], [0], [0], [1], [0, 0, 1, 1], [], []>} : vector<200x32xbf16>, vector<32x32xbf16>, vector<200x32xf32> -> vector<200x32xf32>
    %144 = arith.addf %139, %143 : vector<200x32xf32>
    %c46_75 = arith.constant 46 : index
    %c0_76 = arith.constant 0 : index
    %145 = vector.load %arg9[%c46_75, %c0_76] : memref<272x32xf32, #tpu.memory_space<vmem>>, vector<200x32xf32>
    %146 = arith.truncf %145 : vector<200x32xf32> to vector<200x32xbf16>
    %c416 = arith.constant 416 : index
    %c0_77 = arith.constant 0 : index
    %147 = vector.load %arg2[%c416, %c0_77] : memref<608x32xbf16, #tpu.memory_space<vmem>>, vector<32x32xbf16>
    %cst_78 = arith.constant dense<0.000000e+00> : vector<200x32xf32>
    %148 = tpu.matmul %146, %147, %cst_78 {dimension_numbers = #tpu.dot_dimension_numbers<[1], [0], [0], [1], [0, 0, 1, 1], [], []>} : vector<200x32xbf16>, vector<32x32xbf16>, vector<200x32xf32> -> vector<200x32xf32>
    %149 = arith.addf %144, %148 : vector<200x32xf32>
    %c48 = arith.constant 48 : index
    %c0_79 = arith.constant 0 : index
    %150 = vector.load %arg9[%c48, %c0_79] : memref<272x32xf32, #tpu.memory_space<vmem>>, vector<200x32xf32>
    %151 = arith.truncf %150 : vector<200x32xf32> to vector<200x32xbf16>
    %c448 = arith.constant 448 : index
    %c0_80 = arith.constant 0 : index
    %152 = vector.load %arg2[%c448, %c0_80] : memref<608x32xbf16, #tpu.memory_space<vmem>>, vector<32x32xbf16>
    %cst_81 = arith.constant dense<0.000000e+00> : vector<200x32xf32>
    %153 = tpu.matmul %151, %152, %cst_81 {dimension_numbers = #tpu.dot_dimension_numbers<[1], [0], [0], [1], [0, 0, 1, 1], [], []>} : vector<200x32xbf16>, vector<32x32xbf16>, vector<200x32xf32> -> vector<200x32xf32>
    %154 = arith.addf %149, %153 : vector<200x32xf32>
    %c64_82 = arith.constant 64 : index
    %c0_83 = arith.constant 0 : index
    %155 = vector.load %arg9[%c64_82, %c0_83] : memref<272x32xf32, #tpu.memory_space<vmem>>, vector<200x32xf32>
    %156 = arith.truncf %155 : vector<200x32xf32> to vector<200x32xbf16>
    %c480 = arith.constant 480 : index
    %c0_84 = arith.constant 0 : index
    %157 = vector.load %arg2[%c480, %c0_84] : memref<608x32xbf16, #tpu.memory_space<vmem>>, vector<32x32xbf16>
    %cst_85 = arith.constant dense<0.000000e+00> : vector<200x32xf32>
    %158 = tpu.matmul %156, %157, %cst_85 {dimension_numbers = #tpu.dot_dimension_numbers<[1], [0], [0], [1], [0, 0, 1, 1], [], []>} : vector<200x32xbf16>, vector<32x32xbf16>, vector<200x32xf32> -> vector<200x32xf32>
    %159 = arith.addf %154, %158 : vector<200x32xf32>
    %c66 = arith.constant 66 : index
    %c0_86 = arith.constant 0 : index
    %160 = vector.load %arg9[%c66, %c0_86] : memref<272x32xf32, #tpu.memory_space<vmem>>, vector<200x32xf32>
    %161 = arith.truncf %160 : vector<200x32xf32> to vector<200x32xbf16>
    %c512 = arith.constant 512 : index
    %c0_87 = arith.constant 0 : index
    %162 = vector.load %arg2[%c512, %c0_87] : memref<608x32xbf16, #tpu.memory_space<vmem>>, vector<32x32xbf16>
    %cst_88 = arith.constant dense<0.000000e+00> : vector<200x32xf32>
    %163 = tpu.matmul %161, %162, %cst_88 {dimension_numbers = #tpu.dot_dimension_numbers<[1], [0], [0], [1], [0, 0, 1, 1], [], []>} : vector<200x32xbf16>, vector<32x32xbf16>, vector<200x32xf32> -> vector<200x32xf32>
    %164 = arith.addf %159, %163 : vector<200x32xf32>
    %c68 = arith.constant 68 : index
    %c0_89 = arith.constant 0 : index
    %165 = vector.load %arg9[%c68, %c0_89] : memref<272x32xf32, #tpu.memory_space<vmem>>, vector<200x32xf32>
    %166 = arith.truncf %165 : vector<200x32xf32> to vector<200x32xbf16>
    %c544 = arith.constant 544 : index
    %c0_90 = arith.constant 0 : index
    %167 = vector.load %arg2[%c544, %c0_90] : memref<608x32xbf16, #tpu.memory_space<vmem>>, vector<32x32xbf16>
    %cst_91 = arith.constant dense<0.000000e+00> : vector<200x32xf32>
    %168 = tpu.matmul %166, %167, %cst_91 {dimension_numbers = #tpu.dot_dimension_numbers<[1], [0], [0], [1], [0, 0, 1, 1], [], []>} : vector<200x32xbf16>, vector<32x32xbf16>, vector<200x32xf32> -> vector<200x32xf32>
    %169 = arith.addf %164, %168 : vector<200x32xf32>
    %170 = vector.extract_strided_slice %9 {offsets = [13, 0], sizes = [1, 32], strides = [1, 1]} : vector<17x32xf32> to vector<1x32xf32>
    %171 = vector.broadcast %170 : vector<1x32xf32> to vector<200x32xf32>
    %172 = arith.mulf %169, %171 : vector<200x32xf32>
    %173 = vector.extract_strided_slice %9 {offsets = [14, 0], sizes = [1, 32], strides = [1, 1]} : vector<17x32xf32> to vector<1x32xf32>
    %174 = vector.broadcast %173 : vector<1x32xf32> to vector<200x32xf32>
    %175 = arith.addf %172, %174 : vector<200x32xf32>
    %cst_92 = arith.constant 0.000000e+00 : f32
    %176 = vector.broadcast %cst_92 : f32 to vector<200x32xf32>
    %177 = arith.maximumf %175, %176 : vector<200x32xf32>
    %178 = arith.truncf %177 : vector<200x32xf32> to vector<200x32xbf16>
    %c576 = arith.constant 576 : index
    %c0_93 = arith.constant 0 : index
    %179 = vector.load %arg2[%c576, %c0_93] : memref<608x32xbf16, #tpu.memory_space<vmem>>, vector<32x32xbf16>
    %cst_94 = arith.constant dense<0.000000e+00> : vector<200x32xf32>
    %180 = tpu.matmul %178, %179, %cst_94 {dimension_numbers = #tpu.dot_dimension_numbers<[1], [0], [0], [1], [0, 0, 1, 1], [], []>} : vector<200x32xbf16>, vector<32x32xbf16>, vector<200x32xf32> -> vector<200x32xf32>
    %181 = vector.extract_strided_slice %9 {offsets = [15, 0], sizes = [1, 32], strides = [1, 1]} : vector<17x32xf32> to vector<1x32xf32>
    %182 = vector.broadcast %181 : vector<1x32xf32> to vector<200x32xf32>
    %183 = arith.mulf %180, %182 : vector<200x32xf32>
    %184 = vector.extract_strided_slice %9 {offsets = [16, 0], sizes = [1, 32], strides = [1, 1]} : vector<17x32xf32> to vector<1x32xf32>
    %185 = vector.broadcast %184 : vector<1x32xf32> to vector<200x32xf32>
    %186 = arith.addf %183, %185 : vector<200x32xf32>
    %cst_95 = arith.constant 0.000000e+00 : f32
    %187 = vector.broadcast %cst_95 : f32 to vector<200x32xf32>
    %188 = arith.maximumf %186, %187 : vector<200x32xf32>
    %189 = arith.truncf %188 : vector<200x32xf32> to vector<200x32xbf16>
    %c0_96 = arith.constant 0 : index
    %c0_97 = arith.constant 0 : index
    %190 = vector.load %arg4[%c0_96, %c0_97] : memref<8x1024xf32, #tpu.memory_space<vmem>>, vector<8x1024xf32>
    %c0_i32_98 = arith.constant 0 : i32
    %191 = tpu.memref_slice %arg13[%c0_i32_98] : memref<3x!tpu.dma_semaphore, #tpu.memory_space<semaphore_mem>> -> memref<1x!tpu.dma_semaphore, #tpu.memory_space<semaphore_mem>>
    %192 = tpu.memref_squeeze %191 : memref<1x!tpu.dma_semaphore, #tpu.memory_space<semaphore_mem>> -> memref<!tpu.dma_semaphore, #tpu.memory_space<semaphore_mem>>
    tpu.wait_dma2 semaphore(%192 : memref<!tpu.dma_semaphore, #tpu.memory_space<semaphore_mem>>) src(%arg5 : memref<1152x1024xbf16, #tpu.memory_space<any>>) dst(%arg10 : memref<1152x1024xbf16, #tpu.memory_space<vmem>>)
    %cst_99 = arith.constant 0.000000e+00 : f32
    %193 = vector.broadcast %cst_99 : f32 to vector<2x1024xf32>
    %194 = vector.extract_strided_slice %189 {offsets = [22, 0], sizes = [2, 32], strides = [1, 1]} : vector<200x32xbf16> to vector<2x32xbf16>
    %c0_100 = arith.constant 0 : index
    %c0_101 = arith.constant 0 : index
    %195 = vector.load %arg10[%c0_100, %c0_101] : memref<1152x1024xbf16, #tpu.memory_space<vmem>>, vector<32x1024xbf16>
    %cst_102 = arith.constant dense<0.000000e+00> : vector<2x1024xf32>
    %196 = tpu.matmul %194, %195, %cst_102 {dimension_numbers = #tpu.dot_dimension_numbers<[1], [0], [0], [1], [0, 0, 1, 1], [], []>} : vector<2x32xbf16>, vector<32x1024xbf16>, vector<2x1024xf32> -> vector<2x1024xf32>
    %197 = arith.addf %193, %196 : vector<2x1024xf32>
    %198 = vector.extract_strided_slice %189 {offsets = [24, 0], sizes = [2, 32], strides = [1, 1]} : vector<200x32xbf16> to vector<2x32xbf16>
    %c32_103 = arith.constant 32 : index
    %c0_104 = arith.constant 0 : index
    %199 = vector.load %arg10[%c32_103, %c0_104] : memref<1152x1024xbf16, #tpu.memory_space<vmem>>, vector<32x1024xbf16>
    %cst_105 = arith.constant dense<0.000000e+00> : vector<2x1024xf32>
    %200 = tpu.matmul %198, %199, %cst_105 {dimension_numbers = #tpu.dot_dimension_numbers<[1], [0], [0], [1], [0, 0, 1, 1], [], []>} : vector<2x32xbf16>, vector<32x1024xbf16>, vector<2x1024xf32> -> vector<2x1024xf32>
    %201 = arith.addf %197, %200 : vector<2x1024xf32>
    %202 = vector.extract_strided_slice %189 {offsets = [26, 0], sizes = [2, 32], strides = [1, 1]} : vector<200x32xbf16> to vector<2x32xbf16>
    %c64_106 = arith.constant 64 : index
    %c0_107 = arith.constant 0 : index
    %203 = vector.load %arg10[%c64_106, %c0_107] : memref<1152x1024xbf16, #tpu.memory_space<vmem>>, vector<32x1024xbf16>
    %cst_108 = arith.constant dense<0.000000e+00> : vector<2x1024xf32>
    %204 = tpu.matmul %202, %203, %cst_108 {dimension_numbers = #tpu.dot_dimension_numbers<[1], [0], [0], [1], [0, 0, 1, 1], [], []>} : vector<2x32xbf16>, vector<32x1024xbf16>, vector<2x1024xf32> -> vector<2x1024xf32>
    %205 = arith.addf %201, %204 : vector<2x1024xf32>
    %206 = vector.extract_strided_slice %189 {offsets = [28, 0], sizes = [2, 32], strides = [1, 1]} : vector<200x32xbf16> to vector<2x32xbf16>
    %c96_109 = arith.constant 96 : index
    %c0_110 = arith.constant 0 : index
    %207 = vector.load %arg10[%c96_109, %c0_110] : memref<1152x1024xbf16, #tpu.memory_space<vmem>>, vector<32x1024xbf16>
    %cst_111 = arith.constant dense<0.000000e+00> : vector<2x1024xf32>
    %208 = tpu.matmul %206, %207, %cst_111 {dimension_numbers = #tpu.dot_dimension_numbers<[1], [0], [0], [1], [0, 0, 1, 1], [], []>} : vector<2x32xbf16>, vector<32x1024xbf16>, vector<2x1024xf32> -> vector<2x1024xf32>
    %209 = arith.addf %205, %208 : vector<2x1024xf32>
    %210 = vector.extract_strided_slice %189 {offsets = [30, 0], sizes = [2, 32], strides = [1, 1]} : vector<200x32xbf16> to vector<2x32xbf16>
    %c128_112 = arith.constant 128 : index
    %c0_113 = arith.constant 0 : index
    %211 = vector.load %arg10[%c128_112, %c0_113] : memref<1152x1024xbf16, #tpu.memory_space<vmem>>, vector<32x1024xbf16>
    %cst_114 = arith.constant dense<0.000000e+00> : vector<2x1024xf32>
    %212 = tpu.matmul %210, %211, %cst_114 {dimension_numbers = #tpu.dot_dimension_numbers<[1], [0], [0], [1], [0, 0, 1, 1], [], []>} : vector<2x32xbf16>, vector<32x1024xbf16>, vector<2x1024xf32> -> vector<2x1024xf32>
    %213 = arith.addf %209, %212 : vector<2x1024xf32>
    %214 = vector.extract_strided_slice %189 {offsets = [32, 0], sizes = [2, 32], strides = [1, 1]} : vector<200x32xbf16> to vector<2x32xbf16>
    %c160_115 = arith.constant 160 : index
    %c0_116 = arith.constant 0 : index
    %215 = vector.load %arg10[%c160_115, %c0_116] : memref<1152x1024xbf16, #tpu.memory_space<vmem>>, vector<32x1024xbf16>
    %cst_117 = arith.constant dense<0.000000e+00> : vector<2x1024xf32>
    %216 = tpu.matmul %214, %215, %cst_117 {dimension_numbers = #tpu.dot_dimension_numbers<[1], [0], [0], [1], [0, 0, 1, 1], [], []>} : vector<2x32xbf16>, vector<32x1024xbf16>, vector<2x1024xf32> -> vector<2x1024xf32>
    %217 = arith.addf %213, %216 : vector<2x1024xf32>
    %218 = vector.extract_strided_slice %189 {offsets = [42, 0], sizes = [2, 32], strides = [1, 1]} : vector<200x32xbf16> to vector<2x32xbf16>
    %c192_118 = arith.constant 192 : index
    %c0_119 = arith.constant 0 : index
    %219 = vector.load %arg10[%c192_118, %c0_119] : memref<1152x1024xbf16, #tpu.memory_space<vmem>>, vector<32x1024xbf16>
    %cst_120 = arith.constant dense<0.000000e+00> : vector<2x1024xf32>
    %220 = tpu.matmul %218, %219, %cst_120 {dimension_numbers = #tpu.dot_dimension_numbers<[1], [0], [0], [1], [0, 0, 1, 1], [], []>} : vector<2x32xbf16>, vector<32x1024xbf16>, vector<2x1024xf32> -> vector<2x1024xf32>
    %221 = arith.addf %217, %220 : vector<2x1024xf32>
    %222 = vector.extract_strided_slice %189 {offsets = [44, 0], sizes = [2, 32], strides = [1, 1]} : vector<200x32xbf16> to vector<2x32xbf16>
    %c224_121 = arith.constant 224 : index
    %c0_122 = arith.constant 0 : index
    %223 = vector.load %arg10[%c224_121, %c0_122] : memref<1152x1024xbf16, #tpu.memory_space<vmem>>, vector<32x1024xbf16>
    %cst_123 = arith.constant dense<0.000000e+00> : vector<2x1024xf32>
    %224 = tpu.matmul %222, %223, %cst_123 {dimension_numbers = #tpu.dot_dimension_numbers<[1], [0], [0], [1], [0, 0, 1, 1], [], []>} : vector<2x32xbf16>, vector<32x1024xbf16>, vector<2x1024xf32> -> vector<2x1024xf32>
    %225 = arith.addf %221, %224 : vector<2x1024xf32>
    %226 = vector.extract_strided_slice %189 {offsets = [46, 0], sizes = [2, 32], strides = [1, 1]} : vector<200x32xbf16> to vector<2x32xbf16>
    %c256_124 = arith.constant 256 : index
    %c0_125 = arith.constant 0 : index
    %227 = vector.load %arg10[%c256_124, %c0_125] : memref<1152x1024xbf16, #tpu.memory_space<vmem>>, vector<32x1024xbf16>
    %cst_126 = arith.constant dense<0.000000e+00> : vector<2x1024xf32>
    %228 = tpu.matmul %226, %227, %cst_126 {dimension_numbers = #tpu.dot_dimension_numbers<[1], [0], [0], [1], [0, 0, 1, 1], [], []>} : vector<2x32xbf16>, vector<32x1024xbf16>, vector<2x1024xf32> -> vector<2x1024xf32>
    %229 = arith.addf %225, %228 : vector<2x1024xf32>
    %230 = vector.extract_strided_slice %189 {offsets = [48, 0], sizes = [2, 32], strides = [1, 1]} : vector<200x32xbf16> to vector<2x32xbf16>
    %c288_127 = arith.constant 288 : index
    %c0_128 = arith.constant 0 : index
    %231 = vector.load %arg10[%c288_127, %c0_128] : memref<1152x1024xbf16, #tpu.memory_space<vmem>>, vector<32x1024xbf16>
    %cst_129 = arith.constant dense<0.000000e+00> : vector<2x1024xf32>
    %232 = tpu.matmul %230, %231, %cst_129 {dimension_numbers = #tpu.dot_dimension_numbers<[1], [0], [0], [1], [0, 0, 1, 1], [], []>} : vector<2x32xbf16>, vector<32x1024xbf16>, vector<2x1024xf32> -> vector<2x1024xf32>
    %233 = arith.addf %229, %232 : vector<2x1024xf32>
    %234 = vector.extract_strided_slice %189 {offsets = [50, 0], sizes = [2, 32], strides = [1, 1]} : vector<200x32xbf16> to vector<2x32xbf16>
    %c320_130 = arith.constant 320 : index
    %c0_131 = arith.constant 0 : index
    %235 = vector.load %arg10[%c320_130, %c0_131] : memref<1152x1024xbf16, #tpu.memory_space<vmem>>, vector<32x1024xbf16>
    %cst_132 = arith.constant dense<0.000000e+00> : vector<2x1024xf32>
    %236 = tpu.matmul %234, %235, %cst_132 {dimension_numbers = #tpu.dot_dimension_numbers<[1], [0], [0], [1], [0, 0, 1, 1], [], []>} : vector<2x32xbf16>, vector<32x1024xbf16>, vector<2x1024xf32> -> vector<2x1024xf32>
    %237 = arith.addf %233, %236 : vector<2x1024xf32>
    %238 = vector.extract_strided_slice %189 {offsets = [52, 0], sizes = [2, 32], strides = [1, 1]} : vector<200x32xbf16> to vector<2x32xbf16>
    %c352_133 = arith.constant 352 : index
    %c0_134 = arith.constant 0 : index
    %239 = vector.load %arg10[%c352_133, %c0_134] : memref<1152x1024xbf16, #tpu.memory_space<vmem>>, vector<32x1024xbf16>
    %cst_135 = arith.constant dense<0.000000e+00> : vector<2x1024xf32>
    %240 = tpu.matmul %238, %239, %cst_135 {dimension_numbers = #tpu.dot_dimension_numbers<[1], [0], [0], [1], [0, 0, 1, 1], [], []>} : vector<2x32xbf16>, vector<32x1024xbf16>, vector<2x1024xf32> -> vector<2x1024xf32>
    %241 = arith.addf %237, %240 : vector<2x1024xf32>
    %242 = vector.extract_strided_slice %189 {offsets = [62, 0], sizes = [2, 32], strides = [1, 1]} : vector<200x32xbf16> to vector<2x32xbf16>
    %c384_136 = arith.constant 384 : index
    %c0_137 = arith.constant 0 : index
    %243 = vector.load %arg10[%c384_136, %c0_137] : memref<1152x1024xbf16, #tpu.memory_space<vmem>>, vector<32x1024xbf16>
    %cst_138 = arith.constant dense<0.000000e+00> : vector<2x1024xf32>
    %244 = tpu.matmul %242, %243, %cst_138 {dimension_numbers = #tpu.dot_dimension_numbers<[1], [0], [0], [1], [0, 0, 1, 1], [], []>} : vector<2x32xbf16>, vector<32x1024xbf16>, vector<2x1024xf32> -> vector<2x1024xf32>
    %245 = arith.addf %241, %244 : vector<2x1024xf32>
    %246 = vector.extract_strided_slice %189 {offsets = [64, 0], sizes = [2, 32], strides = [1, 1]} : vector<200x32xbf16> to vector<2x32xbf16>
    %c416_139 = arith.constant 416 : index
    %c0_140 = arith.constant 0 : index
    %247 = vector.load %arg10[%c416_139, %c0_140] : memref<1152x1024xbf16, #tpu.memory_space<vmem>>, vector<32x1024xbf16>
    %cst_141 = arith.constant dense<0.000000e+00> : vector<2x1024xf32>
    %248 = tpu.matmul %246, %247, %cst_141 {dimension_numbers = #tpu.dot_dimension_numbers<[1], [0], [0], [1], [0, 0, 1, 1], [], []>} : vector<2x32xbf16>, vector<32x1024xbf16>, vector<2x1024xf32> -> vector<2x1024xf32>
    %249 = arith.addf %245, %248 : vector<2x1024xf32>
    %250 = vector.extract_strided_slice %189 {offsets = [66, 0], sizes = [2, 32], strides = [1, 1]} : vector<200x32xbf16> to vector<2x32xbf16>
    %c448_142 = arith.constant 448 : index
    %c0_143 = arith.constant 0 : index
    %251 = vector.load %arg10[%c448_142, %c0_143] : memref<1152x1024xbf16, #tpu.memory_space<vmem>>, vector<32x1024xbf16>
    %cst_144 = arith.constant dense<0.000000e+00> : vector<2x1024xf32>
    %252 = tpu.matmul %250, %251, %cst_144 {dimension_numbers = #tpu.dot_dimension_numbers<[1], [0], [0], [1], [0, 0, 1, 1], [], []>} : vector<2x32xbf16>, vector<32x1024xbf16>, vector<2x1024xf32> -> vector<2x1024xf32>
    %253 = arith.addf %249, %252 : vector<2x1024xf32>
    %254 = vector.extract_strided_slice %189 {offsets = [68, 0], sizes = [2, 32], strides = [1, 1]} : vector<200x32xbf16> to vector<2x32xbf16>
    %c480_145 = arith.constant 480 : index
    %c0_146 = arith.constant 0 : index
    %255 = vector.load %arg10[%c480_145, %c0_146] : memref<1152x1024xbf16, #tpu.memory_space<vmem>>, vector<32x1024xbf16>
    %cst_147 = arith.constant dense<0.000000e+00> : vector<2x1024xf32>
    %256 = tpu.matmul %254, %255, %cst_147 {dimension_numbers = #tpu.dot_dimension_numbers<[1], [0], [0], [1], [0, 0, 1, 1], [], []>} : vector<2x32xbf16>, vector<32x1024xbf16>, vector<2x1024xf32> -> vector<2x1024xf32>
    %257 = arith.addf %253, %256 : vector<2x1024xf32>
    %258 = vector.extract_strided_slice %189 {offsets = [70, 0], sizes = [2, 32], strides = [1, 1]} : vector<200x32xbf16> to vector<2x32xbf16>
    %c512_148 = arith.constant 512 : index
    %c0_149 = arith.constant 0 : index
    %259 = vector.load %arg10[%c512_148, %c0_149] : memref<1152x1024xbf16, #tpu.memory_space<vmem>>, vector<32x1024xbf16>
    %cst_150 = arith.constant dense<0.000000e+00> : vector<2x1024xf32>
    %260 = tpu.matmul %258, %259, %cst_150 {dimension_numbers = #tpu.dot_dimension_numbers<[1], [0], [0], [1], [0, 0, 1, 1], [], []>} : vector<2x32xbf16>, vector<32x1024xbf16>, vector<2x1024xf32> -> vector<2x1024xf32>
    %261 = arith.addf %257, %260 : vector<2x1024xf32>
    %262 = vector.extract_strided_slice %189 {offsets = [72, 0], sizes = [2, 32], strides = [1, 1]} : vector<200x32xbf16> to vector<2x32xbf16>
    %c544_151 = arith.constant 544 : index
    %c0_152 = arith.constant 0 : index
    %263 = vector.load %arg10[%c544_151, %c0_152] : memref<1152x1024xbf16, #tpu.memory_space<vmem>>, vector<32x1024xbf16>
    %cst_153 = arith.constant dense<0.000000e+00> : vector<2x1024xf32>
    %264 = tpu.matmul %262, %263, %cst_153 {dimension_numbers = #tpu.dot_dimension_numbers<[1], [0], [0], [1], [0, 0, 1, 1], [], []>} : vector<2x32xbf16>, vector<32x1024xbf16>, vector<2x1024xf32> -> vector<2x1024xf32>
    %265 = arith.addf %261, %264 : vector<2x1024xf32>
    %266 = vector.extract_strided_slice %189 {offsets = [82, 0], sizes = [2, 32], strides = [1, 1]} : vector<200x32xbf16> to vector<2x32xbf16>
    %c576_154 = arith.constant 576 : index
    %c0_155 = arith.constant 0 : index
    %267 = vector.load %arg10[%c576_154, %c0_155] : memref<1152x1024xbf16, #tpu.memory_space<vmem>>, vector<32x1024xbf16>
    %cst_156 = arith.constant dense<0.000000e+00> : vector<2x1024xf32>
    %268 = tpu.matmul %266, %267, %cst_156 {dimension_numbers = #tpu.dot_dimension_numbers<[1], [0], [0], [1], [0, 0, 1, 1], [], []>} : vector<2x32xbf16>, vector<32x1024xbf16>, vector<2x1024xf32> -> vector<2x1024xf32>
    %269 = arith.addf %265, %268 : vector<2x1024xf32>
    %270 = vector.extract_strided_slice %189 {offsets = [84, 0], sizes = [2, 32], strides = [1, 1]} : vector<200x32xbf16> to vector<2x32xbf16>
    %c608 = arith.constant 608 : index
    %c0_157 = arith.constant 0 : index
    %271 = vector.load %arg10[%c608, %c0_157] : memref<1152x1024xbf16, #tpu.memory_space<vmem>>, vector<32x1024xbf16>
    %cst_158 = arith.constant dense<0.000000e+00> : vector<2x1024xf32>
    %272 = tpu.matmul %270, %271, %cst_158 {dimension_numbers = #tpu.dot_dimension_numbers<[1], [0], [0], [1], [0, 0, 1, 1], [], []>} : vector<2x32xbf16>, vector<32x1024xbf16>, vector<2x1024xf32> -> vector<2x1024xf32>
    %273 = arith.addf %269, %272 : vector<2x1024xf32>
    %274 = vector.extract_strided_slice %189 {offsets = [86, 0], sizes = [2, 32], strides = [1, 1]} : vector<200x32xbf16> to vector<2x32xbf16>
    %c640 = arith.constant 640 : index
    %c0_159 = arith.constant 0 : index
    %275 = vector.load %arg10[%c640, %c0_159] : memref<1152x1024xbf16, #tpu.memory_space<vmem>>, vector<32x1024xbf16>
    %cst_160 = arith.constant dense<0.000000e+00> : vector<2x1024xf32>
    %276 = tpu.matmul %274, %275, %cst_160 {dimension_numbers = #tpu.dot_dimension_numbers<[1], [0], [0], [1], [0, 0, 1, 1], [], []>} : vector<2x32xbf16>, vector<32x1024xbf16>, vector<2x1024xf32> -> vector<2x1024xf32>
    %277 = arith.addf %273, %276 : vector<2x1024xf32>
    %278 = vector.extract_strided_slice %189 {offsets = [88, 0], sizes = [2, 32], strides = [1, 1]} : vector<200x32xbf16> to vector<2x32xbf16>
    %c672 = arith.constant 672 : index
    %c0_161 = arith.constant 0 : index
    %279 = vector.load %arg10[%c672, %c0_161] : memref<1152x1024xbf16, #tpu.memory_space<vmem>>, vector<32x1024xbf16>
    %cst_162 = arith.constant dense<0.000000e+00> : vector<2x1024xf32>
    %280 = tpu.matmul %278, %279, %cst_162 {dimension_numbers = #tpu.dot_dimension_numbers<[1], [0], [0], [1], [0, 0, 1, 1], [], []>} : vector<2x32xbf16>, vector<32x1024xbf16>, vector<2x1024xf32> -> vector<2x1024xf32>
    %281 = arith.addf %277, %280 : vector<2x1024xf32>
    %282 = vector.extract_strided_slice %189 {offsets = [90, 0], sizes = [2, 32], strides = [1, 1]} : vector<200x32xbf16> to vector<2x32xbf16>
    %c704 = arith.constant 704 : index
    %c0_163 = arith.constant 0 : index
    %283 = vector.load %arg10[%c704, %c0_163] : memref<1152x1024xbf16, #tpu.memory_space<vmem>>, vector<32x1024xbf16>
    %cst_164 = arith.constant dense<0.000000e+00> : vector<2x1024xf32>
    %284 = tpu.matmul %282, %283, %cst_164 {dimension_numbers = #tpu.dot_dimension_numbers<[1], [0], [0], [1], [0, 0, 1, 1], [], []>} : vector<2x32xbf16>, vector<32x1024xbf16>, vector<2x1024xf32> -> vector<2x1024xf32>
    %285 = arith.addf %281, %284 : vector<2x1024xf32>
    %286 = vector.extract_strided_slice %189 {offsets = [92, 0], sizes = [2, 32], strides = [1, 1]} : vector<200x32xbf16> to vector<2x32xbf16>
    %c736 = arith.constant 736 : index
    %c0_165 = arith.constant 0 : index
    %287 = vector.load %arg10[%c736, %c0_165] : memref<1152x1024xbf16, #tpu.memory_space<vmem>>, vector<32x1024xbf16>
    %cst_166 = arith.constant dense<0.000000e+00> : vector<2x1024xf32>
    %288 = tpu.matmul %286, %287, %cst_166 {dimension_numbers = #tpu.dot_dimension_numbers<[1], [0], [0], [1], [0, 0, 1, 1], [], []>} : vector<2x32xbf16>, vector<32x1024xbf16>, vector<2x1024xf32> -> vector<2x1024xf32>
    %289 = arith.addf %285, %288 : vector<2x1024xf32>
    %290 = vector.extract_strided_slice %189 {offsets = [102, 0], sizes = [2, 32], strides = [1, 1]} : vector<200x32xbf16> to vector<2x32xbf16>
    %c768 = arith.constant 768 : index
    %c0_167 = arith.constant 0 : index
    %291 = vector.load %arg10[%c768, %c0_167] : memref<1152x1024xbf16, #tpu.memory_space<vmem>>, vector<32x1024xbf16>
    %cst_168 = arith.constant dense<0.000000e+00> : vector<2x1024xf32>
    %292 = tpu.matmul %290, %291, %cst_168 {dimension_numbers = #tpu.dot_dimension_numbers<[1], [0], [0], [1], [0, 0, 1, 1], [], []>} : vector<2x32xbf16>, vector<32x1024xbf16>, vector<2x1024xf32> -> vector<2x1024xf32>
    %293 = arith.addf %289, %292 : vector<2x1024xf32>
    %294 = vector.extract_strided_slice %189 {offsets = [104, 0], sizes = [2, 32], strides = [1, 1]} : vector<200x32xbf16> to vector<2x32xbf16>
    %c800 = arith.constant 800 : index
    %c0_169 = arith.constant 0 : index
    %295 = vector.load %arg10[%c800, %c0_169] : memref<1152x1024xbf16, #tpu.memory_space<vmem>>, vector<32x1024xbf16>
    %cst_170 = arith.constant dense<0.000000e+00> : vector<2x1024xf32>
    %296 = tpu.matmul %294, %295, %cst_170 {dimension_numbers = #tpu.dot_dimension_numbers<[1], [0], [0], [1], [0, 0, 1, 1], [], []>} : vector<2x32xbf16>, vector<32x1024xbf16>, vector<2x1024xf32> -> vector<2x1024xf32>
    %297 = arith.addf %293, %296 : vector<2x1024xf32>
    %298 = vector.extract_strided_slice %189 {offsets = [106, 0], sizes = [2, 32], strides = [1, 1]} : vector<200x32xbf16> to vector<2x32xbf16>
    %c832 = arith.constant 832 : index
    %c0_171 = arith.constant 0 : index
    %299 = vector.load %arg10[%c832, %c0_171] : memref<1152x1024xbf16, #tpu.memory_space<vmem>>, vector<32x1024xbf16>
    %cst_172 = arith.constant dense<0.000000e+00> : vector<2x1024xf32>
    %300 = tpu.matmul %298, %299, %cst_172 {dimension_numbers = #tpu.dot_dimension_numbers<[1], [0], [0], [1], [0, 0, 1, 1], [], []>} : vector<2x32xbf16>, vector<32x1024xbf16>, vector<2x1024xf32> -> vector<2x1024xf32>
    %301 = arith.addf %297, %300 : vector<2x1024xf32>
    %302 = vector.extract_strided_slice %189 {offsets = [108, 0], sizes = [2, 32], strides = [1, 1]} : vector<200x32xbf16> to vector<2x32xbf16>
    %c864 = arith.constant 864 : index
    %c0_173 = arith.constant 0 : index
    %303 = vector.load %arg10[%c864, %c0_173] : memref<1152x1024xbf16, #tpu.memory_space<vmem>>, vector<32x1024xbf16>
    %cst_174 = arith.constant dense<0.000000e+00> : vector<2x1024xf32>
    %304 = tpu.matmul %302, %303, %cst_174 {dimension_numbers = #tpu.dot_dimension_numbers<[1], [0], [0], [1], [0, 0, 1, 1], [], []>} : vector<2x32xbf16>, vector<32x1024xbf16>, vector<2x1024xf32> -> vector<2x1024xf32>
    %305 = arith.addf %301, %304 : vector<2x1024xf32>
    %306 = vector.extract_strided_slice %189 {offsets = [110, 0], sizes = [2, 32], strides = [1, 1]} : vector<200x32xbf16> to vector<2x32xbf16>
    %c896 = arith.constant 896 : index
    %c0_175 = arith.constant 0 : index
    %307 = vector.load %arg10[%c896, %c0_175] : memref<1152x1024xbf16, #tpu.memory_space<vmem>>, vector<32x1024xbf16>
    %cst_176 = arith.constant dense<0.000000e+00> : vector<2x1024xf32>
    %308 = tpu.matmul %306, %307, %cst_176 {dimension_numbers = #tpu.dot_dimension_numbers<[1], [0], [0], [1], [0, 0, 1, 1], [], []>} : vector<2x32xbf16>, vector<32x1024xbf16>, vector<2x1024xf32> -> vector<2x1024xf32>
    %309 = arith.addf %305, %308 : vector<2x1024xf32>
    %310 = vector.extract_strided_slice %189 {offsets = [112, 0], sizes = [2, 32], strides = [1, 1]} : vector<200x32xbf16> to vector<2x32xbf16>
    %c928 = arith.constant 928 : index
    %c0_177 = arith.constant 0 : index
    %311 = vector.load %arg10[%c928, %c0_177] : memref<1152x1024xbf16, #tpu.memory_space<vmem>>, vector<32x1024xbf16>
    %cst_178 = arith.constant dense<0.000000e+00> : vector<2x1024xf32>
    %312 = tpu.matmul %310, %311, %cst_178 {dimension_numbers = #tpu.dot_dimension_numbers<[1], [0], [0], [1], [0, 0, 1, 1], [], []>} : vector<2x32xbf16>, vector<32x1024xbf16>, vector<2x1024xf32> -> vector<2x1024xf32>
    %313 = arith.addf %309, %312 : vector<2x1024xf32>
    %314 = vector.extract_strided_slice %189 {offsets = [122, 0], sizes = [2, 32], strides = [1, 1]} : vector<200x32xbf16> to vector<2x32xbf16>
    %c960 = arith.constant 960 : index
    %c0_179 = arith.constant 0 : index
    %315 = vector.load %arg10[%c960, %c0_179] : memref<1152x1024xbf16, #tpu.memory_space<vmem>>, vector<32x1024xbf16>
    %cst_180 = arith.constant dense<0.000000e+00> : vector<2x1024xf32>
    %316 = tpu.matmul %314, %315, %cst_180 {dimension_numbers = #tpu.dot_dimension_numbers<[1], [0], [0], [1], [0, 0, 1, 1], [], []>} : vector<2x32xbf16>, vector<32x1024xbf16>, vector<2x1024xf32> -> vector<2x1024xf32>
    %317 = arith.addf %313, %316 : vector<2x1024xf32>
    %318 = vector.extract_strided_slice %189 {offsets = [124, 0], sizes = [2, 32], strides = [1, 1]} : vector<200x32xbf16> to vector<2x32xbf16>
    %c992 = arith.constant 992 : index
    %c0_181 = arith.constant 0 : index
    %319 = vector.load %arg10[%c992, %c0_181] : memref<1152x1024xbf16, #tpu.memory_space<vmem>>, vector<32x1024xbf16>
    %cst_182 = arith.constant dense<0.000000e+00> : vector<2x1024xf32>
    %320 = tpu.matmul %318, %319, %cst_182 {dimension_numbers = #tpu.dot_dimension_numbers<[1], [0], [0], [1], [0, 0, 1, 1], [], []>} : vector<2x32xbf16>, vector<32x1024xbf16>, vector<2x1024xf32> -> vector<2x1024xf32>
    %321 = arith.addf %317, %320 : vector<2x1024xf32>
    %322 = vector.extract_strided_slice %189 {offsets = [126, 0], sizes = [2, 32], strides = [1, 1]} : vector<200x32xbf16> to vector<2x32xbf16>
    %c1024 = arith.constant 1024 : index
    %c0_183 = arith.constant 0 : index
    %323 = vector.load %arg10[%c1024, %c0_183] : memref<1152x1024xbf16, #tpu.memory_space<vmem>>, vector<32x1024xbf16>
    %cst_184 = arith.constant dense<0.000000e+00> : vector<2x1024xf32>
    %324 = tpu.matmul %322, %323, %cst_184 {dimension_numbers = #tpu.dot_dimension_numbers<[1], [0], [0], [1], [0, 0, 1, 1], [], []>} : vector<2x32xbf16>, vector<32x1024xbf16>, vector<2x1024xf32> -> vector<2x1024xf32>
    %325 = arith.addf %321, %324 : vector<2x1024xf32>
    %326 = vector.extract_strided_slice %189 {offsets = [128, 0], sizes = [2, 32], strides = [1, 1]} : vector<200x32xbf16> to vector<2x32xbf16>
    %c1056 = arith.constant 1056 : index
    %c0_185 = arith.constant 0 : index
    %327 = vector.load %arg10[%c1056, %c0_185] : memref<1152x1024xbf16, #tpu.memory_space<vmem>>, vector<32x1024xbf16>
    %cst_186 = arith.constant dense<0.000000e+00> : vector<2x1024xf32>
    %328 = tpu.matmul %326, %327, %cst_186 {dimension_numbers = #tpu.dot_dimension_numbers<[1], [0], [0], [1], [0, 0, 1, 1], [], []>} : vector<2x32xbf16>, vector<32x1024xbf16>, vector<2x1024xf32> -> vector<2x1024xf32>
    %329 = arith.addf %325, %328 : vector<2x1024xf32>
    %330 = vector.extract_strided_slice %189 {offsets = [130, 0], sizes = [2, 32], strides = [1, 1]} : vector<200x32xbf16> to vector<2x32xbf16>
    %c1088 = arith.constant 1088 : index
    %c0_187 = arith.constant 0 : index
    %331 = vector.load %arg10[%c1088, %c0_187] : memref<1152x1024xbf16, #tpu.memory_space<vmem>>, vector<32x1024xbf16>
    %cst_188 = arith.constant dense<0.000000e+00> : vector<2x1024xf32>
    %332 = tpu.matmul %330, %331, %cst_188 {dimension_numbers = #tpu.dot_dimension_numbers<[1], [0], [0], [1], [0, 0, 1, 1], [], []>} : vector<2x32xbf16>, vector<32x1024xbf16>, vector<2x1024xf32> -> vector<2x1024xf32>
    %333 = arith.addf %329, %332 : vector<2x1024xf32>
    %334 = vector.extract_strided_slice %189 {offsets = [132, 0], sizes = [2, 32], strides = [1, 1]} : vector<200x32xbf16> to vector<2x32xbf16>
    %c1120 = arith.constant 1120 : index
    %c0_189 = arith.constant 0 : index
    %335 = vector.load %arg10[%c1120, %c0_189] : memref<1152x1024xbf16, #tpu.memory_space<vmem>>, vector<32x1024xbf16>
    %cst_190 = arith.constant dense<0.000000e+00> : vector<2x1024xf32>
    %336 = tpu.matmul %334, %335, %cst_190 {dimension_numbers = #tpu.dot_dimension_numbers<[1], [0], [0], [1], [0, 0, 1, 1], [], []>} : vector<2x32xbf16>, vector<32x1024xbf16>, vector<2x1024xf32> -> vector<2x1024xf32>
    %337 = arith.addf %333, %336 : vector<2x1024xf32>
    %338 = vector.extract_strided_slice %190 {offsets = [0, 0], sizes = [1, 1024], strides = [1, 1]} : vector<8x1024xf32> to vector<1x1024xf32>
    %339 = vector.broadcast %338 : vector<1x1024xf32> to vector<2x1024xf32>
    %340 = arith.mulf %337, %339 : vector<2x1024xf32>
    %341 = vector.extract_strided_slice %190 {offsets = [1, 0], sizes = [1, 1024], strides = [1, 1]} : vector<8x1024xf32> to vector<1x1024xf32>
    %342 = vector.broadcast %341 : vector<1x1024xf32> to vector<2x1024xf32>
    %343 = arith.addf %340, %342 : vector<2x1024xf32>
    %cst_191 = arith.constant 0.000000e+00 : f32
    %344 = vector.broadcast %cst_191 : f32 to vector<2x1024xf32>
    %345 = arith.maximumf %343, %344 : vector<2x1024xf32>
    %c1_i32_192 = arith.constant 1 : i32
    %346 = tpu.memref_slice %arg13[%c1_i32_192] : memref<3x!tpu.dma_semaphore, #tpu.memory_space<semaphore_mem>> -> memref<1x!tpu.dma_semaphore, #tpu.memory_space<semaphore_mem>>
    %347 = tpu.memref_squeeze %346 : memref<1x!tpu.dma_semaphore, #tpu.memory_space<semaphore_mem>> -> memref<!tpu.dma_semaphore, #tpu.memory_space<semaphore_mem>>
    tpu.wait_dma2 semaphore(%347 : memref<!tpu.dma_semaphore, #tpu.memory_space<semaphore_mem>>) src(%arg6 : memref<1024x512xbf16, #tpu.memory_space<any>>) dst(%arg11 : memref<1024x512xbf16, #tpu.memory_space<vmem>>)
    %348 = arith.truncf %345 : vector<2x1024xf32> to vector<2x1024xbf16>
    %c0_193 = arith.constant 0 : index
    %c0_194 = arith.constant 0 : index
    %349 = vector.load %arg11[%c0_193, %c0_194] : memref<1024x512xbf16, #tpu.memory_space<vmem>>, vector<1024x512xbf16>
    %cst_195 = arith.constant dense<0.000000e+00> : vector<2x512xf32>
    %350 = tpu.matmul %348, %349, %cst_195 {dimension_numbers = #tpu.dot_dimension_numbers<[1], [0], [0], [1], [0, 0, 1, 1], [], []>} : vector<2x1024xbf16>, vector<1024x512xbf16>, vector<2x512xf32> -> vector<2x512xf32>
    %351 = vector.extract_strided_slice %190 {offsets = [2, 0], sizes = [1, 512], strides = [1, 1]} : vector<8x1024xf32> to vector<1x512xf32>
    %352 = vector.broadcast %351 : vector<1x512xf32> to vector<2x512xf32>
    %353 = arith.mulf %350, %352 : vector<2x512xf32>
    %354 = vector.extract_strided_slice %190 {offsets = [3, 0], sizes = [1, 512], strides = [1, 1]} : vector<8x1024xf32> to vector<1x512xf32>
    %355 = vector.broadcast %354 : vector<1x512xf32> to vector<2x512xf32>
    %356 = arith.addf %353, %355 : vector<2x512xf32>
    %cst_196 = arith.constant 0.000000e+00 : f32
    %357 = vector.broadcast %cst_196 : f32 to vector<2x512xf32>
    %358 = arith.maximumf %356, %357 : vector<2x512xf32>
    %c2_i32_197 = arith.constant 2 : i32
    %359 = tpu.memref_slice %arg13[%c2_i32_197] : memref<3x!tpu.dma_semaphore, #tpu.memory_space<semaphore_mem>> -> memref<1x!tpu.dma_semaphore, #tpu.memory_space<semaphore_mem>>
    %360 = tpu.memref_squeeze %359 : memref<1x!tpu.dma_semaphore, #tpu.memory_space<semaphore_mem>> -> memref<!tpu.dma_semaphore, #tpu.memory_space<semaphore_mem>>
    tpu.wait_dma2 semaphore(%360 : memref<!tpu.dma_semaphore, #tpu.memory_space<semaphore_mem>>) src(%arg7 : memref<512x128xbf16, #tpu.memory_space<any>>) dst(%arg12 : memref<512x128xbf16, #tpu.memory_space<vmem>>)
    %361 = arith.truncf %358 : vector<2x512xf32> to vector<2x512xbf16>
    %c0_198 = arith.constant 0 : index
    %c0_199 = arith.constant 0 : index
    %362 = vector.load %arg12[%c0_198, %c0_199] : memref<512x128xbf16, #tpu.memory_space<vmem>>, vector<512x128xbf16>
    %cst_200 = arith.constant dense<0.000000e+00> : vector<2x128xf32>
    %363 = tpu.matmul %361, %362, %cst_200 {dimension_numbers = #tpu.dot_dimension_numbers<[1], [0], [0], [1], [0, 0, 1, 1], [], []>} : vector<2x512xbf16>, vector<512x128xbf16>, vector<2x128xf32> -> vector<2x128xf32>
    %364 = vector.extract_strided_slice %190 {offsets = [4, 0], sizes = [1, 128], strides = [1, 1]} : vector<8x1024xf32> to vector<1x128xf32>
    %365 = vector.broadcast %364 : vector<1x128xf32> to vector<2x128xf32>
    %366 = arith.addf %363, %365 : vector<2x128xf32>
    %367 = tpu.iota {dimensions = array<i32: 1>} : vector<2x128xi32>
    %c65_i32 = arith.constant 65 : i32
    %368 = vector.broadcast %c65_i32 : i32 to vector<2x128xi32>
    %369 = arith.cmpi slt, %367, %368 : vector<2x128xi32>
    %cst_201 = arith.constant -1.000000e+30 : f32
    %370 = vector.broadcast %cst_201 : f32 to vector<2x128xf32>
    %371 = arith.select %369, %366, %370 : vector<2x128xi1>, vector<2x128xf32>
    %cst_202 = arith.constant dense<0xFF800000> : vector<2xf32>
    %372 = vector.multi_reduction <maximumf>, %371, %cst_202 [1] : vector<2x128xf32> to vector<2xf32>
    %373 = vector.shape_cast %372 : vector<2xf32> to vector<2x1xf32>
    %374 = vector.broadcast %373 : vector<2x1xf32> to vector<2x128xf32>
    %375 = arith.subf %371, %374 : vector<2x128xf32>
    %376 = math.exp %375 : vector<2x128xf32>
    %cst_203 = arith.constant 0.000000e+00 : f32
    %377 = vector.broadcast %cst_203 : f32 to vector<2x128xf32>
    %378 = arith.select %369, %376, %377 : vector<2x128xi1>, vector<2x128xf32>
    %cst_204 = arith.constant dense<0.000000e+00> : vector<2xf32>
    %379 = vector.multi_reduction <add>, %378, %cst_204 [1] : vector<2x128xf32> to vector<2xf32>
    %380 = vector.shape_cast %379 : vector<2xf32> to vector<2x1xf32>
    %381 = tpu.reciprocal %380 {approx = true} : vector<2x1xf32> -> vector<2x1xf32>
    %382 = vector.broadcast %381 : vector<2x1xf32> to vector<2x128xf32>
    %383 = arith.mulf %378, %382 : vector<2x128xf32>
    %384 = vector.extract_strided_slice %366 {offsets = [0, 65], sizes = [2, 1], strides = [1, 1]} : vector<2x128xf32> to vector<2x1xf32>
    %385 = math.tanh %384 : vector<2x1xf32>
    %c65_i32_205 = arith.constant 65 : i32
    %386 = vector.broadcast %c65_i32_205 : i32 to vector<2x128xi32>
    %387 = arith.cmpi eq, %367, %386 : vector<2x128xi32>
    %388 = vector.shape_cast %385 : vector<2x1xf32> to vector<2x1xf32>
    %389 = vector.broadcast %388 : vector<2x1xf32> to vector<2x128xf32>
    %390 = arith.select %387, %389, %383 : vector<2x128xi1>, vector<2x128xf32>
    %c0_206 = arith.constant 0 : index
    %c0_207 = arith.constant 0 : index
    %391 = vector.load %arg8[%c0_206, %c0_207] : memref<2x128xf32, #tpu.memory_space<vmem>>, vector<2x128xf32>
    tpu.vector_store %arg8[%c0_206, %c0_207], %390 {strides = array<i32>} : memref<2x128xf32, #tpu.memory_space<vmem>>, vector<2x128xf32>,
    return
  }
}

</mosaic_0001>

<bundles_post_ra>
// kernel: nnet_forward.1
= control target key start
LH: loop header
LB: loop body
LE: loop exit
PB: predicated region body
PF: predicated region fallthrough
CT: control target
= control target key end

     0   :  { %13 = vsyncpa [#allocation8], 0  ;;  %s20675_s0 = inlined_call_operand.vmem [shape: f32[272,32], index: 0, kind: input, shape index: {}]   ;;  %s20676_s1 = inlined_call_operand.hbm [shape: f32[17,32], index: 1, kind: input, shape index: {}]   ;;  %s20677_s2 = inlined_call_operand.vmem [shape: bf16[608,32], index: 2, kind: input, shape index: {}]   ;;  %s20678_s3 = inlined_call_operand.vmem [shape: f32[200,1], index: 3, kind: input, shape index: {}]   ;;  %s20679_s4 = inlined_call_operand.hbm [shape: f32[8,1024], index: 4, kind: input, shape index: {}]   ;;  %s20680_s5 = inlined_call_operand.hbm [shape: bf16[1152,1024], index: 5, kind: input, shape index: {}]   ;;  %s20681_s6 = inlined_call_operand.hbm [shape: bf16[1024,512], index: 6, kind: input, shape index: {}]   ;;  %s20682_s7 = inlined_call_operand.hbm [shape: bf16[512,128], index: 7, kind: input, shape index: {}]   ;;  %s20683_s8 = inlined_call_operand.vmem [shape: f32[2,128], index: 8, kind: output, shape index: {}]  }
   0x1   :  { %14 = vsyncpa [#allocation10], 0  ;;  %s17186_s27 = smov [#allocation7]   ;;  %s17110_s9 = scalar_lea.hbm %s20676_s1, 384 }
   0x2   :  { %s22_s28 = sshll.u32 %s17186_s27, 4  ;;  %p17111_p0 = scmp.ne.s32.totalorder %s20676_s1, %s17110_s9  ;;  %s23_s28 = int_to_ptr.vmem [resolvable:$true] %s22_s28 }
   0x3   :  { %p17114_p1 = scmp.lt.u32.totalorder %s17110_s9, %s20676_s1 }
   0x5   :  { %p17116_p2 = pnand %p17114_p1, %p17111_p0 }
   0x7   :  { %17119 = shalt.err (!%p17116_p2)
}
   0x8   :  { %s17120_s14 = scalar_lea.vmem %s23_s28, 384  ;;  %p17125_p4 = scmp.lt.s32.totalorder %s23_s28, %s23_s28 }
   0x9   :  { %p17121_p3 = scmp.ne.s32.totalorder %s23_s28, %s17120_s14  ;;  %p17126_p5 = scmp.lt.s32.totalorder %s17120_s14, %s17120_s14 }
   0xb   :  { %p17127_p6 = por %p17126_p5, %p17125_p4 }
   0xd   :  { %p17128_p7 = pnand %p17127_p6, %p17121_p3 }
   0xf   :  { %17131 = shalt.err (!%p17128_p7)
}
  0x10   :  { %s17187_s15 = smov 128   ;;  %s17188_s16 = smov 8  }
  0x11   :  { %28 = dma.hbm_to_vmem [thread:$0]  %s20676_s1, 384, %s23_s28, [#allocation8], %s17187_s15, %s17187_s15, %s17188_s16  }
  0x12   :  { %s17189_s19 = smov [#allocation9]   ;;  %s17132_s23 = scalar_lea.hbm %s20679_s4, 1024 }
  0x13   :  { %s39_s20 = sshll.u32 %s17189_s19, 4  ;;  %p17133_p8 = scmp.ne.s32.totalorder %s20679_s4, %s17132_s23  ;;  %s40_s20 = int_to_ptr.vmem [resolvable:$true] %s39_s20 }
  0x14   :  { %p17136_p9 = scmp.lt.u32.totalorder %s17132_s23, %s20679_s4 }
  0x16   :  { %p17138_p10 = pnand %p17136_p9, %p17133_p8 }
  0x18   :  { %17141 = shalt.err (!%p17138_p10)
}
  0x19   :  { %s17142_s29 = scalar_lea.vmem %s40_s20, 1024  ;;  %p17147_p12 = scmp.lt.s32.totalorder %s40_s20, %s40_s20 }
  0x1a   :  { %p17143_p11 = scmp.ne.s32.totalorder %s40_s20, %s17142_s29  ;;  %p17148_p13 = scmp.lt.s32.totalorder %s17142_s29, %s17142_s29 }
  0x1c   :  { %p17149_p0 = por %p17148_p13, %p17147_p12 }
  0x1e   :  { %p17150_p1 = pnand %p17149_p0, %p17143_p11 }
  0x20   :  { %17153 = shalt.err (!%p17150_p1)
}
  0x21   :  { %42 = dma.hbm_to_vmem [thread:$0]  %s20679_s4, 1024, %s40_s20, [#allocation10]  }
  0x22   :  { %17176 = dma.done.wait [#allocation8], 384  }
  0x23   :  { %17177 = vsyncadd [#allocation8], 4294966912 }
  0x24   :  { %17178 = dma.done.wait [#allocation10], 1024  }
  0x25   :  { %17179 = vsyncadd [#allocation10], 4294966272  ;;  %s54_s30 = sld [smem:[#allocation0]]   ;;  %s17190_s9 = smov 1024   ;;  %v20685_v0 = vmov 0   ;;  %v20690_v1 = vmov 0.0   ;;  %v20684_v14 = vlaneseq }
  0x26   :  { %66 = sst [smem:[#allocation12]] %s17190_s9  ;;  %17061 = vset.pattern.permute.xlu1 %v20685_v0  ;;  %17060 = vset.pattern.permute.xlu0 %v20685_v0  ;;  %s17192_s10 = smov [#allocation3]   ;;  %vm132_vm0 = vcmask 261120   ;;  %vm17204_vm1 = vmmov 0  }
  0x27   :  { %68 = sst [smem:[#allocation12 + $0x1]] %s17190_s9  ;;  %s62_s11 = sshll.u32 %s17192_s10, 4  ;;  %14582 = vmatprep.subr.bf16.mxu0 %v20690_v1  ;;  %15646 = vmatprep.subr.bf16.mxu1 %v20690_v1  ;;  %v17395_v17 = vshrl.u32 %v20684_v14, 7  ;;  %s63_s11 = int_to_ptr.vmem [resolvable:$true] %s62_s11 }
  0x28   :  { %70 = sst [smem:[#allocation12 + $0x2]] %s17188_s16  ;;  %s17194_s4 = smov 64   ;;  %14586 = vmatprep.mubr.msk.bf16.mxu0 %vm17204_vm1, %v20690_v1  ;;  %15230 = vmatprep.mubr.msk.bf16.mxu1 %vm17204_vm1, %v20690_v1 }
  0x29   :  { %74 = sst [smem:[#allocation12 + $0x4]] %s17187_s15  ;;  %s17195_s12 = smov 2   ;;  %v17408_v20 = vsub.s32 0, %v17395_v17  ;;  %v17411_v21 = vsub.s32 1, %v17395_v17  ;;  %v17422_v25 = vsub.s32 2, %v17395_v17  ;;  %v17458_v36 = vsub.s32 3, %v17395_v17 }
  0x2a   :  { %72 = sst [smem:[#allocation12 + $0x3]] %s17194_s4  ;;  %s17196_s14 = smov 512   ;;  %v17493_v49 = vsub.s32 4, %v17395_v17  ;;  %v20689_v61 = vsub.s32 5, %v17395_v17 }
  0x2b   :  { %76 = sst [smem:[#allocation12 + $0x5]] %s17195_s12  ;;  %s13816_s13 = sshll.u32 %s54_s30, 26 }
  0x2c   :  { %78 = sst [smem:[#allocation12 + $0x6]] %s17196_s14  ;;  %s13817_s17 = sadd.s32 134217728, %s13816_s13 }
  0x2d   :  { %80 = sst [smem:[#allocation12 + $0x7]] %s17194_s4  ;;  %s17197_s18 = smov 4  }
  0x2e   :  { %82 = sst [smem:[#allocation12 + $0x8]] %s17197_s18  ;;  %s17198_s19 = smov [#allocation6]  }
  0x2f   :  { %s17199_s20 = smov [#allocation11]   ;;  %s17200_s16 = smov [#allocation4]  }
  0x30   :  { %84 = dma.general %s20680_s5, 73728, %s63_s11, %s17198_s19, %s17199_s20, [#allocation12], %s13817_s17, 0  }
  0x31   :  { %101 = sst [smem:[#allocation14]] %s17196_s14  ;;  %s97_s23 = sshll.u32 %s17200_s16, 4  ;;  %s98_s23 = int_to_ptr.vmem [resolvable:$true] %s97_s23 }
  0x32   :  { %103 = sst [smem:[#allocation14 + $0x1]] %s17196_s14  ;;  %s17201_s24 = smov 256  }
  0x33   :  { %105 = sst [smem:[#allocation14 + $0x2]] %s17197_s18  ;;  %s17202_s25 = smov [#allocation6 + $0x1]  }
  0x34   :  { %107 = sst [smem:[#allocation14 + $0x3]] %s17194_s4  ;;  %s17203_s26 = smov [#allocation13]  }
  0x35   :  { %109 = sst [smem:[#allocation14 + $0x4]] %s17187_s15 }
  0x36   :  { %111 = sst [smem:[#allocation14 + $0x5]] %s17195_s12 }
  0x37   :  { %113 = sst [smem:[#allocation14 + $0x6]] %s17201_s24 }
  0x38   :  { %115 = sst [smem:[#allocation14 + $0x7]] %s17194_s4  ;;  %s17154_s4 = scalar_lea.hbm %s20682_s7, 4096 }
  0x39   :  { %117 = sst [smem:[#allocation14 + $0x8]] %s17197_s18  ;;  %p17155_p2 = scmp.ne.s32.totalorder %s20682_s7, %s17154_s4 }
  0x3a   :  { %119 = dma.general %s20681_s6, 32768, %s98_s23, %s17202_s25, %s17203_s26, [#allocation14], %s13817_s17, 0  }
  0x3b   :  { %138 = vst.msk [vmem:[#allocation2 + $0x28] sm:$0xff] %vm132_vm0, %v20690_v1  ;;  %133 = vst.msk [vmem:[#allocation2] sm:$0xff] %vm132_vm0, %v20690_v1  ;;  %v17360_v2 = vld [vmem:[#allocation9] sm:$0xff]  ;;  %v17362_v3 = vld [vmem:[#allocation9 + $0x8] sm:$0xff]  ;;  %p17158_p3 = scmp.lt.u32.totalorder %s17154_s4, %s20682_s7 }
  0x3c   :  { %134 = vst.msk [vmem:[#allocation2 + $0x8] sm:$0xff] %vm132_vm0, %v20690_v1  ;;  %135 = vst.msk [vmem:[#allocation2 + $0x10] sm:$0xff] %vm132_vm0, %v20690_v1  ;;  %v17364_v4 = vld [vmem:[#allocation9 + $0x10] sm:$0xff]  ;;  %v17366_v5 = vld [vmem:[#allocation9 + $0x18] sm:$0xff] }
  0x3d   :  { %136 = vst.msk [vmem:[#allocation2 + $0x18] sm:$0xff] %vm132_vm0, %v20690_v1  ;;  %137 = vst.msk [vmem:[#allocation2 + $0x20] sm:$0xff] %vm132_vm0, %v20690_v1  ;;  %v17368_v6 = vld [vmem:[#allocation9 + $0x20] sm:$0xff]  ;;  %v17370_v7 = vld [vmem:[#allocation9 + $0x28] sm:$0xff]  ;;  %p17160_p4 = pnand %p17158_p3, %p17155_p2 }
  0x3e   :  { %139 = vst.msk [vmem:[#allocation2 + $0x30] sm:$0xff] %vm132_vm0, %v20690_v1  ;;  %140 = vst.msk [vmem:[#allocation2 + $0x38] sm:$0xff] %vm132_vm0, %v20690_v1  ;;  %v17372_v8 = vld [vmem:[#allocation9 + $0x30] sm:$0xff]  ;;  %v17374_v9 = vld [vmem:[#allocation9 + $0x38] sm:$0xff] }
  0x3f   :  { %141 = vst.msk [vmem:[#allocation2 + $0x40] sm:$0xff] %vm132_vm0, %v20690_v1  ;;  %142 = vst.msk [vmem:[#allocation2 + $0x48] sm:$0xff] %vm132_vm0, %v20690_v1  ;;  %v169_v10 = vld [vmem:[%s20678_s3 + $0x10] sm:$0xff]  ;;  %v167_v11 = vld [vmem:[%s20678_s3] sm:$0xff] }
  0x40   :  { %143 = vst.msk [vmem:[#allocation2 + $0x50] sm:$0xff] %vm132_vm0, %v20690_v1  ;;  %144 = vst.msk [vmem:[#allocation2 + $0x58] sm:$0xff] %vm132_vm0, %v20690_v1  ;;  %891 = vperm.xlu1 %17061, %v169_v10   ;;  %881 = vperm.xlu0 %17060, %v167_v11   ;;  %v170_v12 = vld [vmem:[%s20678_s3 + $0x18] sm:$0xff]  ;;  %v168_v13 = vld [vmem:[%s20678_s3 + $0x8] sm:$0xff] }
  0x41   :  { %145 = vst.msk [vmem:[#allocation2 + $0x60] sm:$0xff] %vm132_vm0, %v20690_v1  ;;  %146 = vst.msk [vmem:[#allocation2 + $0x68] sm:$0xff] %vm132_vm0, %v20690_v1  ;;  %v172_v15 = vld [vmem:[%s20678_s3 + $0x28] sm:$0xff]  ;;  %v171_v16 = vld [vmem:[%s20678_s3 + $0x20] sm:$0xff] }
  0x42   :  { %147 = vst.msk [vmem:[#allocation2 + $0x70] sm:$0xff] %vm132_vm0, %v20690_v1  ;;  %148 = vst.msk [vmem:[#allocation2 + $0x78] sm:$0xff] %vm132_vm0, %v20690_v1  ;;  %v174_v18 = vld [vmem:[%s20678_s3 + $0x38] sm:$0xff]  ;;  %v173_v19 = vld [vmem:[%s20678_s3 + $0x30] sm:$0xff] }
  0x43   :  { %149 = vst.msk [vmem:[#allocation2 + $0x80] sm:$0xff] %vm132_vm0, %v20690_v1  ;;  %150 = vst.msk [vmem:[#allocation2 + $0x88] sm:$0xff] %vm132_vm0, %v20690_v1  ;;  %v17413_v22 = vld [vmem:[#allocation7] sm:$0xff]  ;;  %v176_v23 = vld [vmem:[%s20678_s3 + $0x48] sm:$0xff] }
  0x44   :  { %151 = vst.msk [vmem:[#allocation2 + $0x90] sm:$0xff] %vm132_vm0, %v20690_v1  ;;  %152 = vst.msk [vmem:[#allocation2 + $0x98] sm:$0xff] %vm132_vm0, %v20690_v1  ;;  %896 = vperm.xlu1 %17061, %v170_v12   ;;  %886 = vperm.xlu0 %17060, %v168_v13   ;;  %v175_v24 = vld [vmem:[%s20678_s3 + $0x40] sm:$0xff]  ;;  %v197_v26 = vld [vmem:[%s20675_s0 + $0x12] sm:$0xff]  ;;  %v17429_v27 = vrot.slane %v17413_v22, %v17408_v20  ;;  %v17433_v28 = vrot.slane %v17413_v22, %v17411_v21 }
  0x45   :  { %153 = vst.msk [vmem:[#allocation2 + $0xa0] sm:$0xff] %vm132_vm0, %v20690_v1  ;;  %154 = vst.msk [vmem:[#allocation2 + $0xa8] sm:$0xff] %vm132_vm0, %v20690_v1  ;;  %v17062_v29 = vld [vmem:[%s20677_s2 + $0x10] sm:$0xff]   ;;  %v195_v31 = vld [vmem:[%s20675_s0 + $0x2] sm:$0xff]  ;;  %v17455_v35 = vrot.slane %v17413_v22, %v17422_v25  ;;  %v17490_v48 = vrot.slane %v17413_v22, %v17458_v36  ;;  %v17517_v60 = vrot.slane %v17413_v22, %v17493_v49 }
  0x46   :  { %155 = vst.msk [vmem:[#allocation2 + $0xb0] sm:$0xff] %vm132_vm0, %v20690_v1  ;;  %156 = vst.msk [vmem:[#allocation2 + $0xb8] sm:$0xff] %vm132_vm0, %v20690_v1  ;;  %v276_v30 = vld [vmem:[%s20675_s0 + $0x14] sm:$0xff]  ;;  %v274_v32 = vld [vmem:[%s20675_s0 + $0x4] sm:$0xff]  ;;  %14583 = vmatpush3.bf16.msra.mxu0 %v17062_v29  ;;  %v226_v37 = vmul.f32 %v17429_v27, %v197_v26  ;;  %v224_v39 = vmul.f32 %v17429_v27, %v195_v31 }
  0x47   :  { %157 = vst.msk [vmem:[#allocation2 + $0xc0] sm:$0xff] %vm132_vm0, %v20690_v1  ;;  %158 = vst.msk [vmem:[#allocation2 + $0xc8] sm:$0xff] %vm132_vm0, %v20690_v1  ;;  %v178_v33 = vld [vmem:[%s20678_s3 + $0x58] sm:$0xff]  ;;  %v177_v34 = vld [vmem:[%s20678_s3 + $0x50] sm:$0xff]  ;;  %v305_v38 = vmul.f32 %v17433_v28, %v276_v30  ;;  %v303_v40 = vmul.f32 %v17433_v28, %v274_v32  ;;  %14584 = vmatprep.subr.bf16.mxu0 %v20690_v1 }
  0x48   :  { %159 = vst.msk [vmem:[#allocation2 + $0xd0] sm:$0xff] %vm132_vm0, %v20690_v1  ;;  %160 = vst.msk [vmem:[#allocation2 + $0xd8] sm:$0xff] %vm132_vm0, %v20690_v1  ;;  %906 = vperm.xlu1 %17061, %v172_v15   ;;  %901 = vperm.xlu0 %17060, %v171_v16   ;;  %v353_v41 = vld [vmem:[%s20675_s0 + $0x6] sm:$0xff]  ;;  %v17063_v42 = vld [vmem:[%s20677_s2 + $0x18] sm:$0xff]  }
  0x49   :  { %161 = vst.msk [vmem:[#allocation2 + $0xe0] sm:$0xff] %vm132_vm0, %v20690_v1  ;;  %162 = vst.msk [vmem:[#allocation2 + $0xe8] sm:$0xff] %vm132_vm0, %v20690_v1  ;;  %v180_v43 = vld [vmem:[%s20678_s3 + $0x68] sm:$0xff]  ;;  %v17477_v44 = vld [vmem:[%s20675_s0 + $0x1a] sm:$0xff]  ;;  %v330_v50 = vadd.f32 %v305_v38, %v226_v37  ;;  %v328_v52 = vadd.f32 %v303_v40, %v224_v39  ;;  %v382_v53 = vmul.f32 %v17455_v35, %v353_v41 }
  0x4a   :  { %163 = vst.msk [vmem:[#allocation2 + $0xf0] sm:$0xff] %vm132_vm0, %v20690_v1  ;;  %164 = vst.msk [vmem:[#allocation2 + $0xf8] sm:$0xff] %vm132_vm0, %v20690_v1  ;;  %v277_v45 = vld [vmem:[%s20675_s0 + $0x1c] sm:$0xff]  ;;  %14585 = vmatpush3.bf16.msra.mxu0 %v17063_v42  ;;  %v17501_v54 = vld [vmem:[%s20675_s0 + $0x26] sm:$0xff]  ;;  %v227_v55 = vmul.f32 %v17429_v27, %v17477_v44 }
  0x4b   :  { %165 = vst.msk [vmem:[#allocation2 + $0x100] sm:$0xff] %vm132_vm0, %v20690_v1  ;;  %166 = vst.msk [vmem:[#allocation2 + $0x108] sm:$0xff] %vm132_vm0, %v20690_v1  ;;  %v179_v46 = vld [vmem:[%s20678_s3 + $0x60] sm:$0xff]  ;;  %v355_v47 = vld [vmem:[%s20675_s0 + $0x16] sm:$0xff]  ;;  %14638 = vmatprep.subr.bf16.mxu0 %v20690_v1  ;;  %v306_v56 = vmul.f32 %v17433_v28, %v277_v45  ;;  %v440_v12 = vmul.f32 %v17490_v48, %v17501_v54  ;;  %v407_v15 = vadd.f32 %v382_v53, %v328_v52 }
  0x4c   :  { %20745 = vst [vmem:[#allocation24_spill] sm:$0xff] %v17360_v2  ;;  %20746 = vst [vmem:[#allocation25_spill] sm:$0xff] %v17362_v3  ;;  %916 = vperm.xlu1 %17061, %v174_v18   ;;  %911 = vperm.xlu0 %17060, %v173_v19   ;;  %v384_v51 = vmul.f32 %v17455_v35, %v355_v47  ;;  %v182_v57 = vld [vmem:[%s20678_s3 + $0x78] sm:$0xff]  ;;  %v181_v59 = vld [vmem:[%s20678_s3 + $0x70] sm:$0xff]  ;;  %v438_v16 = vmul.f32 %v17490_v48, %v355_v47 }
  0x4d   :  { %20747 = vst [vmem:[#allocation26_spill] sm:$0xff] %v17364_v4  ;;  %20748 = vst [vmem:[#allocation27_spill] sm:$0xff] %v17366_v5  ;;  %v356_v58 = vld [vmem:[%s20675_s0 + $0x1e] sm:$0xff]  ;;  %v196_v62 = vld [vmem:[%s20675_s0 + $0xa] sm:$0xff]  ;;  %v331_v19 = vadd.f32 %v306_v56, %v227_v55 }
  0x4e   :  { %20749 = vst [vmem:[#allocation28_spill] sm:$0xff] %v17368_v6  ;;  %20750 = vst [vmem:[#allocation29_spill] sm:$0xff] %v17370_v7  ;;  %v275_v63 = vld [vmem:[%s20675_s0 + $0xc] sm:$0xff]  ;;  %v409_v11 = vadd.f32 %v384_v51, %v330_v50  ;;  %v225_v30 = vmul.f32 %v17429_v27, %v196_v62  ;;  %v183_v32 = vld [vmem:[%s20678_s3 + $0x80] sm:$0xff]  ;;  %v463_v42 = vadd.f32 %v438_v16, %v407_v15 }
  0x4f   :  { %20751 = vst [vmem:[#allocation30_spill] sm:$0xff] %v17372_v8  ;;  %20752 = vst [vmem:[#allocation31_spill] sm:$0xff] %v17374_v9  ;;  %v17529_v10 = vld [vmem:[%s20675_s0 + $0x2a] sm:$0xff]  ;;  %v304_v31 = vmul.f32 %v17433_v28, %v275_v63  ;;  %v186_v45 = vld [vmem:[%s20678_s3 + $0x98] sm:$0xff] }
  0x50   :  { %20753 = vst [vmem:[#allocation32_spill] sm:$0xff] %v17395_v17  ;;  %20754 = vst [vmem:[#allocation33_spill] sm:$0xff] %v17408_v20  ;;  %926 = vperm.xlu1 %17061, %v176_v23   ;;  %921 = vperm.xlu0 %17060, %v175_v24   ;;  %v17536_v13 = vld [vmem:[%s20675_s0 + $0x2c] sm:$0xff]  ;;  %v385_v23 = vmul.f32 %v17455_v35, %v356_v58  ;;  %v488_v24 = vld [vmem:[%s20675_s0 + $0x18] sm:$0xff]  ;;  %v229_v37 = vmul.f32 %v17429_v27, %v17529_v10 }
  0x51   :  { %20755 = vst [vmem:[#allocation34_spill] sm:$0xff] %v17411_v21  ;;  %20756 = vst [vmem:[#allocation35_spill] sm:$0xff] %v17422_v25  ;;  %v490_v18 = vld [vmem:[%s20675_s0 + $0x28] sm:$0xff]  ;;  %v308_v38 = vmul.f32 %v17433_v28, %v17536_v13  ;;  %v465_v40 = vadd.f32 %v440_v12, %v409_v11  ;;  %v491_v50 = vld [vmem:[%s20675_s0 + $0x30] sm:$0xff]  ;;  %v329_v53 = vadd.f32 %v304_v31, %v225_v30 }
  0x52   :  { %20757 = vst [vmem:[#allocation36_spill] sm:$0xff] %v17458_v36  ;;  %20758 = vst [vmem:[#allocation37_spill] sm:$0xff] %v17493_v49  ;;  %v184_v26 = vld [vmem:[%s20678_s3 + $0x88] sm:$0xff]  ;;  %v519_v41 = vmul.f32 %v17517_v60, %v490_v18  ;;  %v185_v56 = vld [vmem:[%s20678_s3 + $0x90] sm:$0xff] }
  0x53   :  { %v17552_v29 = vld [vmem:[%s20675_s0 + $0x2e] sm:$0xff]  ;;  %v17585_v51 = vld [vmem:[%s20675_s0 + $0x22] sm:$0xff]  ;;  %v333_v62 = vadd.f32 %v308_v38, %v229_v37  ;;  %v17630_v38 = vld [vmem:[%s20675_s0 + $0x3a] sm:$0xff] }
  0x54   :  { %936 = vperm.xlu1 %17061, %v178_v33   ;;  %931 = vperm.xlu0 %17060, %v177_v34   ;;  %v17562_v33 = vrot.slane %v17413_v22, %v20689_v61  ;;  %v20688_v34 = vsub.s32 6, %v17395_v17  ;;  %v354_v39 = vld [vmem:[%s20675_s0 + $0xe] sm:$0xff]  ;;  %v441_v47 = vmul.f32 %v17490_v48, %v17552_v29  ;;  %v278_v52 = vld [vmem:[%s20675_s0 + $0x24] sm:$0xff]  ;;  %v387_v63 = vmul.f32 %v17455_v35, %v17552_v29 }
  0x55   :  { %v383_v55 = vmul.f32 %v17455_v35, %v354_v39  ;;  %v17605_v11 = vld [vmem:[%s20675_s0 + $0x3e] sm:$0xff]  ;;  %v544_v12 = vadd.f32 %v519_v41, %v465_v40  ;;  %v188_v30 = vld [vmem:[%s20678_s3 + $0xa8] sm:$0xff]  ;;  %v17621_v31 = vld [vmem:[%s20675_s0 + $0x32] sm:$0xff] }
  0x56   :  { %v576_v15 = vmul.f32 %v17562_v33, %v17529_v10  ;;  %v574_v18 = vmul.f32 %v17562_v33, %v17477_v44  ;;  %v187_v37 = vld [vmem:[%s20678_s3 + $0xa0] sm:$0xff]  ;;  %v443_v39 = vmul.f32 %v17490_v48, %v17605_v11  ;;  %v412_v41 = vadd.f32 %v387_v63, %v333_v62 }
  0x57   :  { %v408_v44 = vadd.f32 %v383_v55, %v329_v53  ;;  %v577_v53 = vmul.f32 %v17562_v33, %v17621_v31  ;;  %v231_v62 = vmul.f32 %v17429_v27, %v17630_v38  ;;  %v17666_v63 = vld [vmem:[%s20675_s0 + $0x42] sm:$0xff] }
  0x58   :  { %946 = vperm.xlu1 %17061, %v180_v43   ;;  %941 = vperm.xlu0 %17060, %v179_v46   ;;  %v517_v43 = vmul.f32 %v17517_v60, %v488_v24  ;;  %v410_v46 = vadd.f32 %v385_v23, %v331_v19  ;;  %v520_v23 = vmul.f32 %v17517_v60, %v491_v50  ;;  %v17652_v50 = vld [vmem:[#allocation7 + $0x8] sm:$0xff] }
  0x59   :  { %v228_v24 = vmul.f32 %v17429_v27, %v17585_v51  ;;  %v17682_v14 = vrot.slane %v17652_v50, %v17408_v20 }
  0x5a   :  { %v542_v16 = vadd.f32 %v517_v43, %v463_v42  ;;  %v466_v19 = vadd.f32 %v441_v47, %v410_v46  ;;  %v281_v42 = vld [vmem:[%s20675_s0 + $0x3c] sm:$0xff]  ;;  %v601_v43 = vadd.f32 %v576_v15, %v544_v12 }
  0x5b   :  { %v17671_v12 = vld [vmem:[%s20675_s0 + $0x36] sm:$0xff] }
  0x5c   :  { %956 = vperm.xlu1 %17061, %v182_v57   ;;  %951 = vperm.xlu0 %17060, %v181_v59   ;;  %v17597_v57 = vrot.slane %v17413_v22, %v20688_v34  ;;  %v20687_v59 = vsub.s32 7, %v17395_v17  ;;  %v599_v46 = vadd.f32 %v574_v18, %v542_v16  ;;  %v189_v16 = vld [vmem:[%s20678_s3 + $0xb0] sm:$0xff]  ;;  %v310_v18 = vmul.f32 %v17433_v28, %v281_v42 }
  0x5e   :  { %v17637_v40 = vrot.slane %v17413_v22, %v20687_v59  ;;  %v630_v47 = vmul.f32 %v17597_v57, %v17529_v10  ;;  %v493_v22 = vld [vmem:[%s20675_s0 + $0x40] sm:$0xff]  ;;  %v190_v10 = vld [vmem:[%s20678_s3 + $0xb8] sm:$0xff]  ;;  %v633_v0 = vmul.f32 %v17597_v57, %v17666_v63 }
  0x60   :  { %966 = vperm.xlu1 %17061, %v184_v26   ;;  %961 = vperm.xlu0 %17060, %v183_v32   ;;  %v307_v26 = vmul.f32 %v17433_v28, %v278_v52  ;;  %v439_v32 = vmul.f32 %v17490_v48, %v356_v58  ;;  %v489_v58 = vld [vmem:[%s20675_s0 + $0x20] sm:$0xff]  ;;  %v545_v52 = vadd.f32 %v520_v23, %v466_v19 }
  0x61   :  { %v691_v19 = vmul.f32 %v17637_v40, %v281_v42  ;;  %v468_v23 = vadd.f32 %v443_v39, %v412_v41  ;;  %v442_v39 = vmul.f32 %v17490_v48, %v17671_v12  ;;  %v17064_v41 = vld [vmem:[%s20677_s2] sm:$0xff]  }
  0x62   :  { %v332_v55 = vadd.f32 %v307_v26, %v228_v24  ;;  %v464_v15 = vadd.f32 %v439_v32, %v408_v44  ;;  %v522_v24 = vmul.f32 %v17517_v60, %v493_v22  ;;  %v1096_v26 = vld [vmem:[#allocation2 + $0x4] sm:$0xff]  ;;  %v655_v44 = vadd.f32 %v630_v47, %v599_v46  ;;  %v492_v46 = vld [vmem:[%s20675_s0 + $0x38] sm:$0xff] }
  0x63   :  { %v689_v32 = vmul.f32 %v17637_v40, %v17536_v13  ;;  %v575_v13 = vmul.f32 %v17562_v33, %v17585_v51  ;;  %v191_v22 = vld [vmem:[%s20678_s3 + $0xc0] sm:$0xff]  ;;  %v748_v51 = vmul.f32 %v17682_v14, %v17605_v11 }
  0x64   :  { %976 = vperm.xlu1 %17061, %v186_v45   ;;  %971 = vperm.xlu0 %17060, %v185_v56   ;;  %v632_v45 = vmul.f32 %v17597_v57, %v17630_v38  ;;  %v386_v56 = vmul.f32 %v17455_v35, %v17501_v54  ;;  %v518_v54 = vmul.f32 %v17517_v60, %v489_v58 }
  0x65   :  { %v602_v58 = vadd.f32 %v577_v53, %v545_v52  ;;  %v335_v52 = vadd.f32 %v310_v18, %v231_v62  ;;  %v389_v53 = vmul.f32 %v17455_v35, %v17605_v11  ;;  %v17723_v11 = vld [vmem:[%s20675_s0 + $0x46] sm:$0xff] }
  0x66   :  { %v411_v42 = vadd.f32 %v386_v56, %v332_v55  ;;  %v547_v55 = vadd.f32 %v522_v24, %v468_v23  ;;  %v579_v56 = vmul.f32 %v17562_v33, %v17666_v63  ;;  %v631_v24 = vmul.f32 %v17597_v57, %v17621_v31 }
  0x67   :  { %v658_v62 = vadd.f32 %v633_v0, %v602_v58  ;;  %v280_v0 = vld [vmem:[%s20675_s0 + $0x34] sm:$0xff] }
  0x68   :  { %986 = vperm.xlu1 %17061, %v188_v30   ;;  %981 = vperm.xlu0 %17060, %v187_v37   ;;  %v1097_v30 = vld [vmem:[#allocation2 + $0xc] sm:$0xff]  ;;  %v657_v37 = vadd.f32 %v632_v45, %v601_v43  ;;  %v282_v43 = vld [vmem:[%s20675_s0 + $0x44] sm:$0xff]  ;;  %v543_v45 = vadd.f32 %v518_v54, %v464_v15  ;;  %v714_v15 = vadd.f32 %v689_v32, %v655_v44 }
  0x69   :  { %v1121_v47 = vpack.c.bf16 %v1097_v30, %v1096_v26  ;;  %v746_v54 = vmul.f32 %v17682_v14, %v17552_v29  ;;  %v692_v18 = vmul.f32 %v17637_v40, %v282_v43  ;;  %v467_v23 = vadd.f32 %v442_v39, %v411_v42  ;;  %v284_v26 = vld [vmem:[%s20675_s0 + $0x54] sm:$0xff] }
  0x6a   :  { %v600_v29 = vadd.f32 %v575_v13, %v543_v45  ;;  %v604_v30 = vadd.f32 %v579_v56, %v547_v55  ;;  %v17740_v44 = vld [vmem:[%s20675_s0 + $0x4e] sm:$0xff]  ;;  %v414_v32 = vadd.f32 %v389_v53, %v335_v52  ;;  %v17745_v42 = vrot.slane %v17652_v50, %v17411_v21 }
  0x6b   :  { %14587 = vmatmul.mubr.msk.bf16.vlgmr.msra.gmra.mrb[0].mxu0 %vm132_vm0, %v1121_v47  ;;  %v771_v39 = vadd.f32 %v746_v54, %v714_v15  ;;  %v749_v45 = vmul.f32 %v17682_v14, %v17723_v11  ;;  %v17753_v47 = vrot.slane %v17652_v50, %v17422_v25  ;;  %v690_v52 = vmul.f32 %v17637_v40, %v280_v0  ;;  %v17759_v53 = vld [vmem:[%s20675_s0 + $0x4a] sm:$0xff] }
  0x6c   :  { %996 = vperm.xlu1 %17061, %v190_v10   ;;  %991 = vperm.xlu0 %17060, %v189_v16   ;;  %v716_v10 = vadd.f32 %v691_v19, %v657_v37  ;;  %v17715_v16 = vld [vmem:[%s20675_s0 + $0x52] sm:$0xff]  ;;  %v521_v19 = vmul.f32 %v17517_v60, %v492_v46  ;;  %v578_v46 = vmul.f32 %v17562_v33, %v17630_v38 }
  0x6d   :  { %14639 = vmatpush3.bf16.msra.mxu0 %v17064_v41  ;;  %14590 = vmatprep.mubr.msk.bf16.mxu0 %vm17204_vm1, %v20690_v1  ;;  %v635_v37 = vmul.f32 %v17597_v57, %v17715_v16  ;;  %v717_v41 = vadd.f32 %v692_v18, %v658_v62  ;;  %v283_v55 = vld [vmem:[%s20675_s0 + $0x4c] sm:$0xff]  ;;  %v445_v56 = vmul.f32 %v17490_v48, %v17740_v44 }
  0x6e   :  { %14640 = vmatprep.subr.bf16.mxu0 %v20690_v1  ;;  %v773_v58 = vadd.f32 %v748_v51, %v716_v10  ;;  %v546_v13 = vadd.f32 %v521_v19, %v467_v23  ;;  %v232_v38 = vmul.f32 %v17429_v27, %v17666_v63  ;;  %v311_v50 = vmul.f32 %v17433_v28, %v282_v43  ;;  %v495_v15 = vld [vmem:[%s20675_s0 + $0x50] sm:$0xff] }
  0x6f   :  { %v660_v10 = vadd.f32 %v635_v37, %v604_v30  ;;  %v694_v51 = vmul.f32 %v17637_v40, %v284_v26  ;;  %v800_v62 = vmul.f32 %v17745_v42, %v771_v39  ;;  %v230_v18 = vmul.f32 %v17429_v27, %v17621_v31  ;;  %v363_v63 = vld [vmem:[%s20675_s0 + $0x56] sm:$0xff] }
  0x70   :  { %1001 = vperm.xlu0 %17060, %v191_v22   ;;  %v656_v22 = vadd.f32 %v631_v24, %v600_v29  ;;  %v802_v54 = vmul.f32 %v17745_v42, %v773_v58  ;;  %v309_v23 = vmul.f32 %v17433_v28, %v280_v0  ;;  %v390_v43 = vmul.f32 %v17455_v35, %v17723_v11  ;;  %v17065_v0 = vld [vmem:[%s20677_s2 + $0x8] sm:$0xff]  }
  0x71   :  { %v774_v19 = vadd.f32 %v749_v45, %v717_v41  ;;  %v603_v29 = vadd.f32 %v578_v46, %v546_v13  ;;  %v634_v24 = vmul.f32 %v17597_v57, %v17759_v53  ;;  %v747_v37 = vmul.f32 %v17682_v14, %v17671_v12  ;;  %14641 = vmatpush3.bf16.msra.mxu0 %v17065_v0 }
  0x72   :  { %v715_v30 = vadd.f32 %v690_v52, %v656_v22  ;;  %v470_v58 = vadd.f32 %v445_v56, %v414_v32  ;;  %v524_v31 = vmul.f32 %v17517_v60, %v495_v15  ;;  %v719_v39 = vadd.f32 %v694_v51, %v660_v10  ;;  %14694 = vmatprep.subr.bf16.mxu0 %v20690_v1 }
  0x73   :  { %v751_v59 = vmul.f32 %v17682_v14, %v363_v63  ;;  %v233_v41 = vmul.f32 %v17429_v27, %v17759_v53  ;;  %v312_v45 = vmul.f32 %v17433_v28, %v283_v55  ;;  %v17796_v13 = vadd.f32 %v17753_v47, %v802_v54 }
  0x74   :  { %v17799_v46 = vadd.f32 %v17753_v47, %v800_v62  ;;  %v334_v32 = vadd.f32 %v309_v23, %v230_v18  ;;  %v388_v22 = vmul.f32 %v17455_v35, %v17671_v12  ;;  %v336_v52 = vadd.f32 %v311_v50, %v232_v38  ;;  %v17812_v62 = vld [vmem:[%s20675_s0 + $0x62] sm:$0xff] }
  0x75   :  { %v803_v56 = vmul.f32 %v17745_v42, %v774_v19  ;;  %v659_v10 = vadd.f32 %v634_v24, %v603_v29  ;;  %v693_v51 = vmul.f32 %v17637_v40, %v283_v55  ;;  %v234_v15 = vmul.f32 %v17429_v27, %v17715_v16  ;;  %v17821_v19 = vld [vmem:[%s20675_s0 + $0x5e] sm:$0xff] }
  0x76   :  { %v313_v54 = vmul.f32 %v17433_v28, %v284_v26  ;;  %v549_v12 = vadd.f32 %v524_v31, %v470_v58  ;;  %v581_v38 = vmul.f32 %v17562_v33, %v17715_v16  ;;  %v772_v50 = vadd.f32 %v747_v37, %v715_v30  ;;  %v494_v26 = vld [vmem:[%s20675_s0 + $0x48] sm:$0xff]  ;;  %v17836_v37 = vld [vmem:[%s20675_s0 + $0x5a] sm:$0xff] }
  0x77   :  { %v776_v18 = vadd.f32 %v751_v59, %v719_v39  ;;  %v337_v23 = vadd.f32 %v312_v45, %v233_v41  ;;  %v391_v55 = vmul.f32 %v17455_v35, %v17740_v44  ;;  %v444_v59 = vmul.f32 %v17490_v48, %v17723_v11  ;;  %v286_v30 = vld [vmem:[%s20675_s0 + $0x64] sm:$0xff]  ;;  %v285_v58 = vld [vmem:[%s20675_s0 + $0x5c] sm:$0xff] }
  0x78   :  { %v413_v16 = vadd.f32 %v388_v22, %v334_v32  ;;  %v415_v31 = vadd.f32 %v390_v43, %v336_v52  ;;  %v392_v0 = vmul.f32 %v17455_v35, %v363_v63  ;;  %v718_v39 = vadd.f32 %v693_v51, %v659_v10  ;;  %v365_v32 = vld [vmem:[%s20675_s0 + $0x66] sm:$0xff] }
  0x79   :  { %v750_v11 = vmul.f32 %v17682_v14, %v17740_v44  ;;  %v17845_v41 = vadd.f32 %v17753_v47, %v803_v56  ;;  %v338_v45 = vadd.f32 %v313_v54, %v234_v15  ;;  %v606_v22 = vadd.f32 %v581_v38, %v549_v12  ;;  %v497_v44 = vld [vmem:[%s20675_s0 + $0x60] sm:$0xff] }
  0x7a   :  { %v637_v34 = vmul.f32 %v17597_v57, %v17812_v62  ;;  %v801_v43 = vmul.f32 %v17745_v42, %v772_v50  ;;  %v446_v52 = vmul.f32 %v17490_v48, %v363_v63  ;;  %v805_v10 = vmul.f32 %v17745_v42, %v776_v18 }
  0x7b   :  { %v416_v51 = vadd.f32 %v391_v55, %v337_v23  ;;  %v236_v56 = vmul.f32 %v17429_v27, %v17812_v62  ;;  %v447_v15 = vmul.f32 %v17490_v48, %v17821_v19  ;;  %v469_v54 = vadd.f32 %v444_v59, %v413_v16 }
  0x7c   :  { %v523_v12 = vmul.f32 %v17517_v60, %v494_v26  ;;  %v775_v38 = vadd.f32 %v750_v11, %v718_v39  ;;  %v315_v50 = vmul.f32 %v17433_v28, %v286_v30  ;;  %v235_v63 = vmul.f32 %v17429_v27, %v17836_v37 }
  0x7d   :  { %v314_v18 = vmul.f32 %v17433_v28, %v285_v58  ;;  %v417_v55 = vadd.f32 %v392_v0, %v338_v45  ;;  %v662_v61 = vadd.f32 %v637_v34, %v606_v22  ;;  %v696_v1 = vmul.f32 %v17637_v40, %v286_v30  ;;  %v17883_v34 = vld [vmem:[%s20675_s0 + $0x6e] sm:$0xff] }
  0x7e   :  { %v17870_v24 = vadd.f32 %v17753_v47, %v801_v43  ;;  %v17873_v59 = vadd.f32 %v17753_v47, %v805_v10  ;;  %v394_v26 = vmul.f32 %v17455_v35, %v365_v32  ;;  %v448_v16 = vmul.f32 %v17490_v48, %v365_v32  ;;  %v17891_v10 = vld [vmem:[%s20675_s0 + $0x6a] sm:$0xff] }
  0x7f   :  { %v472_v39 = vadd.f32 %v447_v15, %v416_v51  ;;  %v548_v11 = vadd.f32 %v523_v12, %v469_v54  ;;  %v580_v29 = vmul.f32 %v17562_v33, %v17759_v53  ;;  %v526_v0 = vmul.f32 %v17517_v60, %v497_v44  ;;  %v17896_v53 = vld [vmem:[%s20675_s0 + $0x6c] sm:$0xff]  ;;  %v496_v15 = vld [vmem:[%s20675_s0 + $0x58] sm:$0xff] }
  0x80   :  { %v804_v30 = vmul.f32 %v17745_v42, %v775_v38  ;;  %v340_v45 = vadd.f32 %v315_v50, %v236_v56  ;;  %v339_v22 = vadd.f32 %v314_v18, %v235_v63  ;;  %v393_v43 = vmul.f32 %v17455_v35, %v17821_v19  ;;  %v288_v56 = vld [vmem:[%s20675_s0 + $0x74] sm:$0xff] }
  0x81   :  { %v721_v51 = vadd.f32 %v696_v1, %v662_v61  ;;  %v753_v44 = vmul.f32 %v17682_v14, %v365_v32  ;;  %v471_v12 = vadd.f32 %v446_v52, %v415_v31  ;;  %v473_v50 = vadd.f32 %v448_v16, %v417_v55  ;;  %v209_v1 = vld [vmem:[%s20675_s0 + $0x72] sm:$0xff] }
  0x82   :  { %v605_v61 = vadd.f32 %v580_v29, %v548_v11  ;;  %v636_v32 = vmul.f32 %v17597_v57, %v17836_v37  ;;  %v551_v63 = vadd.f32 %v526_v0, %v472_v39  ;;  %v583_v18 = vmul.f32 %v17562_v33, %v17812_v62  ;;  %v499_v62 = vld [vmem:[%s20675_s0 + $0x70] sm:$0xff]  ;;  %v17935_v11 = vld [vmem:[%s20675_s0 + $0x7c] sm:$0xff] }
  0x83   :  { %v17915_v23 = vadd.f32 %v17753_v47, %v804_v30  ;;  %v419_v54 = vadd.f32 %v394_v26, %v340_v45  ;;  %v418_v31 = vadd.f32 %v393_v43, %v339_v22  ;;  %v449_v52 = vmul.f32 %v17490_v48, %v17883_v34  ;;  %v17930_v26 = vld [vmem:[%s20675_s0 + $0x7a] sm:$0xff] }
  0x84   :  { %v778_v55 = vadd.f32 %v753_v44, %v721_v51  ;;  %v695_v16 = vmul.f32 %v17637_v40, %v285_v58  ;;  %v237_v29 = vmul.f32 %v17429_v27, %v17891_v10  ;;  %v316_v39 = vmul.f32 %v17433_v28, %v17896_v53  ;;  %v367_v45 = vld [vmem:[%s20675_s0 + $0x76] sm:$0xff] }
  0x85   :  { %v752_v58 = vmul.f32 %v17682_v14, %v17821_v19  ;;  %v238_v0 = vmul.f32 %v17429_v27, %v209_v1  ;;  %v317_v30 = vmul.f32 %v17433_v28, %v288_v56  ;;  %v525_v22 = vmul.f32 %v17517_v60, %v496_v15  ;;  %v498_v19 = vld [vmem:[%s20675_s0 + $0x68] sm:$0xff] }
  0x86   :  { %v661_v43 = vadd.f32 %v636_v32, %v605_v61  ;;  %v396_v51 = vmul.f32 %v17455_v35, %v367_v45  ;;  %v608_v44 = vadd.f32 %v583_v18, %v551_v63  ;;  %v639_v38 = vmul.f32 %v17597_v57, %v209_v1 }
  0x87   :  { %v474_v25 = vadd.f32 %v449_v52, %v418_v31  ;;  %v528_v9 = vmul.f32 %v17517_v60, %v499_v62  ;;  %v239_v8 = vmul.f32 %v17429_v27, %v17930_v26  ;;  %v318_v7 = vmul.f32 %v17433_v28, %v17935_v11  ;;  %v17965_v52 = vld [vmem:[%s20675_s0 + $0x7e] sm:$0xff] }
  0x88   :  { %v807_v15 = vmul.f32 %v17745_v42, %v778_v55  ;;  %v450_v61 = vmul.f32 %v17490_v48, %v367_v45  ;;  %v341_v32 = vadd.f32 %v316_v39, %v237_v29  ;;  %v395_v63 = vmul.f32 %v17455_v35, %v17883_v34 }
  0x89   :  { %v550_v6 = vadd.f32 %v525_v22, %v471_v12  ;;  %v582_v31 = vmul.f32 %v17562_v33, %v17836_v37  ;;  %v527_v62 = vmul.f32 %v17517_v60, %v498_v19  ;;  %v720_v55 = vadd.f32 %v695_v16, %v661_v43  ;;  %v211_v16 = vld [vmem:[%s20675_s0 + $0x82] sm:$0xff] }
  0x8a   :  { %v342_v5 = vadd.f32 %v317_v30, %v238_v0  ;;  %v664_v4 = vadd.f32 %v639_v38, %v608_v44  ;;  %v698_v29 = vmul.f32 %v17637_v40, %v288_v56  ;;  %v553_v39 = vadd.f32 %v528_v9, %v474_v25  ;;  %v17983_v9 = vld [vmem:[%s20675_s0 + $0x8e] sm:$0xff] }
  0x8b   :  { %v585_v21 = vmul.f32 %v17562_v33, %v209_v1  ;;  %v343_v18 = vadd.f32 %v318_v7, %v239_v8  ;;  %v397_v12 = vmul.f32 %v17455_v35, %v17965_v52  ;;  %v17973_v37 = vadd.f32 %v17753_v47, %v807_v15  ;;  %v500_v1 = vld [vmem:[%s20675_s0 + $0x78] sm:$0xff]  ;;  %v18207_v15 = vld [vmem:[%s20675_s0 + $0xc4] sm:$0xff] }
  0x8c   :  { %v475_v22 = vadd.f32 %v450_v61, %v419_v54  ;;  %v420_v3 = vadd.f32 %v395_v63, %v341_v32  ;;  %v451_v38 = vmul.f32 %v17490_v48, %v17965_v52  ;;  %v607_v7 = vadd.f32 %v582_v31, %v550_v6  ;;  %v501_v54 = vld [vmem:[%s20675_s0 + $0x80] sm:$0xff] }
  0x8d   :  { %v638_v8 = vmul.f32 %v17597_v57, %v17891_v10  ;;  %v552_v25 = vadd.f32 %v527_v62, %v473_v50  ;;  %v584_v56 = vmul.f32 %v17562_v33, %v17891_v10  ;;  %v777_v0 = vadd.f32 %v752_v58, %v720_v55  ;;  %v290_v61 = vld [vmem:[%s20675_s0 + $0x84] sm:$0xff] }
  0x8e   :  { %v421_v30 = vadd.f32 %v396_v51, %v342_v5  ;;  %v723_v43 = vadd.f32 %v698_v29, %v664_v4  ;;  %v755_v6 = vmul.f32 %v17682_v14, %v367_v45  ;;  %v610_v44 = vadd.f32 %v585_v21, %v553_v39  ;;  %v503_v5 = vld [vmem:[%s20675_s0 + $0x90] sm:$0xff]  ;;  %v369_v55 = vld [vmem:[%s20675_s0 + $0x86] sm:$0xff] }
  0x8f   :  { %v641_v19 = vmul.f32 %v17597_v57, %v211_v16  ;;  %v422_v50 = vadd.f32 %v397_v12, %v343_v18  ;;  %v453_v10 = vmul.f32 %v17490_v48, %v17983_v9  ;;  %v476_v32 = vadd.f32 %v451_v38, %v420_v3 }
  0x90   :  { %v530_v58 = vmul.f32 %v17517_v60, %v501_v54  ;;  %v529_v4 = vmul.f32 %v17517_v60, %v500_v1  ;;  %v663_v21 = vadd.f32 %v638_v8, %v607_v7  ;;  %v697_v45 = vmul.f32 %v17637_v40, %v17896_v53 }
  0x91   :  { %v609_v51 = vadd.f32 %v584_v56, %v552_v25  ;;  %v640_v63 = vmul.f32 %v17597_v57, %v17930_v26  ;;  %v806_v18 = vmul.f32 %v17745_v42, %v777_v0  ;;  %v780_v31 = vadd.f32 %v755_v6, %v723_v43  ;;  %v213_v0 = vld [vmem:[%s20675_s0 + $0x92] sm:$0xff] }
  0x92   :  { %v754_v3 = vmul.f32 %v17682_v14, %v17883_v34  ;;  %v240_v62 = vmul.f32 %v17429_v27, %v211_v16  ;;  %v666_v29 = vadd.f32 %v641_v19, %v610_v44  ;;  %v700_v39 = vmul.f32 %v17637_v40, %v290_v61  ;;  %v291_v19 = vld [vmem:[%s20675_s0 + $0x8c] sm:$0xff] }
  0x93   :  { %v478_v53 = vadd.f32 %v453_v10, %v422_v50  ;;  %v532_v12 = vmul.f32 %v17517_v60, %v503_v5  ;;  %v555_v38 = vadd.f32 %v530_v58, %v476_v32  ;;  %v587_v7 = vmul.f32 %v17562_v33, %v211_v16  ;;  %v18049_v5 = vld [vmem:[%s20675_s0 + $0xa2] sm:$0xff] }
  0x94   :  { %v554_v8 = vadd.f32 %v529_v4, %v475_v22  ;;  %v586_v25 = vmul.f32 %v17562_v33, %v17930_v26  ;;  %v722_v34 = vadd.f32 %v697_v45, %v663_v21  ;;  %v319_v56 = vmul.f32 %v17433_v28, %v290_v61 }
  0x95   :  { %v665_v54 = vadd.f32 %v640_v63, %v609_v51  ;;  %v699_v1 = vmul.f32 %v17637_v40, %v17935_v11  ;;  %v18031_v43 = vadd.f32 %v17753_v47, %v806_v18  ;;  %v809_v16 = vmul.f32 %v17745_v42, %v780_v31  ;;  %v212_v11 = vld [vmem:[%s20675_s0 + $0x8a] sm:$0xff]  ;;  %v292_v18 = vld [vmem:[%s20675_s0 + $0x94] sm:$0xff] }
  0x96   :  { %v398_v22 = vmul.f32 %v17455_v35, %v369_v55  ;;  %v452_v26 = vmul.f32 %v17490_v48, %v369_v55  ;;  %v725_v6 = vadd.f32 %v700_v39, %v666_v29  ;;  %v757_v44 = vmul.f32 %v17682_v14, %v369_v55 }
  0x97   :  { %v557_v50 = vadd.f32 %v532_v12, %v478_v53  ;;  %v589_v10 = vmul.f32 %v17562_v33, %v213_v0  ;;  %v612_v61 = vadd.f32 %v587_v7, %v555_v38  ;;  %v643_v32 = vmul.f32 %v17597_v57, %v213_v0 }
  0x98   :  { %v611_v58 = vadd.f32 %v586_v25, %v554_v8  ;;  %v642_v4 = vmul.f32 %v17597_v57, %v212_v11  ;;  %v779_v21 = vadd.f32 %v754_v3, %v722_v34  ;;  %v344_v45 = vadd.f32 %v319_v56, %v240_v62  ;;  %v502_v3 = vld [vmem:[%s20675_s0 + $0x88] sm:$0xff] }
  0x99   :  { %v724_v51 = vadd.f32 %v699_v1, %v665_v54  ;;  %v756_v63 = vmul.f32 %v17682_v14, %v17965_v52  ;;  %v18058_v55 = vadd.f32 %v17753_v47, %v809_v16  ;;  %v241_v29 = vmul.f32 %v17429_v27, %v212_v11  ;;  %v294_v34 = vld [vmem:[%s20675_s0 + $0xa4] sm:$0xff] }
  0x9a   :  { %v320_v39 = vmul.f32 %v17433_v28, %v291_v19  ;;  %v477_v62 = vadd.f32 %v452_v26, %v421_v30  ;;  %v782_v53 = vadd.f32 %v757_v44, %v725_v6  ;;  %v614_v52 = vadd.f32 %v589_v10, %v557_v50  ;;  %v371_v10 = vld [vmem:[%s20675_s0 + $0x96] sm:$0xff] }
  0x9b   :  { %v645_v12 = vmul.f32 %v17597_v57, %v18049_v5  ;;  %v668_v38 = vadd.f32 %v643_v32, %v612_v61  ;;  %v702_v7 = vmul.f32 %v17637_v40, %v292_v18  ;;  %v667_v8 = vadd.f32 %v642_v4, %v611_v58 }
  0x9c   :  { %v701_v25 = vmul.f32 %v17637_v40, %v291_v19  ;;  %v808_v56 = vmul.f32 %v17745_v42, %v779_v21  ;;  %v423_v54 = vadd.f32 %v398_v22, %v344_v45  ;;  %v781_v1 = vadd.f32 %v756_v63, %v724_v51  ;;  %v372_v21 = vld [vmem:[%s20675_s0 + $0x9e] sm:$0xff] }
  0x9d   :  { %v531_v30 = vmul.f32 %v17517_v60, %v502_v3  ;;  %v242_v26 = vmul.f32 %v17429_v27, %v213_v0  ;;  %v345_v6 = vadd.f32 %v320_v39, %v241_v29  ;;  %v399_v44 = vmul.f32 %v17455_v35, %v17983_v9 }
  0x9e   :  { %v811_v19 = vmul.f32 %v17745_v42, %v782_v53  ;;  %v321_v50 = vmul.f32 %v17433_v28, %v292_v18  ;;  %v670_v22 = vadd.f32 %v645_v12, %v614_v52  ;;  %v704_v61 = vmul.f32 %v17637_v40, %v294_v34  ;;  %v373_v53 = vld [vmem:[%s20675_s0 + $0xa6] sm:$0xff] }
  0x9f   :  { %v727_v32 = vadd.f32 %v702_v7, %v668_v38  ;;  %v759_v58 = vmul.f32 %v17682_v14, %v371_v10  ;;  %v726_v4 = vadd.f32 %v701_v25, %v667_v8  ;;  %v758_v0 = vmul.f32 %v17682_v14, %v17983_v9 }
  0xa0   :  { %v18091_v45 = vadd.f32 %v17753_v47, %v808_v56  ;;  %v810_v51 = vmul.f32 %v17745_v42, %v781_v1  ;;  %v556_v63 = vadd.f32 %v531_v30, %v477_v62  ;;  %v588_v18 = vmul.f32 %v17562_v33, %v212_v11  ;;  %v18107_v11 = vld [vmem:[%s20675_s0 + $0x9a] sm:$0xff] }
  0xa1   :  { %v400_v29 = vmul.f32 %v17455_v35, %v371_v10  ;;  %v454_v39 = vmul.f32 %v17490_v48, %v371_v10  ;;  %v424_v3 = vadd.f32 %v399_v44, %v345_v6  ;;  %v244_v9 = vmul.f32 %v17429_v27, %v18049_v5  ;;  %v293_v62 = vld [vmem:[%s20675_s0 + $0x9c] sm:$0xff] }
  0xa2   :  { %v323_v52 = vmul.f32 %v17433_v28, %v294_v34  ;;  %v729_v12 = vadd.f32 %v704_v61, %v670_v22  ;;  %v761_v38 = vmul.f32 %v17682_v14, %v373_v53  ;;  %v455_v7 = vmul.f32 %v17490_v48, %v372_v21  ;;  %v505_v1 = vld [vmem:[%s20675_s0 + $0xa0] sm:$0xff] }
  0xa3   :  { %v18114_v8 = vadd.f32 %v17753_v47, %v811_v19  ;;  %v346_v25 = vadd.f32 %v321_v50, %v242_v26  ;;  %v784_v56 = vadd.f32 %v759_v58, %v727_v32  ;;  %v783_v34 = vadd.f32 %v758_v0, %v726_v4  ;;  %v296_v4 = vld [vmem:[%s20675_s0 + $0xb4] sm:$0xff] }
  0xa4   :  { %v18121_v6 = vadd.f32 %v17753_v47, %v810_v51  ;;  %v613_v44 = vadd.f32 %v588_v18, %v556_v63  ;;  %v644_v10 = vmul.f32 %v17597_v57, %v18107_v11  ;;  %v479_v22 = vadd.f32 %v454_v39, %v423_v54  ;;  %v374_v51 = vld [vmem:[%s20675_s0 + $0xae] sm:$0xff] }
  0xa5   :  { %v402_v19 = vmul.f32 %v17455_v35, %v373_v53  ;;  %v243_v26 = vmul.f32 %v17429_v27, %v18107_v11  ;;  %v322_v50 = vmul.f32 %v17433_v28, %v293_v62  ;;  %v348_v61 = vadd.f32 %v323_v52, %v244_v9  ;;  %v18142_v52 = vld [vmem:[%s20675_s0 + $0xb2] sm:$0xff] }
  0xa6   :  { %v786_v32 = vadd.f32 %v761_v38, %v729_v12  ;;  %v480_v58 = vadd.f32 %v455_v7, %v424_v3  ;;  %v534_v0 = vmul.f32 %v17517_v60, %v505_v1  ;;  %v425_v63 = vadd.f32 %v400_v29, %v346_v25  ;;  %v504_v29 = vld [vmem:[%s20675_s0 + $0x98] sm:$0xff]  ;;  %v18157_v25 = vld [vmem:[%s20675_s0 + $0xaa] sm:$0xff] }
  0xa7   :  { %v813_v54 = vmul.f32 %v17745_v42, %v784_v56  ;;  %v812_v18 = vmul.f32 %v17745_v42, %v783_v34  ;;  %v456_v30 = vmul.f32 %v17490_v48, %v373_v53  ;;  %v669_v9 = vadd.f32 %v644_v10, %v613_v44  ;;  %v295_v56 = vld [vmem:[%s20675_s0 + $0xac] sm:$0xff] }
  0xa8   :  { %v703_v3 = vmul.f32 %v17637_v40, %v293_v62  ;;  %v347_v12 = vadd.f32 %v322_v50, %v243_v26  ;;  %v401_v38 = vmul.f32 %v17455_v35, %v372_v21  ;;  %v246_v7 = vmul.f32 %v17429_v27, %v18142_v52  ;;  %v375_v62 = vld [vmem:[%s20675_s0 + $0xb6] sm:$0xff] }
  0xa9   :  { %v325_v53 = vmul.f32 %v17433_v28, %v296_v4  ;;  %v427_v34 = vadd.f32 %v402_v19, %v348_v61  ;;  %v815_v1 = vmul.f32 %v17745_v42, %v786_v32  ;;  %v559_v44 = vadd.f32 %v534_v0, %v480_v58 }
  0xaa   :  { %v591_v10 = vmul.f32 %v17562_v33, %v18049_v5  ;;  %v18166_v26 = vadd.f32 %v17753_v47, %v813_v54  ;;  %v18169_v50 = vadd.f32 %v17753_v47, %v812_v18  ;;  %v760_v39 = vmul.f32 %v17682_v14, %v372_v21 }
  0xab   :  { %v533_v19 = vmul.f32 %v17517_v60, %v504_v29  ;;  %v728_v61 = vadd.f32 %v703_v3, %v669_v9  ;;  %v458_v32 = vmul.f32 %v17490_v48, %v375_v62  ;;  %v245_v5 = vmul.f32 %v17429_v27, %v18157_v25  ;;  %v18190_v3 = vld [vmem:[%s20675_s0 + $0xba] sm:$0xff] }
  0xac   :  { %v324_v58 = vmul.f32 %v17433_v28, %v295_v56  ;;  %v481_v0 = vadd.f32 %v456_v30, %v425_v63  ;;  %v426_v54 = vadd.f32 %v401_v38, %v347_v12  ;;  %v350_v18 = vadd.f32 %v325_v53, %v246_v7  ;;  %v18195_v30 = vld [vmem:[%s20675_s0 + $0xbc] sm:$0xff] }
  0xad   :  { %v404_v16 = vmul.f32 %v17455_v35, %v375_v62  ;;  %v18182_v21 = vadd.f32 %v17753_v47, %v815_v1  ;;  %v616_v31 = vadd.f32 %v591_v10, %v559_v44  ;;  %v647_v29 = vmul.f32 %v17597_v57, %v18142_v52 }
  0xae   :  { %v457_v9 = vmul.f32 %v17490_v48, %v374_v51  ;;  %v558_v38 = vadd.f32 %v533_v19, %v479_v22  ;;  %v590_v7 = vmul.f32 %v17562_v33, %v18107_v11  ;;  %v785_v53 = vadd.f32 %v760_v39, %v728_v61  ;;  %v507_v22 = vld [vmem:[%s20675_s0 + $0xb0] sm:$0xff] }
  0xaf   :  { %v18201_v1 = vadd.f32 %v458_v32, %v427_v34  ;;  %v349_v44 = vadd.f32 %v324_v58, %v245_v5  ;;  %v403_v10 = vmul.f32 %v17455_v35, %v374_v51  ;;  %v429_v2 = vadd.f32 %v404_v16, %v350_v18  ;;  %v506_v34 = vld [vmem:[%s20675_s0 + $0xa8] sm:$0xff]  ;;  %v18228_v5 = vld [vmem:[%s20675_s0 + $0xbe] sm:$0xff] }
  0xb0   :  { %v706_v63 = vmul.f32 %v17637_v40, %v296_v4  ;;  %v247_v11 = vmul.f32 %v17429_v27, %v18190_v3  ;;  %v326_v39 = vmul.f32 %v17433_v28, %v18195_v30  ;;  %v672_v61 = vadd.f32 %v647_v29, %v616_v31  ;;  %v219_v32 = vld [vmem:[%s20675_s0 + $0xc2] sm:$0xff] }
  0xb1   :  { %v763_v16 = vmul.f32 %v17682_v14, %v375_v62  ;;  %v482_v4 = vadd.f32 %v457_v9, %v426_v54  ;;  %v615_v58 = vadd.f32 %v590_v7, %v558_v38  ;;  %v646_v18 = vmul.f32 %v17597_v57, %v18157_v25  ;;  %v18239_v29 = vld [vmem:[%s20675_s0 + $0xc6] sm:$0xff] }
  0xb2   :  { %v248_v12 = vmul.f32 %v17429_v27, %v219_v32  ;;  %v327_v31 = vmul.f32 %v17433_v28, %v18207_v15  ;;  %v814_v62 = vmul.f32 %v17745_v42, %v785_v53  ;;  %v428_v54 = vadd.f32 %v403_v10, %v349_v44 }
  0xb3   :  { %v536_v9 = vmul.f32 %v17517_v60, %v507_v22  ;;  %v535_v38 = vmul.f32 %v17517_v60, %v506_v34  ;;  %v705_v19 = vmul.f32 %v17637_v40, %v295_v56  ;;  %v351_v27 = vadd.f32 %v326_v39, %v247_v11  ;;  %v509_v56 = vld [vmem:[%s20675_s0 + $0xc0] sm:$0xff]  ;;  %v18264_v11 = vld [vmem:[%s20675_s0 + $0xce] sm:$0xff] }
  0xb4   :  { %v405_v28 = vmul.f32 %v17455_v35, %v18228_v5  ;;  %v459_v53 = vmul.f32 %v17490_v48, %v18228_v5  ;;  %v20760_v44 = vmax.f32 %v17796_v13, 0.0  ;;  %v731_v22 = vadd.f32 %v706_v63, %v672_v61 }
  0xb5   :  { %v762_v34 = vmul.f32 %v17682_v14, %v374_v51  ;;  %v406_v17 = vmul.f32 %v17455_v35, %v18239_v29  ;;  %v20762_v13 = vmax.f32 %v17799_v46, 0.0  ;;  %v352_v63 = vadd.f32 %v327_v31, %v248_v12  ;;  %v508_v35 = vld [vmem:[%s20675_s0 + $0xb8] sm:$0xff] }
  0xb6   :  { %v460_v51 = vmul.f32 %v17490_v48, %v18239_v29  ;;  %v561_v61 = vadd.f32 %v536_v9, %v482_v4  ;;  %v560_v49 = vadd.f32 %v535_v38, %v481_v0  ;;  %v592_v46 = vmul.f32 %v17562_v33, %v18157_v25 }
  0xb7   :  { %v430_v31 = vadd.f32 %v405_v28, %v351_v27  ;;  %v20764_v4 = vmax.f32 %v17845_v41, 0.0  ;;  %v18291_v0 = vadd.f32 %v17753_v47, %v814_v62  ;;  %v18293_v25 = vadd.f32 %v763_v16, %v731_v22  ;;  %v511_v16 = vld [vmem:[%s20675_s0 + $0xd0] sm:$0xff] }
  0xb8   :  { %v537_v38 = vmul.f32 %v17517_v60, %v508_v35  ;;  %v20766_v27 = vmax.f32 %v17870_v24, 0.0  ;;  %v617_v22 = vadd.f32 %v592_v46, %v560_v49  ;;  %v510_v24 = vld [vmem:[%s20675_s0 + $0xc8] sm:$0xff]  ;;  %v20768_v49 = vmax.f32 %v17873_v59, 0.0 }
  0xb9   :  { %v540_v46 = vmul.f32 %v17517_v60, %v511_v16  ;;  %v20770_v59 = vmax.f32 %v17915_v23, 0.0  ;;  %v512_v23 = vld [vmem:[%s20675_s0 + $0xd8] sm:$0xff] }
  0xbf   :  { %v18243_v7 = vpop.permute.xlu1 %891  ;;  %v18253_v20 = vpop.permute.xlu0 %881 }
  0xc0   :  { %20759 = vst [vmem:[#allocation38_spill] sm:$0xff] %v18243_v7  ;;  %v1006_v10 = vmul.f32 %v18243_v7, %v20760_v44  ;;  %20761 = vst [vmem:[#allocation39_spill] sm:$0xff] %v18253_v20  ;;  %v1004_v39 = vmul.f32 %v18253_v20, %v20762_v13  ;;  %v671_v44 = vadd.f32 %v646_v18, %v615_v58 }
  0xc1   :  { %v593_v7 = vmul.f32 %v17562_v33, %v18142_v52  ;;  %v484_v58 = vadd.f32 %v459_v53, %v428_v54  ;;  %v538_v18 = vmul.f32 %v17517_v60, %v509_v56  ;;  %v461_v13 = vmul.f32 %v17490_v48, %v18264_v11  ;;  %v18298_v54 = vld [vmem:[%s20675_s0 + $0xd6] sm:$0xff] }
  0xc2   :  { %1031 = vst.msk [vmem:[#allocation2 + $0x28] sm:$0xff] %vm132_vm0, %v1006_v10  ;;  %1029 = vst.msk [vmem:[#allocation2 + $0x18] sm:$0xff] %vm132_vm0, %v1004_v39  ;;  %v730_v28 = vadd.f32 %v705_v19, %v671_v44  ;;  %v485_v53 = vadd.f32 %v460_v51, %v429_v2  ;;  %v649_v10 = vmul.f32 %v17597_v57, %v219_v32 }
  0xc3   :  { %v18280_v12 = vpop.permute.xlu1 %896  ;;  %v18288_v52 = vpop.permute.xlu0 %886  ;;  %v618_v62 = vadd.f32 %v593_v7, %v561_v61  ;;  %v648_v56 = vmul.f32 %v17597_v57, %v18190_v3  ;;  %v431_v39 = vadd.f32 %v406_v17, %v352_v63  ;;  %v462_v19 = vmul.f32 %v17490_v48, %v18298_v54  ;;  %v568_v63 = vld [vmem:[%s20675_s0 + $0xd2] sm:$0xff]  ;;  %v567_v48 = vld [vmem:[%s20675_s0 + $0xca] sm:$0xff] }
  0xc4   :  { %20763 = vst [vmem:[#allocation40_spill] sm:$0xff] %v18280_v12  ;;  %v1007_v9 = vmul.f32 %v18280_v12, %v20764_v4  ;;  %20765 = vst [vmem:[#allocation41_spill] sm:$0xff] %v18288_v52  ;;  %v1005_v41 = vmul.f32 %v18288_v52, %v20766_v27  ;;  %v563_v44 = vadd.f32 %v538_v18, %v484_v58 }
  0xc5   :  { %v595_v51 = vmul.f32 %v17562_v33, %v219_v32  ;;  %v486_v7 = vadd.f32 %v461_v13, %v430_v31  ;;  %v562_v61 = vadd.f32 %v537_v38, %v18201_v1  ;;  %v594_v32 = vmul.f32 %v17562_v33, %v18190_v3 }
  0xc6   :  { %1032 = vst.msk [vmem:[#allocation2 + $0x30] sm:$0xff] %vm132_vm0, %v1007_v9  ;;  %1030 = vst.msk [vmem:[#allocation2 + $0x20] sm:$0xff] %vm132_vm0, %v1005_v41  ;;  %v708_v18 = vmul.f32 %v17637_v40, %v18207_v15  ;;  %v765_v31 = vmul.f32 %v17682_v14, %v18239_v29  ;;  %v539_v1 = vmul.f32 %v17517_v60, %v510_v24  ;;  %v20774_v24 = vmax.f32 %v18031_v43, 0.0 }
  0xc7   :  { %v18315_v2 = vpop.permute.xlu1 %906  ;;  %v18323_v17 = vpop.permute.xlu0 %901  ;;  %v787_v13 = vadd.f32 %v762_v34, %v730_v28  ;;  %v674_v4 = vadd.f32 %v649_v10, %v618_v62  ;;  %v673_v9 = vadd.f32 %v648_v56, %v617_v22  ;;  %v707_v3 = vmul.f32 %v17637_v40, %v18195_v30  ;;  %v681_v34 = vld [vmem:[%s20675_s0 + $0xd4] sm:$0xff]  ;;  %v680_v62 = vld [vmem:[%s20675_s0 + $0xcc] sm:$0xff] }
  0xc8   :  { %20767 = vst [vmem:[#allocation42_spill] sm:$0xff] %v18315_v2  ;;  %v1009_v35 = vmul.f32 %v18315_v2, %v20768_v49  ;;  %20769 = vst [vmem:[#allocation43_spill] sm:$0xff] %v18323_v17  ;;  %v1008_v58 = vmul.f32 %v18323_v17, %v20770_v59  ;;  %v487_v38 = vadd.f32 %v462_v19, %v431_v39  ;;  %v20772_v30 = vmax.f32 %v17973_v37, 0.0  ;;  %v624_v39 = vld [vmem:[%s20675_s0 + $0xe2] sm:$0xff] }
  0xc9   :  { %v620_v29 = vadd.f32 %v595_v51, %v563_v44  ;;  %v651_v27 = vmul.f32 %v17597_v57, %v568_v63  ;;  %v650_v41 = vmul.f32 %v17597_v57, %v567_v48  ;;  %v619_v16 = vadd.f32 %v594_v32, %v562_v61  ;;  %v569_v44 = vld [vmem:[%s20675_s0 + $0xda] sm:$0xff] }
  0xca   :  { %1034 = vst.msk [vmem:[#allocation2 + $0x40] sm:$0xff] %vm132_vm0, %v1009_v35  ;;  %1033 = vst.msk [vmem:[#allocation2 + $0x38] sm:$0xff] %vm132_vm0, %v1008_v58  ;;  %v565_v22 = vadd.f32 %v540_v46, %v486_v7  ;;  %v597_v56 = vmul.f32 %v17562_v33, %v568_v63  ;;  %v564_v19 = vadd.f32 %v539_v1, %v485_v53  ;;  %v1098_v7 = vld [vmem:[#allocation2 + $0x14] sm:$0xff]  ;;  %v20776_v58 = vmax.f32 %v18058_v55, 0.0  ;;  %v682_v55 = vld [vmem:[%s20675_s0 + $0xdc] sm:$0xff] }
  0xcb   :  { %v18350_v15 = vpop.permute.xlu1 %916  ;;  %v18360_v10 = vpop.permute.xlu0 %911  ;;  %v596_v51 = vmul.f32 %v17562_v33, %v567_v48  ;;  %v541_v49 = vmul.f32 %v17517_v60, %v512_v23  ;;  %v733_v63 = vadd.f32 %v708_v18, %v674_v4  ;;  %v732_v61 = vadd.f32 %v707_v3, %v673_v9  ;;  %v683_v9 = vld [vmem:[%s20675_s0 + $0xe4] sm:$0xff] }
  0xcc   :  { %20771 = vst [vmem:[#allocation44_spill] sm:$0xff] %v18350_v15  ;;  %v1011_v28 = vmul.f32 %v18350_v15, %v20772_v30  ;;  %20773 = vst [vmem:[#allocation45_spill] sm:$0xff] %v18360_v10  ;;  %v1010_v37 = vmul.f32 %v18360_v10, %v20774_v24  ;;  %v764_v43 = vmul.f32 %v17682_v14, %v18228_v5  ;;  %v20778_v23 = vmax.f32 %v18091_v45, 0.0 }
  0xcd   :  { %v1099_v35 = vld [vmem:[#allocation2 + $0x1c] sm:$0xff]  ;;  %v710_v32 = vmul.f32 %v17637_v40, %v681_v34  ;;  %v676_v59 = vadd.f32 %v651_v27, %v620_v29  ;;  %v709_v48 = vmul.f32 %v17637_v40, %v680_v62  ;;  %v653_v60 = vmul.f32 %v17597_v57, %v624_v39  ;;  %v1100_v24 = vld [vmem:[#allocation2 + $0x24] sm:$0xff] }
  0xce   :  { %1036 = vst.msk [vmem:[#allocation2 + $0x50] sm:$0xff] %vm132_vm0, %v1011_v28  ;;  %1035 = vst.msk [vmem:[#allocation2 + $0x48] sm:$0xff] %vm132_vm0, %v1010_v37  ;;  %v1122_v46 = vpack.c.bf16 %v1099_v35, %v1098_v7  ;;  %v675_v4 = vadd.f32 %v650_v41, %v619_v16  ;;  %v622_v5 = vadd.f32 %v597_v56, %v565_v22  ;;  %v20779_v30 = vmov 0.0   ;;  %v1101_v37 = vld [vmem:[#allocation2 + $0x2c] sm:$0xff] }
  0xcf   :  { %v18382_v53 = vpop.permute.xlu1 %926  ;;  %v18389_v1 = vpop.permute.xlu0 %921  ;;  %v652_v3 = vmul.f32 %v17597_v57, %v569_v44  ;;  %v621_v27 = vadd.f32 %v596_v51, %v564_v19  ;;  %v566_v34 = vadd.f32 %v541_v49, %v487_v38  ;;  %v598_v41 = vmul.f32 %v17562_v33, %v569_v44  ;;  %v625_v38 = vld [vmem:[%s20675_s0 + $0xea] sm:$0xff] }
  0xd0   :  { %20775 = vst [vmem:[#allocation46_spill] sm:$0xff] %v18382_v53  ;;  %v1013_v18 = vmul.f32 %v18382_v53, %v20776_v58  ;;  %20777 = vst [vmem:[#allocation47_spill] sm:$0xff] %v18389_v1  ;;  %v1012_v29 = vmul.f32 %v18389_v1, %v20778_v23  ;;  %14591 = vmatmul.mubr.msk.bf16.gmra.mrb[4].mxu0 %vm132_vm0, %v1122_v46  ;;  %v817_v45 = vmul.f32 %v17745_v42, %v18293_v25  ;;  %v740_v51 = vld [vmem:[%s20675_s0 + $0xe6] sm:$0xff] }
  0xd1   :  { %14594 = vmatprep.mubr.msk.bf16.mxu0 %vm17204_vm1, %v20779_v30  ;;  %v816_v28 = vmul.f32 %v17745_v42, %v787_v13  ;;  %v790_v16 = vadd.f32 %v765_v31, %v733_v63  ;;  %v767_v62 = vmul.f32 %v17682_v14, %v18298_v54  ;;  %v789_v22 = vadd.f32 %v764_v43, %v732_v61 }
  0xd2   :  { %1038 = vst.msk [vmem:[#allocation2 + $0x60] sm:$0xff] %vm132_vm0, %v1013_v18  ;;  %1037 = vst.msk [vmem:[#allocation2 + $0x58] sm:$0xff] %vm132_vm0, %v1012_v29  ;;  %v735_v56 = vadd.f32 %v710_v32, %v676_v59  ;;  %v766_v39 = vmul.f32 %v17682_v14, %v18264_v11  ;;  %v712_v25 = vmul.f32 %v17637_v40, %v683_v9  ;;  %v20781_v31 = vmax.f32 %v18114_v8, 0.0  ;;  %v739_v8 = vld [vmem:[%s20675_s0 + $0xde] sm:$0xff]  ;;  %v684_v59 = vld [vmem:[%s20675_s0 + $0xec] sm:$0xff] }
  0xd3   :  { %v18415_v33 = vpop.permute.xlu1 %936  ;;  %v18423_v54 = vpop.permute.xlu0 %931  ;;  %v734_v19 = vadd.f32 %v709_v48, %v675_v4  ;;  %v678_v44 = vadd.f32 %v653_v60, %v622_v5  ;;  %v711_v49 = vmul.f32 %v17637_v40, %v682_v55  ;;  %v20783_v11 = vmax.f32 %v18121_v6, 0.0 }
  0xd4   :  { %20780 = vst [vmem:[#allocation48_spill] sm:$0xff] %v18415_v33  ;;  %v1015_v13 = vmul.f32 %v18415_v33, %v20781_v31  ;;  %20782 = vst [vmem:[#allocation49_spill] sm:$0xff] %v18423_v54  ;;  %v677_v35 = vadd.f32 %v652_v3, %v621_v27  ;;  %v623_v63 = vadd.f32 %v598_v41, %v566_v34  ;;  %v868_v43 = vmax.f32 %v18291_v0, 0.0 }
  0xd5   :  { %v1014_v7 = vmul.f32 %v18423_v54, %v20783_v11  ;;  %v654_v61 = vmul.f32 %v17597_v57, %v625_v38  ;;  %v846_v32 = vadd.f32 %v17753_v47, %v817_v45  ;;  %v845_v46 = vadd.f32 %v17753_v47, %v816_v28 }
  0xd6   :  { %1040 = vst.msk [vmem:[#allocation2 + $0x70] sm:$0xff] %vm132_vm0, %v1015_v13  ;;  %v819_v6 = vmul.f32 %v17745_v42, %v790_v16  ;;  %v1123_v60 = vpack.c.bf16 %v1101_v37, %v1100_v24  ;;  %v818_v57 = vmul.f32 %v17745_v42, %v789_v22  ;;  %v792_v58 = vadd.f32 %v767_v62, %v735_v56  ;;  %v1102_v56 = vld [vmem:[#allocation2 + $0x34] sm:$0xff] }
  0xd7   :  { %1039 = vst.msk [vmem:[#allocation2 + $0x68] sm:$0xff] %vm132_vm0, %v1014_v7  ;;  %v18445_v48 = vpop.permute.xlu1 %946  ;;  %v769_v0 = vmul.f32 %v17682_v14, %v740_v51  ;;  %v20785_v18 = vmax.f32 %v18166_v26, 0.0  ;;  %v18452_v5 = vpop.permute.xlu0 %941  ;;  %v791_v9 = vadd.f32 %v766_v39, %v734_v19  ;;  %v737_v3 = vadd.f32 %v712_v25, %v678_v44  ;;  %v741_v26 = vld [vmem:[%s20675_s0 + $0xee] sm:$0xff]  ;;  %v1103_v39 = vld [vmem:[#allocation2 + $0x3c] sm:$0xff] }
  0xd8   :  { %20784 = vst [vmem:[#allocation50_spill] sm:$0xff] %v18445_v48  ;;  %20786 = vst [vmem:[#allocation51_spill] sm:$0xff] %v18452_v5  ;;  %v768_v23 = vmul.f32 %v17682_v14, %v739_v8  ;;  %v20787_v29 = vmax.f32 %v18169_v50, 0.0  ;;  %14595 = vmatmul.mubr.msk.bf16.gmra.mrb[8].mxu0 %vm132_vm0, %v1123_v60  ;;  %v736_v55 = vadd.f32 %v711_v49, %v677_v35  ;;  %v871_v45 = vmax.f32 %v846_v32, 0.0 }
  0xd9   :  { %v1017_v4 = vmul.f32 %v18445_v48, %v20785_v18  ;;  %v679_v34 = vadd.f32 %v654_v61, %v623_v63  ;;  %v713_v41 = vmul.f32 %v17637_v40, %v684_v59  ;;  %14598 = vmatprep.mubr.msk.bf16.mxu0 %vm17204_vm1, %v20779_v30  ;;  %v870_v28 = vmax.f32 %v845_v46, 0.0 }
  0xda   :  { %v1016_v27 = vmul.f32 %v18452_v5, %v20787_v29  ;;  %v848_v16 = vadd.f32 %v17753_v47, %v819_v6  ;;  %v847_v62 = vadd.f32 %v17753_v47, %v818_v57  ;;  %v20789_v40 = vmax.f32 %v18182_v21, 0.0  ;;  %v1104_v57 = vld [vmem:[#allocation2 + $0x44] sm:$0xff] }
  0xdb   :  { %1042 = vst.msk [vmem:[#allocation2 + $0x80] sm:$0xff] %vm132_vm0, %v1017_v4  ;;  %v18467_v50 = vpop.permute.xlu1 %956  ;;  %v18474_v22 = vpop.permute.xlu0 %951  ;;  %v821_v25 = vmul.f32 %v17745_v42, %v792_v58  ;;  %v820_v31 = vmul.f32 %v17745_v42, %v791_v9  ;;  %v794_v13 = vadd.f32 %v769_v0, %v737_v3  ;;  %v793_v37 = vadd.f32 %v768_v23, %v736_v55  ;;  %v1105_v58 = vld [vmem:[#allocation2 + $0x4c] sm:$0xff] }
  0xdc   :  { %1041 = vst.msk [vmem:[#allocation2 + $0x78] sm:$0xff] %vm132_vm0, %v1016_v27  ;;  %20788 = vst [vmem:[#allocation52_spill] sm:$0xff] %v18467_v50  ;;  %v1019_v38 = vmul.f32 %v18467_v50, %v20789_v40  ;;  %v1018_v24 = vmul.f32 %v18474_v22, %v868_v43  ;;  %v738_v19 = vadd.f32 %v713_v41, %v679_v34  ;;  %v873_v49 = vmax.f32 %v848_v16, 0.0  ;;  %v18527_v40 = vld [vmem:[#allocation2 + $0x5c] sm:$0xff] }
  0xdd   :  { %20790 = vst [vmem:[#allocation53_spill] sm:$0xff] %v18474_v22  ;;  %v770_v44 = vmul.f32 %v17682_v14, %v741_v26  ;;  %v1124_v51 = vpack.c.bf16 %v1103_v39, %v1102_v56  ;;  %v872_v35 = vmax.f32 %v847_v62, 0.0  ;;  %v850_v8 = vadd.f32 %v17753_v47, %v821_v25  ;;  %v18525_v62 = vld [vmem:[#allocation2 + $0x54] sm:$0xff]  ;;  %v18756_v50 = vld [vmem:[#allocation2 + $0x5e] sm:$0xff] }
  0xde   :  { %1044 = vst.msk [vmem:[#allocation2 + $0x90] sm:$0xff] %vm132_vm0, %v1019_v38  ;;  %1043 = vst.msk [vmem:[#allocation2 + $0x88] sm:$0xff] %vm132_vm0, %v1018_v24  ;;  %v823_v63 = vmul.f32 %v17745_v42, %v794_v13  ;;  %v849_v14 = vadd.f32 %v17753_v47, %v820_v31  ;;  %v822_v43 = vmul.f32 %v17745_v42, %v793_v37  ;;  %v18541_v31 = vld [vmem:[#allocation2 + $0x64] sm:$0xff]  ;;  %v18543_v13 = vld [vmem:[#allocation2 + $0x6c] sm:$0xff] }
  0xdf   :  { %v18482_v21 = vpop.permute.xlu1 %966  ;;  %v18485_v7 = vpop.permute.xlu0 %961  ;;  %v795_v32 = vadd.f32 %v770_v44, %v738_v19  ;;  %v875_v60 = vmax.f32 %v850_v8, 0.0  ;;  %v1125_v29 = vpack.c.bf16 %v1105_v58, %v1104_v57  ;;  %v1126_v56 = vpack.c.bf16 %v18527_v40, %v18525_v62  ;;  %v18763_v48 = vld [vmem:[#allocation2 + $0x66] sm:$0xff]  ;;  %v18765_v5 = vld [vmem:[#allocation2 + $0x6e] sm:$0xff] }
  0xe0   :  { %20791 = vst [vmem:[#allocation54_spill] sm:$0xff] %v18482_v21  ;;  %v1021_v11 = vmul.f32 %v18482_v21, %v871_v45  ;;  %20792 = vst [vmem:[#allocation55_spill] sm:$0xff] %v18485_v7  ;;  %v1020_v61 = vmul.f32 %v18485_v7, %v870_v28  ;;  %14599 = vmatmul.mubr.msk.bf16.gmra.mrb[12].mxu0 %vm132_vm0, %v1124_v51  ;;  %v852_v0 = vadd.f32 %v17753_v47, %v823_v63  ;;  %v18754_v7 = vld [vmem:[#allocation2 + $0x56] sm:$0xff] }
  0xe1   :  { %14602 = vmatprep.mubr.msk.bf16.mxu0 %vm17204_vm1, %v20779_v30  ;;  %v874_v4 = vmax.f32 %v849_v14, 0.0  ;;  %v851_v9 = vadd.f32 %v17753_v47, %v822_v43  ;;  %v824_v3 = vmul.f32 %v17745_v42, %v795_v32  ;;  %v1127_v24 = vpack.c.bf16 %v18543_v13, %v18541_v31 }
  0xe2   :  { %1046 = vst.msk [vmem:[#allocation2 + $0xa0] sm:$0xff] %vm132_vm0, %v1021_v11  ;;  %1045 = vst.msk [vmem:[#allocation2 + $0x98] sm:$0xff] %vm132_vm0, %v1020_v61  ;;  %v877_v34 = vmax.f32 %v852_v0, 0.0  ;;  %v1054_v0 = vld [vmem:[#allocation2 + $0x2] sm:$0xff]  ;;  %v1542_v22 = vpack.c.bf16 %v18756_v50, %v18754_v7  ;;  %v1543_v33 = vpack.c.bf16 %v18765_v5, %v18763_v48 }
  0xe3   :  { %v18497_v46 = vpop.permute.xlu1 %976  ;;  %v18500_v59 = vpop.permute.xlu0 %971  ;;  %v876_v26 = vmax.f32 %v851_v9, 0.0  ;;  %v853_v45 = vadd.f32 %v17753_v47, %v824_v3  ;;  %v18550_v37 = vld [vmem:[#allocation2 + $0x74] sm:$0xff]  ;;  %v18552_v19 = vld [vmem:[#allocation2 + $0x7c] sm:$0xff]  ;;  %v17067_v3 = vld [vmem:[%s20677_s2 + $0x28] sm:$0xff]  }
  0xe4   :  { %20793 = vst [vmem:[#allocation56_spill] sm:$0xff] %v18497_v46  ;;  %v1023_v6 = vmul.f32 %v18497_v46, %v873_v49  ;;  %20794 = vst [vmem:[#allocation57_spill] sm:$0xff] %v18500_v59  ;;  %v1022_v18 = vmul.f32 %v18500_v59, %v872_v35  ;;  %v1128_v44 = vpack.c.bf16 %v18552_v19, %v18550_v37  ;;  %v17066_v9 = vld [vmem:[%s20677_s2 + $0x20] sm:$0xff]   ;;  %v1514_v46 = vld [vmem:[#allocation2 + $0x16] sm:$0xff] }
  0xe5   :  { %v878_v47 = vmax.f32 %v853_v45, 0.0  ;;  %v18559_v51 = vld [vmem:[#allocation2 + $0x84] sm:$0xff]  ;;  %v18561_v49 = vld [vmem:[#allocation2 + $0x8c] sm:$0xff]  ;;  %v18736_v59 = vld [vmem:[#allocation2 + $0x36] sm:$0xff] }
  0xe6   :  { %1048 = vst.msk [vmem:[#allocation2 + $0xb0] sm:$0xff] %vm132_vm0, %v1023_v6  ;;  %1047 = vst.msk [vmem:[#allocation2 + $0xa8] sm:$0xff] %vm132_vm0, %v1022_v18  ;;  %v1129_v11 = vpack.c.bf16 %v18561_v49, %v18559_v51  ;;  %v1055_v18 = vld [vmem:[#allocation2 + $0xa] sm:$0xff]  ;;  %v18772_v54 = vld [vmem:[#allocation2 + $0x76] sm:$0xff] }
  0xe7   :  { %v18508_v23 = vpop.permute.xlu1 %986  ;;  %v18511_v55 = vpop.permute.xlu0 %981  ;;  %v18774_v53 = vld [vmem:[#allocation2 + $0x7e] sm:$0xff]  ;;  %v18781_v15 = vld [vmem:[#allocation2 + $0x86] sm:$0xff]  ;;  %v18783_v10 = vld [vmem:[#allocation2 + $0x8e] sm:$0xff] }
  0xe8   :  { %20795 = vst [vmem:[#allocation58_spill] sm:$0xff] %v18508_v23  ;;  %v1025_v27 = vmul.f32 %v18508_v23, %v875_v60  ;;  %20796 = vst [vmem:[#allocation59_spill] sm:$0xff] %v18511_v55  ;;  %v1024_v41 = vmul.f32 %v18511_v55, %v874_v4  ;;  %14603 = vmatmul.mubr.msk.bf16.gmra.mrb[16].mxu0 %vm132_vm0, %v1125_v29  ;;  %v1079_v4 = vpack.c.bf16 %v1055_v18, %v1054_v0  ;;  %v18612_v29 = vld [vmem:[#allocation2 + $0x1a] sm:$0xff]  ;;  %v18664_v0 = vld [vmem:[#allocation2 + $0x72] sm:$0xff] }
  0xe9   :  { %14606 = vmatprep.mubr.msk.bf16.mxu0 %vm17204_vm1, %v20779_v30  ;;  %v18568_v35 = vld [vmem:[#allocation2 + $0x94] sm:$0xff]  ;;  %v18570_v8 = vld [vmem:[#allocation2 + $0x9c] sm:$0xff]  ;;  %20800 = vst [vmem:[#allocation63_spill] sm:$0xff] %v18774_v53  ;;  %v1544_v1 = vpack.c.bf16 %v18774_v53, %v18772_v54  ;;  %20801 = vst [vmem:[#allocation64_spill] sm:$0xff] %v18781_v15  ;;  %v1545_v2 = vpack.c.bf16 %v18783_v10, %v18781_v15 }
  0xea   :  { %1050 = vst.msk [vmem:[#allocation2 + $0xc0] sm:$0xff] %vm132_vm0, %v1025_v27  ;;  %1049 = vst.msk [vmem:[#allocation2 + $0xb8] sm:$0xff] %vm132_vm0, %v1024_v41  ;;  %v1130_v63 = vpack.c.bf16 %v18570_v8, %v18568_v35  ;;  %v1056_v27 = vld [vmem:[#allocation2 + $0x12] sm:$0xff]  ;;  %v18619_v41 = vld [vmem:[#allocation2 + $0x22] sm:$0xff] }
  0xeb   :  { %v18520_v42 = vpop.permute.xlu1 %996  ;;  %v18523_v16 = vpop.permute.xlu0 %991  ;;  %v18666_v18 = vld [vmem:[#allocation2 + $0x7a] sm:$0xff]  ;;  %20802 = vst [vmem:[#allocation65_spill] sm:$0xff] %v18783_v10 }
  0xec   :  { %20797 = vst [vmem:[#allocation60_spill] sm:$0xff] %v18520_v42  ;;  %v1027_v28 = vmul.f32 %v18520_v42, %v877_v34  ;;  %20798 = vst [vmem:[#allocation61_spill] sm:$0xff] %v18523_v16  ;;  %v1026_v38 = vmul.f32 %v18523_v16, %v876_v26  ;;  %v1080_v34 = vpack.c.bf16 %v18612_v29, %v1056_v27  ;;  %v18621_v26 = vld [vmem:[#allocation2 + $0x2a] sm:$0xff]  ;;  %v1515_v55 = vld [vmem:[#allocation2 + $0x1e] sm:$0xff] }
  0xed   :  { %v18577_v61 = vld [vmem:[#allocation2 + $0xa4] sm:$0xff]  ;;  %v18579_v14 = vld [vmem:[#allocation2 + $0xac] sm:$0xff]  ;;  %v1081_v45 = vpack.c.bf16 %v18621_v26, %v18619_v41  ;;  %v18790_v17 = vld [vmem:[#allocation2 + $0x96] sm:$0xff] }
  0xee   :  { %1052 = vst.msk [vmem:[#allocation2 + $0xd0] sm:$0xff] %vm132_vm0, %v1027_v28  ;;  %1051 = vst.msk [vmem:[#allocation2 + $0xc8] sm:$0xff] %vm132_vm0, %v1026_v38  ;;  %v1131_v43 = vpack.c.bf16 %v18579_v14, %v18577_v61  ;;  %v18628_v28 = vld [vmem:[#allocation2 + $0x32] sm:$0xff]  ;;  %v18630_v38 = vld [vmem:[#allocation2 + $0x3a] sm:$0xff] }
  0xef   :  { %v18534_v39 = vpop.permute.xlu0 %1001  ;;  %v1512_v42 = vld [vmem:[#allocation2 + $0x6] sm:$0xff]  ;;  %v1513_v16 = vld [vmem:[#allocation2 + $0xe] sm:$0xff]  ;;  %20803 = vst [vmem:[#allocation66_spill] sm:$0xff] %v18790_v17  ;;  %v18792_v12 = vld [vmem:[#allocation2 + $0x9e] sm:$0xff] }
  0xf0   :  { %20799 = vst [vmem:[#allocation62_spill] sm:$0xff] %v18534_v39  ;;  %v1028_v25 = vmul.f32 %v18534_v39, %v878_v47  ;;  %14607 = vmatmul.mubr.msk.bf16.gmra.mrb[20].mxu0 %vm132_vm0, %v1126_v56  ;;  %v1082_v47 = vpack.c.bf16 %v18630_v38, %v18628_v28  ;;  %v18637_v56 = vld [vmem:[#allocation2 + $0x42] sm:$0xff]  ;;  %v1537_v23 = vpack.c.bf16 %v1513_v16, %v1512_v42  ;;  %v18730_v16 = vld [vmem:[#allocation2 + $0x2e] sm:$0xff]  ;;  %20804 = vst [vmem:[#allocation67_spill] sm:$0xff] %v18792_v12 }
  0xf1   :  { %14610 = vmatprep.mubr.msk.bf16.mxu0 %vm17204_vm1, %v20779_v30  ;;  %v18586_v32 = vld [vmem:[#allocation2 + $0xb4] sm:$0xff]  ;;  %v18588_v6 = vld [vmem:[#allocation2 + $0xbc] sm:$0xff]  ;;  %v1538_v42 = vpack.c.bf16 %v1515_v55, %v1514_v46  ;;  %v1546_v52 = vpack.c.bf16 %v18792_v12, %v18790_v17  ;;  %v18799_v20 = vld [vmem:[#allocation2 + $0xa6] sm:$0xff] }
  0xf2   :  { %1053 = vst.msk [vmem:[#allocation2 + $0xd8] sm:$0xff] %vm132_vm0, %v1028_v25  ;;  %v1132_v60 = vpack.c.bf16 %v18588_v6, %v18586_v32  ;;  %v18639_v25 = vld [vmem:[#allocation2 + $0x4a] sm:$0xff]  ;;  %v18738_v46 = vld [vmem:[#allocation2 + $0x3e] sm:$0xff]  ;;  %20805 = vst [vmem:[#allocation68_spill] sm:$0xff] %v18799_v20 }
  0xf3   :  { %v1540_v55 = vpack.c.bf16 %v18738_v46, %v18736_v59  ;;  %v18801_v36 = vld [vmem:[#allocation2 + $0xae] sm:$0xff]  ;;  %v18808_v15 = vld [vmem:[#allocation2 + $0xb6] sm:$0xff]  ;;  %v18810_v12 = vld [vmem:[#allocation2 + $0xbe] sm:$0xff] }
  0xf4   :  { %20806 = vst [vmem:[#allocation69_spill] sm:$0xff] %v18801_v36  ;;  %v1547_v10 = vpack.c.bf16 %v18801_v36, %v18799_v20  ;;  %20807 = vst [vmem:[#allocation70_spill] sm:$0xff] %v18810_v12  ;;  %v1548_v17 = vpack.c.bf16 %v18810_v12, %v18808_v15  ;;  %v17070_v20 = vld [vmem:[%s20677_s2 + $0x40] sm:$0xff]   ;;  %v17071_v12 = vld [vmem:[%s20677_s2 + $0x48] sm:$0xff]  }
  0xf5   :  { %v18595_v57 = vld [vmem:[#allocation2 + $0xc4] sm:$0xff] }
  0xf6   :  { %v1133_v58 = vpack.c.bf16 %v18595_v57, %v18595_v57  ;;  %v18709_v39 = vld [vmem:[#allocation2 + $0xc2] sm:$0xff] }
  0xf7   :  { %v18817_v53 = vld [vmem:[#allocation2 + $0xc6] sm:$0xff] }
  0xf8   :  { %14611 = vmatmul.mubr.msk.bf16.gmra.mrb[24].mxu0 %vm132_vm0, %v1127_v24  ;;  %v1083_v24 = vpack.c.bf16 %v18639_v25, %v18637_v56  ;;  %v1549_v36 = vpack.c.bf16 %v18817_v53, %v18817_v53 }
  0xf9   :  { %14614 = vmatprep.mubr.msk.bf16.mxu0 %vm17204_vm1, %v20779_v30 }
 0x100   :  { %14615 = vmatmul.mubr.msk.bf16.gmra.mrb[28].mxu0 %vm132_vm0, %v1128_v44  ;;  %v18646_v44 = vld [vmem:[#allocation2 + $0x52] sm:$0xff] }
 0x101   :  { %14618 = vmatprep.mubr.msk.bf16.mxu0 %vm17204_vm1, %v20779_v30 }
 0x108   :  { %14619 = vmatmul.mubr.msk.bf16.gmra.mrb[32].mxu0 %vm132_vm0, %v1129_v11  ;;  %v18648_v11 = vld [vmem:[#allocation2 + $0x5a] sm:$0xff] }
 0x109   :  { %14622 = vmatprep.mubr.msk.bf16.mxu0 %vm17204_vm1, %v20779_v30 }
 0x110   :  { %14623 = vmatmul.mubr.msk.bf16.gmra.mrb[36].mxu0 %vm132_vm0, %v1130_v63  ;;  %v1084_v63 = vpack.c.bf16 %v18648_v11, %v18646_v44 }
 0x111   :  { %14626 = vmatprep.mubr.msk.bf16.mxu0 %vm17204_vm1, %v20779_v30 }
 0x118   :  { %14627 = vmatmul.mubr.msk.bf16.gmra.mrb[40].mxu0 %vm132_vm0, %v1131_v43  ;;  %v18655_v43 = vld [vmem:[#allocation2 + $0x62] sm:$0xff] }
 0x119   :  { %14630 = vmatprep.mubr.msk.bf16.mxu0 %vm17204_vm1, %v20779_v30 }
 0x120   :  { %14631 = vmatmul.mubr.msk.bf16.gmra.mrb[44].mxu0 %vm132_vm0, %v1132_v60  ;;  %v18657_v60 = vld [vmem:[#allocation2 + $0x6a] sm:$0xff] }
 0x121   :  { %14634 = vmatprep.mubr.msk.bf16.mxu0 %vm17204_vm1, %v20779_v30 }
 0x128   :  { %14635 = vmatmul.mubr.msk.bf16.gmra.mrb[48].mxu0 %vm132_vm0, %v1133_v58  ;;  %v1085_v58 = vpack.c.bf16 %v18657_v60, %v18655_v43 }
 0x129   :  { %14642 = vmatprep.mubr.msk.bf16.mxu0 %vm17204_vm1, %v20779_v30 }
 0x130   :  { %14643 = vmatmul.mubr.msk.bf16.vlgmr.msra.gmra.mrb[0].mxu0 %vm132_vm0, %v1079_v4  ;;  %v1086_v4 = vpack.c.bf16 %v18666_v18, %v18664_v0 }
 0x131   :  { %14695 = vmatpush3.bf16.msra.mxu0 %v17066_v9  ;;  %14646 = vmatprep.mubr.msk.bf16.mxu0 %vm17204_vm1, %v20779_v30  ;;  %v18673_v9 = vld [vmem:[#allocation2 + $0x82] sm:$0xff] }
 0x132   :  { %14696 = vmatprep.subr.bf16.mxu0 %v20779_v30 }
 0x135   :  { %14697 = vmatpush3.bf16.msra.mxu0 %v17067_v3  ;;  %v18675_v3 = vld [vmem:[#allocation2 + $0x8a] sm:$0xff] }
 0x136   :  { %14750 = vmatprep.subr.bf16.mxu0 %v20779_v30  ;;  %v1087_v27 = vpack.c.bf16 %v18675_v3, %v18673_v9 }
 0x138   :  { %14647 = vmatmul.mubr.msk.bf16.gmra.mrb[4].mxu0 %vm132_vm0, %v1080_v34  ;;  %v18682_v34 = vld [vmem:[#allocation2 + $0x92] sm:$0xff] }
 0x139   :  { %14650 = vmatprep.mubr.msk.bf16.mxu0 %vm17204_vm1, %v20779_v30 }
 0x140   :  { %14651 = vmatmul.mubr.msk.bf16.gmra.mrb[8].mxu0 %vm132_vm0, %v1081_v45  ;;  %v18684_v45 = vld [vmem:[#allocation2 + $0x9a] sm:$0xff] }
 0x141   :  { %14654 = vmatprep.mubr.msk.bf16.mxu0 %vm17204_vm1, %v20779_v30 }
 0x148   :  { %14655 = vmatmul.mubr.msk.bf16.gmra.mrb[12].mxu0 %vm132_vm0, %v1082_v47  ;;  %v1088_v47 = vpack.c.bf16 %v18684_v45, %v18682_v34 }
 0x149   :  { %14658 = vmatprep.mubr.msk.bf16.mxu0 %vm17204_vm1, %v20779_v30 }
 0x150   :  { %14659 = vmatmul.mubr.msk.bf16.gmra.mrb[16].mxu0 %vm132_vm0, %v1083_v24  ;;  %v18691_v24 = vld [vmem:[#allocation2 + $0xa2] sm:$0xff] }
 0x151   :  { %14662 = vmatprep.mubr.msk.bf16.mxu0 %vm17204_vm1, %v20779_v30 }
 0x158   :  { %14663 = vmatmul.mubr.msk.bf16.gmra.mrb[20].mxu0 %vm132_vm0, %v1084_v63  ;;  %v18693_v63 = vld [vmem:[#allocation2 + $0xaa] sm:$0xff] }
 0x159   :  { %14666 = vmatprep.mubr.msk.bf16.mxu0 %vm17204_vm1, %v20779_v30 }
 0x160   :  { %14667 = vmatmul.mubr.msk.bf16.gmra.mrb[24].mxu0 %vm132_vm0, %v1085_v58  ;;  %v1089_v58 = vpack.c.bf16 %v18693_v63, %v18691_v24 }
 0x161   :  { %14670 = vmatprep.mubr.msk.bf16.mxu0 %vm17204_vm1, %v20779_v30 }
 0x168   :  { %14671 = vmatmul.mubr.msk.bf16.gmra.mrb[28].mxu0 %vm132_vm0, %v1086_v4  ;;  %v18700_v4 = vld [vmem:[#allocation2 + $0xb2] sm:$0xff] }
 0x169   :  { %14674 = vmatprep.mubr.msk.bf16.mxu0 %vm17204_vm1, %v20779_v30 }
 0x170   :  { %14675 = vmatmul.mubr.msk.bf16.gmra.mrb[32].mxu0 %vm132_vm0, %v1087_v27  ;;  %v18702_v27 = vld [vmem:[#allocation2 + $0xba] sm:$0xff] }
 0x171   :  { %14678 = vmatprep.mubr.msk.bf16.mxu0 %vm17204_vm1, %v20779_v30 }
 0x178   :  { %14679 = vmatmul.mubr.msk.bf16.gmra.mrb[36].mxu0 %vm132_vm0, %v1088_v47  ;;  %v1090_v47 = vpack.c.bf16 %v18702_v27, %v18700_v4 }
 0x179   :  { %14682 = vmatprep.mubr.msk.bf16.mxu0 %vm17204_vm1, %v20779_v30 }
 0x180   :  { %14683 = vmatmul.mubr.msk.bf16.gmra.mrb[40].mxu0 %vm132_vm0, %v1089_v58  ;;  %v1091_v58 = vpack.c.bf16 %v18709_v39, %v18709_v39 }
 0x181   :  { %14686 = vmatprep.mubr.msk.bf16.mxu0 %vm17204_vm1, %v20779_v30 }
 0x188   :  { %14687 = vmatmul.mubr.msk.bf16.gmra.mrb[44].mxu0 %vm132_vm0, %v1090_v47  ;;  %v17068_v47 = vld [vmem:[%s20677_s2 + $0x30] sm:$0xff]  }
 0x189   :  { %14690 = vmatprep.mubr.msk.bf16.mxu0 %vm17204_vm1, %v20779_v30 }
 0x190   :  { %14691 = vmatmul.mubr.msk.bf16.gmra.mrb[48].mxu0 %vm132_vm0, %v1091_v58  ;;  %v17069_v58 = vld [vmem:[%s20677_s2 + $0x38] sm:$0xff]  }
 0x191   :  { %14698 = vmatprep.mubr.msk.bf16.mxu0 %vm17204_vm1, %v20779_v30 }
 0x198   :  { %14699 = vmatmul.mubr.msk.bf16.vlgmr.msra.gmra.mrb[0].mxu0 %vm132_vm0, %v1537_v23  ;;  %v1516_v23 = vld [vmem:[#allocation2 + $0x26] sm:$0xff] }
 0x199   :  { %14751 = vmatpush3.bf16.msra.mxu0 %v17068_v47  ;;  %14702 = vmatprep.mubr.msk.bf16.mxu0 %vm17204_vm1, %v20779_v30  ;;  %v1539_v47 = vpack.c.bf16 %v18730_v16, %v1516_v23  ;;  %v18747_v23 = vld [vmem:[#allocation2 + $0x4e] sm:$0xff] }
 0x19a   :  { %14752 = vmatprep.subr.bf16.mxu0 %v20779_v30 }
 0x19d   :  { %14753 = vmatpush3.bf16.msra.mxu0 %v17069_v58  ;;  %v18745_v58 = vld [vmem:[#allocation2 + $0x46] sm:$0xff] }
 0x19e   :  { %14806 = vmatprep.subr.bf16.mxu0 %v20779_v30  ;;  %v1541_v21 = vpack.c.bf16 %v18747_v23, %v18745_v58 }
 0x1a0   :  { %14703 = vmatmul.mubr.msk.bf16.gmra.mrb[4].mxu0 %vm132_vm0, %v1538_v42 }
 0x1a1   :  { %14706 = vmatprep.mubr.msk.bf16.mxu0 %vm17204_vm1, %v20779_v30 }
 0x1a8   :  { %14707 = vmatmul.mubr.msk.bf16.gmra.mrb[8].mxu0 %vm132_vm0, %v1539_v47 }
 0x1a9   :  { %14710 = vmatprep.mubr.msk.bf16.mxu0 %vm17204_vm1, %v20779_v30 }
 0x1b0   :  { %14711 = vmatmul.mubr.msk.bf16.gmra.mrb[12].mxu0 %vm132_vm0, %v1540_v55 }
 0x1b1   :  { %14714 = vmatprep.mubr.msk.bf16.mxu0 %vm17204_vm1, %v20779_v30 }
 0x1b8   :  { %14715 = vmatmul.mubr.msk.bf16.gmra.mrb[16].mxu0 %vm132_vm0, %v1541_v21 }
 0x1b9   :  { %14718 = vmatprep.mubr.msk.bf16.mxu0 %vm17204_vm1, %v20779_v30 }
 0x1c0   :  { %14719 = vmatmul.mubr.msk.bf16.gmra.mrb[20].mxu0 %vm132_vm0, %v1542_v22 }
 0x1c1   :  { %14722 = vmatprep.mubr.msk.bf16.mxu0 %vm17204_vm1, %v20779_v30 }
 0x1c8   :  { %14723 = vmatmul.mubr.msk.bf16.gmra.mrb[24].mxu0 %vm132_vm0, %v1543_v33 }
 0x1c9   :  { %14726 = vmatprep.mubr.msk.bf16.mxu0 %vm17204_vm1, %v20779_v30 }
 0x1d0   :  { %14727 = vmatmul.mubr.msk.bf16.gmra.mrb[28].mxu0 %vm132_vm0, %v1544_v1 }
 0x1d1   :  { %14730 = vmatprep.mubr.msk.bf16.mxu0 %vm17204_vm1, %v20779_v30 }
 0x1d8   :  { %14731 = vmatmul.mubr.msk.bf16.gmra.mrb[32].mxu0 %vm132_vm0, %v1545_v2 }
 0x1d9   :  { %14734 = vmatprep.mubr.msk.bf16.mxu0 %vm17204_vm1, %v20779_v30 }
 0x1e0   :  { %14735 = vmatmul.mubr.msk.bf16.gmra.mrb[36].mxu0 %vm132_vm0, %v1546_v52 }
 0x1e1   :  { %14738 = vmatprep.mubr.msk.bf16.mxu0 %vm17204_vm1, %v20779_v30 }
 0x1e8   :  { %14739 = vmatmul.mubr.msk.bf16.gmra.mrb[40].mxu0 %vm132_vm0, %v1547_v10 }
 0x1e9   :  { %14742 = vmatprep.mubr.msk.bf16.mxu0 %vm17204_vm1, %v20779_v30 }
 0x1f0   :  { %14743 = vmatmul.mubr.msk.bf16.gmra.mrb[44].mxu0 %vm132_vm0, %v1548_v17 }
 0x1f1   :  { %14746 = vmatprep.mubr.msk.bf16.mxu0 %vm17204_vm1, %v20779_v30 }
 0x1f8   :  { %14747 = vmatmul.mubr.msk.bf16.gmra.mrb[48].mxu0 %vm132_vm0, %v1549_v36 }
 0x1f9   :  { %14754 = vmatprep.mubr.msk.bf16.mxu0 %vm17204_vm1, %v20779_v30 }
 0x200   :  { %14755 = vmatmul.mubr.msk.bf16.vlgmr.msra.gmra.mrb[0].mxu0 %vm132_vm0, %v1538_v42 }
 0x201   :  { %14807 = vmatpush3.bf16.msra.mxu0 %v17070_v20  ;;  %14758 = vmatprep.mubr.msk.bf16.mxu0 %vm17204_vm1, %v20779_v30  ;;  %v18865_v20 = vld [vmem:[#allocation2 + $0xce] sm:$0xff] }
 0x202   :  { %14808 = vmatprep.subr.bf16.mxu0 %v20779_v30  ;;  %v1802_v36 = vpack.c.bf16 %v18865_v20, %v18817_v53 }
 0x205   :  { %14809 = vmatpush3.bf16.msra.mxu0 %v17071_v12  ;;  %v18872_v12 = vld [vmem:[#allocation2 + $0xd6] sm:$0xff] }
 0x206   :  { %14862 = vmatprep.subr.bf16.mxu0 %v20779_v30 }
 0x208   :  { %14759 = vmatmul.mubr.msk.bf16.gmra.mrb[4].mxu0 %vm132_vm0, %v1539_v47  ;;  %v2024_v47 = vld [vmem:[#allocation2 + $0x38] sm:$0xff] }
 0x209   :  { %14762 = vmatprep.mubr.msk.bf16.mxu0 %vm17204_vm1, %v20779_v30 }
 0x210   :  { %14763 = vmatmul.mubr.msk.bf16.gmra.mrb[8].mxu0 %vm132_vm0, %v1540_v55  ;;  %v2025_v55 = vld [vmem:[#allocation2 + $0x40] sm:$0xff] }
 0x211   :  { %14766 = vmatprep.mubr.msk.bf16.mxu0 %vm17204_vm1, %v20779_v30 }
 0x218   :  { %14767 = vmatmul.mubr.msk.bf16.gmra.mrb[12].mxu0 %vm132_vm0, %v1541_v21  ;;  %v2023_v21 = vld [vmem:[#allocation2 + $0x30] sm:$0xff] }
 0x219   :  { %14770 = vmatprep.mubr.msk.bf16.mxu0 %vm17204_vm1, %v20779_v30 }
 0x220   :  { %14771 = vmatmul.mubr.msk.bf16.gmra.mrb[16].mxu0 %vm132_vm0, %v1542_v22  ;;  %v2022_v22 = vld [vmem:[#allocation2 + $0x28] sm:$0xff] }
 0x221   :  { %14774 = vmatprep.mubr.msk.bf16.mxu0 %vm17204_vm1, %v20779_v30  ;;  %v2046_v42 = vpack.c.bf16 %v2023_v21, %v2022_v22  ;;  %v2030_v22 = vld [vmem:[#allocation2 + $0x68] sm:$0xff]  ;;  %v2031_v21 = vld [vmem:[#allocation2 + $0x70] sm:$0xff] }
 0x228   :  { %14775 = vmatmul.mubr.msk.bf16.gmra.mrb[20].mxu0 %vm132_vm0, %v1543_v33  ;;  %v17073_v33 = vld [vmem:[%s20677_s2 + $0x58] sm:$0xff]  }
 0x229   :  { %14778 = vmatprep.mubr.msk.bf16.mxu0 %vm17204_vm1, %v20779_v30 }
 0x230   :  { %14779 = vmatmul.mubr.msk.bf16.gmra.mrb[24].mxu0 %vm132_vm0, %v1544_v1 }
 0x231   :  { %14782 = vmatprep.mubr.msk.bf16.mxu0 %vm17204_vm1, %v20779_v30 }
 0x238   :  { %14783 = vmatmul.mubr.msk.bf16.gmra.mrb[28].mxu0 %vm132_vm0, %v1545_v2  ;;  %v2021_v2 = vld [vmem:[#allocation2 + $0x20] sm:$0xff] }
 0x239   :  { %14786 = vmatprep.mubr.msk.bf16.mxu0 %vm17204_vm1, %v20779_v30 }
 0x240   :  { %14787 = vmatmul.mubr.msk.bf16.gmra.mrb[32].mxu0 %vm132_vm0, %v1546_v52  ;;  %v1803_v52 = vpack.c.bf16 %v18872_v12, %v18872_v12 }
 0x241   :  { %14790 = vmatprep.mubr.msk.bf16.mxu0 %vm17204_vm1, %v20779_v30 }
 0x248   :  { %14791 = vmatmul.mubr.msk.bf16.gmra.mrb[36].mxu0 %vm132_vm0, %v1547_v10  ;;  %v17072_v10 = vld [vmem:[%s20677_s2 + $0x50] sm:$0xff]  }
 0x249   :  { %14794 = vmatprep.mubr.msk.bf16.mxu0 %vm17204_vm1, %v20779_v30 }
 0x250   :  { %14795 = vmatmul.mubr.msk.bf16.gmra.mrb[40].mxu0 %vm132_vm0, %v1548_v17  ;;  %v2020_v17 = vld [vmem:[#allocation2 + $0x18] sm:$0xff] }
 0x251   :  { %14798 = vmatprep.mubr.msk.bf16.mxu0 %vm17204_vm1, %v20779_v30  ;;  %v2045_v1 = vpack.c.bf16 %v2021_v2, %v2020_v17  ;;  %v2027_v2 = vld [vmem:[#allocation2 + $0x50] sm:$0xff] }
 0x258   :  { %14799 = vmatmul.mubr.msk.bf16.gmra.mrb[44].mxu0 %vm132_vm0, %v1802_v36  ;;  %v2047_v36 = vpack.c.bf16 %v2025_v55, %v2024_v47  ;;  %v2032_v47 = vld [vmem:[#allocation2 + $0x78] sm:$0xff]  ;;  %v2033_v55 = vld [vmem:[#allocation2 + $0x80] sm:$0xff] }
 0x259   :  { %14802 = vmatprep.mubr.msk.bf16.mxu0 %vm17204_vm1, %v20779_v30 }
 0x260   :  { %14803 = vmatmul.mubr.msk.bf16.gmra.mrb[48].mxu0 %vm132_vm0, %v1803_v52  ;;  %v2026_v52 = vld [vmem:[#allocation2 + $0x48] sm:$0xff] }
 0x261   :  { %14810 = vmatprep.mubr.msk.bf16.mxu0 %vm17204_vm1, %v20779_v30  ;;  %v2048_v17 = vpack.c.bf16 %v2027_v2, %v2026_v52  ;;  %v2034_v52 = vld [vmem:[#allocation2 + $0x88] sm:$0xff]  ;;  %v2035_v2 = vld [vmem:[#allocation2 + $0x90] sm:$0xff] }
 0x268   :  { %14811 = vmatmul.mubr.msk.bf16.vlgmr.msra.gmra.mrb[0].mxu0 %vm132_vm0, %v2045_v1  ;;  %v2029_v1 = vld [vmem:[#allocation2 + $0x60] sm:$0xff] }
 0x269   :  { %14863 = vmatpush3.bf16.msra.mxu0 %v17072_v10  ;;  %14814 = vmatprep.mubr.msk.bf16.mxu0 %vm17204_vm1, %v20779_v30  ;;  %v2028_v10 = vld [vmem:[#allocation2 + $0x58] sm:$0xff] }
 0x26a   :  { %14864 = vmatprep.subr.bf16.mxu0 %v20779_v30 }
 0x26d   :  { %14865 = vmatpush3.bf16.msra.mxu0 %v17073_v33  ;;  %v2049_v33 = vpack.c.bf16 %v2029_v1, %v2028_v10  ;;  %v2036_v10 = vld [vmem:[#allocation2 + $0x98] sm:$0xff]  ;;  %v2037_v1 = vld [vmem:[#allocation2 + $0xa0] sm:$0xff] }
 0x26e   :  { %14918 = vmatprep.subr.bf16.mxu0 %v20779_v30 }
 0x270   :  { %14815 = vmatmul.mubr.msk.bf16.gmra.mrb[4].mxu0 %vm132_vm0, %v2046_v42  ;;  %v2050_v42 = vpack.c.bf16 %v2031_v21, %v2030_v22  ;;  %v2038_v22 = vld [vmem:[#allocation2 + $0xa8] sm:$0xff]  ;;  %v2039_v21 = vld [vmem:[#allocation2 + $0xb0] sm:$0xff] }
 0x271   :  { %14818 = vmatprep.mubr.msk.bf16.mxu0 %vm17204_vm1, %v20779_v30 }
 0x278   :  { %14819 = vmatmul.mubr.msk.bf16.gmra.mrb[8].mxu0 %vm132_vm0, %v2047_v36  ;;  %v2051_v36 = vpack.c.bf16 %v2033_v55, %v2032_v47  ;;  %v2040_v47 = vld [vmem:[#allocation2 + $0xb8] sm:$0xff]  ;;  %v2041_v55 = vld [vmem:[#allocation2 + $0xc0] sm:$0xff] }
 0x279   :  { %14822 = vmatprep.mubr.msk.bf16.mxu0 %vm17204_vm1, %v20779_v30 }
 0x280   :  { %14823 = vmatmul.mubr.msk.bf16.gmra.mrb[12].mxu0 %vm132_vm0, %v2048_v17  ;;  %v2052_v17 = vpack.c.bf16 %v2035_v2, %v2034_v52  ;;  %v2042_v52 = vld [vmem:[#allocation2 + $0xc8] sm:$0xff]  ;;  %v2043_v2 = vld [vmem:[#allocation2 + $0xd0] sm:$0xff] }
 0x281   :  { %14826 = vmatprep.mubr.msk.bf16.mxu0 %vm17204_vm1, %v20779_v30 }
 0x288   :  { %14827 = vmatmul.mubr.msk.bf16.gmra.mrb[16].mxu0 %vm132_vm0, %v2049_v33  ;;  %v2053_v33 = vpack.c.bf16 %v2037_v1, %v2036_v10  ;;  %v2044_v10 = vld [vmem:[#allocation2 + $0xd8] sm:$0xff] }
 0x289   :  { %14830 = vmatprep.mubr.msk.bf16.mxu0 %vm17204_vm1, %v20779_v30  ;;  %v2057_v1 = vpack.c.bf16 %v2044_v10, %v2044_v10  ;;  %v2786_v10 = vld [vmem:[#allocation2 + $0x4c] sm:$0xff] }
 0x290   :  { %14831 = vmatmul.mubr.msk.bf16.gmra.mrb[20].mxu0 %vm132_vm0, %v2050_v42  ;;  %v2054_v42 = vpack.c.bf16 %v2039_v21, %v2038_v22  ;;  %v2299_v22 = vpack.c.bf16 %v18619_v41, %v18612_v29  ;;  %v17075_v21 = vld [vmem:[%s20677_s2 + $0x68] sm:$0xff]   ;;  %v2301_v29 = vpack.c.bf16 %v18637_v56, %v18630_v38  ;;  %v2302_v41 = vpack.c.bf16 %v18646_v44, %v18639_v25 }
 0x291   :  { %14834 = vmatprep.mubr.msk.bf16.mxu0 %vm17204_vm1, %v20779_v30  ;;  %v2305_v38 = vpack.c.bf16 %v18673_v9, %v18666_v18  ;;  %v2306_v56 = vpack.c.bf16 %v18682_v34, %v18675_v3  ;;  %v2307_v25 = vpack.c.bf16 %v18691_v24, %v18684_v45  ;;  %v2308_v44 = vpack.c.bf16 %v18700_v4, %v18693_v63  ;;  %v2298_v18 = vld [vmem:[#allocation2 + $0xda] sm:$0xff]  ;;  %v2551_v34 = vld [vmem:[#allocation2 + $0xe2] sm:$0xff]  ;;  %v2552_v24 = vld [vmem:[#allocation2 + $0xea] sm:$0xff] }
 0x292   :  { %v2311_v9 = vpack.c.bf16 %v2298_v18, %v2298_v18  ;;  %v17077_v3 = vld [vmem:[%s20677_s2 + $0x78] sm:$0xff]   ;;  %v2564_v45 = vpack.c.bf16 %v2551_v34, %v2298_v18  ;;  %v2565_v63 = vpack.c.bf16 %v2552_v24, %v2552_v24  ;;  %v2782_v4 = vld [vmem:[#allocation2 + $0x2c] sm:$0xff] }
 0x298   :  { %14835 = vmatmul.mubr.msk.bf16.gmra.mrb[24].mxu0 %vm132_vm0, %v2051_v36  ;;  %v2055_v36 = vpack.c.bf16 %v2041_v55, %v2040_v47  ;;  %v17078_v47 = vld [vmem:[%s20677_s2 + $0x80] sm:$0xff]  }
 0x299   :  { %14838 = vmatprep.mubr.msk.bf16.mxu0 %vm17204_vm1, %v20779_v30 }
 0x2a0   :  { %14839 = vmatmul.mubr.msk.bf16.gmra.mrb[28].mxu0 %vm132_vm0, %v2052_v17  ;;  %v2056_v17 = vpack.c.bf16 %v2043_v2, %v2042_v52  ;;  %v2785_v52 = vld [vmem:[#allocation2 + $0x44] sm:$0xff]  ;;  %v2784_v2 = vld [vmem:[#allocation2 + $0x3c] sm:$0xff] }
 0x2a1   :  { %14842 = vmatprep.mubr.msk.bf16.mxu0 %vm17204_vm1, %v20779_v30 }
 0x2a8   :  { %14843 = vmatmul.mubr.msk.bf16.gmra.mrb[32].mxu0 %vm132_vm0, %v2053_v33  ;;  %v17074_v33 = vld [vmem:[%s20677_s2 + $0x60] sm:$0xff]  }
 0x2a9   :  { %14846 = vmatprep.mubr.msk.bf16.mxu0 %vm17204_vm1, %v20779_v30 }
 0x2b0   :  { %14847 = vmatmul.mubr.msk.bf16.gmra.mrb[36].mxu0 %vm132_vm0, %v2054_v42  ;;  %v2300_v42 = vpack.c.bf16 %v18628_v28, %v18621_v26  ;;  %v2303_v26 = vpack.c.bf16 %v18655_v43, %v18648_v11  ;;  %v2304_v28 = vpack.c.bf16 %v18664_v0, %v18657_v60  ;;  %v2309_v11 = vpack.c.bf16 %v18709_v39, %v18702_v27  ;;  %v2297_v43 = vld [vmem:[#allocation2 + $0xd2] sm:$0xff]  ;;  %v2296_v60 = vld [vmem:[#allocation2 + $0xca] sm:$0xff] }
 0x2b1   :  { %14850 = vmatprep.mubr.msk.bf16.mxu0 %vm17204_vm1, %v20779_v30  ;;  %v2310_v0 = vpack.c.bf16 %v2297_v43, %v2296_v60  ;;  %v17076_v39 = vld [vmem:[%s20677_s2 + $0x70] sm:$0xff]   ;;  %v19186_v43 = vld [vmem:[%s20677_s2 + $0xb8] sm:$0xff]  }
 0x2b2   :  { %v2783_v27 = vld [vmem:[#allocation2 + $0x34] sm:$0xff] }
 0x2b3   :  { %v2807_v55 = vpack.c.bf16 %v2783_v27, %v2782_v4  ;;  %v17100_v60 = vld [vmem:[#allocation7 + $0x8] sm:$0xff] }
 0x2b8   :  { %14851 = vmatmul.mubr.msk.bf16.gmra.mrb[40].mxu0 %vm132_vm0, %v2055_v36  ;;  %v17079_v36 = vld [vmem:[%s20677_s2 + $0x88] sm:$0xff]  }
 0x2b9   :  { %14854 = vmatprep.mubr.msk.bf16.mxu0 %vm17204_vm1, %v20779_v30 }
 0x2c0   :  { %14855 = vmatmul.mubr.msk.bf16.gmra.mrb[44].mxu0 %vm132_vm0, %v2056_v17  ;;  %v2808_v17 = vpack.c.bf16 %v2785_v52, %v2784_v2 }
 0x2c1   :  { %14858 = vmatprep.mubr.msk.bf16.mxu0 %vm17204_vm1, %v20779_v30 }
 0x2c8   :  { %14859 = vmatmul.mubr.msk.bf16.gmra.mrb[48].mxu0 %vm132_vm0, %v2057_v1  ;;  %v2809_v1 = vpack.c.bf16 %v18525_v62, %v2786_v10  ;;  %v2812_v62 = vpack.c.bf16 %v18559_v51, %v18552_v19  ;;  %v2803_v19 = vld [vmem:[#allocation2 + $0xd4] sm:$0xff]  ;;  %v2802_v51 = vld [vmem:[#allocation2 + $0xcc] sm:$0xff] }
 0x2c9   :  { %14866 = vmatprep.mubr.msk.bf16.mxu0 %vm17204_vm1, %v20779_v30  ;;  %v20819_v10 = vld [vmem:[#allocation41_spill] sm:$0xff] }
 0x2d0   :  { %14867 = vmatmul.mubr.msk.bf16.vlgmr.msra.gmra.mrb[0].mxu0 %vm132_vm0, %v2299_v22  ;;  %v2811_v22 = vpack.c.bf16 %v18550_v37, %v18543_v13  ;;  %v2815_v13 = vpack.c.bf16 %v18586_v32, %v18579_v14  ;;  %v2816_v37 = vpack.c.bf16 %v18595_v57, %v18588_v6  ;;  %v2806_v14 = vld [vmem:[#allocation2 + $0xec] sm:$0xff]  ;;  %v3061_v6 = vpack.c.bf16 %v18736_v59, %v18730_v16 }
 0x2d1   :  { %14919 = vmatpush3.bf16.msra.mxu0 %v17074_v33  ;;  %14870 = vmatprep.mubr.msk.bf16.mxu0 %vm17204_vm1, %v20779_v30  ;;  %v2810_v33 = vpack.c.bf16 %v18541_v31, %v18527_v40  ;;  %v2813_v40 = vpack.c.bf16 %v18568_v35, %v18561_v49  ;;  %v2814_v31 = vpack.c.bf16 %v18577_v61, %v18570_v8  ;;  %v2804_v35 = vld [vmem:[#allocation2 + $0xdc] sm:$0xff]  ;;  %v19098_v8 = vld [vmem:[#allocation2 + $0xe4] sm:$0xff] }
 0x2d2   :  { %14920 = vmatprep.subr.bf16.mxu0 %v20779_v30  ;;  %v2817_v49 = vpack.c.bf16 %v2803_v19, %v2802_v51  ;;  %v2818_v61 = vpack.c.bf16 %v19098_v8, %v2804_v35  ;;  %v2819_v32 = vpack.c.bf16 %v2806_v14, %v2806_v14  ;;  %v3062_v57 = vpack.c.bf16 %v18745_v58, %v18738_v46  ;;  %v20809_v46 = vld [vmem:[#allocation64_spill] sm:$0xff]  ;;  %v20820_v51 = vld [vmem:[#allocation38_spill] sm:$0xff] }
 0x2d3   :  { %v3064_v59 = vpack.c.bf16 %v18763_v48, %v18756_v50  ;;  %v3065_v16 = vpack.c.bf16 %v18772_v54, %v18765_v5  ;;  %v20810_v48 = vld [vmem:[#allocation65_spill] sm:$0xff]  ;;  %v20811_v50 = vld [vmem:[#allocation66_spill] sm:$0xff]  ;;  %v20812_v54 = vld [vmem:[#allocation67_spill] sm:$0xff] }
 0x2d4   :  { %v20813_v5 = vld [vmem:[#allocation68_spill] sm:$0xff] }
 0x2d5   :  { %14921 = vmatpush3.bf16.msra.mxu0 %v17075_v21  ;;  %v3063_v21 = vpack.c.bf16 %v18754_v7, %v18747_v23  ;;  %v20808_v7 = vld [vmem:[#allocation63_spill] sm:$0xff]  ;;  %v3067_v23 = vpack.c.bf16 %v20811_v50, %v20810_v48  ;;  %v20821_v14 = vld [vmem:[#allocation40_spill] sm:$0xff] }
 0x2d6   :  { %14974 = vmatprep.subr.bf16.mxu0 %v20779_v30  ;;  %v3066_v58 = vpack.c.bf16 %v20809_v46, %v20808_v7  ;;  %v20822_v48 = vld [vmem:[#allocation43_spill] sm:$0xff] }
 0x2d8   :  { %14871 = vmatmul.mubr.msk.bf16.gmra.mrb[4].mxu0 %vm132_vm0, %v2300_v42 }
 0x2d9   :  { %14874 = vmatprep.mubr.msk.bf16.mxu0 %vm17204_vm1, %v20779_v30 }
 0x2e0   :  { %14875 = vmatmul.mubr.msk.bf16.gmra.mrb[8].mxu0 %vm132_vm0, %v2301_v29 }
 0x2e1   :  { %14878 = vmatprep.mubr.msk.bf16.mxu0 %vm17204_vm1, %v20779_v30 }
 0x2e8   :  { %14879 = vmatmul.mubr.msk.bf16.gmra.mrb[12].mxu0 %vm132_vm0, %v2302_v41 }
 0x2e9   :  { %14882 = vmatprep.mubr.msk.bf16.mxu0 %vm17204_vm1, %v20779_v30 }
 0x2f0   :  { %14883 = vmatmul.mubr.msk.bf16.gmra.mrb[16].mxu0 %vm132_vm0, %v2303_v26 }
 0x2f1   :  { %14886 = vmatprep.mubr.msk.bf16.mxu0 %vm17204_vm1, %v20779_v30 }
 0x2f8   :  { %14887 = vmatmul.mubr.msk.bf16.gmra.mrb[20].mxu0 %vm132_vm0, %v2304_v28 }
 0x2f9   :  { %14890 = vmatprep.mubr.msk.bf16.mxu0 %vm17204_vm1, %v20779_v30 }
 0x300   :  { %14891 = vmatmul.mubr.msk.bf16.gmra.mrb[24].mxu0 %vm132_vm0, %v2305_v38 }
 0x301   :  { %14894 = vmatprep.mubr.msk.bf16.mxu0 %vm17204_vm1, %v20779_v30 }
 0x308   :  { %14895 = vmatmul.mubr.msk.bf16.gmra.mrb[28].mxu0 %vm132_vm0, %v2306_v56 }
 0x309   :  { %14898 = vmatprep.mubr.msk.bf16.mxu0 %vm17204_vm1, %v20779_v30 }
 0x310   :  { %14899 = vmatmul.mubr.msk.bf16.gmra.mrb[32].mxu0 %vm132_vm0, %v2307_v25 }
 0x311   :  { %14902 = vmatprep.mubr.msk.bf16.mxu0 %vm17204_vm1, %v20779_v30 }
 0x318   :  { %14903 = vmatmul.mubr.msk.bf16.gmra.mrb[36].mxu0 %vm132_vm0, %v2308_v44 }
 0x319   :  { %14906 = vmatprep.mubr.msk.bf16.mxu0 %vm17204_vm1, %v20779_v30 }
 0x320   :  { %14907 = vmatmul.mubr.msk.bf16.gmra.mrb[40].mxu0 %vm132_vm0, %v2309_v11 }
 0x321   :  { %14910 = vmatprep.mubr.msk.bf16.mxu0 %vm17204_vm1, %v20779_v30 }
 0x328   :  { %14911 = vmatmul.mubr.msk.bf16.gmra.mrb[44].mxu0 %vm132_vm0, %v2310_v0 }
 0x329   :  { %14914 = vmatprep.mubr.msk.bf16.mxu0 %vm17204_vm1, %v20779_v30 }
 0x330   :  { %14915 = vmatmul.mubr.msk.bf16.gmra.mrb[48].mxu0 %vm132_vm0, %v2311_v9  ;;  %v20817_v9 = vld [vmem:[#allocation37_spill] sm:$0xff] }
 0x331   :  { %14922 = vmatprep.mubr.msk.bf16.mxu0 %vm17204_vm1, %v20779_v30 }
 0x338   :  { %14923 = vmatmul.mubr.msk.bf16.vlgmr.msra.gmra.mrb[0].mxu0 %vm132_vm0, %v2300_v42  ;;  %v3068_v42 = vpack.c.bf16 %v20813_v5, %v20812_v54 }
 0x339   :  { %14975 = vmatpush3.bf16.msra.mxu0 %v17076_v39  ;;  %14926 = vmatprep.mubr.msk.bf16.mxu0 %vm17204_vm1, %v20779_v30  ;;  %v19194_v39 = vrot.slane %v17100_v60, %v20817_v9 }
 0x33a   :  { %14976 = vmatprep.subr.bf16.mxu0 %v20779_v30 }
 0x33d   :  { %14977 = vmatpush3.bf16.msra.mxu0 %v17077_v3 }
 0x33e   :  { %15030 = vmatprep.subr.bf16.mxu0 %v20779_v30 }
 0x340   :  { %14927 = vmatmul.mubr.msk.bf16.gmra.mrb[4].mxu0 %vm132_vm0, %v2301_v29  ;;  %v20814_v29 = vld [vmem:[#allocation69_spill] sm:$0xff] }
 0x341   :  { %14930 = vmatprep.mubr.msk.bf16.mxu0 %vm17204_vm1, %v20779_v30 }
 0x348   :  { %14931 = vmatmul.mubr.msk.bf16.gmra.mrb[8].mxu0 %vm132_vm0, %v2302_v41  ;;  %v3069_v41 = vpack.c.bf16 %v18808_v15, %v20814_v29  ;;  %v3058_v15 = vld [vmem:[#allocation2 + $0xde] sm:$0xff]  ;;  %v17086_v29 = vld [vmem:[%s20677_s2 + $0x90] sm:$0xff]  }
 0x349   :  { %14934 = vmatprep.mubr.msk.bf16.mxu0 %vm17204_vm1, %v20779_v30 }
 0x350   :  { %14935 = vmatmul.mubr.msk.bf16.gmra.mrb[12].mxu0 %vm132_vm0, %v2303_v26  ;;  %v20815_v26 = vld [vmem:[#allocation70_spill] sm:$0xff] }
 0x351   :  { %14938 = vmatprep.mubr.msk.bf16.mxu0 %vm17204_vm1, %v20779_v30 }
 0x358   :  { %14939 = vmatmul.mubr.msk.bf16.gmra.mrb[16].mxu0 %vm132_vm0, %v2304_v28  ;;  %v3070_v28 = vpack.c.bf16 %v18817_v53, %v20815_v26  ;;  %v3060_v53 = vld [vmem:[#allocation2 + $0xee] sm:$0xff] }
 0x359   :  { %14942 = vmatprep.mubr.msk.bf16.mxu0 %vm17204_vm1, %v20779_v30 }
 0x360   :  { %14943 = vmatmul.mubr.msk.bf16.gmra.mrb[20].mxu0 %vm132_vm0, %v2305_v38  ;;  %v3071_v38 = vpack.c.bf16 %v18872_v12, %v18865_v20  ;;  %v17080_v20 = vld [vmem:[%s20677_s2 + $0xa0] sm:$0xff]   ;;  %v17081_v12 = vld [vmem:[%s20677_s2 + $0xa8] sm:$0xff]  }
 0x361   :  { %14946 = vmatprep.mubr.msk.bf16.mxu0 %vm17204_vm1, %v20779_v30 }
 0x368   :  { %14947 = vmatmul.mubr.msk.bf16.gmra.mrb[24].mxu0 %vm132_vm0, %v2306_v56  ;;  %v3059_v56 = vld [vmem:[#allocation2 + $0xe6] sm:$0xff] }
 0x369   :  { %14950 = vmatprep.mubr.msk.bf16.mxu0 %vm17204_vm1, %v20779_v30 }
 0x370   :  { %14951 = vmatmul.mubr.msk.bf16.gmra.mrb[28].mxu0 %vm132_vm0, %v2307_v25  ;;  %v3072_v25 = vpack.c.bf16 %v3059_v56, %v3058_v15 }
 0x371   :  { %14954 = vmatprep.mubr.msk.bf16.mxu0 %vm17204_vm1, %v20779_v30 }
 0x378   :  { %14955 = vmatmul.mubr.msk.bf16.gmra.mrb[32].mxu0 %vm132_vm0, %v2308_v44  ;;  %v3073_v44 = vpack.c.bf16 %v3060_v53, %v3060_v53 }
 0x379   :  { %14958 = vmatprep.mubr.msk.bf16.mxu0 %vm17204_vm1, %v20779_v30 }
 0x380   :  { %14959 = vmatmul.mubr.msk.bf16.gmra.mrb[36].mxu0 %vm132_vm0, %v2309_v11  ;;  %v19179_v11 = vld [vmem:[%s20677_s2 + $0xb0] sm:$0xff]  }
 0x381   :  { %14962 = vmatprep.mubr.msk.bf16.mxu0 %vm17204_vm1, %v20779_v30  ;;  %15648 = vmatpush3.bf16.msra.mxu1 %v19179_v11 }
 0x382   :  { %15647 = vmatprep.subr.bf16.mxu1 %v20779_v30 }
 0x385   :  { %15649 = vmatpush3.bf16.msra.mxu1 %v19186_v43 }
 0x386   :  { %15254 = vmatprep.subr.bf16.mxu1 %v20779_v30 }
 0x388   :  { %14963 = vmatmul.mubr.msk.bf16.gmra.mrb[40].mxu0 %vm132_vm0, %v2310_v0  ;;  %v20816_v0 = vld [vmem:[#allocation36_spill] sm:$0xff] }
 0x389   :  { %14966 = vmatprep.mubr.msk.bf16.mxu0 %vm17204_vm1, %v20779_v30  ;;  %v19191_v18 = vrot.slane %v17100_v60, %v20816_v0 }
 0x390   :  { %14967 = vmatmul.mubr.msk.bf16.gmra.mrb[44].mxu0 %vm132_vm0, %v2564_v45 }
 0x391   :  { %14970 = vmatprep.mubr.msk.bf16.mxu0 %vm17204_vm1, %v20779_v30 }
 0x398   :  { %14971 = vmatmul.mubr.msk.bf16.gmra.mrb[48].mxu0 %vm132_vm0, %v2565_v63 }
 0x399   :  { %14978 = vmatprep.mubr.msk.bf16.mxu0 %vm17204_vm1, %v20779_v30 }
 0x3a0   :  { %14979 = vmatmul.mubr.msk.bf16.vlgmr.msra.gmra.mrb[0].mxu0 %vm132_vm0, %v2807_v55 }
 0x3a1   :  { %15031 = vmatpush3.bf16.msra.mxu0 %v17078_v47  ;;  %14982 = vmatprep.mubr.msk.bf16.mxu0 %vm17204_vm1, %v20779_v30 }
 0x3a2   :  { %15032 = vmatprep.subr.bf16.mxu0 %v20779_v30 }
 0x3a5   :  { %15033 = vmatpush3.bf16.msra.mxu0 %v17079_v36  ;;  %v20818_v36 = vld [vmem:[#allocation39_spill] sm:$0xff] }
 0x3a6   :  { %15086 = vmatprep.subr.bf16.mxu0 %v20779_v30 }
 0x3a8   :  { %14983 = vmatmul.mubr.msk.bf16.gmra.mrb[4].mxu0 %vm132_vm0, %v2808_v17 }
 0x3a9   :  { %14986 = vmatprep.mubr.msk.bf16.mxu0 %vm17204_vm1, %v20779_v30 }
 0x3b0   :  { %14987 = vmatmul.mubr.msk.bf16.gmra.mrb[8].mxu0 %vm132_vm0, %v2809_v1 }
 0x3b1   :  { %14990 = vmatprep.mubr.msk.bf16.mxu0 %vm17204_vm1, %v20779_v30 }
 0x3b8   :  { %14991 = vmatmul.mubr.msk.bf16.gmra.mrb[12].mxu0 %vm132_vm0, %v2810_v33 }
 0x3b9   :  { %14994 = vmatprep.mubr.msk.bf16.mxu0 %vm17204_vm1, %v20779_v30 }
 0x3c0   :  { %14995 = vmatmul.mubr.msk.bf16.gmra.mrb[16].mxu0 %vm132_vm0, %v2811_v22 }
 0x3c1   :  { %14998 = vmatprep.mubr.msk.bf16.mxu0 %vm17204_vm1, %v20779_v30 }
 0x3c8   :  { %14999 = vmatmul.mubr.msk.bf16.gmra.mrb[20].mxu0 %vm132_vm0, %v2812_v62 }
 0x3c9   :  { %15002 = vmatprep.mubr.msk.bf16.mxu0 %vm17204_vm1, %v20779_v30 }
 0x3d0   :  { %15003 = vmatmul.mubr.msk.bf16.gmra.mrb[24].mxu0 %vm132_vm0, %v2813_v40 }
 0x3d1   :  { %15006 = vmatprep.mubr.msk.bf16.mxu0 %vm17204_vm1, %v20779_v30 }
 0x3d8   :  { %15007 = vmatmul.mubr.msk.bf16.gmra.mrb[28].mxu0 %vm132_vm0, %v2814_v31 }
 0x3d9   :  { %15010 = vmatprep.mubr.msk.bf16.mxu0 %vm17204_vm1, %v20779_v30 }
 0x3e0   :  { %15011 = vmatmul.mubr.msk.bf16.gmra.mrb[32].mxu0 %vm132_vm0, %v2815_v13 }
 0x3e1   :  { %15014 = vmatprep.mubr.msk.bf16.mxu0 %vm17204_vm1, %v20779_v30 }
 0x3e8   :  { %15015 = vmatmul.mubr.msk.bf16.gmra.mrb[36].mxu0 %vm132_vm0, %v2816_v37 }
 0x3e9   :  { %15018 = vmatprep.mubr.msk.bf16.mxu0 %vm17204_vm1, %v20779_v30 }
 0x3f0   :  { %15019 = vmatmul.mubr.msk.bf16.gmra.mrb[40].mxu0 %vm132_vm0, %v2817_v49 }
 0x3f1   :  { %15022 = vmatprep.mubr.msk.bf16.mxu0 %vm17204_vm1, %v20779_v30 }
 0x3f8   :  { %15023 = vmatmul.mubr.msk.bf16.gmra.mrb[44].mxu0 %vm132_vm0, %v2818_v61 }
 0x3f9   :  { %15026 = vmatprep.mubr.msk.bf16.mxu0 %vm17204_vm1, %v20779_v30 }
 0x400   :  { %15027 = vmatmul.mubr.msk.bf16.gmra.mrb[48].mxu0 %vm132_vm0, %v2819_v32 }
 0x401   :  { %15034 = vmatprep.mubr.msk.bf16.mxu0 %vm17204_vm1, %v20779_v30 }
 0x408   :  { %15035 = vmatmul.mubr.msk.bf16.vlgmr.msra.gmra.mrb[0].mxu0 %vm132_vm0, %v3061_v6 }
 0x409   :  { %15038 = vmatprep.mubr.msk.bf16.mxu0 %vm17204_vm1, %v20779_v30  ;;  %15087 = vmatpush3.bf16.msra.mxu0 %v17080_v20  ;;  %v17087_v20 = vld [vmem:[%s20677_s2 + $0x98] sm:$0xff]  }
 0x40a   :  { %15088 = vmatprep.subr.bf16.mxu0 %v20779_v30 }
 0x40d   :  { %15089 = vmatpush3.bf16.msra.mxu0 %v17081_v12 }
 0x40e   :  { %15142 = vmatprep.subr.bf16.mxu0 %v20779_v30 }
 0x410   :  { %15039 = vmatmul.mubr.msk.bf16.gmra.mrb[4].mxu0 %vm132_vm0, %v3062_v57 }
 0x411   :  { %15042 = vmatprep.mubr.msk.bf16.mxu0 %vm17204_vm1, %v20779_v30 }
 0x418   :  { %15043 = vmatmul.mubr.msk.bf16.gmra.mrb[8].mxu0 %vm132_vm0, %v3063_v21 }
 0x419   :  { %15046 = vmatprep.mubr.msk.bf16.mxu0 %vm17204_vm1, %v20779_v30 }
 0x420   :  { %15047 = vmatmul.mubr.msk.bf16.gmra.mrb[12].mxu0 %vm132_vm0, %v3064_v59 }
 0x421   :  { %15050 = vmatprep.mubr.msk.bf16.mxu0 %vm17204_vm1, %v20779_v30 }
 0x428   :  { %15051 = vmatmul.mubr.msk.bf16.gmra.mrb[16].mxu0 %vm132_vm0, %v3065_v16 }
 0x429   :  { %15054 = vmatprep.mubr.msk.bf16.mxu0 %vm17204_vm1, %v20779_v30 }
 0x430   :  { %15055 = vmatmul.mubr.msk.bf16.gmra.mrb[20].mxu0 %vm132_vm0, %v3066_v58 }
 0x431   :  { %15058 = vmatprep.mubr.msk.bf16.mxu0 %vm17204_vm1, %v20779_v30 }
 0x438   :  { %15059 = vmatmul.mubr.msk.bf16.gmra.mrb[24].mxu0 %vm132_vm0, %v3067_v23 }
 0x439   :  { %15062 = vmatprep.mubr.msk.bf16.mxu0 %vm17204_vm1, %v20779_v30 }
 0x440   :  { %15063 = vmatmul.mubr.msk.bf16.gmra.mrb[28].mxu0 %vm132_vm0, %v3068_v42 }
 0x441   :  { %15066 = vmatprep.mubr.msk.bf16.mxu0 %vm17204_vm1, %v20779_v30 }
 0x448   :  { %15067 = vmatmul.mubr.msk.bf16.gmra.mrb[32].mxu0 %vm132_vm0, %v3069_v41  ;;  %v20823_v41 = vld [vmem:[#allocation42_spill] sm:$0xff] }
 0x449   :  { %15070 = vmatprep.mubr.msk.bf16.mxu0 %vm17204_vm1, %v20779_v30 }
 0x450   :  { %15071 = vmatmul.mubr.msk.bf16.gmra.mrb[36].mxu0 %vm132_vm0, %v3070_v28 }
 0x451   :  { %15074 = vmatprep.mubr.msk.bf16.mxu0 %vm17204_vm1, %v20779_v30 }
 0x458   :  { %15075 = vmatmul.mubr.msk.bf16.gmra.mrb[40].mxu0 %vm132_vm0, %v3071_v38 }
 0x459   :  { %15078 = vmatprep.mubr.msk.bf16.mxu0 %vm17204_vm1, %v20779_v30 }
 0x460   :  { %15079 = vmatmul.mubr.msk.bf16.gmra.mrb[44].mxu0 %vm132_vm0, %v3072_v25 }
 0x461   :  { %15082 = vmatprep.mubr.msk.bf16.mxu0 %vm17204_vm1, %v20779_v30 }
 0x468   :  { %15083 = vmatmul.mubr.msk.bf16.gmra.mrb[48].mxu0 %vm132_vm0, %v3073_v44 }
 0x469   :  { %15090 = vmatprep.mubr.msk.bf16.mxu0 %vm17204_vm1, %v20779_v30 }
 0x4db   :  { %v3163_v3 = vpop.f32.mrb[0].mxu0 }
 0x4dc   :  { %v3294_v34 = vmul.f32 %v19191_v18, %v3163_v3  ;;  %v15036_v45 = vpop.f32.mrb[1].mxu0  ;;  %v20824_v3 = vld [vmem:[#allocation45_spill] sm:$0xff] }
 0x4dd   :  { %v3166_v24 = vpop.f32.mrb[2].mxu0 }
 0x4de   :  { %v3323_v63 = vadd.f32 %v19194_v39, %v3294_v34  ;;  %v3295_v4 = vmul.f32 %v19191_v18, %v3166_v24  ;;  %v15037_v27 = vpop.f32.mrb[3].mxu0 }
 0x4e0   :  { %v3348_v47 = vmax.f32 %v3323_v63, 0.0  ;;  %v3324_v55 = vadd.f32 %v19194_v39, %v3295_v4 }
 0x4e2   :  { %v3373_v52 = vmul.f32 %v3348_v47, %v20818_v36  ;;  %v3349_v2 = vmax.f32 %v3324_v55, 0.0  ;;  %v20825_v47 = vld [vmem:[#allocation44_spill] sm:$0xff] }
 0x4e3   :  { %v3171_v17 = vpop.f32.mrb[4].mxu0 }
 0x4e4   :  { %3398 = vst.msk [vmem:[#allocation2 + $0x18] sm:$0xff] %vm132_vm0, %v3373_v52  ;;  %v3374_v1 = vmul.f32 %v3349_v2, %v20819_v10  ;;  %v3296_v33 = vmul.f32 %v19191_v18, %v3171_v17  ;;  %v15040_v22 = vpop.f32.mrb[5].mxu0 }
 0x4e5   :  { %v3174_v62 = vpop.f32.mrb[6].mxu0 }
 0x4e6   :  { %3399 = vst.msk [vmem:[#allocation2 + $0x20] sm:$0xff] %vm132_vm0, %v3374_v1  ;;  %v3325_v40 = vadd.f32 %v19194_v39, %v3296_v33  ;;  %v3297_v31 = vmul.f32 %v19191_v18, %v3174_v62  ;;  %v15041_v13 = vpop.f32.mrb[7].mxu0 }
 0x4e7   :  { %v20826_v13 = vld [vmem:[#allocation47_spill] sm:$0xff] }
 0x4e8   :  { %v3350_v37 = vmax.f32 %v3325_v40, 0.0  ;;  %v3326_v19 = vadd.f32 %v19194_v39, %v3297_v31 }
 0x4ea   :  { %v3375_v49 = vmul.f32 %v3350_v37, %v20820_v51  ;;  %v3351_v35 = vmax.f32 %v3326_v19, 0.0 }
 0x4eb   :  { %v3179_v61 = vpop.f32.mrb[8].mxu0 }
 0x4ec   :  { %3400 = vst.msk [vmem:[#allocation2 + $0x28] sm:$0xff] %vm132_vm0, %v3375_v49  ;;  %v3376_v32 = vmul.f32 %v3351_v35, %v20821_v14  ;;  %v3298_v6 = vmul.f32 %v19191_v18, %v3179_v61  ;;  %v15044_v57 = vpop.f32.mrb[9].mxu0  ;;  %v20827_v14 = vld [vmem:[#allocation46_spill] sm:$0xff] }
 0x4ed   :  { %v3182_v21 = vpop.f32.mrb[10].mxu0  ;;  %v3465_v5 = vld [vmem:[#allocation2 + $0x1a] sm:$0xff] }
 0x4ee   :  { %3401 = vst.msk [vmem:[#allocation2 + $0x30] sm:$0xff] %vm132_vm0, %v3376_v32  ;;  %v3327_v59 = vadd.f32 %v19194_v39, %v3298_v6  ;;  %v3299_v16 = vmul.f32 %v19191_v18, %v3182_v21  ;;  %v15045_v7 = vpop.f32.mrb[11].mxu0 }
 0x4f0   :  { %v3352_v46 = vmax.f32 %v3327_v59, 0.0  ;;  %v3328_v58 = vadd.f32 %v19194_v39, %v3299_v16 }
 0x4f2   :  { %v3377_v50 = vmul.f32 %v3352_v46, %v20822_v48  ;;  %v3353_v23 = vmax.f32 %v3328_v58, 0.0 }
 0x4f3   :  { %v3187_v54 = vpop.f32.mrb[12].mxu0  ;;  %v3466_v42 = vld [vmem:[#allocation2 + $0x22] sm:$0xff] }
 0x4f4   :  { %3402 = vst.msk [vmem:[#allocation2 + $0x38] sm:$0xff] %vm132_vm0, %v3377_v50  ;;  %v3378_v26 = vmul.f32 %v3353_v23, %v20823_v41  ;;  %v3300_v28 = vmul.f32 %v19191_v18, %v3187_v54  ;;  %v15048_v38 = vpop.f32.mrb[13].mxu0  ;;  %v3490_v15 = vpack.c.bf16 %v3466_v42, %v3465_v5 }
 0x4f5   :  { %v3190_v56 = vpop.f32.mrb[14].mxu0  ;;  %v3467_v63 = vld [vmem:[#allocation2 + $0x2a] sm:$0xff] }
 0x4f6   :  { %3403 = vst.msk [vmem:[#allocation2 + $0x40] sm:$0xff] %vm132_vm0, %v3378_v26  ;;  %v3329_v25 = vadd.f32 %v19194_v39, %v3300_v28  ;;  %v3301_v53 = vmul.f32 %v19191_v18, %v3190_v56  ;;  %v15049_v44 = vpop.f32.mrb[15].mxu0  ;;  %15091 = vmatmul.mubr.msk.bf16.vlgmr.msra.gmra.mrb[52].mxu0 %vm132_vm0, %v3490_v15  ;;  %v19240_v17 = vld [vmem:[#allocation2 + $0x30] sm:$0xff] }
 0x4f7   :  { %15094 = vmatprep.mubr.msk.bf16.mxu0 %vm17204_vm1, %v20779_v30  ;;  %15143 = vmatpush3.bf16.msra.mxu0 %v17086_v29  ;;  %v20828_v29 = vld [vmem:[#allocation49_spill] sm:$0xff] }
 0x4f8   :  { %v3354_v12 = vmax.f32 %v3329_v25, 0.0  ;;  %v3330_v60 = vadd.f32 %v19194_v39, %v3301_v53  ;;  %15144 = vmatprep.subr.bf16.mxu0 %v20779_v30  ;;  %v20829_v25 = vld [vmem:[#allocation48_spill] sm:$0xff] }
 0x4fa   :  { %v3379_v34 = vmul.f32 %v3354_v12, %v20824_v3  ;;  %v3355_v45 = vmax.f32 %v3330_v60, 0.0 }
 0x4fb   :  { %v3195_v24 = vpop.f32.mrb[16].mxu0  ;;  %v3468_v4 = vld [vmem:[#allocation2 + $0x32] sm:$0xff]  ;;  %15145 = vmatpush3.bf16.msra.mxu0 %v17087_v20 }
 0x4fc   :  { %v19235_v27 = vld [vmem:[#allocation2 + $0x38] sm:$0xff]  ;;  %3404 = vst.msk [vmem:[#allocation2 + $0x48] sm:$0xff] %vm132_vm0, %v3379_v34  ;;  %v3380_v55 = vmul.f32 %v3355_v45, %v20825_v47  ;;  %v3302_v36 = vmul.f32 %v19191_v18, %v3195_v24  ;;  %v15052_v52 = vpop.f32.mrb[17].mxu0  ;;  %v3491_v2 = vpack.c.bf16 %v3468_v4, %v3467_v63  ;;  %15198 = vmatprep.subr.bf16.mxu0 %v20779_v30 }
 0x4fd   :  { %v3198_v10 = vpop.f32.mrb[18].mxu0  ;;  %v4668_v1 = vpack.c.bf16 %v19235_v27, %v19240_v17  ;;  %v3469_v49 = vld [vmem:[#allocation2 + $0x3a] sm:$0xff] }
 0x4fe   :  { %3405 = vst.msk [vmem:[#allocation2 + $0x50] sm:$0xff] %vm132_vm0, %v3380_v55  ;;  %v3331_v33 = vadd.f32 %v19194_v39, %v3302_v36  ;;  %v3303_v22 = vmul.f32 %v19191_v18, %v3198_v10  ;;  %v15053_v62 = vpop.f32.mrb[19].mxu0  ;;  %15095 = vmatmul.mubr.msk.bf16.gmra.mrb[56].mxu0 %vm132_vm0, %v3491_v2  ;;  %v19258_v59 = vld [vmem:[#allocation2 + $0x40] sm:$0xff] }
 0x4ff   :  { %15098 = vmatprep.mubr.msk.bf16.mxu0 %vm17204_vm1, %v20779_v30  ;;  %v20830_v2 = vld [vmem:[#allocation51_spill] sm:$0xff] }
 0x500   :  { %v3356_v40 = vmax.f32 %v3331_v33, 0.0  ;;  %v3332_v31 = vadd.f32 %v19194_v39, %v3303_v22 }
 0x502   :  { %v3381_v37 = vmul.f32 %v3356_v40, %v20826_v13  ;;  %v3357_v19 = vmax.f32 %v3332_v31, 0.0  ;;  %v20831_v13 = vld [vmem:[#allocation50_spill] sm:$0xff] }
 0x503   :  { %v3203_v51 = vpop.f32.mrb[20].mxu0  ;;  %v3470_v35 = vld [vmem:[#allocation2 + $0x42] sm:$0xff] }
 0x504   :  { %v19253_v61 = vld [vmem:[#allocation2 + $0x48] sm:$0xff]  ;;  %3406 = vst.msk [vmem:[#allocation2 + $0x58] sm:$0xff] %vm132_vm0, %v3381_v37  ;;  %v3382_v32 = vmul.f32 %v3357_v19, %v20827_v14  ;;  %v3304_v6 = vmul.f32 %v19191_v18, %v3203_v51  ;;  %v15056_v57 = vpop.f32.mrb[21].mxu0  ;;  %v3492_v21 = vpack.c.bf16 %v3470_v35, %v3469_v49 }
 0x505   :  { %v3206_v16 = vpop.f32.mrb[22].mxu0  ;;  %v19260_v7 = vld [vmem:[#allocation2 + $0x44] sm:$0xff]  ;;  %v19262_v46 = vld [vmem:[#allocation2 + $0x4c] sm:$0xff]  ;;  %v19266_v58 = vpack.c.bf16 %v19253_v61, %v19258_v59 }
 0x506   :  { %3407 = vst.msk [vmem:[#allocation2 + $0x60] sm:$0xff] %vm132_vm0, %v3382_v32  ;;  %v3333_v48 = vadd.f32 %v19194_v39, %v3304_v6  ;;  %v3305_v50 = vmul.f32 %v19191_v18, %v3206_v16  ;;  %v15057_v23 = vpop.f32.mrb[23].mxu0  ;;  %15099 = vmatmul.mubr.msk.bf16.gmra.mrb[60].mxu0 %vm132_vm0, %v3492_v21  ;;  %v5430_v54 = vpack.c.bf16 %v19262_v46, %v19260_v7  ;;  %v3471_v38 = vld [vmem:[#allocation2 + $0x4a] sm:$0xff] }
 0x507   :  { %15102 = vmatprep.mubr.msk.bf16.mxu0 %vm17204_vm1, %v20779_v30  ;;  %v19283_v60 = vld [vmem:[#allocation2 + $0x50] sm:$0xff] }
 0x508   :  { %v3358_v5 = vmax.f32 %v3333_v48, 0.0  ;;  %v3334_v42 = vadd.f32 %v19194_v39, %v3305_v50 }
 0x50a   :  { %v3383_v41 = vmul.f32 %v3358_v5, %v20828_v29  ;;  %v3359_v26 = vmax.f32 %v3334_v42, 0.0  ;;  %v20832_v42 = vld [vmem:[#allocation53_spill] sm:$0xff] }
 0x50b   :  { %v3211_v28 = vpop.f32.mrb[24].mxu0  ;;  %v3472_v15 = vld [vmem:[#allocation2 + $0x52] sm:$0xff] }
 0x50c   :  { %v19278_v56 = vld [vmem:[#allocation2 + $0x58] sm:$0xff]  ;;  %3408 = vst.msk [vmem:[#allocation2 + $0x68] sm:$0xff] %vm132_vm0, %v3383_v41  ;;  %v3384_v53 = vmul.f32 %v3359_v26, %v20829_v25  ;;  %v3306_v44 = vmul.f32 %v19191_v18, %v3211_v28  ;;  %v15060_v20 = vpop.f32.mrb[25].mxu0  ;;  %v3493_v12 = vpack.c.bf16 %v3472_v15, %v3471_v38  ;;  %v20833_v25 = vld [vmem:[#allocation52_spill] sm:$0xff] }
 0x50d   :  { %v3214_v3 = vpop.f32.mrb[26].mxu0  ;;  %v19285_v34 = vld [vmem:[#allocation2 + $0x54] sm:$0xff]  ;;  %v19287_v45 = vld [vmem:[#allocation2 + $0x5c] sm:$0xff]  ;;  %v19291_v24 = vpack.c.bf16 %v19278_v56, %v19283_v60 }
 0x50e   :  { %3409 = vst.msk [vmem:[#allocation2 + $0x70] sm:$0xff] %vm132_vm0, %v3384_v53  ;;  %v3335_v63 = vadd.f32 %v19194_v39, %v3306_v44  ;;  %v3307_v4 = vmul.f32 %v19191_v18, %v3214_v3  ;;  %v15061_v47 = vpop.f32.mrb[27].mxu0  ;;  %15103 = vmatmul.mubr.msk.bf16.gmra.mrb[64].mxu0 %vm132_vm0, %v3493_v12  ;;  %v5431_v55 = vpack.c.bf16 %v19287_v45, %v19285_v34  ;;  %v3473_v62 = vld [vmem:[#allocation2 + $0x5a] sm:$0xff] }
 0x50f   :  { %15106 = vmatprep.mubr.msk.bf16.mxu0 %vm17204_vm1, %v20779_v30  ;;  %v19308_v35 = vld [vmem:[#allocation2 + $0x60] sm:$0xff] }
 0x510   :  { %v3360_v36 = vmax.f32 %v3335_v63, 0.0  ;;  %v3336_v52 = vadd.f32 %v19194_v39, %v3307_v4 }
 0x512   :  { %v3385_v10 = vmul.f32 %v3360_v36, %v20830_v2  ;;  %v3361_v33 = vmax.f32 %v3336_v52, 0.0 }
 0x513   :  { %v3219_v22 = vpop.f32.mrb[28].mxu0  ;;  %v3474_v40 = vld [vmem:[#allocation2 + $0x62] sm:$0xff] }
 0x514   :  { %v19303_v31 = vld [vmem:[#allocation2 + $0x68] sm:$0xff]  ;;  %3410 = vst.msk [vmem:[#allocation2 + $0x78] sm:$0xff] %vm132_vm0, %v3385_v10  ;;  %v3386_v37 = vmul.f32 %v3361_v33, %v20831_v13  ;;  %v3308_v19 = vmul.f32 %v19191_v18, %v3219_v22  ;;  %v15064_v51 = vpop.f32.mrb[29].mxu0  ;;  %v3494_v49 = vpack.c.bf16 %v3474_v40, %v3473_v62  ;;  %v20834_v40 = vld [vmem:[#allocation55_spill] sm:$0xff] }
 0x515   :  { %v3222_v14 = vpop.f32.mrb[30].mxu0  ;;  %v19310_v32 = vld [vmem:[#allocation2 + $0x64] sm:$0xff]  ;;  %v19312_v6 = vld [vmem:[#allocation2 + $0x6c] sm:$0xff]  ;;  %v19316_v57 = vpack.c.bf16 %v19303_v31, %v19308_v35 }
 0x516   :  { %3411 = vst.msk [vmem:[#allocation2 + $0x80] sm:$0xff] %vm132_vm0, %v3386_v37  ;;  %v3337_v21 = vadd.f32 %v19194_v39, %v3308_v19  ;;  %v3309_v16 = vmul.f32 %v19191_v18, %v3222_v14  ;;  %v15065_v48 = vpop.f32.mrb[31].mxu0  ;;  %15107 = vmatmul.mubr.msk.bf16.gmra.mrb[68].mxu0 %vm132_vm0, %v3494_v49  ;;  %v3475_v28 = vld [vmem:[#allocation2 + $0x6a] sm:$0xff] }
 0x517   :  { %15110 = vmatprep.mubr.msk.bf16.mxu0 %vm17204_vm1, %v20779_v30  ;;  %v19333_v3 = vld [vmem:[#allocation2 + $0x70] sm:$0xff] }
 0x518   :  { %v3362_v23 = vmax.f32 %v3337_v21, 0.0  ;;  %v3338_v5 = vadd.f32 %v19194_v39, %v3309_v16  ;;  %v20835_v21 = vld [vmem:[#allocation54_spill] sm:$0xff] }
 0x51a   :  { %v3387_v29 = vmul.f32 %v3362_v23, %v20832_v42  ;;  %v3363_v41 = vmax.f32 %v3338_v5, 0.0 }
 0x51b   :  { %v3227_v26 = vpop.f32.mrb[32].mxu0  ;;  %v3476_v38 = vld [vmem:[#allocation2 + $0x72] sm:$0xff] }
 0x51c   :  { %v19328_v15 = vld [vmem:[#allocation2 + $0x78] sm:$0xff]  ;;  %3412 = vst.msk [vmem:[#allocation2 + $0x88] sm:$0xff] %vm132_vm0, %v3387_v29  ;;  %v3388_v53 = vmul.f32 %v3363_v41, %v20833_v25  ;;  %v3310_v44 = vmul.f32 %v19191_v18, %v3227_v26  ;;  %v15068_v20 = vpop.f32.mrb[33].mxu0  ;;  %v3495_v12 = vpack.c.bf16 %v3476_v38, %v3475_v28 }
 0x51d   :  { %v3230_v63 = vpop.f32.mrb[34].mxu0  ;;  %v19335_v4 = vld [vmem:[#allocation2 + $0x74] sm:$0xff]  ;;  %v19337_v47 = vld [vmem:[#allocation2 + $0x7c] sm:$0xff]  ;;  %v19341_v36 = vpack.c.bf16 %v19328_v15, %v19333_v3 }
 0x51e   :  { %3413 = vst.msk [vmem:[#allocation2 + $0x90] sm:$0xff] %vm132_vm0, %v3388_v53  ;;  %v3339_v52 = vadd.f32 %v19194_v39, %v3310_v44  ;;  %v3311_v2 = vmul.f32 %v19191_v18, %v3230_v63  ;;  %v15069_v10 = vpop.f32.mrb[35].mxu0  ;;  %15111 = vmatmul.mubr.msk.bf16.gmra.mrb[72].mxu0 %vm132_vm0, %v3495_v12  ;;  %v3477_v51 = vld [vmem:[#allocation2 + $0x7a] sm:$0xff]  ;;  %v20836_v44 = vld [vmem:[#allocation57_spill] sm:$0xff] }
 0x51f   :  { %15114 = vmatprep.mubr.msk.bf16.mxu0 %vm17204_vm1, %v20779_v30  ;;  %v19358_v42 = vld [vmem:[#allocation2 + $0x80] sm:$0xff] }
 0x520   :  { %v3364_v22 = vmax.f32 %v3339_v52, 0.0  ;;  %v3340_v62 = vadd.f32 %v19194_v39, %v3311_v2  ;;  %v17084_v2 = vld [vmem:[%s20677_s2 + $0xc0] sm:$0xff]  }
 0x522   :  { %v3389_v13 = vmul.f32 %v3364_v22, %v20834_v40  ;;  %v3365_v37 = vmax.f32 %v3340_v62, 0.0 }
 0x523   :  { %v3235_v19 = vpop.f32.mrb[36].mxu0  ;;  %v3478_v49 = vld [vmem:[#allocation2 + $0x82] sm:$0xff] }
 0x524   :  { %v19353_v14 = vld [vmem:[#allocation2 + $0x88] sm:$0xff]  ;;  %3414 = vst.msk [vmem:[#allocation2 + $0x98] sm:$0xff] %vm132_vm0, %v3389_v13  ;;  %v3390_v16 = vmul.f32 %v3365_v37, %v20835_v21  ;;  %v3312_v48 = vmul.f32 %v19191_v18, %v3235_v19  ;;  %v15072_v23 = vpop.f32.mrb[37].mxu0  ;;  %v3496_v5 = vpack.c.bf16 %v3478_v49, %v3477_v51 }
 0x525   :  { %v3238_v29 = vpop.f32.mrb[38].mxu0  ;;  %v19362_v41 = vpack.c.bf16 %v19353_v14, %v19358_v42  ;;  %v3479_v63 = vld [vmem:[#allocation2 + $0x8a] sm:$0xff] }
 0x526   :  { %3415 = vst.msk [vmem:[#allocation2 + $0xa0] sm:$0xff] %vm132_vm0, %v3390_v16  ;;  %v3341_v26 = vadd.f32 %v19194_v39, %v3312_v48  ;;  %v3313_v28 = vmul.f32 %v19191_v18, %v3238_v29  ;;  %v15073_v38 = vpop.f32.mrb[39].mxu0  ;;  %15115 = vmatmul.mubr.msk.bf16.gmra.mrb[76].mxu0 %vm132_vm0, %v3496_v5  ;;  %v3895_v52 = vld [vmem:[#allocation2 + $0x8c] sm:$0xff] }
 0x527   :  { %15118 = vmatprep.mubr.msk.bf16.mxu0 %vm17204_vm1, %v20779_v30  ;;  %v20837_v13 = vld [vmem:[#allocation56_spill] sm:$0xff]  ;;  %v19382_v16 = vld [vmem:[#allocation2 + $0x90] sm:$0xff] }
 0x528   :  { %v3366_v25 = vmax.f32 %v3341_v26, 0.0  ;;  %v3342_v53 = vadd.f32 %v19194_v39, %v3313_v28  ;;  %v17085_v28 = vld [vmem:[%s20677_s2 + $0xc8] sm:$0xff]  }
 0x52a   :  { %v3391_v20 = vmul.f32 %v3366_v25, %v20836_v44  ;;  %v3367_v12 = vmax.f32 %v3342_v53, 0.0  ;;  %v20838_v53 = vld [vmem:[#allocation59_spill] sm:$0xff] }
 0x52b   :  { %v3243_v10 = vpop.f32.mrb[40].mxu0  ;;  %v3480_v22 = vld [vmem:[#allocation2 + $0x92] sm:$0xff] }
 0x52c   :  { %v3896_v62 = vld [vmem:[#allocation2 + $0x94] sm:$0xff]  ;;  %3416 = vst.msk [vmem:[#allocation2 + $0xa8] sm:$0xff] %vm132_vm0, %v3391_v20  ;;  %v3392_v37 = vmul.f32 %v3367_v12, %v20837_v13  ;;  %v3314_v19 = vmul.f32 %v19191_v18, %v3243_v10  ;;  %v15076_v51 = vpop.f32.mrb[41].mxu0  ;;  %v3497_v49 = vpack.c.bf16 %v3480_v22, %v3479_v63 }
 0x52d   :  { %v19375_v40 = vld [vmem:[#allocation2 + $0x98] sm:$0xff]  ;;  %v19380_v21 = vpack.c.bf16 %v3896_v62, %v3895_v52  ;;  %v3246_v48 = vpop.f32.mrb[42].mxu0 }
 0x52e   :  { %v19386_v23 = vpack.c.bf16 %v19375_v40, %v19382_v16  ;;  %3417 = vst.msk [vmem:[#allocation2 + $0xb0] sm:$0xff] %vm132_vm0, %v3392_v37  ;;  %v3343_v5 = vadd.f32 %v19194_v39, %v3314_v19  ;;  %v3315_v29 = vmul.f32 %v19191_v18, %v3246_v48  ;;  %v15077_v26 = vpop.f32.mrb[43].mxu0  ;;  %15119 = vmatmul.mubr.msk.bf16.gmra.mrb[80].mxu0 %vm132_vm0, %v3497_v49  ;;  %v3481_v12 = vld [vmem:[#allocation2 + $0x9a] sm:$0xff] }
 0x52f   :  { %15231 = vmatmul.mubr.msk.bf16.vlgmr.msra.gmra.mrb[0].mxu1 %vm132_vm0, %v19380_v21  ;;  %15122 = vmatprep.mubr.msk.bf16.mxu0 %vm17204_vm1, %v20779_v30  ;;  %v3897_v63 = vld [vmem:[#allocation2 + $0x9c] sm:$0xff] }
 0x530   :  { %15255 = vmatpush3.bf16.msra.mxu1 %v17084_v2  ;;  %v3368_v38 = vmax.f32 %v3343_v5, 0.0  ;;  %v3344_v25 = vadd.f32 %v19194_v39, %v3315_v29  ;;  %15234 = vmatprep.mubr.msk.bf16.mxu1 %vm17204_vm1, %v20779_v30  ;;  %v20839_v62 = vld [vmem:[#allocation58_spill] sm:$0xff]  ;;  %v19412_v48 = vld [vmem:[#allocation2 + $0xa0] sm:$0xff] }
 0x531   :  { %15256 = vmatprep.subr.bf16.mxu1 %v20779_v30 }
 0x532   :  { %v3393_v44 = vmul.f32 %v3368_v38, %v20838_v53  ;;  %v3369_v20 = vmax.f32 %v3344_v25, 0.0 }
 0x533   :  { %v3251_v52 = vpop.f32.mrb[44].mxu0  ;;  %v3482_v2 = vld [vmem:[#allocation2 + $0xa2] sm:$0xff] }
 0x534   :  { %v3898_v10 = vld [vmem:[#allocation2 + $0xa4] sm:$0xff]  ;;  %15257 = vmatpush3.bf16.msra.mxu1 %v17085_v28  ;;  %3418 = vst.msk [vmem:[#allocation2 + $0xb8] sm:$0xff] %vm132_vm0, %v3393_v44  ;;  %v3394_v13 = vmul.f32 %v3369_v20, %v20839_v62  ;;  %v3316_v37 = vmul.f32 %v19191_v18, %v3251_v52  ;;  %v15080_v19 = vpop.f32.mrb[45].mxu0  ;;  %v3498_v51 = vpack.c.bf16 %v3482_v2, %v3481_v12  ;;  %v20840_v44 = vld [vmem:[#allocation61_spill] sm:$0xff] }
 0x535   :  { %v19404_v22 = vld [vmem:[#allocation2 + $0xa8] sm:$0xff]  ;;  %v19409_v49 = vpack.c.bf16 %v3898_v10, %v3897_v63  ;;  %15310 = vmatprep.subr.bf16.mxu1 %v20779_v30  ;;  %v3254_v5 = vpop.f32.mrb[46].mxu0 }
 0x536   :  { %v19416_v29 = vpack.c.bf16 %v19404_v22, %v19412_v48  ;;  %3419 = vst.msk [vmem:[#allocation2 + $0xc0] sm:$0xff] %vm132_vm0, %v3394_v13  ;;  %v3345_v26 = vadd.f32 %v19194_v39, %v3316_v37  ;;  %v3317_v28 = vmul.f32 %v19191_v18, %v3254_v5  ;;  %v15081_v38 = vpop.f32.mrb[47].mxu0  ;;  %15123 = vmatmul.mubr.msk.bf16.gmra.mrb[84].mxu0 %vm132_vm0, %v3498_v51  ;;  %v3483_v63 = vld [vmem:[#allocation2 + $0xaa] sm:$0xff] }
 0x537   :  { %15235 = vmatmul.mubr.msk.bf16.gmra.mrb[4].mxu1 %vm132_vm0, %v19409_v49  ;;  %15126 = vmatprep.mubr.msk.bf16.mxu0 %vm17204_vm1, %v20779_v30  ;;  %v3899_v52 = vld [vmem:[#allocation2 + $0xac] sm:$0xff] }
 0x538   :  { %15238 = vmatprep.mubr.msk.bf16.mxu1 %vm17204_vm1, %v20779_v30  ;;  %v3370_v25 = vmax.f32 %v3345_v26, 0.0  ;;  %v3346_v53 = vadd.f32 %v19194_v39, %v3317_v28  ;;  %v20841_v37 = vld [vmem:[#allocation60_spill] sm:$0xff]  ;;  %v19437_v28 = vld [vmem:[#allocation2 + $0xb0] sm:$0xff] }
 0x53a   :  { %v3395_v20 = vmul.f32 %v3370_v25, %v20840_v44  ;;  %v3371_v12 = vmax.f32 %v3346_v53, 0.0 }
 0x53b   :  { %v3259_v2 = vpop.f32.mrb[48].mxu0  ;;  %v3484_v10 = vld [vmem:[#allocation2 + $0xb2] sm:$0xff] }
 0x53c   :  { %v3900_v62 = vld [vmem:[#allocation2 + $0xb4] sm:$0xff]  ;;  %3420 = vst.msk [vmem:[#allocation2 + $0xc8] sm:$0xff] %vm132_vm0, %v3395_v20  ;;  %v3396_v19 = vmul.f32 %v3371_v12, %v20841_v37  ;;  %v3318_v51 = vmul.f32 %v19191_v18, %v3259_v2  ;;  %v15084_v5 = vpop.f32.mrb[49].mxu0  ;;  %v3499_v26 = vpack.c.bf16 %v3484_v10, %v3483_v63 }
 0x53d   :  { %v19430_v13 = vld [vmem:[#allocation2 + $0xb8] sm:$0xff]  ;;  %v19435_v38 = vpack.c.bf16 %v3900_v62, %v3899_v52  ;;  %v3262_v25 = vpop.f32.mrb[50].mxu0  ;;  %v19453_v10 = vld [vmem:[#allocation2 + $0xc0] sm:$0xff] }
 0x53e   :  { %v19441_v53 = vpack.c.bf16 %v19430_v13, %v19437_v28  ;;  %3421 = vst.msk [vmem:[#allocation2 + $0xd0] sm:$0xff] %vm132_vm0, %v3396_v19  ;;  %v3347_v44 = vadd.f32 %v19194_v39, %v3318_v51  ;;  %v15085_v20 = vpop.f32.mrb[51].mxu0  ;;  %15127 = vmatmul.mubr.msk.bf16.gmra.mrb[88].mxu0 %vm132_vm0, %v3499_v26  ;;  %v20842_v12 = vld [vmem:[#allocation62_spill] sm:$0xff] }
 0x53f   :  { %15239 = vmatmul.mubr.msk.bf16.gmra.mrb[8].mxu1 %vm132_vm0, %v19435_v38  ;;  %15130 = vmatprep.mubr.msk.bf16.mxu0 %vm17204_vm1, %v20779_v30  ;;  %v3485_v52 = vld [vmem:[#allocation2 + $0xba] sm:$0xff] }
 0x540   :  { %15242 = vmatprep.mubr.msk.bf16.mxu1 %vm17204_vm1, %v20779_v30  ;;  %v3372_v18 = vmax.f32 %v3347_v44, 0.0  ;;  %v3901_v2 = vld [vmem:[#allocation2 + $0xbc] sm:$0xff] }
 0x542   :  { %v3397_v63 = vmul.f32 %v3372_v18, %v20842_v12 }
 0x543   :  { %v3486_v39 = vld [vmem:[#allocation2 + $0xc2] sm:$0xff] }
 0x544   :  { %v3902_v62 = vld [vmem:[#allocation2 + $0xc4] sm:$0xff]  ;;  %3422 = vst.msk [vmem:[#allocation2 + $0xd8] sm:$0xff] %vm132_vm0, %v3397_v63  ;;  %v3500_v19 = vpack.c.bf16 %v3486_v39, %v3485_v52 }
 0x545   :  { %v19455_v37 = vld [vmem:[#allocation2 + $0xc8] sm:$0xff]  ;;  %v19458_v51 = vpack.c.bf16 %v3902_v62, %v3901_v2  ;;  %v19475_v52 = vld [vmem:[#allocation2 + $0xd0] sm:$0xff] }
 0x546   :  { %v19462_v5 = vpack.c.bf16 %v19455_v37, %v19453_v10  ;;  %15131 = vmatmul.mubr.msk.bf16.gmra.mrb[92].mxu0 %vm132_vm0, %v3500_v19  ;;  %v3487_v26 = vld [vmem:[#allocation2 + $0xca] sm:$0xff] }
 0x547   :  { %15243 = vmatmul.mubr.msk.bf16.gmra.mrb[12].mxu1 %vm132_vm0, %v19458_v51  ;;  %15134 = vmatprep.mubr.msk.bf16.mxu0 %vm17204_vm1, %v20779_v30  ;;  %v3903_v44 = vld [vmem:[#allocation2 + $0xcc] sm:$0xff] }
 0x548   :  { %15246 = vmatprep.mubr.msk.bf16.mxu1 %vm17204_vm1, %v20779_v30 }
 0x54b   :  { %v3488_v25 = vld [vmem:[#allocation2 + $0xd2] sm:$0xff]  ;;  %v3489_v39 = vld [vmem:[#allocation2 + $0xda] sm:$0xff] }
 0x54c   :  { %v3904_v20 = vld [vmem:[#allocation2 + $0xd4] sm:$0xff]  ;;  %v3501_v18 = vpack.c.bf16 %v3488_v25, %v3487_v26  ;;  %v19488_v62 = vld [vmem:[#allocation2 + $0xdc] sm:$0xff]  ;;  %v3502_v19 = vpack.c.bf16 %v3489_v39, %v3489_v39 }
 0x54d   :  { %v19471_v12 = vpack.c.bf16 %v3904_v20, %v3903_v44  ;;  %v19473_v63 = vld [vmem:[#allocation2 + $0xd8] sm:$0xff]  ;;  %v3918_v26 = vpack.c.bf16 %v19488_v62, %v19488_v62  ;;  %v3424_v25 = vld [vmem:[#allocation2 + $0x20] sm:$0xff]  ;;  %v17088_v39 = vld [vmem:[%s20677_s2 + $0xd0] sm:$0xff]  }
 0x54e   :  { %15135 = vmatmul.mubr.msk.bf16.gmra.mrb[96].mxu0 %vm132_vm0, %v3501_v18  ;;  %v19482_v2 = vpack.c.bf16 %v19473_v63, %v19475_v52  ;;  %v4136_v44 = vld [vmem:[#allocation2 + $0x34] sm:$0xff]  ;;  %v4135_v18 = vld [vmem:[#allocation2 + $0x2c] sm:$0xff] }
 0x54f   :  { %15247 = vmatmul.mubr.msk.bf16.gmra.mrb[16].mxu1 %vm132_vm0, %v19471_v12  ;;  %15138 = vmatprep.mubr.msk.bf16.mxu0 %vm17204_vm1, %v20779_v30  ;;  %v3423_v20 = vld [vmem:[#allocation2 + $0x18] sm:$0xff]  ;;  %v19501_v50 = vpack.c.bf16 %v4136_v44, %v4135_v18  ;;  %v3452_v18 = vpack.c.bf16 %v19308_v35, %v19278_v56  ;;  %v3453_v56 = vpack.c.bf16 %v19333_v3, %v19303_v31 }
 0x550   :  { %15250 = vmatprep.mubr.msk.bf16.mxu1 %vm17204_vm1, %v20779_v30  ;;  %v3448_v33 = vpack.c.bf16 %v3424_v25, %v3423_v20  ;;  %v19534_v20 = vpack.c.bf16 %v19285_v34, %v19262_v46  ;;  %v3455_v31 = vpack.c.bf16 %v19382_v16, %v19353_v14  ;;  %v3457_v3 = vpack.c.bf16 %v19437_v28, %v19404_v22  ;;  %v5414_v46 = vld [vmem:[#allocation2 + $0x8c] sm:$0xff]  ;;  %v5416_v34 = vld [vmem:[#allocation2 + $0x9c] sm:$0xff] }
 0x551   :  { %v3458_v14 = vpack.c.bf16 %v19453_v10, %v19430_v13  ;;  %v3460_v22 = vpack.c.bf16 %v19473_v63, %v19473_v63  ;;  %v4389_v13 = vld [vmem:[#allocation2 + $0x2e] sm:$0xff] }
 0x556   :  { %15139 = vmatmul.mubr.msk.bf16.gmra.mrb[100].mxu0 %vm132_vm0, %v3502_v19  ;;  %v17089_v19 = vld [vmem:[%s20677_s2 + $0xd8] sm:$0xff]  }
 0x557   :  { %15251 = vmatmul.mubr.msk.bf16.gmra.mrb[20].mxu1 %vm132_vm0, %v3918_v26  ;;  %15146 = vmatprep.mubr.msk.bf16.mxu0 %vm17204_vm1, %v20779_v30  ;;  %v4137_v26 = vld [vmem:[#allocation2 + $0x3c] sm:$0xff] }
 0x558   :  { %15258 = vmatprep.mubr.msk.bf16.mxu1 %vm17204_vm1, %v20779_v30  ;;  %v19518_v44 = vpack.c.bf16 %v19260_v7, %v4137_v26  ;;  %v20844_v7 = vpack.c.bf16 %v19337_v47, %v19335_v4 }
 0x55e   :  { %15147 = vmatmul.mubr.msk.bf16.vlgmr.msra.gmra.mrb[52].mxu0 %vm132_vm0, %v3448_v33  ;;  %v3425_v33 = vld [vmem:[#allocation2 + $0x28] sm:$0xff] }
 0x55f   :  { %15259 = vmatmul.mubr.msk.bf16.vlgmr.msra.gmra.mrb[24].mxu1 %vm132_vm0, %v19501_v50  ;;  %15150 = vmatprep.mubr.msk.bf16.mxu0 %vm17204_vm1, %v20779_v30  ;;  %v3449_v25 = vpack.c.bf16 %v19240_v17, %v3425_v33  ;;  %v4395_v33 = vld [vmem:[#allocation2 + $0x5e] sm:$0xff] }
 0x560   :  { %15311 = vmatpush3.bf16.msra.mxu1 %v17088_v39  ;;  %15262 = vmatprep.mubr.msk.bf16.mxu1 %vm17204_vm1, %v20779_v30  ;;  %v3454_v39 = vpack.c.bf16 %v19358_v42, %v19328_v15  ;;  %v3456_v15 = vpack.c.bf16 %v19412_v48, %v19375_v40  ;;  %v3459_v42 = vpack.c.bf16 %v19475_v52, %v19455_v37  ;;  %v3881_v48 = vld [vmem:[#allocation2 + $0x1c] sm:$0xff]  ;;  %v17091_v37 = vld [vmem:[%s20677_s2 + $0xe8] sm:$0xff]  }
 0x561   :  { %15312 = vmatprep.subr.bf16.mxu1 %v20779_v30  ;;  %15199 = vmatpush3.bf16.msra.mxu0 %v19179_v11  ;;  %v3450_v11 = vpack.c.bf16 %v19258_v59, %v19235_v27  ;;  %v19547_v59 = vpack.c.bf16 %v19310_v32, %v19287_v45  ;;  %v4171_v40 = vpack.c.bf16 %v19098_v8, %v19488_v62  ;;  %v3882_v8 = vld [vmem:[#allocation2 + $0x24] sm:$0xff]  ;;  %v4394_v52 = vld [vmem:[#allocation2 + $0x56] sm:$0xff]  ;;  %v4393_v62 = vld [vmem:[#allocation2 + $0x4e] sm:$0xff] }
 0x562   :  { %15200 = vmatprep.subr.bf16.mxu0 %v20779_v30  ;;  %v3906_v28 = vpack.c.bf16 %v3882_v8, %v3881_v48  ;;  %v4409_v8 = vld [vmem:[#allocation2 + $0xce] sm:$0xff]  ;;  %v4411_v48 = vld [vmem:[#allocation2 + $0xde] sm:$0xff] }
 0x563   :  { %v5415_v45 = vld [vmem:[#allocation2 + $0x94] sm:$0xff] }
 0x564   :  { %15313 = vmatpush3.bf16.msra.mxu1 %v17089_v19  ;;  %v4416_v19 = vpack.c.bf16 %v4394_v52, %v4393_v62 }
 0x565   :  { %15366 = vmatprep.subr.bf16.mxu1 %v20779_v30  ;;  %15201 = vmatpush3.bf16.msra.mxu0 %v19186_v43  ;;  %v3451_v43 = vpack.c.bf16 %v19283_v60, %v19253_v61  ;;  %v19560_v61 = vpack.c.bf16 %v19335_v4, %v19312_v6  ;;  %v19569_v60 = vld [vmem:[#allocation2 + $0x84] sm:$0xff] }
 0x566   :  { %15151 = vmatmul.mubr.msk.bf16.gmra.mrb[56].mxu0 %vm132_vm0, %v3449_v25  ;;  %15590 = vmatprep.subr.bf16.mxu0 %v20779_v30  ;;  %v19575_v35 = vpack.c.bf16 %v19569_v60, %v19337_v47  ;;  %v4398_v25 = vld [vmem:[#allocation2 + $0x76] sm:$0xff] }
 0x567   :  { %15263 = vmatmul.mubr.msk.bf16.gmra.mrb[28].mxu1 %vm132_vm0, %v19518_v44  ;;  %15154 = vmatprep.mubr.msk.bf16.mxu0 %vm17204_vm1, %v20779_v30  ;;  %v5420_v47 = vld [vmem:[#allocation2 + $0xbc] sm:$0xff] }
 0x568   :  { %15266 = vmatprep.mubr.msk.bf16.mxu1 %vm17204_vm1, %v20779_v30 }
 0x56e   :  { %15155 = vmatmul.mubr.msk.bf16.gmra.mrb[60].mxu0 %vm132_vm0, %v3450_v11 }
 0x56f   :  { %15267 = vmatmul.mubr.msk.bf16.gmra.mrb[32].mxu1 %vm132_vm0, %v19534_v20  ;;  %15158 = vmatprep.mubr.msk.bf16.mxu0 %vm17204_vm1, %v20779_v30 }
 0x570   :  { %15270 = vmatprep.mubr.msk.bf16.mxu1 %vm17204_vm1, %v20779_v30 }
 0x576   :  { %15159 = vmatmul.mubr.msk.bf16.gmra.mrb[64].mxu0 %vm132_vm0, %v3451_v43  ;;  %v4399_v43 = vld [vmem:[#allocation2 + $0x7e] sm:$0xff] }
 0x577   :  { %15271 = vmatmul.mubr.msk.bf16.gmra.mrb[36].mxu1 %vm132_vm0, %v19547_v59  ;;  %15162 = vmatprep.mubr.msk.bf16.mxu0 %vm17204_vm1, %v20779_v30 }
 0x578   :  { %15274 = vmatprep.mubr.msk.bf16.mxu1 %vm17204_vm1, %v20779_v30 }
 0x57e   :  { %15163 = vmatmul.mubr.msk.bf16.gmra.mrb[68].mxu0 %vm132_vm0, %v3452_v18 }
 0x57f   :  { %15275 = vmatmul.mubr.msk.bf16.gmra.mrb[40].mxu1 %vm132_vm0, %v19560_v61  ;;  %15166 = vmatprep.mubr.msk.bf16.mxu0 %vm17204_vm1, %v20779_v30 }
 0x580   :  { %15278 = vmatprep.mubr.msk.bf16.mxu1 %vm17204_vm1, %v20779_v30 }
 0x586   :  { %15167 = vmatmul.mubr.msk.bf16.gmra.mrb[72].mxu0 %vm132_vm0, %v3453_v56  ;;  %v4401_v56 = vld [vmem:[#allocation2 + $0x8e] sm:$0xff] }
 0x587   :  { %15279 = vmatmul.mubr.msk.bf16.gmra.mrb[44].mxu1 %vm132_vm0, %v19575_v35  ;;  %15170 = vmatprep.mubr.msk.bf16.mxu0 %vm17204_vm1, %v20779_v30 }
 0x588   :  { %15282 = vmatprep.mubr.msk.bf16.mxu1 %vm17204_vm1, %v20779_v30 }
 0x58e   :  { %15171 = vmatmul.mubr.msk.bf16.gmra.mrb[76].mxu0 %vm132_vm0, %v3454_v39 }
 0x58f   :  { %15283 = vmatmul.mubr.msk.bf16.gmra.mrb[48].mxu1 %vm132_vm0, %v19380_v21  ;;  %15174 = vmatprep.mubr.msk.bf16.mxu0 %vm17204_vm1, %v20779_v30  ;;  %v19639_v21 = vld [vmem:[#allocation2 + $0xec] sm:$0xff] }
 0x590   :  { %15286 = vmatprep.mubr.msk.bf16.mxu1 %vm17204_vm1, %v20779_v30  ;;  %v4172_v16 = vpack.c.bf16 %v19639_v21, %v19639_v21 }
 0x596   :  { %15175 = vmatmul.mubr.msk.bf16.gmra.mrb[80].mxu0 %vm132_vm0, %v3455_v31  ;;  %v4403_v31 = vld [vmem:[#allocation2 + $0x9e] sm:$0xff] }
 0x597   :  { %15287 = vmatmul.mubr.msk.bf16.gmra.mrb[0].mxu1 %vm132_vm0, %v19409_v49  ;;  %15178 = vmatprep.mubr.msk.bf16.mxu0 %vm17204_vm1, %v20779_v30  ;;  %v4390_v49 = vld [vmem:[#allocation2 + $0x36] sm:$0xff] }
 0x598   :  { %15290 = vmatprep.mubr.msk.bf16.mxu1 %vm17204_vm1, %v20779_v30  ;;  %v4414_v10 = vpack.c.bf16 %v4390_v49, %v4389_v13  ;;  %v4412_v13 = vld [vmem:[#allocation2 + $0xe6] sm:$0xff] }
 0x59e   :  { %15179 = vmatmul.mubr.msk.bf16.gmra.mrb[84].mxu0 %vm132_vm0, %v3456_v15 }
 0x59f   :  { %15291 = vmatmul.mubr.msk.bf16.gmra.mrb[4].mxu1 %vm132_vm0, %v19435_v38  ;;  %15182 = vmatprep.mubr.msk.bf16.mxu0 %vm17204_vm1, %v20779_v30  ;;  %v17090_v38 = vld [vmem:[%s20677_s2 + $0xe0] sm:$0xff]  }
 0x5a0   :  { %15294 = vmatprep.mubr.msk.bf16.mxu1 %vm17204_vm1, %v20779_v30 }
 0x5a6   :  { %15183 = vmatmul.mubr.msk.bf16.gmra.mrb[88].mxu0 %vm132_vm0, %v3457_v3  ;;  %v4406_v3 = vld [vmem:[#allocation2 + $0xb6] sm:$0xff] }
 0x5a7   :  { %15295 = vmatmul.mubr.msk.bf16.gmra.mrb[8].mxu1 %vm132_vm0, %v19458_v51  ;;  %15186 = vmatprep.mubr.msk.bf16.mxu0 %vm17204_vm1, %v20779_v30  ;;  %v4392_v51 = vld [vmem:[#allocation2 + $0x46] sm:$0xff] }
 0x5a8   :  { %15298 = vmatprep.mubr.msk.bf16.mxu1 %vm17204_vm1, %v20779_v30 }
 0x5ae   :  { %15187 = vmatmul.mubr.msk.bf16.gmra.mrb[92].mxu0 %vm132_vm0, %v3458_v14  ;;  %v4405_v14 = vld [vmem:[#allocation2 + $0xae] sm:$0xff] }
 0x5af   :  { %15299 = vmatmul.mubr.msk.bf16.gmra.mrb[12].mxu1 %vm132_vm0, %v19471_v12  ;;  %15190 = vmatprep.mubr.msk.bf16.mxu0 %vm17204_vm1, %v20779_v30  ;;  %v4391_v12 = vld [vmem:[#allocation2 + $0x3e] sm:$0xff] }
 0x5b0   :  { %15302 = vmatprep.mubr.msk.bf16.mxu1 %vm17204_vm1, %v20779_v30  ;;  %v4415_v63 = vpack.c.bf16 %v4392_v51, %v4391_v12  ;;  %v17093_v51 = vld [vmem:[%s20677_s2 + $0xf8] sm:$0xff]  }
 0x5b6   :  { %15191 = vmatmul.mubr.msk.bf16.gmra.mrb[96].mxu0 %vm132_vm0, %v3459_v42  ;;  %v4422_v42 = vpack.c.bf16 %v4406_v3, %v4405_v14 }
 0x5b7   :  { %15303 = vmatmul.mubr.msk.bf16.gmra.mrb[16].mxu1 %vm132_vm0, %v4171_v40  ;;  %15194 = vmatprep.mubr.msk.bf16.mxu0 %vm17204_vm1, %v20779_v30  ;;  %v4407_v40 = vld [vmem:[#allocation2 + $0xbe] sm:$0xff] }
 0x5b8   :  { %15306 = vmatprep.mubr.msk.bf16.mxu1 %vm17204_vm1, %v20779_v30 }
 0x5be   :  { %15195 = vmatmul.mubr.msk.bf16.gmra.mrb[100].mxu0 %vm132_vm0, %v3460_v22  ;;  %v4410_v22 = vld [vmem:[#allocation2 + $0xd6] sm:$0xff] }
 0x5bf   :  { %15307 = vmatmul.mubr.msk.bf16.gmra.mrb[20].mxu1 %vm132_vm0, %v4172_v16  ;;  %15202 = vmatprep.mubr.msk.bf16.mxu0 %vm17204_vm1, %v20779_v30  ;;  %v4424_v49 = vpack.c.bf16 %v4410_v22, %v4409_v8  ;;  %v17095_v8 = vld [vmem:[%s20677_s2 + $0x108] sm:$0xff]  }
 0x5c0   :  { %15314 = vmatprep.mubr.msk.bf16.mxu1 %vm17204_vm1, %v20779_v30 }
 0x5c6   :  { %15203 = vmatmul.mubr.msk.bf16.vlgmr.msra.gmra.mrb[52].mxu0 %vm132_vm0, %v3906_v28  ;;  %v4413_v28 = vld [vmem:[#allocation2 + $0xee] sm:$0xff] }
 0x5c7   :  { %15315 = vmatmul.mubr.msk.bf16.vlgmr.msra.gmra.mrb[24].mxu1 %vm132_vm0, %v4414_v10  ;;  %15206 = vmatprep.mubr.msk.bf16.mxu0 %vm17204_vm1, %v20779_v30  ;;  %v4426_v10 = vpack.c.bf16 %v4413_v28, %v4413_v28 }
 0x5c8   :  { %15367 = vmatpush3.bf16.msra.mxu1 %v17090_v38  ;;  %15318 = vmatprep.mubr.msk.bf16.mxu1 %vm17204_vm1, %v20779_v30  ;;  %v4425_v38 = vpack.c.bf16 %v4412_v13, %v4411_v48 }
 0x5c9   :  { %15368 = vmatprep.subr.bf16.mxu1 %v20779_v30 }
 0x5cc   :  { %15369 = vmatpush3.bf16.msra.mxu1 %v17091_v37  ;;  %v17092_v37 = vld [vmem:[%s20677_s2 + $0xf0] sm:$0xff]  }
 0x5cd   :  { %15422 = vmatprep.subr.bf16.mxu1 %v20779_v30 }
 0x5ce   :  { %15207 = vmatmul.mubr.msk.bf16.gmra.mrb[56].mxu0 %vm132_vm0, %v19501_v50  ;;  %v4396_v50 = vld [vmem:[#allocation2 + $0x66] sm:$0xff] }
 0x5cf   :  { %15319 = vmatmul.mubr.msk.bf16.gmra.mrb[28].mxu1 %vm132_vm0, %v4415_v63  ;;  %15210 = vmatprep.mubr.msk.bf16.mxu0 %vm17204_vm1, %v20779_v30  ;;  %v4417_v26 = vpack.c.bf16 %v4396_v50, %v4395_v33 }
 0x5d0   :  { %15322 = vmatprep.mubr.msk.bf16.mxu1 %vm17204_vm1, %v20779_v30 }
 0x5d6   :  { %15211 = vmatmul.mubr.msk.bf16.gmra.mrb[60].mxu0 %vm132_vm0, %v19518_v44  ;;  %v4397_v44 = vld [vmem:[#allocation2 + $0x6e] sm:$0xff] }
 0x5d7   :  { %15323 = vmatmul.mubr.msk.bf16.gmra.mrb[32].mxu1 %vm132_vm0, %v4416_v19  ;;  %15214 = vmatprep.mubr.msk.bf16.mxu0 %vm17204_vm1, %v20779_v30  ;;  %v4418_v11 = vpack.c.bf16 %v4398_v25, %v4397_v44  ;;  %v4665_v44 = vld [vmem:[#allocation2 + $0xe0] sm:$0xff] }
 0x5d8   :  { %15326 = vmatprep.mubr.msk.bf16.mxu1 %vm17204_vm1, %v20779_v30 }
 0x5de   :  { %15215 = vmatmul.mubr.msk.bf16.gmra.mrb[64].mxu0 %vm132_vm0, %v19534_v20  ;;  %v4400_v20 = vld [vmem:[#allocation2 + $0x86] sm:$0xff] }
 0x5df   :  { %15327 = vmatmul.mubr.msk.bf16.gmra.mrb[36].mxu1 %vm132_vm0, %v4417_v26  ;;  %15218 = vmatprep.mubr.msk.bf16.mxu0 %vm17204_vm1, %v20779_v30  ;;  %v4419_v18 = vpack.c.bf16 %v4400_v20, %v4399_v43 }
 0x5e0   :  { %15330 = vmatprep.mubr.msk.bf16.mxu1 %vm17204_vm1, %v20779_v30 }
 0x5e6   :  { %15219 = vmatmul.mubr.msk.bf16.gmra.mrb[68].mxu0 %vm132_vm0, %v19547_v59  ;;  %v4402_v59 = vld [vmem:[#allocation2 + $0x96] sm:$0xff] }
 0x5e7   :  { %15331 = vmatmul.mubr.msk.bf16.gmra.mrb[40].mxu1 %vm132_vm0, %v4418_v11  ;;  %15222 = vmatprep.mubr.msk.bf16.mxu0 %vm17204_vm1, %v20779_v30  ;;  %v4420_v39 = vpack.c.bf16 %v4402_v59, %v4401_v56  ;;  %v4666_v11 = vld [vmem:[#allocation2 + $0xe8] sm:$0xff] }
 0x5e8   :  { %15334 = vmatprep.mubr.msk.bf16.mxu1 %vm17204_vm1, %v20779_v30 }
 0x5ee   :  { %15223 = vmatmul.mubr.msk.bf16.gmra.mrb[72].mxu0 %vm132_vm0, %v19560_v61  ;;  %v4404_v61 = vld [vmem:[#allocation2 + $0xa6] sm:$0xff] }
 0x5ef   :  { %15335 = vmatmul.mubr.msk.bf16.gmra.mrb[44].mxu1 %vm132_vm0, %v4419_v18  ;;  %15226 = vmatprep.mubr.msk.bf16.mxu0 %vm17204_vm1, %v20779_v30  ;;  %v4421_v15 = vpack.c.bf16 %v4404_v61, %v4403_v31  ;;  %v19793_v18 = vpack.c.bf16 %v4666_v11, %v4665_v44 }
 0x5f0   :  { %15338 = vmatprep.mubr.msk.bf16.mxu1 %vm17204_vm1, %v20779_v30 }
 0x5f6   :  { %15227 = vmatmul.mubr.msk.bf16.gmra.mrb[76].mxu0 %vm132_vm0, %v19575_v35  ;;  %v4408_v35 = vld [vmem:[#allocation2 + $0xc6] sm:$0xff] }
 0x5f7   :  { %15339 = vmatmul.mubr.msk.bf16.gmra.mrb[48].mxu1 %vm132_vm0, %v4420_v39  ;;  %15594 = vmatprep.mubr.msk.bf16.mxu0 %vm17204_vm1, %v20779_v30  ;;  %v4423_v16 = vpack.c.bf16 %v4408_v35, %v4407_v40  ;;  %v19801_v39 = vld [vmem:[#allocation2 + $0xf0] sm:$0xff] }
 0x5f8   :  { %15342 = vmatprep.mubr.msk.bf16.mxu1 %vm17204_vm1, %v20779_v30 }
 0x5ff   :  { %15343 = vmatmul.mubr.msk.bf16.gmra.mrb[0].mxu1 %vm132_vm0, %v4421_v15  ;;  %v4680_v15 = vpack.c.bf16 %v19801_v39, %v19801_v39 }
 0x600   :  { %15346 = vmatprep.mubr.msk.bf16.mxu1 %vm17204_vm1, %v20779_v30 }
 0x607   :  { %15347 = vmatmul.mubr.msk.bf16.gmra.mrb[4].mxu1 %vm132_vm0, %v4422_v42 }
 0x608   :  { %15350 = vmatprep.mubr.msk.bf16.mxu1 %vm17204_vm1, %v20779_v30 }
 0x60f   :  { %15351 = vmatmul.mubr.msk.bf16.gmra.mrb[8].mxu1 %vm132_vm0, %v4423_v16  ;;  %v17094_v16 = vld [vmem:[%s20677_s2 + $0x100] sm:$0xff]  }
 0x610   :  { %15354 = vmatprep.mubr.msk.bf16.mxu1 %vm17204_vm1, %v20779_v30 }
 0x617   :  { %15355 = vmatmul.mubr.msk.bf16.gmra.mrb[12].mxu1 %vm132_vm0, %v4424_v49 }
 0x618   :  { %15358 = vmatprep.mubr.msk.bf16.mxu1 %vm17204_vm1, %v20779_v30 }
 0x61f   :  { %15359 = vmatmul.mubr.msk.bf16.gmra.mrb[16].mxu1 %vm132_vm0, %v4425_v38 }
 0x620   :  { %15362 = vmatprep.mubr.msk.bf16.mxu1 %vm17204_vm1, %v20779_v30 }
 0x627   :  { %15363 = vmatmul.mubr.msk.bf16.gmra.mrb[20].mxu1 %vm132_vm0, %v4426_v10 }
 0x628   :  { %15370 = vmatprep.mubr.msk.bf16.mxu1 %vm17204_vm1, %v20779_v30 }
 0x62f   :  { %15371 = vmatmul.mubr.msk.bf16.vlgmr.msra.gmra.mrb[24].mxu1 %vm132_vm0, %v4668_v1 }
 0x630   :  { %15423 = vmatpush3.bf16.msra.mxu1 %v17092_v37  ;;  %15374 = vmatprep.mubr.msk.bf16.mxu1 %vm17204_vm1, %v20779_v30 }
 0x631   :  { %15424 = vmatprep.subr.bf16.mxu1 %v20779_v30 }
 0x634   :  { %15425 = vmatpush3.bf16.msra.mxu1 %v17093_v51 }
 0x635   :  { %15478 = vmatprep.subr.bf16.mxu1 %v20779_v30 }
 0x637   :  { %15375 = vmatmul.mubr.msk.bf16.gmra.mrb[28].mxu1 %vm132_vm0, %v19266_v58 }
 0x638   :  { %15378 = vmatprep.mubr.msk.bf16.mxu1 %vm17204_vm1, %v20779_v30 }
 0x63f   :  { %15379 = vmatmul.mubr.msk.bf16.gmra.mrb[32].mxu1 %vm132_vm0, %v19291_v24 }
 0x640   :  { %15382 = vmatprep.mubr.msk.bf16.mxu1 %vm17204_vm1, %v20779_v30 }
 0x647   :  { %15383 = vmatmul.mubr.msk.bf16.gmra.mrb[36].mxu1 %vm132_vm0, %v19316_v57 }
 0x648   :  { %15386 = vmatprep.mubr.msk.bf16.mxu1 %vm17204_vm1, %v20779_v30 }
 0x64f   :  { %15387 = vmatmul.mubr.msk.bf16.gmra.mrb[40].mxu1 %vm132_vm0, %v19341_v36 }
 0x650   :  { %15390 = vmatprep.mubr.msk.bf16.mxu1 %vm17204_vm1, %v20779_v30 }
 0x657   :  { %15391 = vmatmul.mubr.msk.bf16.gmra.mrb[44].mxu1 %vm132_vm0, %v19362_v41 }
 0x658   :  { %15394 = vmatprep.mubr.msk.bf16.mxu1 %vm17204_vm1, %v20779_v30 }
 0x65f   :  { %15395 = vmatmul.mubr.msk.bf16.gmra.mrb[48].mxu1 %vm132_vm0, %v19386_v23 }
 0x660   :  { %15398 = vmatprep.mubr.msk.bf16.mxu1 %vm17204_vm1, %v20779_v30 }
 0x667   :  { %15399 = vmatmul.mubr.msk.bf16.gmra.mrb[0].mxu1 %vm132_vm0, %v19416_v29 }
 0x668   :  { %15402 = vmatprep.mubr.msk.bf16.mxu1 %vm17204_vm1, %v20779_v30 }
 0x669   :  { %v19767_v27 = vpop.f32.mrb[80].mxu0 }
 0x66a   :  { %v15176_v17 = vpop.f32.mrb[81].mxu0 }
 0x66b   :  { %v19769_v1 = vpop.f32.mrb[82].mxu0 }
 0x66c   :  { %v15177_v12 = vpop.f32.mrb[83].mxu0 }
 0x66f   :  { %15403 = vmatmul.mubr.msk.bf16.gmra.mrb[4].mxu1 %vm132_vm0, %v19441_v53 }
 0x670   :  { %15406 = vmatprep.mubr.msk.bf16.mxu1 %vm17204_vm1, %v20779_v30 }
 0x671   :  { %v19775_v63 = vpop.f32.mrb[84].mxu0 }
 0x672   :  { %v15180_v52 = vpop.f32.mrb[85].mxu0 }
 0x673   :  { %v19777_v62 = vpop.f32.mrb[86].mxu0 }
 0x674   :  { %v15181_v19 = vpop.f32.mrb[87].mxu0 }
 0x677   :  { %15407 = vmatmul.mubr.msk.bf16.gmra.mrb[8].mxu1 %vm132_vm0, %v19462_v5 }
 0x678   :  { %15410 = vmatprep.mubr.msk.bf16.mxu1 %vm17204_vm1, %v20779_v30 }
 0x679   :  { %v19783_v50 = vpop.f32.mrb[88].mxu0 }
 0x67a   :  { %v15184_v33 = vpop.f32.mrb[89].mxu0 }
 0x67b   :  { %v19785_v26 = vpop.f32.mrb[90].mxu0 }
 0x67c   :  { %v15185_v25 = vpop.f32.mrb[91].mxu0 }
 0x67f   :  { %15411 = vmatmul.mubr.msk.bf16.gmra.mrb[12].mxu1 %vm132_vm0, %v19482_v2 }
 0x680   :  { %15414 = vmatprep.mubr.msk.bf16.mxu1 %vm17204_vm1, %v20779_v30 }
 0x681   :  { %v19791_v20 = vpop.f32.mrb[92].mxu0 }
 0x682   :  { %v15188_v43 = vpop.f32.mrb[93].mxu0 }
 0x683   :  { %v19795_v59 = vpop.f32.mrb[94].mxu0 }
 0x684   :  { %v15189_v56 = vpop.f32.mrb[95].mxu0 }
 0x687   :  { %15415 = vmatmul.mubr.msk.bf16.gmra.mrb[16].mxu1 %vm132_vm0, %v19793_v18 }
 0x688   :  { %15418 = vmatprep.mubr.msk.bf16.mxu1 %vm17204_vm1, %v20779_v30 }
 0x689   :  { %v19803_v61 = vpop.f32.mrb[96].mxu0 }
 0x68a   :  { %v15192_v31 = vpop.f32.mrb[97].mxu0 }
 0x68b   :  { %v19807_v3 = vpop.f32.mrb[98].mxu0 }
 0x68c   :  { %v15193_v14 = vpop.f32.mrb[99].mxu0 }
 0x68f   :  { %15419 = vmatmul.mubr.msk.bf16.gmra.mrb[20].mxu1 %vm132_vm0, %v4680_v15 }
 0x690   :  { %15426 = vmatprep.mubr.msk.bf16.mxu1 %vm17204_vm1, %v20779_v30 }
 0x691   :  { %v19812_v42 = vpop.f32.mrb[100].mxu0 }
 0x692   :  { %v15196_v35 = vpop.f32.mrb[101].mxu0 }
 0x693   :  { %v3878_v40 = vpop.f32.mrb[102].mxu0 }
 0x694   :  { %v15197_v22 = vpop.f32.mrb[103].mxu0 }
 0x697   :  { %15427 = vmatmul.mubr.msk.bf16.vlgmr.msra.gmra.mrb[24].mxu1 %vm132_vm0, %v19266_v58 }
 0x698   :  { %15479 = vmatpush3.bf16.msra.mxu1 %v17094_v16  ;;  %15430 = vmatprep.mubr.msk.bf16.mxu1 %vm17204_vm1, %v20779_v30  ;;  %v17096_v16 = vld [vmem:[%s20677_s2 + $0x110] sm:$0xff]  }
 0x699   :  { %15480 = vmatprep.subr.bf16.mxu1 %v20779_v30  ;;  %v19825_v49 = vpop.f32.mrb[52].mxu0 }
 0x69a   :  { %v15204_v48 = vpop.f32.mrb[53].mxu0 }
 0x69b   :  { %v19827_v13 = vpop.f32.mrb[54].mxu0  ;;  %v5153_v48 = vld [vmem:[#allocation2 + $0x52] sm:$0xff] }
 0x69c   :  { %15481 = vmatpush3.bf16.msra.mxu1 %v17095_v8  ;;  %v15205_v38 = vpop.f32.mrb[55].mxu0  ;;  %v5154_v8 = vld [vmem:[#allocation2 + $0x5a] sm:$0xff] }
 0x69d   :  { %15534 = vmatprep.subr.bf16.mxu1 %v20779_v30  ;;  %v5177_v38 = vpack.c.bf16 %v5154_v8, %v5153_v48  ;;  %v5169_v8 = vld [vmem:[#allocation2 + $0xd2] sm:$0xff]  ;;  %v5170_v48 = vld [vmem:[#allocation2 + $0xda] sm:$0xff] }
 0x69f   :  { %15431 = vmatmul.mubr.msk.bf16.gmra.mrb[28].mxu1 %vm132_vm0, %v19291_v24 }
 0x6a0   :  { %15434 = vmatprep.mubr.msk.bf16.mxu1 %vm17204_vm1, %v20779_v30 }
 0x6a1   :  { %v19834_v58 = vpop.f32.mrb[56].mxu0 }
 0x6a2   :  { %v15208_v28 = vpop.f32.mrb[57].mxu0 }
 0x6a3   :  { %v19836_v10 = vpop.f32.mrb[58].mxu0  ;;  %v5156_v28 = vld [vmem:[#allocation2 + $0x6a] sm:$0xff] }
 0x6a4   :  { %v15209_v37 = vpop.f32.mrb[59].mxu0 }
 0x6a5   :  { %v5155_v37 = vld [vmem:[#allocation2 + $0x62] sm:$0xff] }
 0x6a7   :  { %15435 = vmatmul.mubr.msk.bf16.gmra.mrb[32].mxu1 %vm132_vm0, %v19316_v57 }
 0x6a8   :  { %15438 = vmatprep.mubr.msk.bf16.mxu1 %vm17204_vm1, %v20779_v30 }
 0x6a9   :  { %v19842_v51 = vpop.f32.mrb[60].mxu0 }
 0x6aa   :  { %v15212_v17 = vpop.f32.mrb[61].mxu0 }
 0x6ab   :  { %v19844_v12 = vpop.f32.mrb[62].mxu0  ;;  %v5178_v17 = vpack.c.bf16 %v5156_v28, %v5155_v37  ;;  %v17098_v28 = vld [vmem:[%s20677_s2 + $0x120] sm:$0xff]  }
 0x6ac   :  { %v15213_v24 = vpop.f32.mrb[63].mxu0  ;;  %v5171_v37 = vld [vmem:[#allocation2 + $0xe2] sm:$0xff]  ;;  %15591 = vmatpush3.bf16.msra.mxu0 %v17098_v28 }
 0x6ad   :  { %v5158_v24 = vld [vmem:[#allocation2 + $0x7a] sm:$0xff]  ;;  %15592 = vmatprep.subr.bf16.mxu0 %v20779_v30 }
 0x6af   :  { %15439 = vmatmul.mubr.msk.bf16.gmra.mrb[36].mxu1 %vm132_vm0, %v19341_v36 }
 0x6b0   :  { %15442 = vmatprep.mubr.msk.bf16.mxu1 %vm17204_vm1, %v20779_v30 }
 0x6b1   :  { %v19850_v52 = vpop.f32.mrb[64].mxu0 }
 0x6b2   :  { %v15216_v19 = vpop.f32.mrb[65].mxu0 }
 0x6b3   :  { %v19852_v33 = vpop.f32.mrb[66].mxu0  ;;  %v5157_v19 = vld [vmem:[#allocation2 + $0x72] sm:$0xff] }
 0x6b4   :  { %v15217_v57 = vpop.f32.mrb[67].mxu0 }
 0x6b5   :  { %v5179_v57 = vpack.c.bf16 %v5158_v24, %v5157_v19  ;;  %v17099_v24 = vld [vmem:[%s20677_s2 + $0x128] sm:$0xff]  }
 0x6b6   :  { %15593 = vmatpush3.bf16.msra.mxu0 %v17099_v24 }
 0x6b7   :  { %15443 = vmatmul.mubr.msk.bf16.gmra.mrb[40].mxu1 %vm132_vm0, %v19362_v41 }
 0x6b8   :  { %15446 = vmatprep.mubr.msk.bf16.mxu1 %vm17204_vm1, %v20779_v30 }
 0x6b9   :  { %v19858_v25 = vpop.f32.mrb[68].mxu0 }
 0x6ba   :  { %v15220_v44 = vpop.f32.mrb[69].mxu0 }
 0x6bb   :  { %v19860_v11 = vpop.f32.mrb[70].mxu0  ;;  %v5160_v44 = vld [vmem:[#allocation2 + $0x8a] sm:$0xff] }
 0x6bc   :  { %v15221_v36 = vpop.f32.mrb[71].mxu0 }
 0x6bd   :  { %v5159_v36 = vld [vmem:[#allocation2 + $0x82] sm:$0xff] }
 0x6bf   :  { %15447 = vmatmul.mubr.msk.bf16.gmra.mrb[44].mxu1 %vm132_vm0, %v19386_v23 }
 0x6c0   :  { %15450 = vmatprep.mubr.msk.bf16.mxu1 %vm17204_vm1, %v20779_v30 }
 0x6c1   :  { %v19866_v43 = vpop.f32.mrb[72].mxu0 }
 0x6c2   :  { %v15224_v56 = vpop.f32.mrb[73].mxu0 }
 0x6c3   :  { %v19868_v31 = vpop.f32.mrb[74].mxu0  ;;  %v5180_v56 = vpack.c.bf16 %v5160_v44, %v5159_v36  ;;  %v5174_v44 = vld [vmem:[#allocation2 + $0xfa] sm:$0xff] }
 0x6c4   :  { %v15225_v41 = vpop.f32.mrb[75].mxu0 }
 0x6c5   :  { %v5162_v41 = vld [vmem:[#allocation2 + $0x9a] sm:$0xff] }
 0x6c7   :  { %15451 = vmatmul.mubr.msk.bf16.gmra.mrb[48].mxu1 %vm132_vm0, %v19416_v29  ;;  %v4920_v29 = vld [vmem:[#allocation2 + $0xf8] sm:$0xff] }
 0x6c8   :  { %15454 = vmatprep.mubr.msk.bf16.mxu1 %vm17204_vm1, %v20779_v30 }
 0x6c9   :  { %v19874_v15 = vpop.f32.mrb[76].mxu0 }
 0x6ca   :  { %v15228_v14 = vpop.f32.mrb[77].mxu0 }
 0x6cb   :  { %v19876_v35 = vpop.f32.mrb[78].mxu0  ;;  %v5161_v14 = vld [vmem:[#allocation2 + $0x92] sm:$0xff] }
 0x6cc   :  { %v15229_v23 = vpop.f32.mrb[79].mxu0 }
 0x6cd   :  { %v5181_v23 = vpack.c.bf16 %v5162_v41, %v5161_v14  ;;  %v20843_v14 = vpack.c.bf16 %v19312_v6, %v19310_v32  ;;  %v5418_v32 = vld [vmem:[#allocation2 + $0xac] sm:$0xff]  ;;  %v5417_v6 = vld [vmem:[#allocation2 + $0xa4] sm:$0xff] }
 0x6ce   :  { %v5436_v4 = vpack.c.bf16 %v5418_v32, %v5417_v6 }
 0x6cf   :  { %15455 = vmatmul.mubr.msk.bf16.gmra.mrb[0].mxu1 %vm132_vm0, %v19441_v53  ;;  %v4933_v53 = vpack.c.bf16 %v4920_v29, %v19801_v39  ;;  %v17097_v39 = vld [vmem:[%s20677_s2 + $0x118] sm:$0xff]   ;;  %v5164_v29 = vld [vmem:[#allocation2 + $0xaa] sm:$0xff]  ;;  %s17205_s2 = smov [#allocation5]  }
 0x6d0   :  { %15458 = vmatprep.mubr.msk.bf16.mxu1 %vm17204_vm1, %v20779_v30  ;;  %s128_s9 = sshll.u32 %s17205_s2, 4  ;;  %s129_s9 = int_to_ptr.vmem [resolvable:$true] %s128_s9 }
 0x6d7   :  { %15459 = vmatmul.mubr.msk.bf16.gmra.mrb[4].mxu1 %vm132_vm0, %v19462_v5  ;;  %v4921_v5 = vld [vmem:[#allocation2 + $0x100] sm:$0xff] }
 0x6d8   :  { %15462 = vmatprep.mubr.msk.bf16.mxu1 %vm17204_vm1, %v20779_v30  ;;  %v4934_v40 = vpack.c.bf16 %v4921_v5, %v4921_v5 }
 0x6df   :  { %15463 = vmatmul.mubr.msk.bf16.gmra.mrb[8].mxu1 %vm132_vm0, %v19482_v2  ;;  %v5152_v2 = vld [vmem:[#allocation2 + $0x4a] sm:$0xff] }
 0x6e0   :  { %15466 = vmatprep.mubr.msk.bf16.mxu1 %vm17204_vm1, %v20779_v30 }
 0x6e7   :  { %15467 = vmatmul.mubr.msk.bf16.gmra.mrb[12].mxu1 %vm132_vm0, %v19793_v18  ;;  %v5151_v18 = vld [vmem:[#allocation2 + $0x42] sm:$0xff] }
 0x6e8   :  { %15470 = vmatprep.mubr.msk.bf16.mxu1 %vm17204_vm1, %v20779_v30  ;;  %v5176_v22 = vpack.c.bf16 %v5152_v2, %v5151_v18  ;;  %v5165_v2 = vld [vmem:[#allocation2 + $0xb2] sm:$0xff] }
 0x6ef   :  { %15471 = vmatmul.mubr.msk.bf16.gmra.mrb[16].mxu1 %vm132_vm0, %v4933_v53  ;;  %v5163_v53 = vld [vmem:[#allocation2 + $0xa2] sm:$0xff] }
 0x6f0   :  { %15474 = vmatprep.mubr.msk.bf16.mxu1 %vm17204_vm1, %v20779_v30  ;;  %v5182_v5 = vpack.c.bf16 %v5164_v29, %v5163_v53  ;;  %v5422_v29 = vld [vmem:[#allocation2 + $0xcc] sm:$0xff]  ;;  %v5421_v53 = vld [vmem:[#allocation2 + $0xc4] sm:$0xff] }
 0x6f7   :  { %15475 = vmatmul.mubr.msk.bf16.gmra.mrb[20].mxu1 %vm132_vm0, %v4934_v40  ;;  %v5166_v40 = vld [vmem:[#allocation2 + $0xba] sm:$0xff] }
 0x6f8   :  { %15482 = vmatprep.mubr.msk.bf16.mxu1 %vm17204_vm1, %v20779_v30  ;;  %v5183_v18 = vpack.c.bf16 %v5166_v40, %v5165_v2  ;;  %v5423_v40 = vld [vmem:[#allocation2 + $0xd4] sm:$0xff]  ;;  %v5424_v2 = vld [vmem:[#allocation2 + $0xdc] sm:$0xff] }
 0x6ff   :  { %15483 = vmatmul.mubr.msk.bf16.vlgmr.msra.gmra.mrb[24].mxu1 %vm132_vm0, %v5176_v22  ;;  %v5167_v22 = vld [vmem:[#allocation2 + $0xc2] sm:$0xff] }
 0x700   :  { %15535 = vmatpush3.bf16.msra.mxu1 %v17096_v16  ;;  %15486 = vmatprep.mubr.msk.bf16.mxu1 %vm17204_vm1, %v20779_v30  ;;  %v5168_v16 = vld [vmem:[#allocation2 + $0xca] sm:$0xff] }
 0x701   :  { %15536 = vmatprep.subr.bf16.mxu1 %v20779_v30 }
 0x704   :  { %15537 = vmatpush3.bf16.msra.mxu1 %v17097_v39  ;;  %v5184_v39 = vpack.c.bf16 %v5168_v16, %v5167_v22  ;;  %v5425_v16 = vld [vmem:[#allocation2 + $0xe4] sm:$0xff] }
 0x705   :  { %v5440_v22 = vpack.c.bf16 %v19639_v21, %v5425_v16  ;;  %v20845_v21 = vld [vmem:[#allocation32_spill] sm:$0xff] }
 0x707   :  { %15487 = vmatmul.mubr.msk.bf16.gmra.mrb[28].mxu1 %vm132_vm0, %v5177_v38  ;;  %v5185_v38 = vpack.c.bf16 %v5170_v48, %v5169_v8  ;;  %v5428_v8 = vld [vmem:[#allocation2 + $0xfc] sm:$0xff] }
 0x708   :  { %15490 = vmatprep.mubr.msk.bf16.mxu1 %vm17204_vm1, %v20779_v30 }
 0x70f   :  { %15491 = vmatmul.mubr.msk.bf16.gmra.mrb[32].mxu1 %vm132_vm0, %v5178_v17  ;;  %v5172_v17 = vld [vmem:[#allocation2 + $0xea] sm:$0xff] }
 0x710   :  { %15494 = vmatprep.mubr.msk.bf16.mxu1 %vm17204_vm1, %v20779_v30  ;;  %v5186_v19 = vpack.c.bf16 %v5172_v17, %v5171_v37  ;;  %v20005_v37 = vld [vmem:[#allocation7 + $0x8] sm:$0xff]  ;;  %v20846_v17 = vsub.s32 5, %v20845_v21 }
 0x712   :  { %v20010_v24 = vrot.slane %v20005_v37, %v20846_v17 }
 0x717   :  { %15495 = vmatmul.mubr.msk.bf16.gmra.mrb[36].mxu1 %vm132_vm0, %v5179_v57  ;;  %v5173_v57 = vld [vmem:[#allocation2 + $0xf2] sm:$0xff] }
 0x718   :  { %15498 = vmatprep.mubr.msk.bf16.mxu1 %vm17204_vm1, %v20779_v30  ;;  %v5187_v36 = vpack.c.bf16 %v5174_v44, %v5173_v57  ;;  %v20847_v44 = vsub.s32 6, %v20845_v21 }
 0x71f   :  { %15499 = vmatmul.mubr.msk.bf16.gmra.mrb[40].mxu1 %vm132_vm0, %v5180_v56  ;;  %v5175_v56 = vld [vmem:[#allocation2 + $0x102] sm:$0xff] }
 0x720   :  { %15502 = vmatprep.mubr.msk.bf16.mxu1 %vm17204_vm1, %v20779_v30  ;;  %v5188_v41 = vpack.c.bf16 %v5175_v56, %v5175_v56 }
 0x727   :  { %15503 = vmatmul.mubr.msk.bf16.gmra.mrb[44].mxu1 %vm132_vm0, %v5181_v23 }
 0x728   :  { %15506 = vmatprep.mubr.msk.bf16.mxu1 %vm17204_vm1, %v20779_v30 }
 0x72f   :  { %15507 = vmatmul.mubr.msk.bf16.gmra.mrb[48].mxu1 %vm132_vm0, %v5182_v5  ;;  %v5438_v5 = vpack.c.bf16 %v5422_v29, %v5421_v53 }
 0x730   :  { %15510 = vmatprep.mubr.msk.bf16.mxu1 %vm17204_vm1, %v20779_v30 }
 0x737   :  { %15511 = vmatmul.mubr.msk.bf16.gmra.mrb[0].mxu1 %vm132_vm0, %v5183_v18  ;;  %v5439_v18 = vpack.c.bf16 %v5424_v2, %v5423_v40 }
 0x738   :  { %15514 = vmatprep.mubr.msk.bf16.mxu1 %vm17204_vm1, %v20779_v30 }
 0x73f   :  { %15515 = vmatmul.mubr.msk.bf16.gmra.mrb[4].mxu1 %vm132_vm0, %v5184_v39  ;;  %v5427_v39 = vld [vmem:[#allocation2 + $0xf4] sm:$0xff] }
 0x740   :  { %15518 = vmatprep.mubr.msk.bf16.mxu1 %vm17204_vm1, %v20779_v30  ;;  %v5441_v48 = vpack.c.bf16 %v5428_v8, %v5427_v39 }
 0x747   :  { %15519 = vmatmul.mubr.msk.bf16.gmra.mrb[8].mxu1 %vm132_vm0, %v5185_v38  ;;  %v5429_v38 = vld [vmem:[#allocation2 + $0x104] sm:$0xff] }
 0x748   :  { %15522 = vmatprep.mubr.msk.bf16.mxu1 %vm17204_vm1, %v20779_v30  ;;  %v5442_v28 = vpack.c.bf16 %v5429_v38, %v5429_v38 }
 0x74f   :  { %15523 = vmatmul.mubr.msk.bf16.gmra.mrb[12].mxu1 %vm132_vm0, %v5186_v19 }
 0x750   :  { %15526 = vmatprep.mubr.msk.bf16.mxu1 %vm17204_vm1, %v20779_v30 }
 0x757   :  { %15527 = vmatmul.mubr.msk.bf16.gmra.mrb[16].mxu1 %vm132_vm0, %v5187_v36  ;;  %v20016_v36 = vrot.slane %v20005_v37, %v20847_v44 }
 0x758   :  { %15530 = vmatprep.mubr.msk.bf16.mxu1 %vm17204_vm1, %v20779_v30 }
 0x75f   :  { %15531 = vmatmul.mubr.msk.bf16.gmra.mrb[20].mxu1 %vm132_vm0, %v5188_v41 }
 0x760   :  { %15538 = vmatprep.mubr.msk.bf16.mxu1 %vm17204_vm1, %v20779_v30 }
 0x767   :  { %15539 = vmatmul.mubr.msk.bf16.vlgmr.msra.gmra.mrb[24].mxu1 %vm132_vm0, %v5430_v54  ;;  %v5434_v54 = vpack.c.bf16 %v5414_v46, %v19569_v60  ;;  %v5419_v60 = vld [vmem:[#allocation2 + $0xb4] sm:$0xff] }
 0x768   :  { %15542 = vmatprep.mubr.msk.bf16.mxu1 %vm17204_vm1, %v20779_v30  ;;  %v5437_v23 = vpack.c.bf16 %v5420_v47, %v5419_v60 }
 0x76f   :  { %15543 = vmatmul.mubr.msk.bf16.gmra.mrb[28].mxu1 %vm132_vm0, %v5431_v55  ;;  %v5435_v55 = vpack.c.bf16 %v5416_v34, %v5415_v45 }
 0x770   :  { %15546 = vmatprep.mubr.msk.bf16.mxu1 %vm17204_vm1, %v20779_v30 }
 0x777   :  { %15547 = vmatmul.mubr.msk.bf16.gmra.mrb[32].mxu1 %vm132_vm0, %v20843_v14 }
 0x778   :  { %15550 = vmatprep.mubr.msk.bf16.mxu1 %vm17204_vm1, %v20779_v30 }
 0x77f   :  { %15551 = vmatmul.mubr.msk.bf16.gmra.mrb[36].mxu1 %vm132_vm0, %v20844_v7 }
 0x780   :  { %15554 = vmatprep.mubr.msk.bf16.mxu1 %vm17204_vm1, %v20779_v30 }
 0x787   :  { %15555 = vmatmul.mubr.msk.bf16.gmra.mrb[40].mxu1 %vm132_vm0, %v5434_v54 }
 0x788   :  { %15558 = vmatprep.mubr.msk.bf16.mxu1 %vm17204_vm1, %v20779_v30 }
 0x78f   :  { %15559 = vmatmul.mubr.msk.bf16.gmra.mrb[44].mxu1 %vm132_vm0, %v5435_v55 }
 0x790   :  { %15562 = vmatprep.mubr.msk.bf16.mxu1 %vm17204_vm1, %v20779_v30 }
 0x797   :  { %15563 = vmatmul.mubr.msk.bf16.gmra.mrb[48].mxu1 %vm132_vm0, %v5436_v4 }
 0x798   :  { %15566 = vmatprep.mubr.msk.bf16.mxu1 %vm17204_vm1, %v20779_v30 }
 0x79f   :  { %15567 = vmatmul.mubr.msk.bf16.gmra.mrb[0].mxu1 %vm132_vm0, %v5437_v23 }
 0x7a0   :  { %15570 = vmatprep.mubr.msk.bf16.mxu1 %vm17204_vm1, %v20779_v30 }
 0x7a7   :  { %15571 = vmatmul.mubr.msk.bf16.gmra.mrb[4].mxu1 %vm132_vm0, %v5438_v5 }
 0x7a8   :  { %15574 = vmatprep.mubr.msk.bf16.mxu1 %vm17204_vm1, %v20779_v30 }
 0x7af   :  { %15575 = vmatmul.mubr.msk.bf16.gmra.mrb[8].mxu1 %vm132_vm0, %v5439_v18 }
 0x7b0   :  { %15578 = vmatprep.mubr.msk.bf16.mxu1 %vm17204_vm1, %v20779_v30 }
 0x7b7   :  { %15579 = vmatmul.mubr.msk.bf16.gmra.mrb[12].mxu1 %vm132_vm0, %v5440_v22 }
 0x7b8   :  { %15582 = vmatprep.mubr.msk.bf16.mxu1 %vm17204_vm1, %v20779_v30 }
 0x7bf   :  { %15583 = vmatmul.mubr.msk.bf16.gmra.mrb[16].mxu1 %vm132_vm0, %v5441_v48 }
 0x7c0   :  { %15586 = vmatprep.mubr.msk.bf16.mxu1 %vm17204_vm1, %v20779_v30 }
 0x7c7   :  { %15587 = vmatmul.mubr.msk.bf16.gmra.mrb[20].mxu1 %vm132_vm0, %v5442_v28 }
 0x83a   :  { %v5532_v19 = vpop.f32.mrb[24].mxu1 }
 0x83b   :  { %v15650_v57 = vadd.f32 %v5532_v19, %v19825_v49  ;;  %v15540_v56 = vpop.f32.mrb[25].mxu1 }
 0x83c   :  { %v5535_v41 = vpop.f32.mrb[26].mxu1 }
 0x83d   :  { %v5663_v14 = vmul.f32 %v15650_v57, %v20010_v24  ;;  %v15651_v7 = vadd.f32 %v5535_v41, %v19827_v13  ;;  %v15541_v46 = vpop.f32.mrb[27].mxu1 }
 0x83f   :  { %v5692_v54 = vadd.f32 %v20016_v36, %v5663_v14  ;;  %v5664_v34 = vmul.f32 %v15651_v7, %v20010_v24 }
 0x841   :  { %v5693_v45 = vadd.f32 %v20016_v36, %v5664_v34  ;;  %v5717_v49 = vmax.f32 %v5692_v54, 0.0 }
 0x842   :  { %v5540_v55 = vpop.f32.mrb[28].mxu1 }
 0x843   :  { %v5718_v32 = vmax.f32 %v5693_v45, 0.0  ;;  %v15652_v6 = vadd.f32 %v5540_v55, %v19834_v58  ;;  %v15544_v4 = vpop.f32.mrb[29].mxu1 }
 0x844   :  { %v5543_v47 = vpop.f32.mrb[30].mxu1 }
 0x845   :  { %v5742_v60 = vpack.c.bf16 %v5718_v32, %v5717_v49  ;;  %v5665_v23 = vmul.f32 %v15652_v6, %v20010_v24  ;;  %v15653_v29 = vadd.f32 %v5543_v47, %v19836_v10  ;;  %v15545_v13 = vpop.f32.mrb[31].mxu1 }
 0x847   :  { %v5694_v53 = vadd.f32 %v20016_v36, %v5665_v23  ;;  %v5666_v5 = vmul.f32 %v15653_v29, %v20010_v24  ;;  %15595 = vmatmul.mubr.msk.bf16.vlgmr.msra.gmra.mrb[104].mxu0 %vm132_vm0, %v5742_v60 }
 0x848   :  { %15598 = vmatprep.mubr.msk.bf16.mxu0 %vm17204_vm1, %v20779_v30 }
 0x849   :  { %v5695_v40 = vadd.f32 %v20016_v36, %v5666_v5  ;;  %v5719_v2 = vmax.f32 %v5694_v53, 0.0 }
 0x84a   :  { %v5548_v58 = vpop.f32.mrb[32].mxu1 }
 0x84b   :  { %v5720_v18 = vmax.f32 %v5695_v40, 0.0  ;;  %v15654_v16 = vadd.f32 %v5548_v58, %v19842_v51  ;;  %v15548_v22 = vpop.f32.mrb[33].mxu1 }
 0x84c   :  { %v5551_v39 = vpop.f32.mrb[34].mxu1 }
 0x84d   :  { %v5743_v10 = vpack.c.bf16 %v5720_v18, %v5719_v2  ;;  %v5667_v8 = vmul.f32 %v15654_v16, %v20010_v24  ;;  %v15655_v48 = vadd.f32 %v5551_v39, %v19844_v12  ;;  %v15549_v38 = vpop.f32.mrb[35].mxu1 }
 0x84f   :  { %v5696_v28 = vadd.f32 %v20016_v36, %v5667_v8  ;;  %v5668_v17 = vmul.f32 %v15655_v48, %v20010_v24  ;;  %15599 = vmatmul.mubr.msk.bf16.gmra.mrb[108].mxu0 %vm132_vm0, %v5743_v10 }
 0x850   :  { %15602 = vmatprep.mubr.msk.bf16.mxu0 %vm17204_vm1, %v20779_v30 }
 0x851   :  { %v5697_v19 = vadd.f32 %v20016_v36, %v5668_v17  ;;  %v5721_v57 = vmax.f32 %v5696_v28, 0.0 }
 0x852   :  { %v5556_v51 = vpop.f32.mrb[36].mxu1 }
 0x853   :  { %v5722_v44 = vmax.f32 %v5697_v19, 0.0  ;;  %v15656_v56 = vadd.f32 %v5556_v51, %v19850_v52  ;;  %v15552_v41 = vpop.f32.mrb[37].mxu1 }
 0x854   :  { %v5559_v14 = vpop.f32.mrb[38].mxu1 }
 0x855   :  { %v5744_v12 = vpack.c.bf16 %v5722_v44, %v5721_v57  ;;  %v5669_v7 = vmul.f32 %v15656_v56, %v20010_v24  ;;  %v15657_v46 = vadd.f32 %v5559_v14, %v19852_v33  ;;  %v15553_v54 = vpop.f32.mrb[39].mxu1 }
 0x857   :  { %v5698_v34 = vadd.f32 %v20016_v36, %v5669_v7  ;;  %v5670_v45 = vmul.f32 %v15657_v46, %v20010_v24  ;;  %15603 = vmatmul.mubr.msk.bf16.gmra.mrb[112].mxu0 %vm132_vm0, %v5744_v12 }
 0x858   :  { %15606 = vmatprep.mubr.msk.bf16.mxu0 %vm17204_vm1, %v20779_v30 }
 0x859   :  { %v5699_v55 = vadd.f32 %v20016_v36, %v5670_v45  ;;  %v5723_v49 = vmax.f32 %v5698_v34, 0.0 }
 0x85a   :  { %v5564_v52 = vpop.f32.mrb[40].mxu1 }
 0x85b   :  { %v5724_v32 = vmax.f32 %v5699_v55, 0.0  ;;  %v15658_v6 = vadd.f32 %v5564_v52, %v19858_v25  ;;  %v15556_v4 = vpop.f32.mrb[41].mxu1 }
 0x85c   :  { %v5567_v47 = vpop.f32.mrb[42].mxu1 }
 0x85d   :  { %v5745_v33 = vpack.c.bf16 %v5724_v32, %v5723_v49  ;;  %v5671_v60 = vmul.f32 %v15658_v6, %v20010_v24  ;;  %v15659_v23 = vadd.f32 %v5567_v47, %v19860_v11  ;;  %v15557_v29 = vpop.f32.mrb[43].mxu1 }
 0x85f   :  { %v5700_v13 = vadd.f32 %v20016_v36, %v5671_v60  ;;  %v5672_v53 = vmul.f32 %v15659_v23, %v20010_v24  ;;  %15607 = vmatmul.mubr.msk.bf16.gmra.mrb[116].mxu0 %vm132_vm0, %v5745_v33 }
 0x860   :  { %15610 = vmatprep.mubr.msk.bf16.mxu0 %vm17204_vm1, %v20779_v30 }
 0x861   :  { %v5701_v5 = vadd.f32 %v20016_v36, %v5672_v53  ;;  %v5725_v40 = vmax.f32 %v5700_v13, 0.0 }
 0x862   :  { %v5572_v25 = vpop.f32.mrb[44].mxu1 }
 0x863   :  { %v5726_v58 = vmax.f32 %v5701_v5, 0.0  ;;  %v15660_v2 = vadd.f32 %v5572_v25, %v19866_v43  ;;  %v15560_v18 = vpop.f32.mrb[45].mxu1 }
 0x864   :  { %v5575_v16 = vpop.f32.mrb[46].mxu1 }
 0x865   :  { %v5746_v11 = vpack.c.bf16 %v5726_v58, %v5725_v40  ;;  %v5673_v22 = vmul.f32 %v15660_v2, %v20010_v24  ;;  %v15661_v39 = vadd.f32 %v5575_v16, %v19868_v31  ;;  %v15561_v10 = vpop.f32.mrb[47].mxu1 }
 0x867   :  { %v5702_v8 = vadd.f32 %v20016_v36, %v5673_v22  ;;  %v5674_v48 = vmul.f32 %v15661_v39, %v20010_v24  ;;  %15611 = vmatmul.mubr.msk.bf16.gmra.mrb[120].mxu0 %vm132_vm0, %v5746_v11 }
 0x868   :  { %15614 = vmatprep.mubr.msk.bf16.mxu0 %vm17204_vm1, %v20779_v30 }
 0x869   :  { %v5703_v38 = vadd.f32 %v20016_v36, %v5674_v48  ;;  %v5727_v28 = vmax.f32 %v5702_v8, 0.0 }
 0x86a   :  { %v5580_v43 = vpop.f32.mrb[48].mxu1 }
 0x86b   :  { %v5728_v17 = vmax.f32 %v5703_v38, 0.0  ;;  %v15662_v19 = vadd.f32 %v5580_v43, %v19874_v15  ;;  %v15564_v51 = vpop.f32.mrb[49].mxu1 }
 0x86c   :  { %v5583_v57 = vpop.f32.mrb[50].mxu1 }
 0x86d   :  { %v5747_v31 = vpack.c.bf16 %v5728_v17, %v5727_v28  ;;  %v5675_v44 = vmul.f32 %v15662_v19, %v20010_v24  ;;  %v15663_v56 = vadd.f32 %v5583_v57, %v19876_v35  ;;  %v15565_v41 = vpop.f32.mrb[51].mxu1 }
 0x86f   :  { %v5704_v14 = vadd.f32 %v20016_v36, %v5675_v44  ;;  %v5676_v12 = vmul.f32 %v15663_v56, %v20010_v24  ;;  %15615 = vmatmul.mubr.msk.bf16.gmra.mrb[124].mxu0 %vm132_vm0, %v5747_v31 }
 0x870   :  { %15618 = vmatprep.mubr.msk.bf16.mxu0 %vm17204_vm1, %v20779_v30 }
 0x871   :  { %v5705_v7 = vadd.f32 %v20016_v36, %v5676_v12  ;;  %v5729_v46 = vmax.f32 %v5704_v14, 0.0 }
 0x872   :  { %v5588_v15 = vpop.f32.mrb[0].mxu1 }
 0x873   :  { %v5730_v54 = vmax.f32 %v5705_v7, 0.0  ;;  %v15664_v34 = vadd.f32 %v5588_v15, %v19767_v27  ;;  %v15568_v45 = vpop.f32.mrb[1].mxu1 }
 0x874   :  { %v5591_v55 = vpop.f32.mrb[2].mxu1 }
 0x875   :  { %v5748_v35 = vpack.c.bf16 %v5730_v54, %v5729_v46  ;;  %v5677_v52 = vmul.f32 %v15664_v34, %v20010_v24  ;;  %v15665_v49 = vadd.f32 %v5591_v55, %v19769_v1  ;;  %v15569_v32 = vpop.f32.mrb[3].mxu1 }
 0x877   :  { %v5706_v6 = vadd.f32 %v20016_v36, %v5677_v52  ;;  %v5678_v4 = vmul.f32 %v15665_v49, %v20010_v24  ;;  %15619 = vmatmul.mubr.msk.bf16.gmra.mrb[128].mxu0 %vm132_vm0, %v5748_v35 }
 0x878   :  { %15622 = vmatprep.mubr.msk.bf16.mxu0 %vm17204_vm1, %v20779_v30 }
 0x879   :  { %v5707_v47 = vadd.f32 %v20016_v36, %v5678_v4  ;;  %v5731_v33 = vmax.f32 %v5706_v6, 0.0 }
 0x87a   :  { %v5596_v27 = vpop.f32.mrb[4].mxu1 }
 0x87b   :  { %v5732_v60 = vmax.f32 %v5707_v47, 0.0  ;;  %v15666_v23 = vadd.f32 %v5596_v27, %v19775_v63  ;;  %v15572_v29 = vpop.f32.mrb[5].mxu1 }
 0x87c   :  { %v5599_v13 = vpop.f32.mrb[6].mxu1 }
 0x87d   :  { %v5749_v1 = vpack.c.bf16 %v5732_v60, %v5731_v33  ;;  %v5679_v53 = vmul.f32 %v15666_v23, %v20010_v24  ;;  %v15667_v5 = vadd.f32 %v5599_v13, %v19777_v62  ;;  %v15573_v25 = vpop.f32.mrb[7].mxu1 }
 0x87f   :  { %v5708_v40 = vadd.f32 %v20016_v36, %v5679_v53  ;;  %v5680_v58 = vmul.f32 %v15667_v5, %v20010_v24  ;;  %15623 = vmatmul.mubr.msk.bf16.gmra.mrb[132].mxu0 %vm132_vm0, %v5749_v1 }
 0x880   :  { %15626 = vmatprep.mubr.msk.bf16.mxu0 %vm17204_vm1, %v20779_v30 }
 0x881   :  { %v5709_v2 = vadd.f32 %v20016_v36, %v5680_v58  ;;  %v5733_v18 = vmax.f32 %v5708_v40, 0.0 }
 0x882   :  { %v5604_v63 = vpop.f32.mrb[8].mxu1 }
 0x883   :  { %v5734_v16 = vmax.f32 %v5709_v2, 0.0  ;;  %v15668_v11 = vadd.f32 %v5604_v63, %v19783_v50  ;;  %v15576_v22 = vpop.f32.mrb[9].mxu1 }
 0x884   :  { %v5607_v39 = vpop.f32.mrb[10].mxu1 }
 0x885   :  { %v5750_v62 = vpack.c.bf16 %v5734_v16, %v5733_v18  ;;  %v5681_v10 = vmul.f32 %v15668_v11, %v20010_v24  ;;  %v15669_v8 = vadd.f32 %v5607_v39, %v19785_v26  ;;  %v15577_v48 = vpop.f32.mrb[11].mxu1 }
 0x887   :  { %v5710_v38 = vadd.f32 %v20016_v36, %v5681_v10  ;;  %v5682_v43 = vmul.f32 %v15669_v8, %v20010_v24  ;;  %15627 = vmatmul.mubr.msk.bf16.gmra.mrb[136].mxu0 %vm132_vm0, %v5750_v62 }
 0x888   :  { %15630 = vmatprep.mubr.msk.bf16.mxu0 %vm17204_vm1, %v20779_v30 }
 0x889   :  { %v5711_v28 = vadd.f32 %v20016_v36, %v5682_v43  ;;  %v5735_v17 = vmax.f32 %v5710_v38, 0.0 }
 0x88a   :  { %v5612_v50 = vpop.f32.mrb[12].mxu1 }
 0x88b   :  { %v5736_v19 = vmax.f32 %v5711_v28, 0.0  ;;  %v15670_v51 = vadd.f32 %v5612_v50, %v19791_v20  ;;  %v15580_v57 = vpop.f32.mrb[13].mxu1 }
 0x88c   :  { %v5615_v31 = vpop.f32.mrb[14].mxu1 }
 0x88d   :  { %v5751_v26 = vpack.c.bf16 %v5736_v19, %v5735_v17  ;;  %v5683_v44 = vmul.f32 %v15670_v51, %v20010_v24  ;;  %v15671_v56 = vadd.f32 %v5615_v31, %v19795_v59  ;;  %v15581_v41 = vpop.f32.mrb[15].mxu1 }
 0x88f   :  { %v5712_v14 = vadd.f32 %v20016_v36, %v5683_v44  ;;  %v5684_v12 = vmul.f32 %v15671_v56, %v20010_v24  ;;  %15631 = vmatmul.mubr.msk.bf16.gmra.mrb[140].mxu0 %vm132_vm0, %v5751_v26 }
 0x890   :  { %15634 = vmatprep.mubr.msk.bf16.mxu0 %vm17204_vm1, %v20779_v30 }
 0x891   :  { %v5713_v7 = vadd.f32 %v20016_v36, %v5684_v12  ;;  %v5737_v15 = vmax.f32 %v5712_v14, 0.0 }
 0x892   :  { %v5620_v20 = vpop.f32.mrb[16].mxu1 }
 0x893   :  { %v5738_v46 = vmax.f32 %v5713_v7, 0.0  ;;  %v15672_v54 = vadd.f32 %v5620_v20, %v19803_v61  ;;  %v15584_v34 = vpop.f32.mrb[17].mxu1 }
 0x894   :  { %v5623_v45 = vpop.f32.mrb[18].mxu1 }
 0x895   :  { %v5752_v59 = vpack.c.bf16 %v5738_v46, %v5737_v15  ;;  %v5685_v55 = vmul.f32 %v15672_v54, %v20010_v24  ;;  %v15673_v35 = vadd.f32 %v5623_v45, %v19807_v3  ;;  %v15585_v52 = vpop.f32.mrb[19].mxu1 }
 0x897   :  { %v5714_v49 = vadd.f32 %v20016_v36, %v5685_v55  ;;  %v5686_v32 = vmul.f32 %v15673_v35, %v20010_v24  ;;  %15635 = vmatmul.mubr.msk.bf16.gmra.mrb[144].mxu0 %vm132_vm0, %v5752_v59 }
 0x898   :  { %15638 = vmatprep.mubr.msk.bf16.mxu0 %vm17204_vm1, %v20779_v30 }
 0x899   :  { %v5715_v6 = vadd.f32 %v20016_v36, %v5686_v32  ;;  %v5739_v4 = vmax.f32 %v5714_v49, 0.0 }
 0x89a   :  { %v5628_v61 = vpop.f32.mrb[20].mxu1 }
 0x89b   :  { %v5740_v47 = vmax.f32 %v5715_v6, 0.0  ;;  %v15674_v27 = vadd.f32 %v5628_v61, %v19812_v42  ;;  %v15588_v33 = vpop.f32.mrb[21].mxu1 }
 0x89c   :  { %v5631_v60 = vpop.f32.mrb[22].mxu1 }
 0x89d   :  { %v5753_v3 = vpack.c.bf16 %v5740_v47, %v5739_v4  ;;  %v5687_v23 = vmul.f32 %v15674_v27, %v20010_v24  ;;  %v15589_v29 = vpop.f32.mrb[23].mxu1 }
 0x89f   :  { %v5716_v13 = vadd.f32 %v20016_v36, %v5687_v23  ;;  %15639 = vmatmul.mubr.msk.bf16.gmra.mrb[148].mxu0 %vm132_vm0, %v5753_v3 }
 0x8a0   :  { %15642 = vmatprep.mubr.msk.bf16.mxu0 %vm17204_vm1, %v20779_v30 }
 0x8a1   :  { %v5741_v1 = vmax.f32 %v5716_v13, 0.0 }
 0x8a3   :  { %v5754_v53 = vpack.c.bf16 %v5741_v1, %v5741_v1 }
 0x8a7   :  { %15643 = vmatmul.mubr.msk.bf16.gmra.mrb[152].mxu0 %vm132_vm0, %v5754_v53 }
 0x8a8   :  { %17163 = shalt.err (!%p17160_p4)  }
 0x8a9   :  { %s17164_s18 = scalar_lea.vmem %s129_s9, 4096  ;;  %p17169_p6 = scmp.lt.s32.totalorder %s129_s9, %s129_s9 }
 0x8aa   :  { %p17165_p5 = scmp.ne.s32.totalorder %s129_s9, %s17164_s18  ;;  %p17170_p7 = scmp.lt.s32.totalorder %s17164_s18, %s17164_s18 }
 0x8ac   :  { %p17171_p8 = por %p17170_p7, %p17169_p6 }
 0x8ae   :  { %p17172_p9 = pnand %p17171_p8, %p17165_p5 }
 0x8b0   :  { %17175 = shalt.err (!%p17172_p9)  }
 0x8b1   :  { %131 = dma.hbm_to_vmem [thread:$0]  %s20682_s7, 4096, %s129_s9, [#allocation6 + $0x2]  ;;  %v20848_v5 = vsub.s32 7, %v20845_v21  ;;  %v20146_v40 = vld [vmem:[#allocation7 + $0x10] ss:$0 sm:$0xff] }
 0x8b3   :  { %v20144_v25 = vrot.slane %v20005_v37, %v20848_v5 }
 0x91a   :  { %v5844_v30 = vpop.f32.mrb[104].mxu0 }
 0x91b   :  { %v15596_v42 = vpop.f32.mrb[105].mxu0 }
 0x91c   :  { %v5846_v24 = vpop.f32.mrb[106].mxu0 }
 0x91d   :  { %v15597_v36 = vpop.f32.mrb[107].mxu0 }
 0x922   :  { %v5850_v58 = vpop.f32.mrb[108].mxu0 }
 0x923   :  { %v5941_v2 = vmul.f32 %v20144_v25, %v5850_v58  ;;  %v15600_v63 = vpop.f32.mrb[109].mxu0 }
 0x924   :  { %v5853_v18 = vpop.f32.mrb[110].mxu0 }
 0x925   :  { %v5961_v16 = vadd.f32 %v20146_v40, %v5941_v2  ;;  %v5942_v11 = vmul.f32 %v20144_v25, %v5853_v18  ;;  %v15601_v22 = vpop.f32.mrb[111].mxu0 }
 0x927   :  { %v5962_v39 = vadd.f32 %v20146_v40, %v5942_v11  ;;  %v5977_v62 = vmax.f32 %v5961_v16, 0.0 }
 0x929   :  { %v5978_v10 = vmax.f32 %v5962_v39, 0.0 }
 0x92a   :  { %v5858_v21 = vpop.f32.mrb[112].mxu0 }
 0x92b   :  { %v20152_v8 = vpack.c.bf16 %v5978_v10, %v5977_v62  ;;  %v5943_v37 = vmul.f32 %v20144_v25, %v5858_v21  ;;  %v15604_v48 = vpop.f32.mrb[113].mxu0 }
 0x92c   :  { %v5861_v38 = vpop.f32.mrb[114].mxu0 }
 0x92d   :  { %v5963_v43 = vadd.f32 %v20146_v40, %v5943_v37  ;;  %v5944_v28 = vmul.f32 %v20144_v25, %v5861_v38  ;;  %v15605_v50 = vpop.f32.mrb[115].mxu0 }
 0x92f   :  { %v5964_v17 = vadd.f32 %v20146_v40, %v5944_v28  ;;  %v5979_v19 = vmax.f32 %v5963_v43, 0.0 }
 0x931   :  { %v5980_v51 = vmax.f32 %v5964_v17, 0.0 }
 0x932   :  { %v5866_v57 = vpop.f32.mrb[116].mxu0 }
 0x933   :  { %v20158_v31 = vpack.c.bf16 %v5980_v51, %v5979_v19  ;;  %v5945_v26 = vmul.f32 %v20144_v25, %v5866_v57  ;;  %v15608_v44 = vpop.f32.mrb[117].mxu0 }
 0x934   :  { %v5869_v56 = vpop.f32.mrb[118].mxu0 }
 0x935   :  { %v5965_v41 = vadd.f32 %v20146_v40, %v5945_v26  ;;  %v5946_v14 = vmul.f32 %v20144_v25, %v5869_v56  ;;  %v15609_v12 = vpop.f32.mrb[119].mxu0 }
 0x937   :  { %v5966_v7 = vadd.f32 %v20146_v40, %v5946_v14  ;;  %v5981_v20 = vmax.f32 %v5965_v41, 0.0 }
 0x939   :  { %v5982_v15 = vmax.f32 %v5966_v7, 0.0 }
 0x93a   :  { %v5874_v46 = vpop.f32.mrb[120].mxu0 }
 0x93b   :  { %v20164_v54 = vpack.c.bf16 %v5982_v15, %v5981_v20  ;;  %v5947_v34 = vmul.f32 %v20144_v25, %v5874_v46  ;;  %v15612_v45 = vpop.f32.mrb[121].mxu0 }
 0x93c   :  { %v5877_v59 = vpop.f32.mrb[122].mxu0 }
 0x93d   :  { %v5967_v55 = vadd.f32 %v20146_v40, %v5947_v34  ;;  %v5948_v35 = vmul.f32 %v20144_v25, %v5877_v59  ;;  %v15613_v52 = vpop.f32.mrb[123].mxu0 }
 0x93f   :  { %v5968_v49 = vadd.f32 %v20146_v40, %v5948_v35  ;;  %v5983_v32 = vmax.f32 %v5967_v55, 0.0 }
 0x941   :  { %v5984_v6 = vmax.f32 %v5968_v49, 0.0 }
 0x942   :  { %v5882_v61 = vpop.f32.mrb[124].mxu0 }
 0x943   :  { %v20170_v4 = vpack.c.bf16 %v5984_v6, %v5983_v32  ;;  %v5949_v47 = vmul.f32 %v20144_v25, %v5882_v61  ;;  %v15616_v27 = vpop.f32.mrb[125].mxu0 }
 0x944   :  { %v5885_v33 = vpop.f32.mrb[126].mxu0 }
 0x945   :  { %v5969_v60 = vadd.f32 %v20146_v40, %v5949_v47  ;;  %v5950_v3 = vmul.f32 %v20144_v25, %v5885_v33  ;;  %v15617_v23 = vpop.f32.mrb[127].mxu0 }
 0x947   :  { %v5970_v29 = vadd.f32 %v20146_v40, %v5950_v3  ;;  %v5985_v13 = vmax.f32 %v5969_v60, 0.0 }
 0x949   :  { %v5986_v1 = vmax.f32 %v5970_v29, 0.0 }
 0x94a   :  { %v5890_v53 = vpop.f32.mrb[128].mxu0 }
 0x94b   :  { %v20176_v30 = vpack.c.bf16 %v5986_v1, %v5985_v13  ;;  %v5951_v42 = vmul.f32 %v20144_v25, %v5890_v53  ;;  %v15620_v24 = vpop.f32.mrb[129].mxu0 }
 0x94c   :  { %v5893_v36 = vpop.f32.mrb[130].mxu0 }
 0x94d   :  { %v5971_v5 = vadd.f32 %v20146_v40, %v5951_v42  ;;  %v5952_v58 = vmul.f32 %v20144_v25, %v5893_v36  ;;  %v15621_v2 = vpop.f32.mrb[131].mxu0 }
 0x94f   :  { %v5972_v63 = vadd.f32 %v20146_v40, %v5952_v58  ;;  %v5987_v18 = vmax.f32 %v5971_v5, 0.0 }
 0x951   :  { %v5988_v16 = vmax.f32 %v5972_v63, 0.0 }
 0x952   :  { %v5898_v11 = vpop.f32.mrb[132].mxu0 }
 0x953   :  { %v20182_v22 = vpack.c.bf16 %v5988_v16, %v5987_v18  ;;  %v5953_v39 = vmul.f32 %v20144_v25, %v5898_v11  ;;  %v15624_v62 = vpop.f32.mrb[133].mxu0 }
 0x954   :  { %v5901_v10 = vpop.f32.mrb[134].mxu0 }
 0x955   :  { %v5973_v21 = vadd.f32 %v20146_v40, %v5953_v39  ;;  %v5954_v37 = vmul.f32 %v20144_v25, %v5901_v10  ;;  %v15625_v48 = vpop.f32.mrb[135].mxu0 }
 0x957   :  { %v5974_v38 = vadd.f32 %v20146_v40, %v5954_v37  ;;  %v5989_v43 = vmax.f32 %v5973_v21, 0.0 }
 0x959   :  { %v5990_v28 = vmax.f32 %v5974_v38, 0.0 }
 0x95a   :  { %v5906_v50 = vpop.f32.mrb[136].mxu0 }
 0x95b   :  { %v20188_v17 = vpack.c.bf16 %v5990_v28, %v5989_v43  ;;  %v5955_v19 = vmul.f32 %v20144_v25, %v5906_v50  ;;  %v15628_v51 = vpop.f32.mrb[137].mxu0 }
 0x95c   :  { %v5909_v57 = vpop.f32.mrb[138].mxu0 }
 0x95d   :  { %v5975_v26 = vadd.f32 %v20146_v40, %v5955_v19  ;;  %v5956_v44 = vmul.f32 %v20144_v25, %v5909_v57  ;;  %v15629_v56 = vpop.f32.mrb[139].mxu0 }
 0x95f   :  { %v5976_v41 = vadd.f32 %v20146_v40, %v5956_v44  ;;  %v5991_v14 = vmax.f32 %v5975_v26, 0.0 }
 0x961   :  { %v5992_v12 = vmax.f32 %v5976_v41, 0.0 }
 0x962   :  { %v5914_v7 = vpop.f32.mrb[140].mxu0 }
 0x963   :  { %v20194_v20 = vpack.c.bf16 %v5992_v12, %v5991_v14  ;;  %v15632_v15 = vpop.f32.mrb[141].mxu0 }
 0x964   :  { %v5916_v46 = vpop.f32.mrb[142].mxu0 }
 0x965   :  { %v15633_v34 = vpop.f32.mrb[143].mxu0 }
 0x96a   :  { %v5920_v45 = vpop.f32.mrb[144].mxu0 }
 0x96b   :  { %v15636_v59 = vpop.f32.mrb[145].mxu0 }
 0x96c   :  { %v5922_v55 = vpop.f32.mrb[146].mxu0 }
 0x96d   :  { %v15637_v35 = vpop.f32.mrb[147].mxu0 }
 0x972   :  { %v5926_v52 = vpop.f32.mrb[148].mxu0 }
 0x973   :  { %v15640_v49 = vpop.f32.mrb[149].mxu0 }
 0x974   :  { %v5928_v32 = vpop.f32.mrb[150].mxu0 }
 0x975   :  { %v15641_v6 = vpop.f32.mrb[151].mxu0 }
 0x97a   :  { %v5932_v25 = vpop.f32.mrb[152].mxu0 }
 0x97b   :  { %v15644_v61 = vpop.f32.mrb[153].mxu0 }
 0x97c   :  { %v5934_v47 = vpop.f32.mrb[154].mxu0 }
 0x97d   :  { %v15645_v40 = vpop.f32.mrb[155].mxu0 }
 0x97e   :  { %17180 = dma.done.wait [#allocation6], 73728 }
 0x97f   :  { %17181 = vsyncadd [#allocation6], 4294893568  ;;  %v20849_v27 = vmov 0   ;;  %v6030_v33 = vld [vmem:[#allocation3 + $0x88] sm:$0xff]  ;;  %v6029_v60 = vld [vmem:[#allocation3 + $0x80] sm:$0xff]  ;;  %v6046_v13 = vrot.slane %v20152_v8, 4 }
 0x980   :  { %6082 = vmatprep.mubr.bf16.mxu1 %v20849_v27  ;;  %v6038_v3 = vld [vmem:[#allocation3 + $0xc8] sm:$0xff]  ;;  %6050 = vmatprep.subr.bf16.mxu1 %v6030_v33  ;;  %v6037_v23 = vld [vmem:[#allocation3 + $0xc0] sm:$0xff]  ;;  %v6032_v29 = vld [vmem:[#allocation3 + $0x98] sm:$0xff]  ;;  %v6214_v37 = vrot.slane %v20152_v8, 3  ;;  %v6398_v46 = vrot.slane %v20152_v8, 5 }
 0x981   :  { %6051 = vmatpush1.bf16.msra.mxu1 %v6029_v60  ;;  %v6031_v1 = vld [vmem:[#allocation3 + $0x90] sm:$0xff]  ;;  %v6040_v53 = vld [vmem:[#allocation3 + $0xd8] sm:$0xff]  ;;  %v6034_v24 = vld [vmem:[#allocation3 + $0xa8] sm:$0xff] }
 0x982   :  { %6052 = vmatprep.subr.bf16.mxu1 %v6038_v3  ;;  %v6039_v42 = vld [vmem:[#allocation3 + $0xd0] sm:$0xff]  ;;  %v6033_v36 = vld [vmem:[#allocation3 + $0xa0] sm:$0xff]  ;;  %v6042_v5 = vld [vmem:[#allocation3 + $0xe8] sm:$0xff] }
 0x983   :  { %v6041_v58 = vld [vmem:[#allocation3 + $0xe0] sm:$0xff]  ;;  %v6036_v2 = vld [vmem:[#allocation3 + $0xb8] sm:$0xff]  ;;  %v6035_v63 = vld [vmem:[#allocation3 + $0xb0] sm:$0xff] }
 0x984   :  { %v6044_v18 = vld [vmem:[#allocation3 + $0xf8] sm:$0xff]  ;;  %v6043_v16 = vld [vmem:[#allocation3 + $0xf0] sm:$0xff]  ;;  %v6014_v11 = vld [vmem:[#allocation3 + $0x8] sm:$0xff] }
 0x985   :  { %6053 = vmatpush1.bf16.msra.mxu1 %v6037_v23  ;;  %v6013_v39 = vld [vmem:[#allocation3] sm:$0xff]  ;;  %v6022_v62 = vld [vmem:[#allocation3 + $0x48] sm:$0xff]  ;;  %v6016_v21 = vld [vmem:[#allocation3 + $0x18] sm:$0xff]  ;;  %v6590_v23 = vrot.slane %v20152_v8, 6 }
 0x986   :  { %6091 = vmatprep.subr.bf16.mxu1 %v6032_v29  ;;  %v6021_v10 = vld [vmem:[#allocation3 + $0x40] sm:$0xff]  ;;  %v6015_v48 = vld [vmem:[#allocation3 + $0x10] sm:$0xff]  ;;  %v6024_v38 = vld [vmem:[#allocation3 + $0x58] sm:$0xff] }
 0x987   :  { %v6023_v43 = vld [vmem:[#allocation3 + $0x50] sm:$0xff]  ;;  %v6018_v28 = vld [vmem:[#allocation3 + $0x28] sm:$0xff]  ;;  %v6017_v50 = vld [vmem:[#allocation3 + $0x20] sm:$0xff] }
 0x988   :  { %14106 = vmatmul.mubr.msk.bf16.vlgmr.msra.gmra.mrb[52].mxu1 %vm132_vm0, %v6046_v13  ;;  %v6026_v19 = vld [vmem:[#allocation3 + $0x68] sm:$0xff]  ;;  %v6025_v51 = vld [vmem:[#allocation3 + $0x60] sm:$0xff]  ;;  %v6020_v57 = vld [vmem:[#allocation3 + $0x38] sm:$0xff] }
 0x989   :  { %6092 = vmatpush1.bf16.msra.mxu1 %v6031_v1  ;;  %6123 = vmatprep.mubr.bf16.mxu1 %v20849_v27  ;;  %v6019_v26 = vld [vmem:[#allocation3 + $0x30] sm:$0xff]  ;;  %v6028_v44 = vld [vmem:[#allocation3 + $0x78] sm:$0xff]  ;;  %v6383_v41 = vld [vmem:[#allocation3 + $0x108] sm:$0xff] }
 0x98a   :  { %6093 = vmatprep.subr.bf16.mxu1 %v6040_v53  ;;  %v6027_v56 = vld [vmem:[#allocation3 + $0x70] sm:$0xff]  ;;  %v6382_v14 = vld [vmem:[#allocation3 + $0x100] sm:$0xff]  ;;  %v6391_v12 = vld [vmem:[#allocation3 + $0x148] sm:$0xff] }
 0x98b   :  { %v6390_v7 = vld [vmem:[#allocation3 + $0x140] sm:$0xff]  ;;  %v6385_v15 = vld [vmem:[#allocation3 + $0x118] sm:$0xff]  ;;  %v6384_v34 = vld [vmem:[#allocation3 + $0x110] sm:$0xff] }
 0x98c   :  { %v6393_v45 = vld [vmem:[#allocation3 + $0x158] sm:$0xff]  ;;  %v6392_v59 = vld [vmem:[#allocation3 + $0x150] sm:$0xff]  ;;  %v6387_v55 = vld [vmem:[#allocation3 + $0x128] sm:$0xff] }
 0x98d   :  { %6094 = vmatpush1.bf16.msra.mxu1 %v6039_v42  ;;  %v6386_v35 = vld [vmem:[#allocation3 + $0x120] sm:$0xff]  ;;  %v6395_v52 = vld [vmem:[#allocation3 + $0x168] sm:$0xff]  ;;  %v6389_v32 = vld [vmem:[#allocation3 + $0x138] sm:$0xff] }
 0x98e   :  { %6132 = vmatprep.subr.bf16.mxu1 %v6034_v24  ;;  %v6394_v49 = vld [vmem:[#allocation3 + $0x160] sm:$0xff]  ;;  %v6388_v6 = vld [vmem:[#allocation3 + $0x130] sm:$0xff]  ;;  %v6397_v25 = vld [vmem:[#allocation3 + $0x178] sm:$0xff] }
 0x98f   :  { %v6396_v61 = vld [vmem:[#allocation3 + $0x170] sm:$0xff]  ;;  %v6575_v47 = vld [vmem:[#allocation3 + $0x188] sm:$0xff]  ;;  %v6574_v40 = vld [vmem:[#allocation3 + $0x180] sm:$0xff] }
 0x990   :  { %14107 = vmatmul.mubr.msk.bf16.vlgmr.msra.gmra.mrb[56].mxu1 %vm132_vm0, %v6046_v13  ;;  %v6583_v33 = vld [vmem:[#allocation3 + $0x1c8] sm:$0xff]  ;;  %v6582_v60 = vld [vmem:[#allocation3 + $0x1c0] sm:$0xff]  ;;  %v6577_v3 = vld [vmem:[#allocation3 + $0x198] sm:$0xff] }
 0x991   :  { %6133 = vmatpush1.bf16.msra.mxu1 %v6033_v36  ;;  %6164 = vmatprep.mubr.bf16.mxu1 %v20849_v27  ;;  %v6576_v29 = vld [vmem:[#allocation3 + $0x190] sm:$0xff]  ;;  %v6579_v53 = vld [vmem:[#allocation3 + $0x1a8] sm:$0xff]  ;;  %v6578_v42 = vld [vmem:[#allocation3 + $0x1a0] sm:$0xff] }
 0x992   :  { %6134 = vmatprep.subr.bf16.mxu1 %v6042_v5  ;;  %v6584_v1 = vld [vmem:[#allocation3 + $0x1d0] sm:$0xff]  ;;  %v6587_v24 = vld [vmem:[#allocation3 + $0x1e8] sm:$0xff]  ;;  %v6586_v36 = vld [vmem:[#allocation3 + $0x1e0] sm:$0xff] }
 0x993   :  { %v6581_v5 = vld [vmem:[#allocation3 + $0x1b8] sm:$0xff] }
 0x995   :  { %6135 = vmatpush1.bf16.msra.mxu1 %v6041_v58  ;;  %v6580_v58 = vld [vmem:[#allocation3 + $0x1b0] sm:$0xff] }
 0x996   :  { %6173 = vmatprep.subr.bf16.mxu1 %v6036_v2  ;;  %v6589_v2 = vld [vmem:[#allocation3 + $0x1f8] sm:$0xff] }
 0x998   :  { %14108 = vmatmul.mubr.msk.bf16.vlgmr.msra.gmra.mrb[60].mxu1 %vm132_vm0, %v6046_v13 }
 0x999   :  { %6174 = vmatpush1.bf16.msra.mxu1 %v6035_v63  ;;  %6205 = vmatprep.mubr.bf16.mxu1 %v20849_v27  ;;  %v6588_v63 = vld [vmem:[#allocation3 + $0x1f0] sm:$0xff] }
 0x99a   :  { %6175 = vmatprep.subr.bf16.mxu1 %v6044_v18  ;;  %v6767_v18 = vld [vmem:[#allocation3 + $0x208] sm:$0xff] }
 0x99d   :  { %6176 = vmatpush1.bf16.msra.mxu1 %v6043_v16  ;;  %v6766_v16 = vld [vmem:[#allocation3 + $0x200] sm:$0xff] }
 0x99e   :  { %6218 = vmatprep.subr.bf16.mxu1 %v6014_v11  ;;  %v6775_v11 = vld [vmem:[#allocation3 + $0x248] sm:$0xff] }
 0x9a0   :  { %14109 = vmatmul.mubr.msk.bf16.vlgmr.msra.gmra.mrb[64].mxu1 %vm132_vm0, %v6046_v13  ;;  %v6585_v13 = vld [vmem:[#allocation3 + $0x1d8] sm:$0xff] }
 0x9a1   :  { %6219 = vmatpush1.bf16.msra.mxu1 %v6013_v39  ;;  %6250 = vmatprep.mubr.bf16.mxu1 %v20849_v27  ;;  %v6774_v39 = vld [vmem:[#allocation3 + $0x240] sm:$0xff] }
 0x9a2   :  { %6220 = vmatprep.subr.bf16.mxu1 %v6022_v62  ;;  %v6769_v62 = vld [vmem:[#allocation3 + $0x218] sm:$0xff] }
 0x9a5   :  { %6221 = vmatpush1.bf16.msra.mxu1 %v6021_v10  ;;  %v6782_v10 = vrot.slane %v20152_v8, 7  ;;  %v6778_v8 = vld [vmem:[#allocation3 + $0x260] sm:$0xff] }
 0x9a6   :  { %6259 = vmatprep.subr.bf16.mxu1 %v6016_v21  ;;  %v6768_v21 = vld [vmem:[#allocation3 + $0x210] sm:$0xff] }
 0x9a8   :  { %14110 = vmatmul.mubr.msk.bf16.vlgmr.msra.gmra.mrb[52].mxu1 %vm132_vm0, %v6214_v37 }
 0x9a9   :  { %6260 = vmatpush1.bf16.msra.mxu1 %v6015_v48  ;;  %6291 = vmatprep.mubr.bf16.mxu1 %v20849_v27  ;;  %v6776_v48 = vld [vmem:[#allocation3 + $0x250] sm:$0xff] }
 0x9aa   :  { %6261 = vmatprep.subr.bf16.mxu1 %v6024_v38  ;;  %v6771_v38 = vld [vmem:[#allocation3 + $0x228] sm:$0xff] }
 0x9ad   :  { %6262 = vmatpush1.bf16.msra.mxu1 %v6023_v43  ;;  %v6770_v43 = vld [vmem:[#allocation3 + $0x220] sm:$0xff] }
 0x9ae   :  { %6300 = vmatprep.subr.bf16.mxu1 %v6018_v28  ;;  %v6779_v28 = vld [vmem:[#allocation3 + $0x268] sm:$0xff] }
 0x9b0   :  { %14111 = vmatmul.mubr.msk.bf16.vlgmr.msra.gmra.mrb[56].mxu1 %vm132_vm0, %v6214_v37 }
 0x9b1   :  { %6301 = vmatpush1.bf16.msra.mxu1 %v6017_v50  ;;  %6332 = vmatprep.mubr.bf16.mxu1 %v20849_v27  ;;  %v6773_v50 = vld [vmem:[#allocation3 + $0x238] sm:$0xff] }
 0x9b2   :  { %6302 = vmatprep.subr.bf16.mxu1 %v6026_v19  ;;  %v6772_v19 = vld [vmem:[#allocation3 + $0x230] sm:$0xff] }
 0x9b5   :  { %6303 = vmatpush1.bf16.msra.mxu1 %v6025_v51  ;;  %v6781_v51 = vld [vmem:[#allocation3 + $0x278] sm:$0xff] }
 0x9b6   :  { %6341 = vmatprep.subr.bf16.mxu1 %v6020_v57  ;;  %v6780_v57 = vld [vmem:[#allocation3 + $0x270] sm:$0xff] }
 0x9b8   :  { %14112 = vmatmul.mubr.msk.bf16.vlgmr.msra.gmra.mrb[60].mxu1 %vm132_vm0, %v6214_v37 }
 0x9b9   :  { %6342 = vmatpush1.bf16.msra.mxu1 %v6019_v26  ;;  %6373 = vmatprep.mubr.bf16.mxu1 %v20849_v27  ;;  %v6959_v26 = vld [vmem:[#allocation3 + $0x288] sm:$0xff] }
 0x9ba   :  { %6343 = vmatprep.subr.bf16.mxu1 %v6028_v44  ;;  %v6958_v44 = vld [vmem:[#allocation3 + $0x280] sm:$0xff] }
 0x9bd   :  { %6344 = vmatpush1.bf16.msra.mxu1 %v6027_v56  ;;  %v6967_v56 = vld [vmem:[#allocation3 + $0x2c8] sm:$0xff] }
 0x9be   :  { %6402 = vmatprep.subr.bf16.mxu1 %v6383_v41  ;;  %v6966_v41 = vld [vmem:[#allocation3 + $0x2c0] sm:$0xff] }
 0x9c0   :  { %14113 = vmatmul.mubr.msk.bf16.vlgmr.msra.gmra.mrb[64].mxu1 %vm132_vm0, %v6214_v37  ;;  %v6777_v37 = vld [vmem:[#allocation3 + $0x258] sm:$0xff] }
 0x9c1   :  { %6403 = vmatpush1.bf16.msra.mxu1 %v6382_v14  ;;  %6434 = vmatprep.mubr.bf16.mxu1 %v20849_v27  ;;  %v6961_v14 = vld [vmem:[#allocation3 + $0x298] sm:$0xff] }
 0x9c2   :  { %6404 = vmatprep.subr.bf16.mxu1 %v6391_v12  ;;  %v6960_v12 = vld [vmem:[#allocation3 + $0x290] sm:$0xff] }
 0x9c5   :  { %6405 = vmatpush1.bf16.msra.mxu1 %v6390_v7  ;;  %v6969_v7 = vld [vmem:[#allocation3 + $0x2d8] sm:$0xff] }
 0x9c6   :  { %6443 = vmatprep.subr.bf16.mxu1 %v6385_v15  ;;  %v6968_v15 = vld [vmem:[#allocation3 + $0x2d0] sm:$0xff] }
 0x9c8   :  { %14114 = vmatmul.mubr.msk.bf16.vlgmr.msra.gmra.mrb[52].mxu1 %vm132_vm0, %v6398_v46 }
 0x9c9   :  { %6444 = vmatpush1.bf16.msra.mxu1 %v6384_v34  ;;  %6475 = vmatprep.mubr.bf16.mxu1 %v20849_v27  ;;  %v6962_v34 = vld [vmem:[#allocation3 + $0x2a0] sm:$0xff] }
 0x9ca   :  { %6445 = vmatprep.subr.bf16.mxu1 %v6393_v45  ;;  %v6971_v45 = vld [vmem:[#allocation3 + $0x2e8] sm:$0xff] }
 0x9cd   :  { %6446 = vmatpush1.bf16.msra.mxu1 %v6392_v59  ;;  %v6970_v59 = vld [vmem:[#allocation3 + $0x2e0] sm:$0xff] }
 0x9ce   :  { %6484 = vmatprep.subr.bf16.mxu1 %v6387_v55  ;;  %v6965_v55 = vld [vmem:[#allocation3 + $0x2b8] sm:$0xff] }
 0x9d0   :  { %14115 = vmatmul.mubr.msk.bf16.vlgmr.msra.gmra.mrb[56].mxu1 %vm132_vm0, %v6398_v46 }
 0x9d1   :  { %6485 = vmatpush1.bf16.msra.mxu1 %v6386_v35  ;;  %6516 = vmatprep.mubr.bf16.mxu1 %v20849_v27  ;;  %v6964_v35 = vld [vmem:[#allocation3 + $0x2b0] sm:$0xff] }
 0x9d2   :  { %6486 = vmatprep.subr.bf16.mxu1 %v6395_v52  ;;  %v6973_v52 = vld [vmem:[#allocation3 + $0x2f8] sm:$0xff] }
 0x9d5   :  { %6487 = vmatpush1.bf16.msra.mxu1 %v6394_v49  ;;  %v6972_v49 = vld [vmem:[#allocation3 + $0x2f0] sm:$0xff] }
 0x9d6   :  { %6525 = vmatprep.subr.bf16.mxu1 %v6389_v32  ;;  %v7150_v32 = vld [vmem:[#allocation3 + $0x308] sm:$0xff] }
 0x9d8   :  { %14116 = vmatmul.mubr.msk.bf16.vlgmr.msra.gmra.mrb[60].mxu1 %vm132_vm0, %v6398_v46 }
 0x9d9   :  { %6526 = vmatpush1.bf16.msra.mxu1 %v6388_v6  ;;  %6557 = vmatprep.mubr.bf16.mxu1 %v20849_v27  ;;  %v7149_v6 = vld [vmem:[#allocation3 + $0x300] sm:$0xff] }
 0x9da   :  { %6527 = vmatprep.subr.bf16.mxu1 %v6397_v25  ;;  %v7158_v25 = vld [vmem:[#allocation3 + $0x348] sm:$0xff] }
 0x9dd   :  { %6528 = vmatpush1.bf16.msra.mxu1 %v6396_v61  ;;  %v7157_v61 = vld [vmem:[#allocation3 + $0x340] sm:$0xff] }
 0x9de   :  { %6594 = vmatprep.subr.bf16.mxu1 %v6575_v47  ;;  %v7152_v47 = vld [vmem:[#allocation3 + $0x318] sm:$0xff] }
 0x9e0   :  { %14117 = vmatmul.mubr.msk.bf16.vlgmr.msra.gmra.mrb[64].mxu1 %vm132_vm0, %v6398_v46  ;;  %v6963_v46 = vld [vmem:[#allocation3 + $0x2a8] sm:$0xff] }
 0x9e1   :  { %6595 = vmatpush1.bf16.msra.mxu1 %v6574_v40  ;;  %6626 = vmatprep.mubr.bf16.mxu1 %v20849_v27  ;;  %v7166_v40 = vrot.slane %v20158_v31, 5 }
 0x9e2   :  { %6596 = vmatprep.subr.bf16.mxu1 %v6583_v33  ;;  %v7151_v33 = vld [vmem:[#allocation3 + $0x310] sm:$0xff] }
 0x9e5   :  { %6597 = vmatpush1.bf16.msra.mxu1 %v6582_v60  ;;  %v7160_v60 = vld [vmem:[#allocation3 + $0x358] sm:$0xff] }
 0x9e6   :  { %6635 = vmatprep.subr.bf16.mxu1 %v6577_v3  ;;  %v7159_v3 = vld [vmem:[#allocation3 + $0x350] sm:$0xff] }
 0x9e8   :  { %14118 = vmatmul.mubr.msk.bf16.vlgmr.msra.gmra.mrb[52].mxu1 %vm132_vm0, %v6590_v23 }
 0x9e9   :  { %6636 = vmatpush1.bf16.msra.mxu1 %v6576_v29  ;;  %6667 = vmatprep.mubr.bf16.mxu1 %v20849_v27  ;;  %v7153_v29 = vld [vmem:[#allocation3 + $0x320] sm:$0xff] }
 0x9ea   :  { %6637 = vmatprep.subr.bf16.mxu1 %v6585_v13  ;;  %v7162_v13 = vld [vmem:[#allocation3 + $0x368] sm:$0xff] }
 0x9ed   :  { %6638 = vmatpush1.bf16.msra.mxu1 %v6584_v1  ;;  %v7161_v1 = vld [vmem:[#allocation3 + $0x360] sm:$0xff] }
 0x9ee   :  { %6676 = vmatprep.subr.bf16.mxu1 %v6579_v53  ;;  %v7156_v53 = vld [vmem:[#allocation3 + $0x338] sm:$0xff] }
 0x9f0   :  { %14119 = vmatmul.mubr.msk.bf16.vlgmr.msra.gmra.mrb[56].mxu1 %vm132_vm0, %v6590_v23 }
 0x9f1   :  { %6677 = vmatpush1.bf16.msra.mxu1 %v6578_v42  ;;  %6708 = vmatprep.mubr.bf16.mxu1 %v20849_v27  ;;  %v7155_v42 = vld [vmem:[#allocation3 + $0x330] sm:$0xff] }
 0x9f2   :  { %6678 = vmatprep.subr.bf16.mxu1 %v6587_v24  ;;  %v7164_v24 = vld [vmem:[#allocation3 + $0x378] sm:$0xff] }
 0x9f5   :  { %6679 = vmatpush1.bf16.msra.mxu1 %v6586_v36  ;;  %v7163_v36 = vld [vmem:[#allocation3 + $0x370] sm:$0xff] }
 0x9f6   :  { %6717 = vmatprep.subr.bf16.mxu1 %v6581_v5  ;;  %v7343_v5 = vld [vmem:[#allocation3 + $0x388] sm:$0xff] }
 0x9f8   :  { %14120 = vmatmul.mubr.msk.bf16.vlgmr.msra.gmra.mrb[60].mxu1 %vm132_vm0, %v6590_v23 }
 0x9f9   :  { %6718 = vmatpush1.bf16.msra.mxu1 %v6580_v58  ;;  %6749 = vmatprep.mubr.bf16.mxu1 %v20849_v27  ;;  %v7342_v58 = vld [vmem:[#allocation3 + $0x380] sm:$0xff] }
 0x9fa   :  { %6719 = vmatprep.subr.bf16.mxu1 %v6589_v2  ;;  %v7351_v2 = vld [vmem:[#allocation3 + $0x3c8] sm:$0xff] }
 0x9fd   :  { %6720 = vmatpush1.bf16.msra.mxu1 %v6588_v63  ;;  %v7350_v63 = vld [vmem:[#allocation3 + $0x3c0] sm:$0xff] }
 0x9fe   :  { %6786 = vmatprep.subr.bf16.mxu1 %v6767_v18  ;;  %v7345_v18 = vld [vmem:[#allocation3 + $0x398] sm:$0xff] }
 0xa00   :  { %14121 = vmatmul.mubr.msk.bf16.vlgmr.msra.gmra.mrb[64].mxu1 %vm132_vm0, %v6590_v23  ;;  %v7154_v23 = vld [vmem:[#allocation3 + $0x328] sm:$0xff] }
 0xa01   :  { %6787 = vmatpush1.bf16.msra.mxu1 %v6766_v16  ;;  %6818 = vmatprep.mubr.bf16.mxu1 %v20849_v27  ;;  %v7358_v16 = vrot.slane %v20158_v31, 6 }
 0xa02   :  { %6788 = vmatprep.subr.bf16.mxu1 %v6775_v11  ;;  %v7344_v11 = vld [vmem:[#allocation3 + $0x390] sm:$0xff] }
 0xa05   :  { %6789 = vmatpush1.bf16.msra.mxu1 %v6774_v39  ;;  %v7353_v39 = vld [vmem:[#allocation3 + $0x3d8] sm:$0xff] }
 0xa06   :  { %6827 = vmatprep.subr.bf16.mxu1 %v6769_v62  ;;  %v7352_v62 = vld [vmem:[#allocation3 + $0x3d0] sm:$0xff] }
 0xa08   :  { %14122 = vmatmul.mubr.msk.bf16.vlgmr.msra.gmra.mrb[52].mxu1 %vm132_vm0, %v6782_v10 }
 0xa09   :  { %6828 = vmatpush1.bf16.msra.mxu1 %v6768_v21  ;;  %6859 = vmatprep.mubr.bf16.mxu1 %v20849_v27  ;;  %v7346_v21 = vld [vmem:[#allocation3 + $0x3a0] sm:$0xff] }
 0xa0a   :  { %6829 = vmatprep.subr.bf16.mxu1 %v6777_v37  ;;  %v7355_v37 = vld [vmem:[#allocation3 + $0x3e8] sm:$0xff] }
 0xa0d   :  { %6830 = vmatpush1.bf16.msra.mxu1 %v6776_v48  ;;  %v7354_v48 = vld [vmem:[#allocation3 + $0x3e0] sm:$0xff] }
 0xa0e   :  { %6868 = vmatprep.subr.bf16.mxu1 %v6771_v38  ;;  %v7349_v38 = vld [vmem:[#allocation3 + $0x3b8] sm:$0xff] }
 0xa10   :  { %14123 = vmatmul.mubr.msk.bf16.vlgmr.msra.gmra.mrb[56].mxu1 %vm132_vm0, %v6782_v10 }
 0xa11   :  { %6869 = vmatpush1.bf16.msra.mxu1 %v6770_v43  ;;  %6900 = vmatprep.mubr.bf16.mxu1 %v20849_v27  ;;  %v7348_v43 = vld [vmem:[#allocation3 + $0x3b0] sm:$0xff] }
 0xa12   :  { %6870 = vmatprep.subr.bf16.mxu1 %v6779_v28  ;;  %v7357_v28 = vld [vmem:[#allocation3 + $0x3f8] sm:$0xff] }
 0xa15   :  { %6871 = vmatpush1.bf16.msra.mxu1 %v6778_v8  ;;  %v7356_v8 = vld [vmem:[#allocation3 + $0x3f0] sm:$0xff] }
 0xa16   :  { %6909 = vmatprep.subr.bf16.mxu1 %v6773_v50  ;;  %v7535_v50 = vld [vmem:[#allocation3 + $0x408] sm:$0xff] }
 0xa18   :  { %14124 = vmatmul.mubr.msk.bf16.vlgmr.msra.gmra.mrb[60].mxu1 %vm132_vm0, %v6782_v10 }
 0xa19   :  { %6910 = vmatpush1.bf16.msra.mxu1 %v6772_v19  ;;  %6941 = vmatprep.mubr.bf16.mxu1 %v20849_v27  ;;  %v7534_v19 = vld [vmem:[#allocation3 + $0x400] sm:$0xff] }
 0xa1a   :  { %6911 = vmatprep.subr.bf16.mxu1 %v6781_v51  ;;  %v7543_v51 = vld [vmem:[#allocation3 + $0x448] sm:$0xff] }
 0xa1d   :  { %6912 = vmatpush1.bf16.msra.mxu1 %v6780_v57  ;;  %v7542_v57 = vld [vmem:[#allocation3 + $0x440] sm:$0xff] }
 0xa1e   :  { %6977 = vmatprep.subr.bf16.mxu1 %v6959_v26  ;;  %v7537_v26 = vld [vmem:[#allocation3 + $0x418] sm:$0xff] }
 0xa20   :  { %14125 = vmatmul.mubr.msk.bf16.vlgmr.msra.gmra.mrb[64].mxu1 %vm132_vm0, %v6782_v10  ;;  %v7347_v10 = vld [vmem:[#allocation3 + $0x3a8] sm:$0xff] }
 0xa21   :  { %6978 = vmatpush1.bf16.msra.mxu1 %v6958_v44  ;;  %7009 = vmatprep.mubr.bf16.mxu1 %v20849_v27  ;;  %v7550_v44 = vrot.slane %v20158_v31, 7 }
 0xa22   :  { %6979 = vmatprep.subr.bf16.mxu1 %v6967_v56  ;;  %v7536_v56 = vld [vmem:[#allocation3 + $0x410] sm:$0xff] }
 0xa25   :  { %6980 = vmatpush1.bf16.msra.mxu1 %v6966_v41  ;;  %v7545_v41 = vld [vmem:[#allocation3 + $0x458] sm:$0xff] }
 0xa26   :  { %7018 = vmatprep.subr.bf16.mxu1 %v6961_v14  ;;  %v7544_v14 = vld [vmem:[#allocation3 + $0x450] sm:$0xff] }
 0xa28   :  { %14126 = vmatmul.mubr.msk.bf16.vlgmr.msra.gmra.mrb[52].mxu1 %vm132_vm0, %v20158_v31 }
 0xa29   :  { %7019 = vmatpush1.bf16.msra.mxu1 %v6960_v12  ;;  %7050 = vmatprep.mubr.bf16.mxu1 %v20849_v27  ;;  %v7539_v12 = vld [vmem:[#allocation3 + $0x428] sm:$0xff] }
 0xa2a   :  { %7020 = vmatprep.subr.bf16.mxu1 %v6969_v7  ;;  %v7538_v7 = vld [vmem:[#allocation3 + $0x420] sm:$0xff] }
 0xa2d   :  { %7021 = vmatpush1.bf16.msra.mxu1 %v6968_v15  ;;  %v7547_v15 = vld [vmem:[#allocation3 + $0x468] sm:$0xff] }
 0xa2e   :  { %7059 = vmatprep.subr.bf16.mxu1 %v6963_v46  ;;  %v7541_v46 = vld [vmem:[#allocation3 + $0x438] sm:$0xff] }
 0xa30   :  { %14127 = vmatmul.mubr.msk.bf16.vlgmr.msra.gmra.mrb[56].mxu1 %vm132_vm0, %v20158_v31 }
 0xa31   :  { %7060 = vmatpush1.bf16.msra.mxu1 %v6962_v34  ;;  %7091 = vmatprep.mubr.bf16.mxu1 %v20849_v27  ;;  %v7540_v34 = vld [vmem:[#allocation3 + $0x430] sm:$0xff] }
 0xa32   :  { %7061 = vmatprep.subr.bf16.mxu1 %v6971_v45  ;;  %v7549_v45 = vld [vmem:[#allocation3 + $0x478] sm:$0xff] }
 0xa35   :  { %7062 = vmatpush1.bf16.msra.mxu1 %v6970_v59  ;;  %v7548_v59 = vld [vmem:[#allocation3 + $0x470] sm:$0xff] }
 0xa36   :  { %7100 = vmatprep.subr.bf16.mxu1 %v6965_v55  ;;  %v7727_v55 = vld [vmem:[#allocation3 + $0x488] sm:$0xff] }
 0xa38   :  { %14128 = vmatmul.mubr.msk.bf16.vlgmr.msra.gmra.mrb[60].mxu1 %vm132_vm0, %v20158_v31 }
 0xa39   :  { %7101 = vmatpush1.bf16.msra.mxu1 %v6964_v35  ;;  %7132 = vmatprep.mubr.bf16.mxu1 %v20849_v27  ;;  %v7726_v35 = vld [vmem:[#allocation3 + $0x480] sm:$0xff] }
 0xa3a   :  { %7102 = vmatprep.subr.bf16.mxu1 %v6973_v52  ;;  %v7735_v52 = vld [vmem:[#allocation3 + $0x4c8] sm:$0xff] }
 0xa3d   :  { %7103 = vmatpush1.bf16.msra.mxu1 %v6972_v49  ;;  %v7734_v49 = vld [vmem:[#allocation3 + $0x4c0] sm:$0xff] }
 0xa3e   :  { %7170 = vmatprep.subr.bf16.mxu1 %v7150_v32  ;;  %v7729_v32 = vld [vmem:[#allocation3 + $0x498] sm:$0xff] }
 0xa40   :  { %14129 = vmatmul.mubr.msk.bf16.vlgmr.msra.gmra.mrb[64].mxu1 %vm132_vm0, %v20158_v31  ;;  %v7546_v31 = vld [vmem:[#allocation3 + $0x460] sm:$0xff] }
 0xa41   :  { %7171 = vmatpush1.bf16.msra.mxu1 %v7149_v6  ;;  %7202 = vmatprep.mubr.bf16.mxu1 %v20849_v27  ;;  %v7728_v6 = vld [vmem:[#allocation3 + $0x490] sm:$0xff] }
 0xa42   :  { %7172 = vmatprep.subr.bf16.mxu1 %v7158_v25  ;;  %v7737_v25 = vld [vmem:[#allocation3 + $0x4d8] sm:$0xff] }
 0xa45   :  { %7173 = vmatpush1.bf16.msra.mxu1 %v7157_v61  ;;  %v7736_v61 = vld [vmem:[#allocation3 + $0x4d0] sm:$0xff] }
 0xa46   :  { %7211 = vmatprep.subr.bf16.mxu1 %v7152_v47  ;;  %v7731_v47 = vld [vmem:[#allocation3 + $0x4a8] sm:$0xff] }
 0xa48   :  { %14130 = vmatmul.mubr.msk.bf16.vlgmr.msra.gmra.mrb[52].mxu1 %vm132_vm0, %v7166_v40 }
 0xa49   :  { %7212 = vmatpush1.bf16.msra.mxu1 %v7151_v33  ;;  %7243 = vmatprep.mubr.bf16.mxu1 %v20849_v27  ;;  %v7739_v33 = vld [vmem:[#allocation3 + $0x4e8] sm:$0xff] }
 0xa4a   :  { %7213 = vmatprep.subr.bf16.mxu1 %v7160_v60  ;;  %v7738_v60 = vld [vmem:[#allocation3 + $0x4e0] sm:$0xff] }
 0xa4d   :  { %7214 = vmatpush1.bf16.msra.mxu1 %v7159_v3  ;;  %v7733_v3 = vld [vmem:[#allocation3 + $0x4b8] sm:$0xff] }
 0xa4e   :  { %7252 = vmatprep.subr.bf16.mxu1 %v7154_v23  ;;  %v7732_v23 = vld [vmem:[#allocation3 + $0x4b0] sm:$0xff] }
 0xa50   :  { %14131 = vmatmul.mubr.msk.bf16.vlgmr.msra.gmra.mrb[56].mxu1 %vm132_vm0, %v7166_v40 }
 0xa51   :  { %7253 = vmatpush1.bf16.msra.mxu1 %v7153_v29  ;;  %7284 = vmatprep.mubr.bf16.mxu1 %v20849_v27  ;;  %v7741_v29 = vld [vmem:[#allocation3 + $0x4f8] sm:$0xff] }
 0xa52   :  { %7254 = vmatprep.subr.bf16.mxu1 %v7162_v13  ;;  %v7740_v13 = vld [vmem:[#allocation3 + $0x4f0] sm:$0xff] }
 0xa55   :  { %7255 = vmatpush1.bf16.msra.mxu1 %v7161_v1  ;;  %v7918_v1 = vld [vmem:[#allocation3 + $0x508] sm:$0xff] }
 0xa56   :  { %7293 = vmatprep.subr.bf16.mxu1 %v7156_v53  ;;  %v7917_v53 = vld [vmem:[#allocation3 + $0x500] sm:$0xff] }
 0xa58   :  { %14132 = vmatmul.mubr.msk.bf16.vlgmr.msra.gmra.mrb[60].mxu1 %vm132_vm0, %v7166_v40 }
 0xa59   :  { %7294 = vmatpush1.bf16.msra.mxu1 %v7155_v42  ;;  %7325 = vmatprep.mubr.bf16.mxu1 %v20849_v27  ;;  %v7926_v42 = vld [vmem:[#allocation3 + $0x548] sm:$0xff] }
 0xa5a   :  { %7295 = vmatprep.subr.bf16.mxu1 %v7164_v24  ;;  %v7925_v24 = vld [vmem:[#allocation3 + $0x540] sm:$0xff] }
 0xa5d   :  { %7296 = vmatpush1.bf16.msra.mxu1 %v7163_v36  ;;  %v7920_v36 = vld [vmem:[#allocation3 + $0x518] sm:$0xff] }
 0xa5e   :  { %7362 = vmatprep.subr.bf16.mxu1 %v7343_v5  ;;  %v7934_v5 = vrot.slane %v20164_v54, 1 }
 0xa60   :  { %14133 = vmatmul.mubr.msk.bf16.vlgmr.msra.gmra.mrb[64].mxu1 %vm132_vm0, %v7166_v40  ;;  %v7730_v40 = vld [vmem:[#allocation3 + $0x4a0] sm:$0xff] }
 0xa61   :  { %7363 = vmatpush1.bf16.msra.mxu1 %v7342_v58  ;;  %7394 = vmatprep.mubr.bf16.mxu1 %v20849_v27  ;;  %v7919_v58 = vld [vmem:[#allocation3 + $0x510] sm:$0xff] }
 0xa62   :  { %7364 = vmatprep.subr.bf16.mxu1 %v7351_v2  ;;  %v7928_v2 = vld [vmem:[#allocation3 + $0x558] sm:$0xff] }
 0xa65   :  { %7365 = vmatpush1.bf16.msra.mxu1 %v7350_v63  ;;  %v7927_v63 = vld [vmem:[#allocation3 + $0x550] sm:$0xff] }
 0xa66   :  { %7403 = vmatprep.subr.bf16.mxu1 %v7345_v18  ;;  %v7922_v18 = vld [vmem:[#allocation3 + $0x528] sm:$0xff] }
 0xa68   :  { %14134 = vmatmul.mubr.msk.bf16.vlgmr.msra.gmra.mrb[52].mxu1 %vm132_vm0, %v7358_v16 }
 0xa69   :  { %7404 = vmatpush1.bf16.msra.mxu1 %v7344_v11  ;;  %7435 = vmatprep.mubr.bf16.mxu1 %v20849_v27  ;;  %v7930_v11 = vld [vmem:[#allocation3 + $0x568] sm:$0xff] }
 0xa6a   :  { %7405 = vmatprep.subr.bf16.mxu1 %v7353_v39  ;;  %v7929_v39 = vld [vmem:[#allocation3 + $0x560] sm:$0xff] }
 0xa6d   :  { %7406 = vmatpush1.bf16.msra.mxu1 %v7352_v62  ;;  %v7924_v62 = vld [vmem:[#allocation3 + $0x538] sm:$0xff] }
 0xa6e   :  { %7444 = vmatprep.subr.bf16.mxu1 %v7347_v10  ;;  %v7923_v10 = vld [vmem:[#allocation3 + $0x530] sm:$0xff] }
 0xa70   :  { %14135 = vmatmul.mubr.msk.bf16.vlgmr.msra.gmra.mrb[56].mxu1 %vm132_vm0, %v7358_v16 }
 0xa71   :  { %7445 = vmatpush1.bf16.msra.mxu1 %v7346_v21  ;;  %7476 = vmatprep.mubr.bf16.mxu1 %v20849_v27  ;;  %v7932_v21 = vld [vmem:[#allocation3 + $0x578] sm:$0xff] }
 0xa72   :  { %7446 = vmatprep.subr.bf16.mxu1 %v7355_v37  ;;  %v7931_v37 = vld [vmem:[#allocation3 + $0x570] sm:$0xff] }
 0xa75   :  { %7447 = vmatpush1.bf16.msra.mxu1 %v7354_v48  ;;  %v8111_v48 = vld [vmem:[#allocation3 + $0x588] sm:$0xff] }
 0xa76   :  { %7485 = vmatprep.subr.bf16.mxu1 %v7349_v38  ;;  %v8110_v38 = vld [vmem:[#allocation3 + $0x580] sm:$0xff] }
 0xa78   :  { %14136 = vmatmul.mubr.msk.bf16.vlgmr.msra.gmra.mrb[60].mxu1 %vm132_vm0, %v7358_v16 }
 0xa79   :  { %7486 = vmatpush1.bf16.msra.mxu1 %v7348_v43  ;;  %7517 = vmatprep.mubr.bf16.mxu1 %v20849_v27  ;;  %v8119_v43 = vld [vmem:[#allocation3 + $0x5c8] sm:$0xff] }
 0xa7a   :  { %7487 = vmatprep.subr.bf16.mxu1 %v7357_v28  ;;  %v8118_v28 = vld [vmem:[#allocation3 + $0x5c0] sm:$0xff] }
 0xa7d   :  { %7488 = vmatpush1.bf16.msra.mxu1 %v7356_v8  ;;  %v8113_v8 = vld [vmem:[#allocation3 + $0x598] sm:$0xff] }
 0xa7e   :  { %7554 = vmatprep.subr.bf16.mxu1 %v7535_v50  ;;  %v8126_v50 = vrot.slane %v20164_v54, 2 }
 0xa80   :  { %14137 = vmatmul.mubr.msk.bf16.vlgmr.msra.gmra.mrb[64].mxu1 %vm132_vm0, %v7358_v16  ;;  %v7921_v16 = vld [vmem:[#allocation3 + $0x520] sm:$0xff] }
 0xa81   :  { %7555 = vmatpush1.bf16.msra.mxu1 %v7534_v19  ;;  %7586 = vmatprep.mubr.bf16.mxu1 %v20849_v27  ;;  %v8112_v19 = vld [vmem:[#allocation3 + $0x590] sm:$0xff] }
 0xa82   :  { %7556 = vmatprep.subr.bf16.mxu1 %v7543_v51  ;;  %v8121_v51 = vld [vmem:[#allocation3 + $0x5d8] sm:$0xff] }
 0xa85   :  { %7557 = vmatpush1.bf16.msra.mxu1 %v7542_v57  ;;  %v8120_v57 = vld [vmem:[#allocation3 + $0x5d0] sm:$0xff] }
 0xa86   :  { %7595 = vmatprep.subr.bf16.mxu1 %v7537_v26  ;;  %v8115_v26 = vld [vmem:[#allocation3 + $0x5a8] sm:$0xff] }
 0xa88   :  { %14138 = vmatmul.mubr.msk.bf16.vlgmr.msra.gmra.mrb[52].mxu1 %vm132_vm0, %v7550_v44 }
 0xa89   :  { %7596 = vmatpush1.bf16.msra.mxu1 %v7536_v56  ;;  %7627 = vmatprep.mubr.bf16.mxu1 %v20849_v27  ;;  %v8123_v56 = vld [vmem:[#allocation3 + $0x5e8] sm:$0xff] }
 0xa8a   :  { %7597 = vmatprep.subr.bf16.mxu1 %v7545_v41  ;;  %v8122_v41 = vld [vmem:[#allocation3 + $0x5e0] sm:$0xff] }
 0xa8d   :  { %7598 = vmatpush1.bf16.msra.mxu1 %v7544_v14  ;;  %v8117_v14 = vld [vmem:[#allocation3 + $0x5b8] sm:$0xff] }
 0xa8e   :  { %7636 = vmatprep.subr.bf16.mxu1 %v7539_v12  ;;  %v8116_v12 = vld [vmem:[#allocation3 + $0x5b0] sm:$0xff] }
 0xa90   :  { %14139 = vmatmul.mubr.msk.bf16.vlgmr.msra.gmra.mrb[56].mxu1 %vm132_vm0, %v7550_v44 }
 0xa91   :  { %7637 = vmatpush1.bf16.msra.mxu1 %v7538_v7  ;;  %7668 = vmatprep.mubr.bf16.mxu1 %v20849_v27  ;;  %v8125_v7 = vld [vmem:[#allocation3 + $0x5f8] sm:$0xff] }
 0xa92   :  { %7638 = vmatprep.subr.bf16.mxu1 %v7547_v15  ;;  %v8124_v15 = vld [vmem:[#allocation3 + $0x5f0] sm:$0xff] }
 0xa95   :  { %7639 = vmatpush1.bf16.msra.mxu1 %v7546_v31  ;;  %v8303_v31 = vld [vmem:[#allocation3 + $0x608] sm:$0xff] }
 0xa96   :  { %7677 = vmatprep.subr.bf16.mxu1 %v7541_v46  ;;  %v8302_v46 = vld [vmem:[#allocation3 + $0x600] sm:$0xff] }
 0xa98   :  { %14140 = vmatmul.mubr.msk.bf16.vlgmr.msra.gmra.mrb[60].mxu1 %vm132_vm0, %v7550_v44 }
 0xa99   :  { %7678 = vmatpush1.bf16.msra.mxu1 %v7540_v34  ;;  %7709 = vmatprep.mubr.bf16.mxu1 %v20849_v27  ;;  %v8311_v34 = vld [vmem:[#allocation3 + $0x648] sm:$0xff] }
 0xa9a   :  { %7679 = vmatprep.subr.bf16.mxu1 %v7549_v45  ;;  %v8310_v45 = vld [vmem:[#allocation3 + $0x640] sm:$0xff] }
 0xa9d   :  { %7680 = vmatpush1.bf16.msra.mxu1 %v7548_v59  ;;  %v8305_v59 = vld [vmem:[#allocation3 + $0x618] sm:$0xff] }
 0xa9e   :  { %7745 = vmatprep.subr.bf16.mxu1 %v7727_v55  ;;  %v8318_v55 = vrot.slane %v20164_v54, 7 }
 0xaa0   :  { %14141 = vmatmul.mubr.msk.bf16.vlgmr.msra.gmra.mrb[64].mxu1 %vm132_vm0, %v7550_v44  ;;  %v8114_v44 = vld [vmem:[#allocation3 + $0x5a0] sm:$0xff] }
 0xaa1   :  { %7746 = vmatpush1.bf16.msra.mxu1 %v7726_v35  ;;  %7777 = vmatprep.mubr.bf16.mxu1 %v20849_v27  ;;  %v8304_v35 = vld [vmem:[#allocation3 + $0x610] sm:$0xff] }
 0xaa2   :  { %7747 = vmatprep.subr.bf16.mxu1 %v7735_v52  ;;  %v8313_v52 = vld [vmem:[#allocation3 + $0x658] sm:$0xff] }
 0xaa5   :  { %7748 = vmatpush1.bf16.msra.mxu1 %v7734_v49  ;;  %v8312_v49 = vld [vmem:[#allocation3 + $0x650] sm:$0xff] }
 0xaa6   :  { %7786 = vmatprep.subr.bf16.mxu1 %v7729_v32  ;;  %v8307_v32 = vld [vmem:[#allocation3 + $0x628] sm:$0xff] }
 0xaa8   :  { %14142 = vmatmul.mubr.msk.bf16.vlgmr.msra.gmra.mrb[52].mxu1 %vm132_vm0, %v20164_v54 }
 0xaa9   :  { %7787 = vmatpush1.bf16.msra.mxu1 %v7728_v6  ;;  %7818 = vmatprep.mubr.bf16.mxu1 %v20849_v27  ;;  %v8306_v6 = vld [vmem:[#allocation3 + $0x620] sm:$0xff] }
 0xaaa   :  { %7788 = vmatprep.subr.bf16.mxu1 %v7737_v25  ;;  %v8315_v25 = vld [vmem:[#allocation3 + $0x668] sm:$0xff] }
 0xaad   :  { %7789 = vmatpush1.bf16.msra.mxu1 %v7736_v61  ;;  %v8309_v61 = vld [vmem:[#allocation3 + $0x638] sm:$0xff] }
 0xaae   :  { %7827 = vmatprep.subr.bf16.mxu1 %v7731_v47  ;;  %v8308_v47 = vld [vmem:[#allocation3 + $0x630] sm:$0xff] }
 0xab0   :  { %14143 = vmatmul.mubr.msk.bf16.vlgmr.msra.gmra.mrb[56].mxu1 %vm132_vm0, %v20164_v54 }
 0xab1   :  { %7828 = vmatpush1.bf16.msra.mxu1 %v7730_v40  ;;  %7859 = vmatprep.mubr.bf16.mxu1 %v20849_v27  ;;  %v8317_v40 = vld [vmem:[#allocation3 + $0x678] sm:$0xff] }
 0xab2   :  { %7829 = vmatprep.subr.bf16.mxu1 %v7739_v33  ;;  %v8316_v33 = vld [vmem:[#allocation3 + $0x670] sm:$0xff] }
 0xab5   :  { %7830 = vmatpush1.bf16.msra.mxu1 %v7738_v60  ;;  %v8495_v60 = vld [vmem:[#allocation3 + $0x688] sm:$0xff] }
 0xab6   :  { %7868 = vmatprep.subr.bf16.mxu1 %v7733_v3  ;;  %v8494_v3 = vld [vmem:[#allocation3 + $0x680] sm:$0xff] }
 0xab8   :  { %14144 = vmatmul.mubr.msk.bf16.vlgmr.msra.gmra.mrb[60].mxu1 %vm132_vm0, %v20164_v54 }
 0xab9   :  { %7869 = vmatpush1.bf16.msra.mxu1 %v7732_v23  ;;  %7900 = vmatprep.mubr.bf16.mxu1 %v20849_v27  ;;  %v8503_v23 = vld [vmem:[#allocation3 + $0x6c8] sm:$0xff] }
 0xaba   :  { %7870 = vmatprep.subr.bf16.mxu1 %v7741_v29  ;;  %v8502_v29 = vld [vmem:[#allocation3 + $0x6c0] sm:$0xff] }
 0xabd   :  { %7871 = vmatpush1.bf16.msra.mxu1 %v7740_v13  ;;  %v8497_v13 = vld [vmem:[#allocation3 + $0x698] sm:$0xff] }
 0xabe   :  { %7938 = vmatprep.subr.bf16.mxu1 %v7918_v1  ;;  %v8496_v1 = vld [vmem:[#allocation3 + $0x690] sm:$0xff] }
 0xac0   :  { %14145 = vmatmul.mubr.msk.bf16.vlgmr.msra.gmra.mrb[64].mxu1 %vm132_vm0, %v20164_v54  ;;  %v8314_v54 = vld [vmem:[#allocation3 + $0x660] sm:$0xff] }
 0xac1   :  { %7939 = vmatpush1.bf16.msra.mxu1 %v7917_v53  ;;  %7970 = vmatprep.mubr.bf16.mxu1 %v20849_v27  ;;  %v8505_v53 = vld [vmem:[#allocation3 + $0x6d8] sm:$0xff] }
 0xac2   :  { %7940 = vmatprep.subr.bf16.mxu1 %v7926_v42  ;;  %v8504_v42 = vld [vmem:[#allocation3 + $0x6d0] sm:$0xff] }
 0xac5   :  { %7941 = vmatpush1.bf16.msra.mxu1 %v7925_v24  ;;  %v8499_v24 = vld [vmem:[#allocation3 + $0x6a8] sm:$0xff] }
 0xac6   :  { %7979 = vmatprep.subr.bf16.mxu1 %v7920_v36  ;;  %v8498_v36 = vld [vmem:[#allocation3 + $0x6a0] sm:$0xff] }
 0xac8   :  { %14146 = vmatmul.mubr.msk.bf16.vlgmr.msra.gmra.mrb[52].mxu1 %vm132_vm0, %v7934_v5 }
 0xac9   :  { %7980 = vmatpush1.bf16.msra.mxu1 %v7919_v58  ;;  %8011 = vmatprep.mubr.bf16.mxu1 %v20849_v27  ;;  %v8506_v58 = vld [vmem:[#allocation3 + $0x6e0] sm:$0xff] }
 0xaca   :  { %7981 = vmatprep.subr.bf16.mxu1 %v7928_v2  ;;  %v8501_v2 = vld [vmem:[#allocation3 + $0x6b8] sm:$0xff] }
 0xacd   :  { %7982 = vmatpush1.bf16.msra.mxu1 %v7927_v63  ;;  %v8500_v63 = vld [vmem:[#allocation3 + $0x6b0] sm:$0xff] }
 0xace   :  { %8020 = vmatprep.subr.bf16.mxu1 %v7922_v18  ;;  %v8509_v18 = vld [vmem:[#allocation3 + $0x6f8] sm:$0xff] }
 0xad0   :  { %14147 = vmatmul.mubr.msk.bf16.vlgmr.msra.gmra.mrb[56].mxu1 %vm132_vm0, %v7934_v5 }
 0xad1   :  { %8021 = vmatpush1.bf16.msra.mxu1 %v7921_v16  ;;  %8052 = vmatprep.mubr.bf16.mxu1 %v20849_v27  ;;  %v8508_v16 = vld [vmem:[#allocation3 + $0x6f0] sm:$0xff] }
 0xad2   :  { %8022 = vmatprep.subr.bf16.mxu1 %v7930_v11  ;;  %v8686_v11 = vld [vmem:[#allocation3 + $0x708] sm:$0xff] }
 0xad5   :  { %8023 = vmatpush1.bf16.msra.mxu1 %v7929_v39  ;;  %v8685_v39 = vld [vmem:[#allocation3 + $0x700] sm:$0xff] }
 0xad6   :  { %8061 = vmatprep.subr.bf16.mxu1 %v7924_v62  ;;  %v8694_v62 = vld [vmem:[#allocation3 + $0x748] sm:$0xff] }
 0xad8   :  { %14148 = vmatmul.mubr.msk.bf16.vlgmr.msra.gmra.mrb[60].mxu1 %vm132_vm0, %v7934_v5 }
 0xad9   :  { %8062 = vmatpush1.bf16.msra.mxu1 %v7923_v10  ;;  %8093 = vmatprep.mubr.bf16.mxu1 %v20849_v27  ;;  %v8693_v10 = vld [vmem:[#allocation3 + $0x740] sm:$0xff] }
 0xada   :  { %8063 = vmatprep.subr.bf16.mxu1 %v7932_v21  ;;  %v8688_v21 = vld [vmem:[#allocation3 + $0x718] sm:$0xff] }
 0xadd   :  { %8064 = vmatpush1.bf16.msra.mxu1 %v7931_v37  ;;  %v8702_v37 = vrot.slane %v20170_v4, 1 }
 0xade   :  { %8130 = vmatprep.subr.bf16.mxu1 %v8111_v48  ;;  %v8687_v48 = vld [vmem:[#allocation3 + $0x710] sm:$0xff] }
 0xae0   :  { %14149 = vmatmul.mubr.msk.bf16.vlgmr.msra.gmra.mrb[64].mxu1 %vm132_vm0, %v7934_v5  ;;  %v8507_v5 = vld [vmem:[#allocation3 + $0x6e8] sm:$0xff] }
 0xae1   :  { %8131 = vmatpush1.bf16.msra.mxu1 %v8110_v38  ;;  %8162 = vmatprep.mubr.bf16.mxu1 %v20849_v27  ;;  %v8696_v38 = vld [vmem:[#allocation3 + $0x758] sm:$0xff] }
 0xae2   :  { %8132 = vmatprep.subr.bf16.mxu1 %v8119_v43  ;;  %v8695_v43 = vld [vmem:[#allocation3 + $0x750] sm:$0xff] }
 0xae5   :  { %8133 = vmatpush1.bf16.msra.mxu1 %v8118_v28  ;;  %v8690_v28 = vld [vmem:[#allocation3 + $0x728] sm:$0xff] }
 0xae6   :  { %8171 = vmatprep.subr.bf16.mxu1 %v8113_v8  ;;  %v8689_v8 = vld [vmem:[#allocation3 + $0x720] sm:$0xff] }
 0xae8   :  { %14150 = vmatmul.mubr.msk.bf16.vlgmr.msra.gmra.mrb[52].mxu1 %vm132_vm0, %v8126_v50 }
 0xae9   :  { %8172 = vmatpush1.bf16.msra.mxu1 %v8112_v19  ;;  %8203 = vmatprep.mubr.bf16.mxu1 %v20849_v27  ;;  %v8697_v19 = vld [vmem:[#allocation3 + $0x760] sm:$0xff] }
 0xaea   :  { %8173 = vmatprep.subr.bf16.mxu1 %v8121_v51  ;;  %v8692_v51 = vld [vmem:[#allocation3 + $0x738] sm:$0xff] }
 0xaed   :  { %8174 = vmatpush1.bf16.msra.mxu1 %v8120_v57  ;;  %v8691_v57 = vld [vmem:[#allocation3 + $0x730] sm:$0xff] }
 0xaee   :  { %8212 = vmatprep.subr.bf16.mxu1 %v8115_v26  ;;  %v8700_v26 = vld [vmem:[#allocation3 + $0x778] sm:$0xff] }
 0xaf0   :  { %14151 = vmatmul.mubr.msk.bf16.vlgmr.msra.gmra.mrb[56].mxu1 %vm132_vm0, %v8126_v50 }
 0xaf1   :  { %8213 = vmatpush1.bf16.msra.mxu1 %v8114_v44  ;;  %8244 = vmatprep.mubr.bf16.mxu1 %v20849_v27  ;;  %v8699_v44 = vld [vmem:[#allocation3 + $0x770] sm:$0xff] }
 0xaf2   :  { %8214 = vmatprep.subr.bf16.mxu1 %v8123_v56  ;;  %v8879_v56 = vld [vmem:[#allocation3 + $0x788] sm:$0xff] }
 0xaf5   :  { %8215 = vmatpush1.bf16.msra.mxu1 %v8122_v41  ;;  %v8878_v41 = vld [vmem:[#allocation3 + $0x780] sm:$0xff] }
 0xaf6   :  { %8253 = vmatprep.subr.bf16.mxu1 %v8117_v14  ;;  %v8887_v14 = vld [vmem:[#allocation3 + $0x7c8] sm:$0xff] }
 0xaf8   :  { %14152 = vmatmul.mubr.msk.bf16.vlgmr.msra.gmra.mrb[60].mxu1 %vm132_vm0, %v8126_v50 }
 0xaf9   :  { %8254 = vmatpush1.bf16.msra.mxu1 %v8116_v12  ;;  %8285 = vmatprep.mubr.bf16.mxu1 %v20849_v27  ;;  %v8886_v12 = vld [vmem:[#allocation3 + $0x7c0] sm:$0xff] }
 0xafa   :  { %8255 = vmatprep.subr.bf16.mxu1 %v8125_v7  ;;  %v8881_v7 = vld [vmem:[#allocation3 + $0x798] sm:$0xff] }
 0xafd   :  { %8256 = vmatpush1.bf16.msra.mxu1 %v8124_v15  ;;  %v8894_v15 = vrot.slane %v20170_v4, 2 }
 0xafe   :  { %8322 = vmatprep.subr.bf16.mxu1 %v8303_v31  ;;  %v8880_v31 = vld [vmem:[#allocation3 + $0x790] sm:$0xff] }
 0xb00   :  { %14153 = vmatmul.mubr.msk.bf16.vlgmr.msra.gmra.mrb[64].mxu1 %vm132_vm0, %v8126_v50  ;;  %v8698_v50 = vld [vmem:[#allocation3 + $0x768] sm:$0xff] }
 0xb01   :  { %8323 = vmatpush1.bf16.msra.mxu1 %v8302_v46  ;;  %8354 = vmatprep.mubr.bf16.mxu1 %v20849_v27  ;;  %v8889_v46 = vld [vmem:[#allocation3 + $0x7d8] sm:$0xff] }
 0xb02   :  { %8324 = vmatprep.subr.bf16.mxu1 %v8311_v34  ;;  %v8888_v34 = vld [vmem:[#allocation3 + $0x7d0] sm:$0xff] }
 0xb05   :  { %8325 = vmatpush1.bf16.msra.mxu1 %v8310_v45  ;;  %v8883_v45 = vld [vmem:[#allocation3 + $0x7a8] sm:$0xff] }
 0xb06   :  { %8363 = vmatprep.subr.bf16.mxu1 %v8305_v59  ;;  %v8882_v59 = vld [vmem:[#allocation3 + $0x7a0] sm:$0xff] }
 0xb08   :  { %14154 = vmatmul.mubr.msk.bf16.vlgmr.msra.gmra.mrb[52].mxu1 %vm132_vm0, %v8318_v55 }
 0xb09   :  { %8364 = vmatpush1.bf16.msra.mxu1 %v8304_v35  ;;  %8395 = vmatprep.mubr.bf16.mxu1 %v20849_v27  ;;  %v8890_v35 = vld [vmem:[#allocation3 + $0x7e0] sm:$0xff] }
 0xb0a   :  { %8365 = vmatprep.subr.bf16.mxu1 %v8313_v52  ;;  %v8885_v52 = vld [vmem:[#allocation3 + $0x7b8] sm:$0xff] }
 0xb0d   :  { %8366 = vmatpush1.bf16.msra.mxu1 %v8312_v49  ;;  %v8884_v49 = vld [vmem:[#allocation3 + $0x7b0] sm:$0xff] }
 0xb0e   :  { %8404 = vmatprep.subr.bf16.mxu1 %v8307_v32  ;;  %v8893_v32 = vld [vmem:[#allocation3 + $0x7f8] sm:$0xff] }
 0xb10   :  { %14155 = vmatmul.mubr.msk.bf16.vlgmr.msra.gmra.mrb[56].mxu1 %vm132_vm0, %v8318_v55 }
 0xb11   :  { %8405 = vmatpush1.bf16.msra.mxu1 %v8306_v6  ;;  %8436 = vmatprep.mubr.bf16.mxu1 %v20849_v27  ;;  %v8892_v6 = vld [vmem:[#allocation3 + $0x7f0] sm:$0xff] }
 0xb12   :  { %8406 = vmatprep.subr.bf16.mxu1 %v8315_v25  ;;  %v9071_v25 = vld [vmem:[#allocation3 + $0x808] sm:$0xff] }
 0xb15   :  { %8407 = vmatpush1.bf16.msra.mxu1 %v8314_v54  ;;  %v9070_v54 = vld [vmem:[#allocation3 + $0x800] sm:$0xff] }
 0xb16   :  { %8445 = vmatprep.subr.bf16.mxu1 %v8309_v61  ;;  %v9079_v61 = vld [vmem:[#allocation3 + $0x848] sm:$0xff] }
 0xb18   :  { %14156 = vmatmul.mubr.msk.bf16.vlgmr.msra.gmra.mrb[60].mxu1 %vm132_vm0, %v8318_v55 }
 0xb19   :  { %8446 = vmatpush1.bf16.msra.mxu1 %v8308_v47  ;;  %8477 = vmatprep.mubr.bf16.mxu1 %v20849_v27  ;;  %v9078_v47 = vld [vmem:[#allocation3 + $0x840] sm:$0xff] }
 0xb1a   :  { %8447 = vmatprep.subr.bf16.mxu1 %v8317_v40  ;;  %v9073_v40 = vld [vmem:[#allocation3 + $0x818] sm:$0xff] }
 0xb1d   :  { %8448 = vmatpush1.bf16.msra.mxu1 %v8316_v33  ;;  %v9086_v33 = vrot.slane %v20170_v4, 3 }
 0xb1e   :  { %8513 = vmatprep.subr.bf16.mxu1 %v8495_v60  ;;  %v9072_v60 = vld [vmem:[#allocation3 + $0x810] sm:$0xff] }
 0xb20   :  { %14157 = vmatmul.mubr.msk.bf16.vlgmr.msra.gmra.mrb[64].mxu1 %vm132_vm0, %v8318_v55  ;;  %v8891_v55 = vld [vmem:[#allocation3 + $0x7e8] sm:$0xff] }
 0xb21   :  { %8514 = vmatpush1.bf16.msra.mxu1 %v8494_v3  ;;  %8545 = vmatprep.mubr.bf16.mxu1 %v20849_v27  ;;  %v9081_v3 = vld [vmem:[#allocation3 + $0x858] sm:$0xff] }
 0xb22   :  { %8515 = vmatprep.subr.bf16.mxu1 %v8503_v23  ;;  %v9080_v23 = vld [vmem:[#allocation3 + $0x850] sm:$0xff] }
 0xb25   :  { %8516 = vmatpush1.bf16.msra.mxu1 %v8502_v29  ;;  %v9075_v29 = vld [vmem:[#allocation3 + $0x828] sm:$0xff] }
 0xb26   :  { %8554 = vmatprep.subr.bf16.mxu1 %v8497_v13  ;;  %v9074_v13 = vld [vmem:[#allocation3 + $0x820] sm:$0xff] }
 0xb28   :  { %14158 = vmatmul.mubr.msk.bf16.vlgmr.msra.gmra.mrb[52].mxu1 %vm132_vm0, %v20170_v4 }
 0xb29   :  { %8555 = vmatpush1.bf16.msra.mxu1 %v8496_v1  ;;  %8586 = vmatprep.mubr.bf16.mxu1 %v20849_v27  ;;  %v9083_v1 = vld [vmem:[#allocation3 + $0x868] sm:$0xff] }
 0xb2a   :  { %8556 = vmatprep.subr.bf16.mxu1 %v8505_v53  ;;  %v9082_v53 = vld [vmem:[#allocation3 + $0x860] sm:$0xff] }
 0xb2d   :  { %8557 = vmatpush1.bf16.msra.mxu1 %v8504_v42  ;;  %v9077_v42 = vld [vmem:[#allocation3 + $0x838] sm:$0xff] }
 0xb2e   :  { %8595 = vmatprep.subr.bf16.mxu1 %v8499_v24  ;;  %v9076_v24 = vld [vmem:[#allocation3 + $0x830] sm:$0xff] }
 0xb30   :  { %14159 = vmatmul.mubr.msk.bf16.vlgmr.msra.gmra.mrb[56].mxu1 %vm132_vm0, %v20170_v4 }
 0xb31   :  { %8596 = vmatpush1.bf16.msra.mxu1 %v8498_v36  ;;  %8627 = vmatprep.mubr.bf16.mxu1 %v20849_v27  ;;  %v9085_v36 = vld [vmem:[#allocation3 + $0x878] sm:$0xff] }
 0xb32   :  { %8597 = vmatprep.subr.bf16.mxu1 %v8507_v5  ;;  %v9084_v5 = vld [vmem:[#allocation3 + $0x870] sm:$0xff] }
 0xb35   :  { %8598 = vmatpush1.bf16.msra.mxu1 %v8506_v58  ;;  %v9263_v58 = vld [vmem:[#allocation3 + $0x888] sm:$0xff] }
 0xb36   :  { %8636 = vmatprep.subr.bf16.mxu1 %v8501_v2  ;;  %v9262_v2 = vld [vmem:[#allocation3 + $0x880] sm:$0xff] }
 0xb38   :  { %14160 = vmatmul.mubr.msk.bf16.vlgmr.msra.gmra.mrb[60].mxu1 %vm132_vm0, %v20170_v4 }
 0xb39   :  { %8637 = vmatpush1.bf16.msra.mxu1 %v8500_v63  ;;  %8668 = vmatprep.mubr.bf16.mxu1 %v20849_v27  ;;  %v9271_v63 = vld [vmem:[#allocation3 + $0x8c8] sm:$0xff] }
 0xb3a   :  { %8638 = vmatprep.subr.bf16.mxu1 %v8509_v18  ;;  %v9270_v18 = vld [vmem:[#allocation3 + $0x8c0] sm:$0xff] }
 0xb3d   :  { %8639 = vmatpush1.bf16.msra.mxu1 %v8508_v16  ;;  %v9265_v16 = vld [vmem:[#allocation3 + $0x898] sm:$0xff] }
 0xb3e   :  { %8706 = vmatprep.subr.bf16.mxu1 %v8686_v11  ;;  %v9278_v11 = vrot.slane %v20170_v4, 4 }
 0xb40   :  { %14161 = vmatmul.mubr.msk.bf16.vlgmr.msra.gmra.mrb[64].mxu1 %vm132_vm0, %v20170_v4  ;;  %v9274_v4 = vld [vmem:[#allocation3 + $0x8e0] sm:$0xff] }
 0xb41   :  { %8707 = vmatpush1.bf16.msra.mxu1 %v8685_v39  ;;  %8738 = vmatprep.mubr.bf16.mxu1 %v20849_v27  ;;  %v9264_v39 = vld [vmem:[#allocation3 + $0x890] sm:$0xff] }
 0xb42   :  { %8708 = vmatprep.subr.bf16.mxu1 %v8694_v62  ;;  %v9273_v62 = vld [vmem:[#allocation3 + $0x8d8] sm:$0xff] }
 0xb45   :  { %8709 = vmatpush1.bf16.msra.mxu1 %v8693_v10  ;;  %v9272_v10 = vld [vmem:[#allocation3 + $0x8d0] sm:$0xff] }
 0xb46   :  { %8747 = vmatprep.subr.bf16.mxu1 %v8688_v21  ;;  %v9267_v21 = vld [vmem:[#allocation3 + $0x8a8] sm:$0xff] }
 0xb48   :  { %14162 = vmatmul.mubr.msk.bf16.vlgmr.msra.gmra.mrb[52].mxu1 %vm132_vm0, %v8702_v37 }
 0xb49   :  { %8748 = vmatpush1.bf16.msra.mxu1 %v8687_v48  ;;  %8779 = vmatprep.mubr.bf16.mxu1 %v20849_v27  ;;  %v9275_v48 = vld [vmem:[#allocation3 + $0x8e8] sm:$0xff] }
 0xb4a   :  { %8749 = vmatprep.subr.bf16.mxu1 %v8696_v38  ;;  %v9269_v38 = vld [vmem:[#allocation3 + $0x8b8] sm:$0xff] }
 0xb4d   :  { %8750 = vmatpush1.bf16.msra.mxu1 %v8695_v43  ;;  %v9268_v43 = vld [vmem:[#allocation3 + $0x8b0] sm:$0xff] }
 0xb4e   :  { %8788 = vmatprep.subr.bf16.mxu1 %v8690_v28  ;;  %v9277_v28 = vld [vmem:[#allocation3 + $0x8f8] sm:$0xff] }
 0xb50   :  { %14163 = vmatmul.mubr.msk.bf16.vlgmr.msra.gmra.mrb[56].mxu1 %vm132_vm0, %v8702_v37 }
 0xb51   :  { %8789 = vmatpush1.bf16.msra.mxu1 %v8689_v8  ;;  %8820 = vmatprep.mubr.bf16.mxu1 %v20849_v27  ;;  %v9276_v8 = vld [vmem:[#allocation3 + $0x8f0] sm:$0xff] }
 0xb52   :  { %8790 = vmatprep.subr.bf16.mxu1 %v8698_v50  ;;  %v9455_v50 = vld [vmem:[#allocation3 + $0x908] sm:$0xff] }
 0xb55   :  { %8791 = vmatpush1.bf16.msra.mxu1 %v8697_v19  ;;  %v9454_v19 = vld [vmem:[#allocation3 + $0x900] sm:$0xff] }
 0xb56   :  { %8829 = vmatprep.subr.bf16.mxu1 %v8692_v51  ;;  %v9463_v51 = vld [vmem:[#allocation3 + $0x948] sm:$0xff] }
 0xb58   :  { %14164 = vmatmul.mubr.msk.bf16.vlgmr.msra.gmra.mrb[60].mxu1 %vm132_vm0, %v8702_v37 }
 0xb59   :  { %8830 = vmatpush1.bf16.msra.mxu1 %v8691_v57  ;;  %8861 = vmatprep.mubr.bf16.mxu1 %v20849_v27  ;;  %v9462_v57 = vld [vmem:[#allocation3 + $0x940] sm:$0xff] }
 0xb5a   :  { %8831 = vmatprep.subr.bf16.mxu1 %v8700_v26  ;;  %v9457_v26 = vld [vmem:[#allocation3 + $0x918] sm:$0xff] }
 0xb5d   :  { %8832 = vmatpush1.bf16.msra.mxu1 %v8699_v44  ;;  %v9471_v44 = vrot.slane %v20176_v30, 1 }
 0xb5e   :  { %8898 = vmatprep.subr.bf16.mxu1 %v8879_v56  ;;  %v9456_v56 = vld [vmem:[#allocation3 + $0x910] sm:$0xff] }
 0xb60   :  { %14165 = vmatmul.mubr.msk.bf16.vlgmr.msra.gmra.mrb[64].mxu1 %vm132_vm0, %v8702_v37  ;;  %v9266_v37 = vld [vmem:[#allocation3 + $0x8a0] sm:$0xff] }
 0xb61   :  { %8899 = vmatpush1.bf16.msra.mxu1 %v8878_v41  ;;  %8930 = vmatprep.mubr.bf16.mxu1 %v20849_v27  ;;  %v9465_v41 = vld [vmem:[#allocation3 + $0x958] sm:$0xff] }
 0xb62   :  { %8900 = vmatprep.subr.bf16.mxu1 %v8887_v14  ;;  %v9464_v14 = vld [vmem:[#allocation3 + $0x950] sm:$0xff] }
 0xb65   :  { %8901 = vmatpush1.bf16.msra.mxu1 %v8886_v12  ;;  %v9459_v12 = vld [vmem:[#allocation3 + $0x928] sm:$0xff] }
 0xb66   :  { %8939 = vmatprep.subr.bf16.mxu1 %v8881_v7  ;;  %v9458_v7 = vld [vmem:[#allocation3 + $0x920] sm:$0xff] }
 0xb68   :  { %14166 = vmatmul.mubr.msk.bf16.vlgmr.msra.gmra.mrb[52].mxu1 %vm132_vm0, %v8894_v15 }
 0xb69   :  { %8940 = vmatpush1.bf16.msra.mxu1 %v8880_v31  ;;  %8971 = vmatprep.mubr.bf16.mxu1 %v20849_v27  ;;  %v9466_v31 = vld [vmem:[#allocation3 + $0x960] sm:$0xff] }
 0xb6a   :  { %8941 = vmatprep.subr.bf16.mxu1 %v8889_v46  ;;  %v9461_v46 = vld [vmem:[#allocation3 + $0x938] sm:$0xff] }
 0xb6d   :  { %8942 = vmatpush1.bf16.msra.mxu1 %v8888_v34  ;;  %v9460_v34 = vld [vmem:[#allocation3 + $0x930] sm:$0xff] }
 0xb6e   :  { %8980 = vmatprep.subr.bf16.mxu1 %v8883_v45  ;;  %v9469_v45 = vld [vmem:[#allocation3 + $0x978] sm:$0xff] }
 0xb70   :  { %14167 = vmatmul.mubr.msk.bf16.vlgmr.msra.gmra.mrb[56].mxu1 %vm132_vm0, %v8894_v15 }
 0xb71   :  { %8981 = vmatpush1.bf16.msra.mxu1 %v8882_v59  ;;  %9012 = vmatprep.mubr.bf16.mxu1 %v20849_v27  ;;  %v9468_v59 = vld [vmem:[#allocation3 + $0x970] sm:$0xff] }
 0xb72   :  { %8982 = vmatprep.subr.bf16.mxu1 %v8891_v55  ;;  %v9648_v55 = vld [vmem:[#allocation3 + $0x988] sm:$0xff] }
 0xb75   :  { %8983 = vmatpush1.bf16.msra.mxu1 %v8890_v35  ;;  %v9647_v35 = vld [vmem:[#allocation3 + $0x980] sm:$0xff] }
 0xb76   :  { %9021 = vmatprep.subr.bf16.mxu1 %v8885_v52  ;;  %v9656_v52 = vld [vmem:[#allocation3 + $0x9c8] sm:$0xff] }
 0xb78   :  { %14168 = vmatmul.mubr.msk.bf16.vlgmr.msra.gmra.mrb[60].mxu1 %vm132_vm0, %v8894_v15 }
 0xb79   :  { %9022 = vmatpush1.bf16.msra.mxu1 %v8884_v49  ;;  %9053 = vmatprep.mubr.bf16.mxu1 %v20849_v27  ;;  %v9655_v49 = vld [vmem:[#allocation3 + $0x9c0] sm:$0xff] }
 0xb7a   :  { %9023 = vmatprep.subr.bf16.mxu1 %v8893_v32  ;;  %v9650_v32 = vld [vmem:[#allocation3 + $0x998] sm:$0xff] }
 0xb7d   :  { %9024 = vmatpush1.bf16.msra.mxu1 %v8892_v6  ;;  %v9663_v6 = vrot.slane %v20176_v30, 2 }
 0xb7e   :  { %9090 = vmatprep.subr.bf16.mxu1 %v9071_v25  ;;  %v9649_v25 = vld [vmem:[#allocation3 + $0x990] sm:$0xff] }
 0xb80   :  { %14169 = vmatmul.mubr.msk.bf16.vlgmr.msra.gmra.mrb[64].mxu1 %vm132_vm0, %v8894_v15  ;;  %v9467_v15 = vld [vmem:[#allocation3 + $0x968] sm:$0xff] }
 0xb81   :  { %9091 = vmatpush1.bf16.msra.mxu1 %v9070_v54  ;;  %9122 = vmatprep.mubr.bf16.mxu1 %v20849_v27  ;;  %v9658_v54 = vld [vmem:[#allocation3 + $0x9d8] sm:$0xff] }
 0xb82   :  { %9092 = vmatprep.subr.bf16.mxu1 %v9079_v61  ;;  %v9657_v61 = vld [vmem:[#allocation3 + $0x9d0] sm:$0xff] }
 0xb85   :  { %9093 = vmatpush1.bf16.msra.mxu1 %v9078_v47  ;;  %v9652_v47 = vld [vmem:[#allocation3 + $0x9a8] sm:$0xff] }
 0xb86   :  { %9131 = vmatprep.subr.bf16.mxu1 %v9073_v40  ;;  %v9651_v40 = vld [vmem:[#allocation3 + $0x9a0] sm:$0xff] }
 0xb88   :  { %14170 = vmatmul.mubr.msk.bf16.vlgmr.msra.gmra.mrb[52].mxu1 %vm132_vm0, %v9086_v33 }
 0xb89   :  { %9132 = vmatpush1.bf16.msra.mxu1 %v9072_v60  ;;  %9163 = vmatprep.mubr.bf16.mxu1 %v20849_v27  ;;  %v9659_v60 = vld [vmem:[#allocation3 + $0x9e0] sm:$0xff] }
 0xb8a   :  { %9133 = vmatprep.subr.bf16.mxu1 %v9081_v3  ;;  %v9654_v3 = vld [vmem:[#allocation3 + $0x9b8] sm:$0xff] }
 0xb8d   :  { %9134 = vmatpush1.bf16.msra.mxu1 %v9080_v23  ;;  %v9653_v23 = vld [vmem:[#allocation3 + $0x9b0] sm:$0xff] }
 0xb8e   :  { %9172 = vmatprep.subr.bf16.mxu1 %v9075_v29  ;;  %v9662_v29 = vld [vmem:[#allocation3 + $0x9f8] sm:$0xff] }
 0xb90   :  { %14171 = vmatmul.mubr.msk.bf16.vlgmr.msra.gmra.mrb[56].mxu1 %vm132_vm0, %v9086_v33 }
 0xb91   :  { %9173 = vmatpush1.bf16.msra.mxu1 %v9074_v13  ;;  %9204 = vmatprep.mubr.bf16.mxu1 %v20849_v27  ;;  %v9661_v13 = vld [vmem:[#allocation3 + $0x9f0] sm:$0xff] }
 0xb92   :  { %9174 = vmatprep.subr.bf16.mxu1 %v9083_v1  ;;  %v9840_v1 = vld [vmem:[#allocation3 + $0xa08] sm:$0xff] }
 0xb95   :  { %9175 = vmatpush1.bf16.msra.mxu1 %v9082_v53  ;;  %v9839_v53 = vld [vmem:[#allocation3 + $0xa00] sm:$0xff] }
 0xb96   :  { %9213 = vmatprep.subr.bf16.mxu1 %v9077_v42  ;;  %v9848_v42 = vld [vmem:[#allocation3 + $0xa48] sm:$0xff] }
 0xb98   :  { %14172 = vmatmul.mubr.msk.bf16.vlgmr.msra.gmra.mrb[60].mxu1 %vm132_vm0, %v9086_v33 }
 0xb99   :  { %9214 = vmatpush1.bf16.msra.mxu1 %v9076_v24  ;;  %9245 = vmatprep.mubr.bf16.mxu1 %v20849_v27  ;;  %v9847_v24 = vld [vmem:[#allocation3 + $0xa40] sm:$0xff] }
 0xb9a   :  { %9215 = vmatprep.subr.bf16.mxu1 %v9085_v36  ;;  %v9842_v36 = vld [vmem:[#allocation3 + $0xa18] sm:$0xff] }
 0xb9d   :  { %9216 = vmatpush1.bf16.msra.mxu1 %v9084_v5  ;;  %v9855_v5 = vrot.slane %v20176_v30, 3 }
 0xb9e   :  { %9282 = vmatprep.subr.bf16.mxu1 %v9263_v58  ;;  %v9841_v58 = vld [vmem:[#allocation3 + $0xa10] sm:$0xff] }
 0xba0   :  { %14173 = vmatmul.mubr.msk.bf16.vlgmr.msra.gmra.mrb[64].mxu1 %vm132_vm0, %v9086_v33  ;;  %v9660_v33 = vld [vmem:[#allocation3 + $0x9e8] sm:$0xff] }
 0xba1   :  { %9283 = vmatpush1.bf16.msra.mxu1 %v9262_v2  ;;  %9314 = vmatprep.mubr.bf16.mxu1 %v20849_v27  ;;  %v9850_v2 = vld [vmem:[#allocation3 + $0xa58] sm:$0xff] }
 0xba2   :  { %9284 = vmatprep.subr.bf16.mxu1 %v9271_v63  ;;  %v9849_v63 = vld [vmem:[#allocation3 + $0xa50] sm:$0xff] }
 0xba5   :  { %9285 = vmatpush1.bf16.msra.mxu1 %v9270_v18  ;;  %v9844_v18 = vld [vmem:[#allocation3 + $0xa28] sm:$0xff] }
 0xba6   :  { %9323 = vmatprep.subr.bf16.mxu1 %v9265_v16  ;;  %v9843_v16 = vld [vmem:[#allocation3 + $0xa20] sm:$0xff] }
 0xba8   :  { %14174 = vmatmul.mubr.msk.bf16.vlgmr.msra.gmra.mrb[52].mxu1 %vm132_vm0, %v9278_v11 }
 0xba9   :  { %9324 = vmatpush1.bf16.msra.mxu1 %v9264_v39  ;;  %9355 = vmatprep.mubr.bf16.mxu1 %v20849_v27  ;;  %v9851_v39 = vld [vmem:[#allocation3 + $0xa60] sm:$0xff] }
 0xbaa   :  { %9325 = vmatprep.subr.bf16.mxu1 %v9273_v62  ;;  %v9846_v62 = vld [vmem:[#allocation3 + $0xa38] sm:$0xff] }
 0xbad   :  { %9326 = vmatpush1.bf16.msra.mxu1 %v9272_v10  ;;  %v9845_v10 = vld [vmem:[#allocation3 + $0xa30] sm:$0xff] }
 0xbae   :  { %9364 = vmatprep.subr.bf16.mxu1 %v9267_v21  ;;  %v9854_v21 = vld [vmem:[#allocation3 + $0xa78] sm:$0xff] }
 0xbb0   :  { %14175 = vmatmul.mubr.msk.bf16.vlgmr.msra.gmra.mrb[56].mxu1 %vm132_vm0, %v9278_v11 }
 0xbb1   :  { %9365 = vmatpush1.bf16.msra.mxu1 %v9266_v37  ;;  %9396 = vmatprep.mubr.bf16.mxu1 %v20849_v27  ;;  %v9853_v37 = vld [vmem:[#allocation3 + $0xa70] sm:$0xff] }
 0xbb2   :  { %9366 = vmatprep.subr.bf16.mxu1 %v9275_v48  ;;  %v10032_v48 = vld [vmem:[#allocation3 + $0xa88] sm:$0xff] }
 0xbb5   :  { %9367 = vmatpush1.bf16.msra.mxu1 %v9274_v4  ;;  %v10031_v4 = vld [vmem:[#allocation3 + $0xa80] sm:$0xff] }
 0xbb6   :  { %9405 = vmatprep.subr.bf16.mxu1 %v9269_v38  ;;  %v10040_v38 = vld [vmem:[#allocation3 + $0xac8] sm:$0xff] }
 0xbb8   :  { %14176 = vmatmul.mubr.msk.bf16.vlgmr.msra.gmra.mrb[60].mxu1 %vm132_vm0, %v9278_v11 }
 0xbb9   :  { %9406 = vmatpush1.bf16.msra.mxu1 %v9268_v43  ;;  %9437 = vmatprep.mubr.bf16.mxu1 %v20849_v27  ;;  %v10039_v43 = vld [vmem:[#allocation3 + $0xac0] sm:$0xff] }
 0xbba   :  { %9407 = vmatprep.subr.bf16.mxu1 %v9277_v28  ;;  %v10034_v28 = vld [vmem:[#allocation3 + $0xa98] sm:$0xff] }
 0xbbd   :  { %9408 = vmatpush1.bf16.msra.mxu1 %v9276_v8  ;;  %v10047_v8 = vrot.slane %v20176_v30, 4 }
 0xbbe   :  { %9475 = vmatprep.subr.bf16.mxu1 %v9455_v50  ;;  %v10033_v50 = vld [vmem:[#allocation3 + $0xa90] sm:$0xff] }
 0xbc0   :  { %14177 = vmatmul.mubr.msk.bf16.vlgmr.msra.gmra.mrb[64].mxu1 %vm132_vm0, %v9278_v11  ;;  %v9852_v11 = vld [vmem:[#allocation3 + $0xa68] sm:$0xff] }
 0xbc1   :  { %9476 = vmatpush1.bf16.msra.mxu1 %v9454_v19  ;;  %9507 = vmatprep.mubr.bf16.mxu1 %v20849_v27  ;;  %v10042_v19 = vld [vmem:[#allocation3 + $0xad8] sm:$0xff] }
 0xbc2   :  { %9477 = vmatprep.subr.bf16.mxu1 %v9463_v51  ;;  %v10041_v51 = vld [vmem:[#allocation3 + $0xad0] sm:$0xff] }
 0xbc5   :  { %9478 = vmatpush1.bf16.msra.mxu1 %v9462_v57  ;;  %v10036_v57 = vld [vmem:[#allocation3 + $0xaa8] sm:$0xff] }
 0xbc6   :  { %9516 = vmatprep.subr.bf16.mxu1 %v9457_v26  ;;  %v10035_v26 = vld [vmem:[#allocation3 + $0xaa0] sm:$0xff] }
 0xbc8   :  { %14178 = vmatmul.mubr.msk.bf16.vlgmr.msra.gmra.mrb[52].mxu1 %vm132_vm0, %v9471_v44 }
 0xbc9   :  { %9517 = vmatpush1.bf16.msra.mxu1 %v9456_v56  ;;  %9548 = vmatprep.mubr.bf16.mxu1 %v20849_v27  ;;  %v10043_v56 = vld [vmem:[#allocation3 + $0xae0] sm:$0xff] }
 0xbca   :  { %9518 = vmatprep.subr.bf16.mxu1 %v9465_v41  ;;  %v10038_v41 = vld [vmem:[#allocation3 + $0xab8] sm:$0xff] }
 0xbcd   :  { %9519 = vmatpush1.bf16.msra.mxu1 %v9464_v14  ;;  %v10037_v14 = vld [vmem:[#allocation3 + $0xab0] sm:$0xff] }
 0xbce   :  { %9557 = vmatprep.subr.bf16.mxu1 %v9459_v12  ;;  %v10046_v12 = vld [vmem:[#allocation3 + $0xaf8] sm:$0xff] }
 0xbd0   :  { %14179 = vmatmul.mubr.msk.bf16.vlgmr.msra.gmra.mrb[56].mxu1 %vm132_vm0, %v9471_v44 }
 0xbd1   :  { %9558 = vmatpush1.bf16.msra.mxu1 %v9458_v7  ;;  %9589 = vmatprep.mubr.bf16.mxu1 %v20849_v27  ;;  %v10045_v7 = vld [vmem:[#allocation3 + $0xaf0] sm:$0xff] }
 0xbd2   :  { %9559 = vmatprep.subr.bf16.mxu1 %v9467_v15  ;;  %v10224_v15 = vld [vmem:[#allocation3 + $0xb08] sm:$0xff] }
 0xbd5   :  { %9560 = vmatpush1.bf16.msra.mxu1 %v9466_v31  ;;  %v10223_v31 = vld [vmem:[#allocation3 + $0xb00] sm:$0xff] }
 0xbd6   :  { %9598 = vmatprep.subr.bf16.mxu1 %v9461_v46  ;;  %v10232_v46 = vld [vmem:[#allocation3 + $0xb48] sm:$0xff] }
 0xbd8   :  { %14180 = vmatmul.mubr.msk.bf16.vlgmr.msra.gmra.mrb[60].mxu1 %vm132_vm0, %v9471_v44 }
 0xbd9   :  { %9599 = vmatpush1.bf16.msra.mxu1 %v9460_v34  ;;  %9630 = vmatprep.mubr.bf16.mxu1 %v20849_v27  ;;  %v10231_v34 = vld [vmem:[#allocation3 + $0xb40] sm:$0xff] }
 0xbda   :  { %9600 = vmatprep.subr.bf16.mxu1 %v9469_v45  ;;  %v10226_v45 = vld [vmem:[#allocation3 + $0xb18] sm:$0xff] }
 0xbdd   :  { %9601 = vmatpush1.bf16.msra.mxu1 %v9468_v59  ;;  %v10239_v59 = vrot.slane %v20176_v30, 5 }
 0xbde   :  { %9667 = vmatprep.subr.bf16.mxu1 %v9648_v55  ;;  %v10225_v55 = vld [vmem:[#allocation3 + $0xb10] sm:$0xff] }
 0xbe0   :  { %14181 = vmatmul.mubr.msk.bf16.vlgmr.msra.gmra.mrb[64].mxu1 %vm132_vm0, %v9471_v44  ;;  %v10044_v44 = vld [vmem:[#allocation3 + $0xae8] sm:$0xff] }
 0xbe1   :  { %9668 = vmatpush1.bf16.msra.mxu1 %v9647_v35  ;;  %9699 = vmatprep.mubr.bf16.mxu1 %v20849_v27  ;;  %v10234_v35 = vld [vmem:[#allocation3 + $0xb58] sm:$0xff] }
 0xbe2   :  { %9669 = vmatprep.subr.bf16.mxu1 %v9656_v52  ;;  %v10233_v52 = vld [vmem:[#allocation3 + $0xb50] sm:$0xff] }
 0xbe5   :  { %9670 = vmatpush1.bf16.msra.mxu1 %v9655_v49  ;;  %v10228_v49 = vld [vmem:[#allocation3 + $0xb28] sm:$0xff] }
 0xbe6   :  { %9708 = vmatprep.subr.bf16.mxu1 %v9650_v32  ;;  %v10227_v32 = vld [vmem:[#allocation3 + $0xb20] sm:$0xff] }
 0xbe8   :  { %14182 = vmatmul.mubr.msk.bf16.vlgmr.msra.gmra.mrb[52].mxu1 %vm132_vm0, %v9663_v6 }
 0xbe9   :  { %9709 = vmatpush1.bf16.msra.mxu1 %v9649_v25  ;;  %9740 = vmatprep.mubr.bf16.mxu1 %v20849_v27  ;;  %v10235_v25 = vld [vmem:[#allocation3 + $0xb60] sm:$0xff] }
 0xbea   :  { %9710 = vmatprep.subr.bf16.mxu1 %v9658_v54  ;;  %v10230_v54 = vld [vmem:[#allocation3 + $0xb38] sm:$0xff] }
 0xbed   :  { %9711 = vmatpush1.bf16.msra.mxu1 %v9657_v61  ;;  %v10229_v61 = vld [vmem:[#allocation3 + $0xb30] sm:$0xff] }
 0xbee   :  { %9749 = vmatprep.subr.bf16.mxu1 %v9652_v47  ;;  %v10238_v47 = vld [vmem:[#allocation3 + $0xb78] sm:$0xff] }
 0xbf0   :  { %14183 = vmatmul.mubr.msk.bf16.vlgmr.msra.gmra.mrb[56].mxu1 %vm132_vm0, %v9663_v6 }
 0xbf1   :  { %9750 = vmatpush1.bf16.msra.mxu1 %v9651_v40  ;;  %9781 = vmatprep.mubr.bf16.mxu1 %v20849_v27  ;;  %v10237_v40 = vld [vmem:[#allocation3 + $0xb70] sm:$0xff] }
 0xbf2   :  { %9751 = vmatprep.subr.bf16.mxu1 %v9660_v33  ;;  %v10416_v33 = vld [vmem:[#allocation3 + $0xb88] sm:$0xff] }
 0xbf5   :  { %9752 = vmatpush1.bf16.msra.mxu1 %v9659_v60  ;;  %v10415_v60 = vld [vmem:[#allocation3 + $0xb80] sm:$0xff] }
 0xbf6   :  { %9790 = vmatprep.subr.bf16.mxu1 %v9654_v3  ;;  %v10424_v3 = vld [vmem:[#allocation3 + $0xbc8] sm:$0xff] }
 0xbf8   :  { %14184 = vmatmul.mubr.msk.bf16.vlgmr.msra.gmra.mrb[60].mxu1 %vm132_vm0, %v9663_v6 }
 0xbf9   :  { %9791 = vmatpush1.bf16.msra.mxu1 %v9653_v23  ;;  %9822 = vmatprep.mubr.bf16.mxu1 %v20849_v27  ;;  %v10423_v23 = vld [vmem:[#allocation3 + $0xbc0] sm:$0xff] }
 0xbfa   :  { %9792 = vmatprep.subr.bf16.mxu1 %v9662_v29  ;;  %v10418_v29 = vld [vmem:[#allocation3 + $0xb98] sm:$0xff] }
 0xbfd   :  { %9793 = vmatpush1.bf16.msra.mxu1 %v9661_v13  ;;  %v10431_v13 = vrot.slane %v20176_v30, 6  ;;  %v10427_v30 = vld [vmem:[#allocation3 + $0xbe0] sm:$0xff] }
 0xbfe   :  { %9859 = vmatprep.subr.bf16.mxu1 %v9840_v1  ;;  %v10417_v1 = vld [vmem:[#allocation3 + $0xb90] sm:$0xff] }
 0xc00   :  { %14185 = vmatmul.mubr.msk.bf16.vlgmr.msra.gmra.mrb[64].mxu1 %vm132_vm0, %v9663_v6  ;;  %v10236_v6 = vld [vmem:[#allocation3 + $0xb68] sm:$0xff] }
 0xc01   :  { %9860 = vmatpush1.bf16.msra.mxu1 %v9839_v53  ;;  %9891 = vmatprep.mubr.bf16.mxu1 %v20849_v27  ;;  %v10426_v53 = vld [vmem:[#allocation3 + $0xbd8] sm:$0xff] }
 0xc02   :  { %9861 = vmatprep.subr.bf16.mxu1 %v9848_v42  ;;  %v10425_v42 = vld [vmem:[#allocation3 + $0xbd0] sm:$0xff] }
 0xc05   :  { %9862 = vmatpush1.bf16.msra.mxu1 %v9847_v24  ;;  %v10420_v24 = vld [vmem:[#allocation3 + $0xba8] sm:$0xff] }
 0xc06   :  { %9900 = vmatprep.subr.bf16.mxu1 %v9842_v36  ;;  %v10419_v36 = vld [vmem:[#allocation3 + $0xba0] sm:$0xff] }
 0xc08   :  { %14186 = vmatmul.mubr.msk.bf16.vlgmr.msra.gmra.mrb[52].mxu1 %vm132_vm0, %v9855_v5 }
 0xc09   :  { %9901 = vmatpush1.bf16.msra.mxu1 %v9841_v58  ;;  %9932 = vmatprep.mubr.bf16.mxu1 %v20849_v27  ;;  %v10422_v58 = vld [vmem:[#allocation3 + $0xbb8] sm:$0xff] }
 0xc0a   :  { %9902 = vmatprep.subr.bf16.mxu1 %v9850_v2  ;;  %v10421_v2 = vld [vmem:[#allocation3 + $0xbb0] sm:$0xff] }
 0xc0d   :  { %9903 = vmatpush1.bf16.msra.mxu1 %v9849_v63  ;;  %v10430_v63 = vld [vmem:[#allocation3 + $0xbf8] sm:$0xff] }
 0xc0e   :  { %9941 = vmatprep.subr.bf16.mxu1 %v9844_v18  ;;  %v10429_v18 = vld [vmem:[#allocation3 + $0xbf0] sm:$0xff] }
 0xc10   :  { %14187 = vmatmul.mubr.msk.bf16.vlgmr.msra.gmra.mrb[56].mxu1 %vm132_vm0, %v9855_v5 }
 0xc11   :  { %9942 = vmatpush1.bf16.msra.mxu1 %v9843_v16  ;;  %9973 = vmatprep.mubr.bf16.mxu1 %v20849_v27  ;;  %v10608_v16 = vld [vmem:[#allocation3 + $0xc08] sm:$0xff] }
 0xc12   :  { %9943 = vmatprep.subr.bf16.mxu1 %v9852_v11  ;;  %v10607_v11 = vld [vmem:[#allocation3 + $0xc00] sm:$0xff] }
 0xc15   :  { %9944 = vmatpush1.bf16.msra.mxu1 %v9851_v39  ;;  %v10616_v39 = vld [vmem:[#allocation3 + $0xc48] sm:$0xff] }
 0xc16   :  { %9982 = vmatprep.subr.bf16.mxu1 %v9846_v62  ;;  %v10615_v62 = vld [vmem:[#allocation3 + $0xc40] sm:$0xff] }
 0xc18   :  { %14188 = vmatmul.mubr.msk.bf16.vlgmr.msra.gmra.mrb[60].mxu1 %vm132_vm0, %v9855_v5 }
 0xc19   :  { %9983 = vmatpush1.bf16.msra.mxu1 %v9845_v10  ;;  %10014 = vmatprep.mubr.bf16.mxu1 %v20849_v27  ;;  %v10610_v10 = vld [vmem:[#allocation3 + $0xc18] sm:$0xff] }
 0xc1a   :  { %9984 = vmatprep.subr.bf16.mxu1 %v9854_v21  ;;  %v10624_v21 = vrot.slane %v20182_v22, 3 }
 0xc1d   :  { %9985 = vmatpush1.bf16.msra.mxu1 %v9853_v37  ;;  %v10609_v37 = vld [vmem:[#allocation3 + $0xc10] sm:$0xff] }
 0xc1e   :  { %10051 = vmatprep.subr.bf16.mxu1 %v10032_v48  ;;  %v10618_v48 = vld [vmem:[#allocation3 + $0xc58] sm:$0xff] }
 0xc20   :  { %14189 = vmatmul.mubr.msk.bf16.vlgmr.msra.gmra.mrb[64].mxu1 %vm132_vm0, %v9855_v5  ;;  %v10428_v5 = vld [vmem:[#allocation3 + $0xbe8] sm:$0xff] }
 0xc21   :  { %10052 = vmatpush1.bf16.msra.mxu1 %v10031_v4  ;;  %10083 = vmatprep.mubr.bf16.mxu1 %v20849_v27  ;;  %v10617_v4 = vld [vmem:[#allocation3 + $0xc50] sm:$0xff] }
 0xc22   :  { %10053 = vmatprep.subr.bf16.mxu1 %v10040_v38  ;;  %v10612_v38 = vld [vmem:[#allocation3 + $0xc28] sm:$0xff] }
 0xc25   :  { %10054 = vmatpush1.bf16.msra.mxu1 %v10039_v43  ;;  %v10611_v43 = vld [vmem:[#allocation3 + $0xc20] sm:$0xff] }
 0xc26   :  { %10092 = vmatprep.subr.bf16.mxu1 %v10034_v28  ;;  %v10620_v28 = vld [vmem:[#allocation3 + $0xc68] sm:$0xff] }
 0xc28   :  { %14190 = vmatmul.mubr.msk.bf16.vlgmr.msra.gmra.mrb[52].mxu1 %vm132_vm0, %v10047_v8 }
 0xc29   :  { %10093 = vmatpush1.bf16.msra.mxu1 %v10033_v50  ;;  %10124 = vmatprep.mubr.bf16.mxu1 %v20849_v27  ;;  %v10614_v50 = vld [vmem:[#allocation3 + $0xc38] sm:$0xff] }
 0xc2a   :  { %10094 = vmatprep.subr.bf16.mxu1 %v10042_v19  ;;  %v10613_v19 = vld [vmem:[#allocation3 + $0xc30] sm:$0xff] }
 0xc2d   :  { %10095 = vmatpush1.bf16.msra.mxu1 %v10041_v51  ;;  %v10622_v51 = vld [vmem:[#allocation3 + $0xc78] sm:$0xff] }
 0xc2e   :  { %10133 = vmatprep.subr.bf16.mxu1 %v10036_v57  ;;  %v10621_v57 = vld [vmem:[#allocation3 + $0xc70] sm:$0xff] }
 0xc30   :  { %14191 = vmatmul.mubr.msk.bf16.vlgmr.msra.gmra.mrb[56].mxu1 %vm132_vm0, %v10047_v8 }
 0xc31   :  { %10134 = vmatpush1.bf16.msra.mxu1 %v10035_v26  ;;  %10165 = vmatprep.mubr.bf16.mxu1 %v20849_v27  ;;  %v10801_v26 = vld [vmem:[#allocation3 + $0xc88] sm:$0xff] }
 0xc32   :  { %10135 = vmatprep.subr.bf16.mxu1 %v10044_v44  ;;  %v10800_v44 = vld [vmem:[#allocation3 + $0xc80] sm:$0xff] }
 0xc35   :  { %10136 = vmatpush1.bf16.msra.mxu1 %v10043_v56  ;;  %v10809_v56 = vld [vmem:[#allocation3 + $0xcc8] sm:$0xff] }
 0xc36   :  { %10174 = vmatprep.subr.bf16.mxu1 %v10038_v41  ;;  %v10808_v41 = vld [vmem:[#allocation3 + $0xcc0] sm:$0xff] }
 0xc38   :  { %14192 = vmatmul.mubr.msk.bf16.vlgmr.msra.gmra.mrb[60].mxu1 %vm132_vm0, %v10047_v8 }
 0xc39   :  { %10175 = vmatpush1.bf16.msra.mxu1 %v10037_v14  ;;  %10206 = vmatprep.mubr.bf16.mxu1 %v20849_v27  ;;  %v10803_v14 = vld [vmem:[#allocation3 + $0xc98] sm:$0xff] }
 0xc3a   :  { %10176 = vmatprep.subr.bf16.mxu1 %v10046_v12  ;;  %v10816_v12 = vrot.slane %v20182_v22, 4 }
 0xc3d   :  { %10177 = vmatpush1.bf16.msra.mxu1 %v10045_v7  ;;  %v10802_v7 = vld [vmem:[#allocation3 + $0xc90] sm:$0xff] }
 0xc3e   :  { %10243 = vmatprep.subr.bf16.mxu1 %v10224_v15  ;;  %v10811_v15 = vld [vmem:[#allocation3 + $0xcd8] sm:$0xff] }
 0xc40   :  { %14193 = vmatmul.mubr.msk.bf16.vlgmr.msra.gmra.mrb[64].mxu1 %vm132_vm0, %v10047_v8  ;;  %v10619_v8 = vld [vmem:[#allocation3 + $0xc60] sm:$0xff] }
 0xc41   :  { %10244 = vmatpush1.bf16.msra.mxu1 %v10223_v31  ;;  %10275 = vmatprep.mubr.bf16.mxu1 %v20849_v27  ;;  %v10810_v31 = vld [vmem:[#allocation3 + $0xcd0] sm:$0xff] }
 0xc42   :  { %10245 = vmatprep.subr.bf16.mxu1 %v10232_v46  ;;  %v10805_v46 = vld [vmem:[#allocation3 + $0xca8] sm:$0xff] }
 0xc45   :  { %10246 = vmatpush1.bf16.msra.mxu1 %v10231_v34  ;;  %v10804_v34 = vld [vmem:[#allocation3 + $0xca0] sm:$0xff] }
 0xc46   :  { %10284 = vmatprep.subr.bf16.mxu1 %v10226_v45  ;;  %v10813_v45 = vld [vmem:[#allocation3 + $0xce8] sm:$0xff] }
 0xc48   :  { %14194 = vmatmul.mubr.msk.bf16.vlgmr.msra.gmra.mrb[52].mxu1 %vm132_vm0, %v10239_v59 }
 0xc49   :  { %10285 = vmatpush1.bf16.msra.mxu1 %v10225_v55  ;;  %10316 = vmatprep.mubr.bf16.mxu1 %v20849_v27  ;;  %v10807_v55 = vld [vmem:[#allocation3 + $0xcb8] sm:$0xff] }
 0xc4a   :  { %10286 = vmatprep.subr.bf16.mxu1 %v10234_v35  ;;  %v10806_v35 = vld [vmem:[#allocation3 + $0xcb0] sm:$0xff] }
 0xc4d   :  { %10287 = vmatpush1.bf16.msra.mxu1 %v10233_v52  ;;  %v10815_v52 = vld [vmem:[#allocation3 + $0xcf8] sm:$0xff] }
 0xc4e   :  { %10325 = vmatprep.subr.bf16.mxu1 %v10228_v49  ;;  %v10814_v49 = vld [vmem:[#allocation3 + $0xcf0] sm:$0xff] }
 0xc50   :  { %14195 = vmatmul.mubr.msk.bf16.vlgmr.msra.gmra.mrb[56].mxu1 %vm132_vm0, %v10239_v59 }
 0xc51   :  { %10326 = vmatpush1.bf16.msra.mxu1 %v10227_v32  ;;  %10357 = vmatprep.mubr.bf16.mxu1 %v20849_v27  ;;  %v10993_v32 = vld [vmem:[#allocation3 + $0xd08] sm:$0xff] }
 0xc52   :  { %10327 = vmatprep.subr.bf16.mxu1 %v10236_v6  ;;  %v10992_v6 = vld [vmem:[#allocation3 + $0xd00] sm:$0xff] }
 0xc55   :  { %10328 = vmatpush1.bf16.msra.mxu1 %v10235_v25  ;;  %v11001_v25 = vld [vmem:[#allocation3 + $0xd48] sm:$0xff] }
 0xc56   :  { %10366 = vmatprep.subr.bf16.mxu1 %v10230_v54  ;;  %v11000_v54 = vld [vmem:[#allocation3 + $0xd40] sm:$0xff] }
 0xc58   :  { %14196 = vmatmul.mubr.msk.bf16.vlgmr.msra.gmra.mrb[60].mxu1 %vm132_vm0, %v10239_v59 }
 0xc59   :  { %10367 = vmatpush1.bf16.msra.mxu1 %v10229_v61  ;;  %10398 = vmatprep.mubr.bf16.mxu1 %v20849_v27  ;;  %v10995_v61 = vld [vmem:[#allocation3 + $0xd18] sm:$0xff] }
 0xc5a   :  { %10368 = vmatprep.subr.bf16.mxu1 %v10238_v47  ;;  %v11008_v47 = vrot.slane %v20182_v22, 5 }
 0xc5d   :  { %10369 = vmatpush1.bf16.msra.mxu1 %v10237_v40  ;;  %v10994_v40 = vld [vmem:[#allocation3 + $0xd10] sm:$0xff] }
 0xc5e   :  { %10435 = vmatprep.subr.bf16.mxu1 %v10416_v33  ;;  %v11003_v33 = vld [vmem:[#allocation3 + $0xd58] sm:$0xff] }
 0xc60   :  { %14197 = vmatmul.mubr.msk.bf16.vlgmr.msra.gmra.mrb[64].mxu1 %vm132_vm0, %v10239_v59  ;;  %v10812_v59 = vld [vmem:[#allocation3 + $0xce0] sm:$0xff] }
 0xc61   :  { %10436 = vmatpush1.bf16.msra.mxu1 %v10415_v60  ;;  %10467 = vmatprep.mubr.bf16.mxu1 %v20849_v27  ;;  %v11002_v60 = vld [vmem:[#allocation3 + $0xd50] sm:$0xff] }
 0xc62   :  { %10437 = vmatprep.subr.bf16.mxu1 %v10424_v3  ;;  %v10997_v3 = vld [vmem:[#allocation3 + $0xd28] sm:$0xff] }
 0xc65   :  { %10438 = vmatpush1.bf16.msra.mxu1 %v10423_v23  ;;  %v10996_v23 = vld [vmem:[#allocation3 + $0xd20] sm:$0xff] }
 0xc66   :  { %10476 = vmatprep.subr.bf16.mxu1 %v10418_v29  ;;  %v11005_v29 = vld [vmem:[#allocation3 + $0xd68] sm:$0xff] }
 0xc68   :  { %14198 = vmatmul.mubr.msk.bf16.vlgmr.msra.gmra.mrb[52].mxu1 %vm132_vm0, %v10431_v13 }
 0xc69   :  { %10477 = vmatpush1.bf16.msra.mxu1 %v10417_v1  ;;  %10508 = vmatprep.mubr.bf16.mxu1 %v20849_v27  ;;  %v10999_v1 = vld [vmem:[#allocation3 + $0xd38] sm:$0xff] }
 0xc6a   :  { %10478 = vmatprep.subr.bf16.mxu1 %v10426_v53  ;;  %v10998_v53 = vld [vmem:[#allocation3 + $0xd30] sm:$0xff] }
 0xc6d   :  { %10479 = vmatpush1.bf16.msra.mxu1 %v10425_v42  ;;  %v11007_v42 = vld [vmem:[#allocation3 + $0xd78] sm:$0xff] }
 0xc6e   :  { %10517 = vmatprep.subr.bf16.mxu1 %v10420_v24  ;;  %v11006_v24 = vld [vmem:[#allocation3 + $0xd70] sm:$0xff] }
 0xc70   :  { %14199 = vmatmul.mubr.msk.bf16.vlgmr.msra.gmra.mrb[56].mxu1 %vm132_vm0, %v10431_v13 }
 0xc71   :  { %10518 = vmatpush1.bf16.msra.mxu1 %v10419_v36  ;;  %10549 = vmatprep.mubr.bf16.mxu1 %v20849_v27  ;;  %v11185_v36 = vld [vmem:[#allocation3 + $0xd88] sm:$0xff] }
 0xc72   :  { %10519 = vmatprep.subr.bf16.mxu1 %v10428_v5  ;;  %v11184_v5 = vld [vmem:[#allocation3 + $0xd80] sm:$0xff] }
 0xc75   :  { %10520 = vmatpush1.bf16.msra.mxu1 %v10427_v30  ;;  %v11193_v30 = vld [vmem:[#allocation3 + $0xdc8] sm:$0xff] }
 0xc76   :  { %10558 = vmatprep.subr.bf16.mxu1 %v10422_v58  ;;  %v11192_v58 = vld [vmem:[#allocation3 + $0xdc0] sm:$0xff] }
 0xc78   :  { %14200 = vmatmul.mubr.msk.bf16.vlgmr.msra.gmra.mrb[60].mxu1 %vm132_vm0, %v10431_v13 }
 0xc79   :  { %10559 = vmatpush1.bf16.msra.mxu1 %v10421_v2  ;;  %10590 = vmatprep.mubr.bf16.mxu1 %v20849_v27  ;;  %v11187_v2 = vld [vmem:[#allocation3 + $0xd98] sm:$0xff] }
 0xc7a   :  { %10560 = vmatprep.subr.bf16.mxu1 %v10430_v63  ;;  %v11200_v63 = vrot.slane %v20182_v22, 6 }
 0xc7d   :  { %10561 = vmatpush1.bf16.msra.mxu1 %v10429_v18  ;;  %v11186_v18 = vld [vmem:[#allocation3 + $0xd90] sm:$0xff] }
 0xc7e   :  { %10628 = vmatprep.subr.bf16.mxu1 %v10608_v16  ;;  %v11195_v16 = vld [vmem:[#allocation3 + $0xdd8] sm:$0xff] }
 0xc80   :  { %14201 = vmatmul.mubr.msk.bf16.vlgmr.msra.gmra.mrb[64].mxu1 %vm132_vm0, %v10431_v13  ;;  %v11004_v13 = vld [vmem:[#allocation3 + $0xd60] sm:$0xff] }
 0xc81   :  { %10629 = vmatpush1.bf16.msra.mxu1 %v10607_v11  ;;  %10660 = vmatprep.mubr.bf16.mxu1 %v20849_v27  ;;  %v11194_v11 = vld [vmem:[#allocation3 + $0xdd0] sm:$0xff] }
 0xc82   :  { %10630 = vmatprep.subr.bf16.mxu1 %v10616_v39  ;;  %v11189_v39 = vld [vmem:[#allocation3 + $0xda8] sm:$0xff] }
 0xc85   :  { %10631 = vmatpush1.bf16.msra.mxu1 %v10615_v62  ;;  %v11188_v62 = vld [vmem:[#allocation3 + $0xda0] sm:$0xff] }
 0xc86   :  { %10669 = vmatprep.subr.bf16.mxu1 %v10610_v10  ;;  %v11197_v10 = vld [vmem:[#allocation3 + $0xde8] sm:$0xff] }
 0xc88   :  { %14202 = vmatmul.mubr.msk.bf16.vlgmr.msra.gmra.mrb[52].mxu1 %vm132_vm0, %v10624_v21 }
 0xc89   :  { %10670 = vmatpush1.bf16.msra.mxu1 %v10609_v37  ;;  %10701 = vmatprep.mubr.bf16.mxu1 %v20849_v27  ;;  %v11191_v37 = vld [vmem:[#allocation3 + $0xdb8] sm:$0xff] }
 0xc8a   :  { %10671 = vmatprep.subr.bf16.mxu1 %v10618_v48  ;;  %v11190_v48 = vld [vmem:[#allocation3 + $0xdb0] sm:$0xff] }
 0xc8d   :  { %10672 = vmatpush1.bf16.msra.mxu1 %v10617_v4  ;;  %v11199_v4 = vld [vmem:[#allocation3 + $0xdf8] sm:$0xff] }
 0xc8e   :  { %10710 = vmatprep.subr.bf16.mxu1 %v10612_v38  ;;  %v11198_v38 = vld [vmem:[#allocation3 + $0xdf0] sm:$0xff] }
 0xc90   :  { %14203 = vmatmul.mubr.msk.bf16.vlgmr.msra.gmra.mrb[56].mxu1 %vm132_vm0, %v10624_v21 }
 0xc91   :  { %10711 = vmatpush1.bf16.msra.mxu1 %v10611_v43  ;;  %10742 = vmatprep.mubr.bf16.mxu1 %v20849_v27  ;;  %v11377_v43 = vld [vmem:[#allocation3 + $0xe08] sm:$0xff] }
 0xc92   :  { %10712 = vmatprep.subr.bf16.mxu1 %v10620_v28  ;;  %v11376_v28 = vld [vmem:[#allocation3 + $0xe00] sm:$0xff] }
 0xc95   :  { %10713 = vmatpush1.bf16.msra.mxu1 %v10619_v8  ;;  %v11385_v8 = vld [vmem:[#allocation3 + $0xe48] sm:$0xff] }
 0xc96   :  { %10751 = vmatprep.subr.bf16.mxu1 %v10614_v50  ;;  %v11384_v50 = vld [vmem:[#allocation3 + $0xe40] sm:$0xff] }
 0xc98   :  { %14204 = vmatmul.mubr.msk.bf16.vlgmr.msra.gmra.mrb[60].mxu1 %vm132_vm0, %v10624_v21 }
 0xc99   :  { %10752 = vmatpush1.bf16.msra.mxu1 %v10613_v19  ;;  %10783 = vmatprep.mubr.bf16.mxu1 %v20849_v27  ;;  %v11379_v19 = vld [vmem:[#allocation3 + $0xe18] sm:$0xff] }
 0xc9a   :  { %10753 = vmatprep.subr.bf16.mxu1 %v10622_v51  ;;  %v11392_v51 = vrot.slane %v20182_v22, 7  ;;  %v11388_v22 = vld [vmem:[#allocation3 + $0xe60] sm:$0xff] }
 0xc9d   :  { %10754 = vmatpush1.bf16.msra.mxu1 %v10621_v57  ;;  %v11378_v57 = vld [vmem:[#allocation3 + $0xe10] sm:$0xff] }
 0xc9e   :  { %10820 = vmatprep.subr.bf16.mxu1 %v10801_v26  ;;  %v11387_v26 = vld [vmem:[#allocation3 + $0xe58] sm:$0xff] }
 0xca0   :  { %14205 = vmatmul.mubr.msk.bf16.vlgmr.msra.gmra.mrb[64].mxu1 %vm132_vm0, %v10624_v21  ;;  %v11196_v21 = vld [vmem:[#allocation3 + $0xde0] sm:$0xff] }
 0xca1   :  { %10821 = vmatpush1.bf16.msra.mxu1 %v10800_v44  ;;  %10852 = vmatprep.mubr.bf16.mxu1 %v20849_v27  ;;  %v11386_v44 = vld [vmem:[#allocation3 + $0xe50] sm:$0xff] }
 0xca2   :  { %10822 = vmatprep.subr.bf16.mxu1 %v10809_v56  ;;  %v11381_v56 = vld [vmem:[#allocation3 + $0xe28] sm:$0xff] }
 0xca5   :  { %10823 = vmatpush1.bf16.msra.mxu1 %v10808_v41  ;;  %v11380_v41 = vld [vmem:[#allocation3 + $0xe20] sm:$0xff] }
 0xca6   :  { %10861 = vmatprep.subr.bf16.mxu1 %v10803_v14  ;;  %v11389_v14 = vld [vmem:[#allocation3 + $0xe68] sm:$0xff] }
 0xca8   :  { %14206 = vmatmul.mubr.msk.bf16.vlgmr.msra.gmra.mrb[52].mxu1 %vm132_vm0, %v10816_v12 }
 0xca9   :  { %10862 = vmatpush1.bf16.msra.mxu1 %v10802_v7  ;;  %10893 = vmatprep.mubr.bf16.mxu1 %v20849_v27  ;;  %v11382_v7 = vld [vmem:[#allocation3 + $0xe30] sm:$0xff] }
 0xcaa   :  { %10863 = vmatprep.subr.bf16.mxu1 %v10811_v15  ;;  %v11391_v15 = vld [vmem:[#allocation3 + $0xe78] sm:$0xff] }
 0xcad   :  { %10864 = vmatpush1.bf16.msra.mxu1 %v10810_v31  ;;  %v11390_v31 = vld [vmem:[#allocation3 + $0xe70] sm:$0xff] }
 0xcae   :  { %10902 = vmatprep.subr.bf16.mxu1 %v10805_v46  ;;  %v11569_v46 = vld [vmem:[#allocation3 + $0xe88] sm:$0xff] }
 0xcb0   :  { %14207 = vmatmul.mubr.msk.bf16.vlgmr.msra.gmra.mrb[56].mxu1 %vm132_vm0, %v10816_v12 }
 0xcb1   :  { %10903 = vmatpush1.bf16.msra.mxu1 %v10804_v34  ;;  %10934 = vmatprep.mubr.bf16.mxu1 %v20849_v27  ;;  %v11568_v34 = vld [vmem:[#allocation3 + $0xe80] sm:$0xff] }
 0xcb2   :  { %10904 = vmatprep.subr.bf16.mxu1 %v10813_v45  ;;  %v11577_v45 = vld [vmem:[#allocation3 + $0xec8] sm:$0xff] }
 0xcb5   :  { %10905 = vmatpush1.bf16.msra.mxu1 %v10812_v59  ;;  %v11576_v59 = vld [vmem:[#allocation3 + $0xec0] sm:$0xff] }
 0xcb6   :  { %10943 = vmatprep.subr.bf16.mxu1 %v10807_v55  ;;  %v11571_v55 = vld [vmem:[#allocation3 + $0xe98] sm:$0xff] }
 0xcb8   :  { %14208 = vmatmul.mubr.msk.bf16.vlgmr.msra.gmra.mrb[60].mxu1 %vm132_vm0, %v10816_v12 }
 0xcb9   :  { %10944 = vmatpush1.bf16.msra.mxu1 %v10806_v35  ;;  %10975 = vmatprep.mubr.bf16.mxu1 %v20849_v27  ;;  %v11570_v35 = vld [vmem:[#allocation3 + $0xe90] sm:$0xff] }
 0xcba   :  { %10945 = vmatprep.subr.bf16.mxu1 %v10815_v52  ;;  %v11579_v52 = vld [vmem:[#allocation3 + $0xed8] sm:$0xff] }
 0xcbd   :  { %10946 = vmatpush1.bf16.msra.mxu1 %v10814_v49  ;;  %v11578_v49 = vld [vmem:[#allocation3 + $0xed0] sm:$0xff] }
 0xcbe   :  { %11012 = vmatprep.subr.bf16.mxu1 %v10993_v32  ;;  %v11573_v32 = vld [vmem:[#allocation3 + $0xea8] sm:$0xff] }
 0xcc0   :  { %14209 = vmatmul.mubr.msk.bf16.vlgmr.msra.gmra.mrb[64].mxu1 %vm132_vm0, %v10816_v12  ;;  %v11383_v12 = vld [vmem:[#allocation3 + $0xe38] sm:$0xff] }
 0xcc1   :  { %11013 = vmatpush1.bf16.msra.mxu1 %v10992_v6  ;;  %11044 = vmatprep.mubr.bf16.mxu1 %v20849_v27  ;;  %v11572_v6 = vld [vmem:[#allocation3 + $0xea0] sm:$0xff] }
 0xcc2   :  { %11014 = vmatprep.subr.bf16.mxu1 %v11001_v25  ;;  %v11581_v25 = vld [vmem:[#allocation3 + $0xee8] sm:$0xff] }
 0xcc5   :  { %11015 = vmatpush1.bf16.msra.mxu1 %v11000_v54  ;;  %v11580_v54 = vld [vmem:[#allocation3 + $0xee0] sm:$0xff] }
 0xcc6   :  { %11053 = vmatprep.subr.bf16.mxu1 %v10995_v61  ;;  %v11575_v61 = vld [vmem:[#allocation3 + $0xeb8] sm:$0xff] }
 0xcc8   :  { %14210 = vmatmul.mubr.msk.bf16.vlgmr.msra.gmra.mrb[52].mxu1 %vm132_vm0, %v11008_v47 }
 0xcc9   :  { %11054 = vmatpush1.bf16.msra.mxu1 %v10994_v40  ;;  %11085 = vmatprep.mubr.bf16.mxu1 %v20849_v27  ;;  %v11583_v40 = vld [vmem:[#allocation3 + $0xef8] sm:$0xff] }
 0xcca   :  { %11055 = vmatprep.subr.bf16.mxu1 %v11003_v33  ;;  %v11582_v33 = vld [vmem:[#allocation3 + $0xef0] sm:$0xff] }
 0xccd   :  { %11056 = vmatpush1.bf16.msra.mxu1 %v11002_v60  ;;  %v11760_v60 = vld [vmem:[#allocation3 + $0xf08] sm:$0xff] }
 0xcce   :  { %11094 = vmatprep.subr.bf16.mxu1 %v10997_v3  ;;  %v11759_v3 = vld [vmem:[#allocation3 + $0xf00] sm:$0xff] }
 0xcd0   :  { %14211 = vmatmul.mubr.msk.bf16.vlgmr.msra.gmra.mrb[56].mxu1 %vm132_vm0, %v11008_v47 }
 0xcd1   :  { %11095 = vmatpush1.bf16.msra.mxu1 %v10996_v23  ;;  %11126 = vmatprep.mubr.bf16.mxu1 %v20849_v27  ;;  %v11768_v23 = vld [vmem:[#allocation3 + $0xf48] sm:$0xff] }
 0xcd2   :  { %11096 = vmatprep.subr.bf16.mxu1 %v11005_v29  ;;  %v11767_v29 = vld [vmem:[#allocation3 + $0xf40] sm:$0xff] }
 0xcd5   :  { %11097 = vmatpush1.bf16.msra.mxu1 %v11004_v13  ;;  %v11762_v13 = vld [vmem:[#allocation3 + $0xf18] sm:$0xff] }
 0xcd6   :  { %11135 = vmatprep.subr.bf16.mxu1 %v10999_v1  ;;  %v11776_v1 = vrot.slane %v20188_v17, 5 }
 0xcd8   :  { %14212 = vmatmul.mubr.msk.bf16.vlgmr.msra.gmra.mrb[60].mxu1 %vm132_vm0, %v11008_v47 }
 0xcd9   :  { %11136 = vmatpush1.bf16.msra.mxu1 %v10998_v53  ;;  %11167 = vmatprep.mubr.bf16.mxu1 %v20849_v27  ;;  %v11761_v53 = vld [vmem:[#allocation3 + $0xf10] sm:$0xff] }
 0xcda   :  { %11137 = vmatprep.subr.bf16.mxu1 %v11007_v42  ;;  %v11770_v42 = vld [vmem:[#allocation3 + $0xf58] sm:$0xff] }
 0xcdd   :  { %11138 = vmatpush1.bf16.msra.mxu1 %v11006_v24  ;;  %v11769_v24 = vld [vmem:[#allocation3 + $0xf50] sm:$0xff] }
 0xcde   :  { %11204 = vmatprep.subr.bf16.mxu1 %v11185_v36  ;;  %v11764_v36 = vld [vmem:[#allocation3 + $0xf28] sm:$0xff] }
 0xce0   :  { %14213 = vmatmul.mubr.msk.bf16.vlgmr.msra.gmra.mrb[64].mxu1 %vm132_vm0, %v11008_v47  ;;  %v11574_v47 = vld [vmem:[#allocation3 + $0xeb0] sm:$0xff] }
 0xce1   :  { %11205 = vmatpush1.bf16.msra.mxu1 %v11184_v5  ;;  %11236 = vmatprep.mubr.bf16.mxu1 %v20849_v27  ;;  %v11763_v5 = vld [vmem:[#allocation3 + $0xf20] sm:$0xff] }
 0xce2   :  { %11206 = vmatprep.subr.bf16.mxu1 %v11193_v30  ;;  %v11772_v30 = vld [vmem:[#allocation3 + $0xf68] sm:$0xff] }
 0xce5   :  { %11207 = vmatpush1.bf16.msra.mxu1 %v11192_v58  ;;  %v11771_v58 = vld [vmem:[#allocation3 + $0xf60] sm:$0xff] }
 0xce6   :  { %11245 = vmatprep.subr.bf16.mxu1 %v11187_v2  ;;  %v11766_v2 = vld [vmem:[#allocation3 + $0xf38] sm:$0xff] }
 0xce8   :  { %14214 = vmatmul.mubr.msk.bf16.vlgmr.msra.gmra.mrb[52].mxu1 %vm132_vm0, %v11200_v63 }
 0xce9   :  { %11246 = vmatpush1.bf16.msra.mxu1 %v11186_v18  ;;  %11277 = vmatprep.mubr.bf16.mxu1 %v20849_v27  ;;  %v11774_v18 = vld [vmem:[#allocation3 + $0xf78] sm:$0xff] }
 0xcea   :  { %11247 = vmatprep.subr.bf16.mxu1 %v11195_v16  ;;  %v11773_v16 = vld [vmem:[#allocation3 + $0xf70] sm:$0xff] }
 0xced   :  { %11248 = vmatpush1.bf16.msra.mxu1 %v11194_v11  ;;  %v11953_v11 = vld [vmem:[#allocation3 + $0xf88] sm:$0xff] }
 0xcee   :  { %11286 = vmatprep.subr.bf16.mxu1 %v11189_v39  ;;  %v11952_v39 = vld [vmem:[#allocation3 + $0xf80] sm:$0xff] }
 0xcf0   :  { %14215 = vmatmul.mubr.msk.bf16.vlgmr.msra.gmra.mrb[56].mxu1 %vm132_vm0, %v11200_v63 }
 0xcf1   :  { %11287 = vmatpush1.bf16.msra.mxu1 %v11188_v62  ;;  %11318 = vmatprep.mubr.bf16.mxu1 %v20849_v27  ;;  %v11961_v62 = vld [vmem:[#allocation3 + $0xfc8] sm:$0xff] }
 0xcf2   :  { %11288 = vmatprep.subr.bf16.mxu1 %v11197_v10  ;;  %v11960_v10 = vld [vmem:[#allocation3 + $0xfc0] sm:$0xff] }
 0xcf5   :  { %11289 = vmatpush1.bf16.msra.mxu1 %v11196_v21  ;;  %v11955_v21 = vld [vmem:[#allocation3 + $0xf98] sm:$0xff] }
 0xcf6   :  { %11327 = vmatprep.subr.bf16.mxu1 %v11191_v37  ;;  %v11968_v37 = vrot.slane %v20188_v17, 6 }
 0xcf8   :  { %14216 = vmatmul.mubr.msk.bf16.vlgmr.msra.gmra.mrb[60].mxu1 %vm132_vm0, %v11200_v63 }
 0xcf9   :  { %11328 = vmatpush1.bf16.msra.mxu1 %v11190_v48  ;;  %11359 = vmatprep.mubr.bf16.mxu1 %v20849_v27  ;;  %v11954_v48 = vld [vmem:[#allocation3 + $0xf90] sm:$0xff] }
 0xcfa   :  { %11329 = vmatprep.subr.bf16.mxu1 %v11199_v4  ;;  %v11963_v4 = vld [vmem:[#allocation3 + $0xfd8] sm:$0xff] }
 0xcfd   :  { %11330 = vmatpush1.bf16.msra.mxu1 %v11198_v38  ;;  %v11962_v38 = vld [vmem:[#allocation3 + $0xfd0] sm:$0xff] }
 0xcfe   :  { %11396 = vmatprep.subr.bf16.mxu1 %v11377_v43  ;;  %v11957_v43 = vld [vmem:[#allocation3 + $0xfa8] sm:$0xff] }
 0xd00   :  { %14217 = vmatmul.mubr.msk.bf16.vlgmr.msra.gmra.mrb[64].mxu1 %vm132_vm0, %v11200_v63  ;;  %v11765_v63 = vld [vmem:[#allocation3 + $0xf30] sm:$0xff] }
 0xd01   :  { %11397 = vmatpush1.bf16.msra.mxu1 %v11376_v28  ;;  %11428 = vmatprep.mubr.bf16.mxu1 %v20849_v27  ;;  %v11956_v28 = vld [vmem:[#allocation3 + $0xfa0] sm:$0xff] }
 0xd02   :  { %11398 = vmatprep.subr.bf16.mxu1 %v11385_v8  ;;  %v11965_v8 = vld [vmem:[#allocation3 + $0xfe8] sm:$0xff] }
 0xd05   :  { %11399 = vmatpush1.bf16.msra.mxu1 %v11384_v50  ;;  %v11964_v50 = vld [vmem:[#allocation3 + $0xfe0] sm:$0xff] }
 0xd06   :  { %11437 = vmatprep.subr.bf16.mxu1 %v11379_v19  ;;  %v11959_v19 = vld [vmem:[#allocation3 + $0xfb8] sm:$0xff] }
 0xd08   :  { %14218 = vmatmul.mubr.msk.bf16.vlgmr.msra.gmra.mrb[52].mxu1 %vm132_vm0, %v11392_v51 }
 0xd09   :  { %11438 = vmatpush1.bf16.msra.mxu1 %v11378_v57  ;;  %11469 = vmatprep.mubr.bf16.mxu1 %v20849_v27  ;;  %v11967_v57 = vld [vmem:[#allocation3 + $0xff8] sm:$0xff] }
 0xd0a   :  { %11439 = vmatprep.subr.bf16.mxu1 %v11387_v26  ;;  %v11966_v26 = vld [vmem:[#allocation3 + $0xff0] sm:$0xff] }
 0xd0d   :  { %11440 = vmatpush1.bf16.msra.mxu1 %v11386_v44  ;;  %v12145_v44 = vld [vmem:[#allocation3 + $0x1008] sm:$0xff] }
 0xd0e   :  { %11478 = vmatprep.subr.bf16.mxu1 %v11381_v56  ;;  %v12144_v56 = vld [vmem:[#allocation3 + $0x1000] sm:$0xff] }
 0xd10   :  { %14219 = vmatmul.mubr.msk.bf16.vlgmr.msra.gmra.mrb[56].mxu1 %vm132_vm0, %v11392_v51 }
 0xd11   :  { %11479 = vmatpush1.bf16.msra.mxu1 %v11380_v41  ;;  %11510 = vmatprep.mubr.bf16.mxu1 %v20849_v27  ;;  %v12153_v41 = vld [vmem:[#allocation3 + $0x1048] sm:$0xff] }
 0xd12   :  { %11480 = vmatprep.subr.bf16.mxu1 %v11389_v14  ;;  %v12152_v14 = vld [vmem:[#allocation3 + $0x1040] sm:$0xff] }
 0xd15   :  { %11481 = vmatpush1.bf16.msra.mxu1 %v11388_v22  ;;  %v12147_v22 = vld [vmem:[#allocation3 + $0x1018] sm:$0xff] }
 0xd16   :  { %11519 = vmatprep.subr.bf16.mxu1 %v11383_v12  ;;  %v12160_v12 = vrot.slane %v20188_v17, 7 }
 0xd18   :  { %14220 = vmatmul.mubr.msk.bf16.vlgmr.msra.gmra.mrb[60].mxu1 %vm132_vm0, %v11392_v51 }
 0xd19   :  { %11520 = vmatpush1.bf16.msra.mxu1 %v11382_v7  ;;  %11551 = vmatprep.mubr.bf16.mxu1 %v20849_v27  ;;  %v12146_v7 = vld [vmem:[#allocation3 + $0x1010] sm:$0xff] }
 0xd1a   :  { %11521 = vmatprep.subr.bf16.mxu1 %v11391_v15  ;;  %v12155_v15 = vld [vmem:[#allocation3 + $0x1058] sm:$0xff] }
 0xd1d   :  { %11522 = vmatpush1.bf16.msra.mxu1 %v11390_v31  ;;  %v12154_v31 = vld [vmem:[#allocation3 + $0x1050] sm:$0xff] }
 0xd1e   :  { %11587 = vmatprep.subr.bf16.mxu1 %v11569_v46  ;;  %v12149_v46 = vld [vmem:[#allocation3 + $0x1028] sm:$0xff] }
 0xd20   :  { %14221 = vmatmul.mubr.msk.bf16.vlgmr.msra.gmra.mrb[64].mxu1 %vm132_vm0, %v11392_v51  ;;  %v11958_v51 = vld [vmem:[#allocation3 + $0xfb0] sm:$0xff] }
 0xd21   :  { %11588 = vmatpush1.bf16.msra.mxu1 %v11568_v34  ;;  %11619 = vmatprep.mubr.bf16.mxu1 %v20849_v27  ;;  %v12148_v34 = vld [vmem:[#allocation3 + $0x1020] sm:$0xff] }
 0xd22   :  { %11589 = vmatprep.subr.bf16.mxu1 %v11577_v45  ;;  %v12157_v45 = vld [vmem:[#allocation3 + $0x1068] sm:$0xff] }
 0xd25   :  { %11590 = vmatpush1.bf16.msra.mxu1 %v11576_v59  ;;  %v12151_v59 = vld [vmem:[#allocation3 + $0x1038] sm:$0xff] }
 0xd26   :  { %11628 = vmatprep.subr.bf16.mxu1 %v11571_v55  ;;  %v12150_v55 = vld [vmem:[#allocation3 + $0x1030] sm:$0xff] }
 0xd28   :  { %14222 = vmatmul.mubr.msk.bf16.vlgmr.msra.gmra.mrb[52].mxu1 %vm132_vm0, %v20188_v17 }
 0xd29   :  { %11629 = vmatpush1.bf16.msra.mxu1 %v11570_v35  ;;  %11660 = vmatprep.mubr.bf16.mxu1 %v20849_v27  ;;  %v12159_v35 = vld [vmem:[#allocation3 + $0x1078] sm:$0xff] }
 0xd2a   :  { %11630 = vmatprep.subr.bf16.mxu1 %v11579_v52  ;;  %v12158_v52 = vld [vmem:[#allocation3 + $0x1070] sm:$0xff] }
 0xd2d   :  { %11631 = vmatpush1.bf16.msra.mxu1 %v11578_v49  ;;  %v12337_v49 = vld [vmem:[#allocation3 + $0x1088] sm:$0xff] }
 0xd2e   :  { %11669 = vmatprep.subr.bf16.mxu1 %v11573_v32  ;;  %v12336_v32 = vld [vmem:[#allocation3 + $0x1080] sm:$0xff] }
 0xd30   :  { %14223 = vmatmul.mubr.msk.bf16.vlgmr.msra.gmra.mrb[56].mxu1 %vm132_vm0, %v20188_v17 }
 0xd31   :  { %11670 = vmatpush1.bf16.msra.mxu1 %v11572_v6  ;;  %11701 = vmatprep.mubr.bf16.mxu1 %v20849_v27  ;;  %v12345_v6 = vld [vmem:[#allocation3 + $0x10c8] sm:$0xff] }
 0xd32   :  { %11671 = vmatprep.subr.bf16.mxu1 %v11581_v25  ;;  %v12344_v25 = vld [vmem:[#allocation3 + $0x10c0] sm:$0xff] }
 0xd35   :  { %11672 = vmatpush1.bf16.msra.mxu1 %v11580_v54  ;;  %v12339_v54 = vld [vmem:[#allocation3 + $0x1098] sm:$0xff] }
 0xd36   :  { %11710 = vmatprep.subr.bf16.mxu1 %v11575_v61  ;;  %v12338_v61 = vld [vmem:[#allocation3 + $0x1090] sm:$0xff] }
 0xd38   :  { %14224 = vmatmul.mubr.msk.bf16.vlgmr.msra.gmra.mrb[60].mxu1 %vm132_vm0, %v20188_v17 }
 0xd39   :  { %11711 = vmatpush1.bf16.msra.mxu1 %v11574_v47  ;;  %11742 = vmatprep.mubr.bf16.mxu1 %v20849_v27  ;;  %v12347_v47 = vld [vmem:[#allocation3 + $0x10d8] sm:$0xff] }
 0xd3a   :  { %11712 = vmatprep.subr.bf16.mxu1 %v11583_v40  ;;  %v12346_v40 = vld [vmem:[#allocation3 + $0x10d0] sm:$0xff] }
 0xd3d   :  { %11713 = vmatpush1.bf16.msra.mxu1 %v11582_v33  ;;  %v12341_v33 = vld [vmem:[#allocation3 + $0x10a8] sm:$0xff] }
 0xd3e   :  { %11780 = vmatprep.subr.bf16.mxu1 %v11760_v60  ;;  %v12340_v60 = vld [vmem:[#allocation3 + $0x10a0] sm:$0xff] }
 0xd40   :  { %14225 = vmatmul.mubr.msk.bf16.vlgmr.msra.gmra.mrb[64].mxu1 %vm132_vm0, %v20188_v17  ;;  %v12156_v17 = vld [vmem:[#allocation3 + $0x1060] sm:$0xff] }
 0xd41   :  { %11781 = vmatpush1.bf16.msra.mxu1 %v11759_v3  ;;  %11812 = vmatprep.mubr.bf16.mxu1 %v20849_v27  ;;  %v12349_v3 = vld [vmem:[#allocation3 + $0x10e8] sm:$0xff] }
 0xd42   :  { %11782 = vmatprep.subr.bf16.mxu1 %v11768_v23  ;;  %v12348_v23 = vld [vmem:[#allocation3 + $0x10e0] sm:$0xff] }
 0xd45   :  { %11783 = vmatpush1.bf16.msra.mxu1 %v11767_v29  ;;  %v12343_v29 = vld [vmem:[#allocation3 + $0x10b8] sm:$0xff] }
 0xd46   :  { %11821 = vmatprep.subr.bf16.mxu1 %v11762_v13  ;;  %v12342_v13 = vld [vmem:[#allocation3 + $0x10b0] sm:$0xff] }
 0xd48   :  { %14226 = vmatmul.mubr.msk.bf16.vlgmr.msra.gmra.mrb[52].mxu1 %vm132_vm0, %v11776_v1 }
 0xd49   :  { %11822 = vmatpush1.bf16.msra.mxu1 %v11761_v53  ;;  %11853 = vmatprep.mubr.bf16.mxu1 %v20849_v27  ;;  %v12350_v53 = vld [vmem:[#allocation3 + $0x10f0] sm:$0xff] }
 0xd4a   :  { %11823 = vmatprep.subr.bf16.mxu1 %v11770_v42  ;;  %v12528_v42 = vld [vmem:[#allocation3 + $0x1108] sm:$0xff] }
 0xd4d   :  { %11824 = vmatpush1.bf16.msra.mxu1 %v11769_v24  ;;  %v12527_v24 = vld [vmem:[#allocation3 + $0x1100] sm:$0xff] }
 0xd4e   :  { %11862 = vmatprep.subr.bf16.mxu1 %v11764_v36  ;;  %v12536_v36 = vld [vmem:[#allocation3 + $0x1148] sm:$0xff] }
 0xd50   :  { %14227 = vmatmul.mubr.msk.bf16.vlgmr.msra.gmra.mrb[56].mxu1 %vm132_vm0, %v11776_v1 }
 0xd51   :  { %11863 = vmatpush1.bf16.msra.mxu1 %v11763_v5  ;;  %11894 = vmatprep.mubr.bf16.mxu1 %v20849_v27  ;;  %v12535_v5 = vld [vmem:[#allocation3 + $0x1140] sm:$0xff] }
 0xd52   :  { %11864 = vmatprep.subr.bf16.mxu1 %v11772_v30  ;;  %v12530_v30 = vld [vmem:[#allocation3 + $0x1118] sm:$0xff] }
 0xd55   :  { %11865 = vmatpush1.bf16.msra.mxu1 %v11771_v58  ;;  %v12544_v58 = vrot.slane %v20194_v20, 1 }
 0xd56   :  { %11903 = vmatprep.subr.bf16.mxu1 %v11766_v2  ;;  %v12529_v2 = vld [vmem:[#allocation3 + $0x1110] sm:$0xff] }
 0xd58   :  { %14228 = vmatmul.mubr.msk.bf16.vlgmr.msra.gmra.mrb[60].mxu1 %vm132_vm0, %v11776_v1 }
 0xd59   :  { %11904 = vmatpush1.bf16.msra.mxu1 %v11765_v63  ;;  %11935 = vmatprep.mubr.bf16.mxu1 %v20849_v27  ;;  %v12538_v63 = vld [vmem:[#allocation3 + $0x1158] sm:$0xff] }
 0xd5a   :  { %11905 = vmatprep.subr.bf16.mxu1 %v11774_v18  ;;  %v12537_v18 = vld [vmem:[#allocation3 + $0x1150] sm:$0xff] }
 0xd5d   :  { %11906 = vmatpush1.bf16.msra.mxu1 %v11773_v16  ;;  %v12532_v16 = vld [vmem:[#allocation3 + $0x1128] sm:$0xff] }
 0xd5e   :  { %11972 = vmatprep.subr.bf16.mxu1 %v11953_v11  ;;  %v12531_v11 = vld [vmem:[#allocation3 + $0x1120] sm:$0xff] }
 0xd60   :  { %14229 = vmatmul.mubr.msk.bf16.vlgmr.msra.gmra.mrb[64].mxu1 %vm132_vm0, %v11776_v1  ;;  %v12351_v1 = vld [vmem:[#allocation3 + $0x10f8] sm:$0xff] }
 0xd61   :  { %11973 = vmatpush1.bf16.msra.mxu1 %v11952_v39  ;;  %12004 = vmatprep.mubr.bf16.mxu1 %v20849_v27  ;;  %v12540_v39 = vld [vmem:[#allocation3 + $0x1168] sm:$0xff] }
 0xd62   :  { %11974 = vmatprep.subr.bf16.mxu1 %v11961_v62  ;;  %v12539_v62 = vld [vmem:[#allocation3 + $0x1160] sm:$0xff] }
 0xd65   :  { %11975 = vmatpush1.bf16.msra.mxu1 %v11960_v10  ;;  %v12534_v10 = vld [vmem:[#allocation3 + $0x1138] sm:$0xff] }
 0xd66   :  { %12013 = vmatprep.subr.bf16.mxu1 %v11955_v21  ;;  %v12533_v21 = vld [vmem:[#allocation3 + $0x1130] sm:$0xff] }
 0xd68   :  { %14230 = vmatmul.mubr.msk.bf16.vlgmr.msra.gmra.mrb[52].mxu1 %vm132_vm0, %v11968_v37 }
 0xd69   :  { %12014 = vmatpush1.bf16.msra.mxu1 %v11954_v48  ;;  %12045 = vmatprep.mubr.bf16.mxu1 %v20849_v27  ;;  %v12541_v48 = vld [vmem:[#allocation3 + $0x1170] sm:$0xff] }
 0xd6a   :  { %12015 = vmatprep.subr.bf16.mxu1 %v11963_v4  ;;  %v12721_v4 = vld [vmem:[#allocation3 + $0x1188] sm:$0xff] }
 0xd6d   :  { %12016 = vmatpush1.bf16.msra.mxu1 %v11962_v38  ;;  %v12720_v38 = vld [vmem:[#allocation3 + $0x1180] sm:$0xff] }
 0xd6e   :  { %12054 = vmatprep.subr.bf16.mxu1 %v11957_v43  ;;  %v12729_v43 = vld [vmem:[#allocation3 + $0x11c8] sm:$0xff] }
 0xd70   :  { %14231 = vmatmul.mubr.msk.bf16.vlgmr.msra.gmra.mrb[56].mxu1 %vm132_vm0, %v11968_v37 }
 0xd71   :  { %12055 = vmatpush1.bf16.msra.mxu1 %v11956_v28  ;;  %12086 = vmatprep.mubr.bf16.mxu1 %v20849_v27  ;;  %v12728_v28 = vld [vmem:[#allocation3 + $0x11c0] sm:$0xff] }
 0xd72   :  { %12056 = vmatprep.subr.bf16.mxu1 %v11965_v8  ;;  %v12723_v8 = vld [vmem:[#allocation3 + $0x1198] sm:$0xff] }
 0xd75   :  { %12057 = vmatpush1.bf16.msra.mxu1 %v11964_v50  ;;  %v12736_v50 = vrot.slane %v20194_v20, 2 }
 0xd76   :  { %12095 = vmatprep.subr.bf16.mxu1 %v11959_v19  ;;  %v12722_v19 = vld [vmem:[#allocation3 + $0x1190] sm:$0xff] }
 0xd78   :  { %14232 = vmatmul.mubr.msk.bf16.vlgmr.msra.gmra.mrb[60].mxu1 %vm132_vm0, %v11968_v37 }
 0xd79   :  { %12096 = vmatpush1.bf16.msra.mxu1 %v11958_v51  ;;  %12127 = vmatprep.mubr.bf16.mxu1 %v20849_v27  ;;  %v12731_v51 = vld [vmem:[#allocation3 + $0x11d8] sm:$0xff] }
 0xd7a   :  { %12097 = vmatprep.subr.bf16.mxu1 %v11967_v57  ;;  %v12730_v57 = vld [vmem:[#allocation3 + $0x11d0] sm:$0xff] }
 0xd7d   :  { %12098 = vmatpush1.bf16.msra.mxu1 %v11966_v26  ;;  %v12725_v26 = vld [vmem:[#allocation3 + $0x11a8] sm:$0xff] }
 0xd7e   :  { %12164 = vmatprep.subr.bf16.mxu1 %v12145_v44  ;;  %v12724_v44 = vld [vmem:[#allocation3 + $0x11a0] sm:$0xff] }
 0xd80   :  { %14233 = vmatmul.mubr.msk.bf16.vlgmr.msra.gmra.mrb[64].mxu1 %vm132_vm0, %v11968_v37  ;;  %v12542_v37 = vld [vmem:[#allocation3 + $0x1178] sm:$0xff] }
 0xd81   :  { %12165 = vmatpush1.bf16.msra.mxu1 %v12144_v56  ;;  %12196 = vmatprep.mubr.bf16.mxu1 %v20849_v27  ;;  %v12733_v56 = vld [vmem:[#allocation3 + $0x11e8] sm:$0xff] }
 0xd82   :  { %12166 = vmatprep.subr.bf16.mxu1 %v12153_v41  ;;  %v12727_v41 = vld [vmem:[#allocation3 + $0x11b8] sm:$0xff] }
 0xd85   :  { %12167 = vmatpush1.bf16.msra.mxu1 %v12152_v14  ;;  %v12726_v14 = vld [vmem:[#allocation3 + $0x11b0] sm:$0xff] }
 0xd86   :  { %12205 = vmatprep.subr.bf16.mxu1 %v12147_v22  ;;  %v12735_v22 = vld [vmem:[#allocation3 + $0x11f8] sm:$0xff] }
 0xd88   :  { %14234 = vmatmul.mubr.msk.bf16.vlgmr.msra.gmra.mrb[52].mxu1 %vm132_vm0, %v12160_v12 }
 0xd89   :  { %12206 = vmatpush1.bf16.msra.mxu1 %v12146_v7  ;;  %12237 = vmatprep.mubr.bf16.mxu1 %v20849_v27  ;;  %v20850_v7 = vld [vmem:[#allocation33_spill] sm:$0xff] }
 0xd8a   :  { %12207 = vmatprep.subr.bf16.mxu1 %v12155_v15  ;;  %v20851_v15 = vld [vmem:[#allocation24_spill] sm:$0xff] }
 0xd8d   :  { %12208 = vmatpush1.bf16.msra.mxu1 %v12154_v31  ;;  %v12915_v31 = vrot.slane %v20851_v15, %v20850_v7 }
 0xd8e   :  { %12246 = vmatprep.subr.bf16.mxu1 %v12149_v46  ;;  %v20852_v46 = vld [vmem:[#allocation25_spill] sm:$0xff] }
 0xd90   :  { %14235 = vmatmul.mubr.msk.bf16.vlgmr.msra.gmra.mrb[56].mxu1 %vm132_vm0, %v12160_v12 }
 0xd91   :  { %12247 = vmatpush1.bf16.msra.mxu1 %v12148_v34  ;;  %12278 = vmatprep.mubr.bf16.mxu1 %v20849_v27  ;;  %v12919_v34 = vrot.slane %v20852_v46, %v20850_v7 }
 0xd92   :  { %12248 = vmatprep.subr.bf16.mxu1 %v12157_v45  ;;  %v20853_v45 = vld [vmem:[#allocation34_spill] sm:$0xff] }
 0xd95   :  { %12249 = vmatpush1.bf16.msra.mxu1 %v12156_v17  ;;  %v12955_v17 = vrot.slane %v20851_v15, %v20853_v45 }
 0xd96   :  { %12287 = vmatprep.subr.bf16.mxu1 %v12151_v59 }
 0xd98   :  { %14236 = vmatmul.mubr.msk.bf16.vlgmr.msra.gmra.mrb[60].mxu1 %vm132_vm0, %v12160_v12 }
 0xd99   :  { %12288 = vmatpush1.bf16.msra.mxu1 %v12150_v55  ;;  %12319 = vmatprep.mubr.bf16.mxu1 %v20849_v27  ;;  %v12959_v55 = vrot.slane %v20852_v46, %v20853_v45 }
 0xd9a   :  { %12289 = vmatprep.subr.bf16.mxu1 %v12159_v35 }
 0xd9d   :  { %12290 = vmatpush1.bf16.msra.mxu1 %v12158_v52 }
 0xd9e   :  { %12355 = vmatprep.subr.bf16.mxu1 %v12337_v49 }
 0xda0   :  { %14237 = vmatmul.mubr.msk.bf16.vlgmr.msra.gmra.mrb[64].mxu1 %vm132_vm0, %v12160_v12  ;;  %v12734_v12 = vld [vmem:[#allocation3 + $0x11f0] sm:$0xff] }
 0xda1   :  { %12356 = vmatpush1.bf16.msra.mxu1 %v12336_v32  ;;  %12387 = vmatprep.mubr.bf16.mxu1 %v20849_v27 }
 0xda2   :  { %12357 = vmatprep.subr.bf16.mxu1 %v12345_v6 }
 0xda5   :  { %12358 = vmatpush1.bf16.msra.mxu1 %v12344_v25 }
 0xda6   :  { %12396 = vmatprep.subr.bf16.mxu1 %v12339_v54 }
 0xda8   :  { %14238 = vmatmul.mubr.msk.bf16.vlgmr.msra.gmra.mrb[52].mxu1 %vm132_vm0, %v20194_v20 }
 0xda9   :  { %12397 = vmatpush1.bf16.msra.mxu1 %v12338_v61  ;;  %12428 = vmatprep.mubr.bf16.mxu1 %v20849_v27  ;;  %v20854_v61 = vld [vmem:[#allocation26_spill] sm:$0xff] }
 0xdaa   :  { %12398 = vmatprep.subr.bf16.mxu1 %v12347_v47  ;;  %v12923_v47 = vrot.slane %v20854_v61, %v20850_v7 }
 0xdad   :  { %12399 = vmatpush1.bf16.msra.mxu1 %v12346_v40 }
 0xdae   :  { %12437 = vmatprep.subr.bf16.mxu1 %v12341_v33  ;;  %v20855_v33 = vld [vmem:[#allocation27_spill] sm:$0xff] }
 0xdb0   :  { %14239 = vmatmul.mubr.msk.bf16.vlgmr.msra.gmra.mrb[56].mxu1 %vm132_vm0, %v20194_v20 }
 0xdb1   :  { %12438 = vmatpush1.bf16.msra.mxu1 %v12340_v60  ;;  %12469 = vmatprep.mubr.bf16.mxu1 %v20849_v27  ;;  %v12927_v60 = vrot.slane %v20855_v33, %v20850_v7 }
 0xdb2   :  { %12439 = vmatprep.subr.bf16.mxu1 %v12349_v3  ;;  %v12963_v3 = vrot.slane %v20854_v61, %v20853_v45 }
 0xdb5   :  { %12440 = vmatpush1.bf16.msra.mxu1 %v12348_v23 }
 0xdb6   :  { %12478 = vmatprep.subr.bf16.mxu1 %v12343_v29  ;;  %v12967_v29 = vrot.slane %v20855_v33, %v20853_v45 }
 0xdb8   :  { %14240 = vmatmul.mubr.msk.bf16.vlgmr.msra.gmra.mrb[60].mxu1 %vm132_vm0, %v20194_v20 }
 0xdb9   :  { %12479 = vmatpush1.bf16.msra.mxu1 %v12342_v13  ;;  %12510 = vmatprep.mubr.bf16.mxu1 %v20849_v27 }
 0xdba   :  { %12480 = vmatprep.subr.bf16.mxu1 %v12351_v1 }
 0xdbd   :  { %12481 = vmatpush1.bf16.msra.mxu1 %v12350_v53 }
 0xdbe   :  { %12548 = vmatprep.subr.bf16.mxu1 %v12528_v42 }
 0xdc0   :  { %14241 = vmatmul.mubr.msk.bf16.vlgmr.msra.gmra.mrb[64].mxu1 %vm132_vm0, %v20194_v20  ;;  %v12732_v20 = vld [vmem:[#allocation3 + $0x11e0] sm:$0xff] }
 0xdc1   :  { %12549 = vmatpush1.bf16.msra.mxu1 %v12527_v24  ;;  %12580 = vmatprep.mubr.bf16.mxu1 %v20849_v27 }
 0xdc2   :  { %12550 = vmatprep.subr.bf16.mxu1 %v12536_v36 }
 0xdc5   :  { %12551 = vmatpush1.bf16.msra.mxu1 %v12535_v5 }
 0xdc6   :  { %12589 = vmatprep.subr.bf16.mxu1 %v12530_v30 }
 0xdc8   :  { %14242 = vmatmul.mubr.msk.bf16.vlgmr.msra.gmra.mrb[52].mxu1 %vm132_vm0, %v12544_v58 }
 0xdc9   :  { %12590 = vmatpush1.bf16.msra.mxu1 %v12529_v2  ;;  %12621 = vmatprep.mubr.bf16.mxu1 %v20849_v27 }
 0xdca   :  { %12591 = vmatprep.subr.bf16.mxu1 %v12538_v63 }
 0xdcd   :  { %12592 = vmatpush1.bf16.msra.mxu1 %v12537_v18  ;;  %v20857_v18 = vld [vmem:[#allocation29_spill] sm:$0xff] }
 0xdce   :  { %12630 = vmatprep.subr.bf16.mxu1 %v12532_v16  ;;  %v12935_v16 = vrot.slane %v20857_v18, %v20850_v7 }
 0xdd0   :  { %14243 = vmatmul.mubr.msk.bf16.vlgmr.msra.gmra.mrb[56].mxu1 %vm132_vm0, %v12544_v58 }
 0xdd1   :  { %12631 = vmatpush1.bf16.msra.mxu1 %v12531_v11  ;;  %12662 = vmatprep.mubr.bf16.mxu1 %v20849_v27 }
 0xdd2   :  { %12632 = vmatprep.subr.bf16.mxu1 %v12540_v39 }
 0xdd5   :  { %12633 = vmatpush1.bf16.msra.mxu1 %v12539_v62  ;;  %v12975_v62 = vrot.slane %v20857_v18, %v20853_v45 }
 0xdd6   :  { %12671 = vmatprep.subr.bf16.mxu1 %v12534_v10 }
 0xdd8   :  { %14244 = vmatmul.mubr.msk.bf16.vlgmr.msra.gmra.mrb[60].mxu1 %vm132_vm0, %v12544_v58 }
 0xdd9   :  { %12672 = vmatpush1.bf16.msra.mxu1 %v12533_v21  ;;  %12703 = vmatprep.mubr.bf16.mxu1 %v20849_v27 }
 0xdda   :  { %12673 = vmatprep.subr.bf16.mxu1 %v12542_v37 }
 0xddd   :  { %12674 = vmatpush1.bf16.msra.mxu1 %v12541_v48 }
 0xdde   :  { %12740 = vmatprep.subr.bf16.mxu1 %v12721_v4 }
 0xde0   :  { %14245 = vmatmul.mubr.msk.bf16.vlgmr.msra.gmra.mrb[64].mxu1 %vm132_vm0, %v12544_v58  ;;  %v20856_v58 = vld [vmem:[#allocation28_spill] sm:$0xff] }
 0xde1   :  { %12741 = vmatpush1.bf16.msra.mxu1 %v12720_v38  ;;  %12772 = vmatprep.mubr.bf16.mxu1 %v20849_v27  ;;  %v12931_v2 = vrot.slane %v20856_v58, %v20850_v7  ;;  %v12971_v11 = vrot.slane %v20856_v58, %v20853_v45 }
 0xde2   :  { %12742 = vmatprep.subr.bf16.mxu1 %v12729_v43 }
 0xde5   :  { %12743 = vmatpush1.bf16.msra.mxu1 %v12728_v28 }
 0xde6   :  { %12781 = vmatprep.subr.bf16.mxu1 %v12723_v8  ;;  %v20858_v8 = vld [vmem:[#allocation30_spill] sm:$0xff] }
 0xde8   :  { %14246 = vmatmul.mubr.msk.bf16.vlgmr.msra.gmra.mrb[52].mxu1 %vm132_vm0, %v12736_v50 }
 0xde9   :  { %12782 = vmatpush1.bf16.msra.mxu1 %v12722_v19  ;;  %12813 = vmatprep.mubr.bf16.mxu1 %v20849_v27 }
 0xdea   :  { %12783 = vmatprep.subr.bf16.mxu1 %v12731_v51  ;;  %v20859_v51 = vld [vmem:[#allocation31_spill] sm:$0xff] }
 0xded   :  { %12784 = vmatpush1.bf16.msra.mxu1 %v12730_v57  ;;  %v12943_v57 = vrot.slane %v20859_v51, %v20850_v7 }
 0xdee   :  { %12822 = vmatprep.subr.bf16.mxu1 %v12725_v26  ;;  %v12979_v26 = vrot.slane %v20858_v8, %v20853_v45 }
 0xdf0   :  { %14247 = vmatmul.mubr.msk.bf16.vlgmr.msra.gmra.mrb[56].mxu1 %vm132_vm0, %v12736_v50 }
 0xdf1   :  { %12823 = vmatpush1.bf16.msra.mxu1 %v12724_v44  ;;  %12854 = vmatprep.mubr.bf16.mxu1 %v20849_v27 }
 0xdf2   :  { %12824 = vmatprep.subr.bf16.mxu1 %v12733_v56  ;;  %v12983_v56 = vrot.slane %v20859_v51, %v20853_v45 }
 0xdf5   :  { %12825 = vmatpush1.bf16.msra.mxu1 %v12732_v20 }
 0xdf6   :  { %12863 = vmatprep.subr.bf16.mxu1 %v12727_v41 }
 0xdf8   :  { %14248 = vmatmul.mubr.msk.bf16.vlgmr.msra.gmra.mrb[60].mxu1 %vm132_vm0, %v12736_v50 }
 0xdf9   :  { %12864 = vmatpush1.bf16.msra.mxu1 %v12726_v14  ;;  %12895 = vmatprep.mubr.bf16.mxu1 %v20849_v27 }
 0xdfa   :  { %12865 = vmatprep.subr.bf16.mxu1 %v12735_v22 }
 0xdfd   :  { %12866 = vmatpush1.bf16.msra.mxu1 %v12734_v12 }
 0xe00   :  { %14249 = vmatmul.mubr.msk.bf16.vlgmr.msra.gmra.mrb[64].mxu1 %vm132_vm0, %v12736_v50  ;;  %v12939_v50 = vrot.slane %v20858_v8, %v20850_v7 }
 0xebb   :  { %v12774_v59 = vpop.f32.mrb[52].mxu1 }
 0xebc   :  { %v12944_v35 = vmul.f32 %v12915_v31, %v12774_v59  ;;  %v12776_v27 = vpop.f32.mrb[53].mxu1 }
 0xebd   :  { %v12945_v52 = vmul.f32 %v12919_v34, %v12776_v27  ;;  %v12778_v49 = vpop.f32.mrb[54].mxu1 }
 0xebe   :  { %v20543_v32 = vadd.f32 %v12955_v17, %v12944_v35  ;;  %v12779_v6 = vpop.f32.mrb[55].mxu1 }
 0xebf   :  { %v12985_v25 = vadd.f32 %v12959_v55, %v12945_v52 }
 0xec0   :  { %v12992_v54 = vmax.f32 %v20543_v32, 0.0 }
 0xec1   :  { %v12993_v40 = vmax.f32 %v12985_v25, 0.0 }
 0xec3   :  { %v12815_v23 = vpop.f32.mrb[56].mxu1 }
 0xec4   :  { %v12946_v13 = vmul.f32 %v12923_v47, %v12815_v23  ;;  %v12817_v1 = vpop.f32.mrb[57].mxu1 }
 0xec5   :  { %v12947_v53 = vmul.f32 %v12927_v60, %v12817_v1  ;;  %v12819_v42 = vpop.f32.mrb[58].mxu1 }
 0xec6   :  { %v20554_v24 = vadd.f32 %v12963_v3, %v12946_v13  ;;  %v12820_v36 = vpop.f32.mrb[59].mxu1 }
 0xec7   :  { %v20556_v5 = vadd.f32 %v12967_v29, %v12947_v53 }
 0xec8   :  { %v12994_v30 = vmax.f32 %v20554_v24, 0.0 }
 0xec9   :  { %v12995_v63 = vmax.f32 %v20556_v5, 0.0 }
 0xecb   :  { %v12856_v39 = vpop.f32.mrb[60].mxu1 }
 0xecc   :  { %v12948_v10 = vmul.f32 %v12931_v2, %v12856_v39  ;;  %v12858_v21 = vpop.f32.mrb[61].mxu1 }
 0xecd   :  { %v12949_v37 = vmul.f32 %v12935_v16, %v12858_v21  ;;  %v12860_v48 = vpop.f32.mrb[62].mxu1 }
 0xece   :  { %v20568_v4 = vadd.f32 %v12971_v11, %v12948_v10  ;;  %v12861_v38 = vpop.f32.mrb[63].mxu1 }
 0xecf   :  { %v20570_v43 = vadd.f32 %v12975_v62, %v12949_v37 }
 0xed0   :  { %v12996_v28 = vmax.f32 %v20568_v4, 0.0 }
 0xed1   :  { %v12997_v19 = vmax.f32 %v20570_v43, 0.0 }
 0xed3   :  { %v12897_v44 = vpop.f32.mrb[64].mxu1 }
 0xed4   :  { %v12950_v20 = vmul.f32 %v12939_v50, %v12897_v44  ;;  %v12899_v41 = vpop.f32.mrb[65].mxu1 }
 0xed5   :  { %v12951_v14 = vmul.f32 %v12943_v57, %v12899_v41  ;;  %v12901_v22 = vpop.f32.mrb[66].mxu1 }
 0xed6   :  { %v20582_v12 = vadd.f32 %v12979_v26, %v12950_v20  ;;  %v12902_v31 = vpop.f32.mrb[67].mxu1 }
 0xed7   :  { %v20584_v34 = vadd.f32 %v12983_v56, %v12951_v14 }
 0xed8   :  { %v12998_v17 = vmax.f32 %v20582_v12, 0.0 }
 0xed9   :  { %v12999_v7 = vmax.f32 %v20584_v34, 0.0 }
 0xeda   :  { %17182 = dma.done.wait [#allocation6 + $0x1], 32768 }
 0xedb   :  { %17183 = vsyncadd [#allocation6 + $0x1], 4294934528  ;;  %v20588_v59 = vpack.c.bf16 %v12993_v40, %v12993_v40  ;;  %v13013_v45 = vld [vmem:[#allocation4 + $0x8] sm:$0xff]  ;;  %v13012_v55 = vld [vmem:[#allocation4] sm:$0xff]  ;;  %v20594_v51 = vpack.c.bf16 %v12992_v54, %v12992_v54  ;;  %v20599_v57 = vpack.c.bf16 %v12995_v63, %v12995_v63 }
 0xedc   :  { %v13017_v35 = vld [vmem:[#allocation4 + $0x28] sm:$0xff]  ;;  %13268 = vmatprep.subr.bf16.mxu0 %v13013_v45  ;;  %v13016_v27 = vld [vmem:[#allocation4 + $0x20] sm:$0xff]  ;;  %v13026_v12 = vld [vmem:[#allocation4 + $0x70] sm:$0xff] }
 0xedd   :  { %13300 = vmatprep.mubr.bf16.mxu0 %v20588_v59  ;;  %13269 = vmatpush1.bf16.msra.mxu0 %v13012_v55  ;;  %v13021_v52 = vld [vmem:[#allocation4 + $0x48] sm:$0xff]  ;;  %v13020_v49 = vld [vmem:[#allocation4 + $0x40] sm:$0xff] }
 0xede   :  { %13270 = vmatprep.subr.bf16.mxu0 %v13017_v35  ;;  %v13025_v6 = vld [vmem:[#allocation4 + $0x68] sm:$0xff]  ;;  %v13024_v25 = vld [vmem:[#allocation4 + $0x60] sm:$0xff] }
 0xedf   :  { %v13029_v47 = vld [vmem:[#allocation4 + $0x88] sm:$0xff]  ;;  %v13028_v40 = vld [vmem:[#allocation4 + $0x80] sm:$0xff] }
 0xee0   :  { %v13033_v60 = vld [vmem:[#allocation4 + $0xa8] sm:$0xff]  ;;  %v13032_v3 = vld [vmem:[#allocation4 + $0xa0] sm:$0xff] }
 0xee1   :  { %13271 = vmatpush1.bf16.msra.mxu0 %v13016_v27  ;;  %v13037_v23 = vld [vmem:[#allocation4 + $0xc8] sm:$0xff]  ;;  %v13036_v29 = vld [vmem:[#allocation4 + $0xc0] sm:$0xff] }
 0xee2   :  { %13272 = vmatprep.subr.bf16.mxu0 %v13021_v52  ;;  %v13041_v13 = vld [vmem:[#allocation4 + $0xe8] sm:$0xff]  ;;  %v13040_v1 = vld [vmem:[#allocation4 + $0xe0] sm:$0xff] }
 0xee3   :  { %v13045_v53 = vld [vmem:[#allocation4 + $0x108] sm:$0xff]  ;;  %v13044_v42 = vld [vmem:[#allocation4 + $0x100] sm:$0xff] }
 0xee4   :  { %v13049_v36 = vld [vmem:[#allocation4 + $0x128] sm:$0xff]  ;;  %v13048_v58 = vld [vmem:[#allocation4 + $0x120] sm:$0xff] }
 0xee5   :  { %13273 = vmatpush1.bf16.msra.mxu0 %v13020_v49  ;;  %v13053_v2 = vld [vmem:[#allocation4 + $0x148] sm:$0xff]  ;;  %v13052_v18 = vld [vmem:[#allocation4 + $0x140] sm:$0xff] }
 0xee6   :  { %13274 = vmatprep.subr.bf16.mxu0 %v13025_v6  ;;  %v13057_v16 = vld [vmem:[#allocation4 + $0x168] sm:$0xff]  ;;  %v13056_v11 = vld [vmem:[#allocation4 + $0x160] sm:$0xff] }
 0xee7   :  { %v13061_v39 = vld [vmem:[#allocation4 + $0x188] sm:$0xff]  ;;  %v13060_v62 = vld [vmem:[#allocation4 + $0x180] sm:$0xff] }
 0xee8   :  { %v13065_v10 = vld [vmem:[#allocation4 + $0x1a8] sm:$0xff]  ;;  %v13064_v21 = vld [vmem:[#allocation4 + $0x1a0] sm:$0xff] }
 0xee9   :  { %13275 = vmatpush1.bf16.msra.mxu0 %v13024_v25  ;;  %v13069_v37 = vld [vmem:[#allocation4 + $0x1c8] sm:$0xff]  ;;  %v13068_v48 = vld [vmem:[#allocation4 + $0x1c0] sm:$0xff] }
 0xeea   :  { %13276 = vmatprep.subr.bf16.mxu0 %v13029_v47  ;;  %v13073_v38 = vld [vmem:[#allocation4 + $0x1e8] sm:$0xff]  ;;  %v13072_v8 = vld [vmem:[#allocation4 + $0x1e0] sm:$0xff] }
 0xeeb   :  { %v13077_v50 = vld [vmem:[#allocation4 + $0x208] sm:$0xff]  ;;  %v13076_v26 = vld [vmem:[#allocation4 + $0x200] sm:$0xff] }
 0xeec   :  { %v13081_v44 = vld [vmem:[#allocation4 + $0x228] sm:$0xff]  ;;  %v13080_v56 = vld [vmem:[#allocation4 + $0x220] sm:$0xff] }
 0xeed   :  { %13277 = vmatpush1.bf16.msra.mxu0 %v13028_v40  ;;  %v13085_v32 = vld [vmem:[#allocation4 + $0x248] sm:$0xff]  ;;  %v13084_v54 = vld [vmem:[#allocation4 + $0x240] sm:$0xff] }
 0xeee   :  { %13278 = vmatprep.subr.bf16.mxu0 %v13033_v60  ;;  %v13089_v20 = vld [vmem:[#allocation4 + $0x268] sm:$0xff]  ;;  %v13088_v5 = vld [vmem:[#allocation4 + $0x260] sm:$0xff] }
 0xeef   :  { %v13093_v63 = vld [vmem:[#allocation4 + $0x288] sm:$0xff]  ;;  %v13092_v41 = vld [vmem:[#allocation4 + $0x280] sm:$0xff] }
 0xef0   :  { %v13097_v14 = vld [vmem:[#allocation4 + $0x2a8] sm:$0xff]  ;;  %v13096_v22 = vld [vmem:[#allocation4 + $0x2a0] sm:$0xff] }
 0xef1   :  { %13279 = vmatpush1.bf16.msra.mxu0 %v13032_v3  ;;  %v13101_v31 = vld [vmem:[#allocation4 + $0x2c8] sm:$0xff]  ;;  %v13100_v45 = vld [vmem:[#allocation4 + $0x2c0] sm:$0xff] }
 0xef2   :  { %13280 = vmatprep.subr.bf16.mxu0 %v13037_v23  ;;  %v13105_v55 = vld [vmem:[#allocation4 + $0x2e8] sm:$0xff]  ;;  %v13104_v35 = vld [vmem:[#allocation4 + $0x2e0] sm:$0xff] }
 0xef3   :  { %v13109_v27 = vld [vmem:[#allocation4 + $0x308] sm:$0xff]  ;;  %v13108_v52 = vld [vmem:[#allocation4 + $0x300] sm:$0xff] }
 0xef4   :  { %v13113_v49 = vld [vmem:[#allocation4 + $0x328] sm:$0xff]  ;;  %v13112_v6 = vld [vmem:[#allocation4 + $0x320] sm:$0xff] }
 0xef5   :  { %13281 = vmatpush1.bf16.msra.mxu0 %v13036_v29  ;;  %v13117_v25 = vld [vmem:[#allocation4 + $0x348] sm:$0xff]  ;;  %v13116_v47 = vld [vmem:[#allocation4 + $0x340] sm:$0xff] }
 0xef6   :  { %13282 = vmatprep.subr.bf16.mxu0 %v13041_v13  ;;  %v13121_v40 = vld [vmem:[#allocation4 + $0x368] sm:$0xff]  ;;  %v13120_v60 = vld [vmem:[#allocation4 + $0x360] sm:$0xff] }
 0xef7   :  { %v13125_v3 = vld [vmem:[#allocation4 + $0x388] sm:$0xff]  ;;  %v13124_v23 = vld [vmem:[#allocation4 + $0x380] sm:$0xff] }
 0xef8   :  { %v13129_v29 = vld [vmem:[#allocation4 + $0x3a8] sm:$0xff]  ;;  %v13128_v13 = vld [vmem:[#allocation4 + $0x3a0] sm:$0xff] }
 0xef9   :  { %13283 = vmatpush1.bf16.msra.mxu0 %v13040_v1  ;;  %v13133_v1 = vld [vmem:[#allocation4 + $0x3c8] sm:$0xff]  ;;  %v13152_v43 = vld [vmem:[#allocation4 + $0x460] sm:$0xff] }
 0xefa   :  { %13284 = vmatprep.subr.bf16.mxu0 %v13045_v53  ;;  %v13132_v53 = vld [vmem:[#allocation4 + $0x3c0] sm:$0xff]  ;;  %v13149_v24 = vld [vmem:[#allocation4 + $0x448] sm:$0xff] }
 0xefb   :  { %v13213_v4 = vld [vmem:[#allocation4 + $0x648] sm:$0xff]  ;;  %v13216_v34 = vld [vmem:[#allocation4 + $0x660] sm:$0xff] }
 0xefd   :  { %13285 = vmatpush1.bf16.msra.mxu0 %v13044_v42  ;;  %v13137_v42 = vld [vmem:[#allocation4 + $0x3e8] sm:$0xff] }
 0xefe   :  { %13286 = vmatprep.subr.bf16.mxu0 %v13049_v36  ;;  %v13136_v36 = vld [vmem:[#allocation4 + $0x3e0] sm:$0xff] }
 0xf01   :  { %13287 = vmatpush1.bf16.msra.mxu0 %v13048_v58  ;;  %v13141_v58 = vld [vmem:[#allocation4 + $0x408] sm:$0xff] }
 0xf02   :  { %13288 = vmatprep.subr.bf16.mxu0 %v13053_v2  ;;  %v20606_v2 = vpack.c.bf16 %v12994_v30, %v12994_v30  ;;  %v13148_v30 = vld [vmem:[#allocation4 + $0x440] sm:$0xff] }
 0xf05   :  { %13289 = vmatpush1.bf16.msra.mxu0 %v13052_v18  ;;  %v20611_v18 = vpack.c.bf16 %v12997_v19, %v12997_v19  ;;  %v13157_v19 = vld [vmem:[#allocation4 + $0x488] sm:$0xff] }
 0xf06   :  { %13290 = vmatprep.subr.bf16.mxu0 %v13057_v16  ;;  %v13140_v16 = vld [vmem:[#allocation4 + $0x400] sm:$0xff] }
 0xf09   :  { %13291 = vmatpush1.bf16.msra.mxu0 %v13056_v11  ;;  %v13145_v11 = vld [vmem:[#allocation4 + $0x428] sm:$0xff] }
 0xf0a   :  { %13292 = vmatprep.subr.bf16.mxu0 %v13061_v39  ;;  %v13144_v39 = vld [vmem:[#allocation4 + $0x420] sm:$0xff] }
 0xf0d   :  { %13293 = vmatpush1.bf16.msra.mxu0 %v13060_v62  ;;  %v13153_v62 = vld [vmem:[#allocation4 + $0x468] sm:$0xff] }
 0xf0e   :  { %13294 = vmatprep.subr.bf16.mxu0 %v13065_v10  ;;  %v13156_v10 = vld [vmem:[#allocation4 + $0x480] sm:$0xff] }
 0xf11   :  { %13295 = vmatpush1.bf16.msra.mxu0 %v13064_v21  ;;  %v13161_v21 = vld [vmem:[#allocation4 + $0x4a8] sm:$0xff] }
 0xf12   :  { %13296 = vmatprep.subr.bf16.mxu0 %v13069_v37  ;;  %v13160_v37 = vld [vmem:[#allocation4 + $0x4a0] sm:$0xff] }
 0xf15   :  { %13297 = vmatpush1.bf16.msra.mxu0 %v13068_v48  ;;  %v13165_v48 = vld [vmem:[#allocation4 + $0x4c8] sm:$0xff] }
 0xf16   :  { %13298 = vmatprep.subr.bf16.mxu0 %v13073_v38  ;;  %v13164_v38 = vld [vmem:[#allocation4 + $0x4c0] sm:$0xff] }
 0xf19   :  { %13299 = vmatpush1.bf16.msra.mxu0 %v13072_v8  ;;  %v13169_v8 = vld [vmem:[#allocation4 + $0x4e8] sm:$0xff] }
 0xf1a   :  { %13309 = vmatprep.subr.bf16.mxu0 %v13077_v50  ;;  %v13168_v50 = vld [vmem:[#allocation4 + $0x4e0] sm:$0xff] }
 0xf1c   :  { %13301 = vmatmul.mubr.bf16.vlgmr.msra.gmra.mrb[156].mxu0 %v20594_v51 }
 0xf1d   :  { %13310 = vmatpush1.bf16.msra.mxu0 %v13076_v26  ;;  %13341 = vmatprep.mubr.bf16.mxu0 %v20599_v57  ;;  %v13173_v26 = vld [vmem:[#allocation4 + $0x508] sm:$0xff] }
 0xf1e   :  { %13311 = vmatprep.subr.bf16.mxu0 %v13081_v44  ;;  %v13172_v44 = vld [vmem:[#allocation4 + $0x500] sm:$0xff] }
 0xf21   :  { %13312 = vmatpush1.bf16.msra.mxu0 %v13080_v56  ;;  %v13177_v56 = vld [vmem:[#allocation4 + $0x528] sm:$0xff] }
 0xf22   :  { %13313 = vmatprep.subr.bf16.mxu0 %v13085_v32  ;;  %v13176_v32 = vld [vmem:[#allocation4 + $0x520] sm:$0xff] }
 0xf25   :  { %13314 = vmatpush1.bf16.msra.mxu0 %v13084_v54  ;;  %v13181_v54 = vld [vmem:[#allocation4 + $0x548] sm:$0xff] }
 0xf26   :  { %13315 = vmatprep.subr.bf16.mxu0 %v13089_v20  ;;  %v13180_v20 = vld [vmem:[#allocation4 + $0x540] sm:$0xff] }
 0xf29   :  { %13316 = vmatpush1.bf16.msra.mxu0 %v13088_v5  ;;  %v13185_v5 = vld [vmem:[#allocation4 + $0x568] sm:$0xff] }
 0xf2a   :  { %13317 = vmatprep.subr.bf16.mxu0 %v13093_v63  ;;  %v13184_v63 = vld [vmem:[#allocation4 + $0x560] sm:$0xff] }
 0xf2d   :  { %13318 = vmatpush1.bf16.msra.mxu0 %v13092_v41  ;;  %v13189_v41 = vld [vmem:[#allocation4 + $0x588] sm:$0xff] }
 0xf2e   :  { %13319 = vmatprep.subr.bf16.mxu0 %v13097_v14  ;;  %v13188_v14 = vld [vmem:[#allocation4 + $0x580] sm:$0xff] }
 0xf31   :  { %13320 = vmatpush1.bf16.msra.mxu0 %v13096_v22  ;;  %v13193_v22 = vld [vmem:[#allocation4 + $0x5a8] sm:$0xff] }
 0xf32   :  { %13321 = vmatprep.subr.bf16.mxu0 %v13101_v31  ;;  %v13192_v31 = vld [vmem:[#allocation4 + $0x5a0] sm:$0xff] }
 0xf35   :  { %13322 = vmatpush1.bf16.msra.mxu0 %v13100_v45  ;;  %v13197_v45 = vld [vmem:[#allocation4 + $0x5c8] sm:$0xff] }
 0xf36   :  { %13323 = vmatprep.subr.bf16.mxu0 %v13105_v55  ;;  %v13196_v55 = vld [vmem:[#allocation4 + $0x5c0] sm:$0xff] }
 0xf39   :  { %13324 = vmatpush1.bf16.msra.mxu0 %v13104_v35  ;;  %v13201_v35 = vld [vmem:[#allocation4 + $0x5e8] sm:$0xff] }
 0xf3a   :  { %13325 = vmatprep.subr.bf16.mxu0 %v13109_v27  ;;  %v13200_v27 = vld [vmem:[#allocation4 + $0x5e0] sm:$0xff] }
 0xf3d   :  { %13326 = vmatpush1.bf16.msra.mxu0 %v13108_v52  ;;  %v13205_v52 = vld [vmem:[#allocation4 + $0x608] sm:$0xff] }
 0xf3e   :  { %13327 = vmatprep.subr.bf16.mxu0 %v13113_v49  ;;  %v20618_v49 = vpack.c.bf16 %v12996_v28, %v12996_v28  ;;  %v13212_v28 = vld [vmem:[#allocation4 + $0x640] sm:$0xff] }
 0xf41   :  { %13328 = vmatpush1.bf16.msra.mxu0 %v13112_v6  ;;  %v20623_v6 = vpack.c.bf16 %v12999_v7, %v12999_v7  ;;  %v13221_v7 = vld [vmem:[#allocation4 + $0x688] sm:$0xff] }
 0xf42   :  { %13329 = vmatprep.subr.bf16.mxu0 %v13117_v25  ;;  %v13204_v25 = vld [vmem:[#allocation4 + $0x600] sm:$0xff] }
 0xf45   :  { %13330 = vmatpush1.bf16.msra.mxu0 %v13116_v47  ;;  %v13209_v47 = vld [vmem:[#allocation4 + $0x628] sm:$0xff] }
 0xf46   :  { %13331 = vmatprep.subr.bf16.mxu0 %v13121_v40  ;;  %v13208_v40 = vld [vmem:[#allocation4 + $0x620] sm:$0xff] }
 0xf49   :  { %13332 = vmatpush1.bf16.msra.mxu0 %v13120_v60  ;;  %v13217_v60 = vld [vmem:[#allocation4 + $0x668] sm:$0xff] }
 0xf4a   :  { %13333 = vmatprep.subr.bf16.mxu0 %v13125_v3  ;;  %v13220_v3 = vld [vmem:[#allocation4 + $0x680] sm:$0xff] }
 0xf4d   :  { %13334 = vmatpush1.bf16.msra.mxu0 %v13124_v23  ;;  %v13225_v23 = vld [vmem:[#allocation4 + $0x6a8] sm:$0xff] }
 0xf4e   :  { %13335 = vmatprep.subr.bf16.mxu0 %v13129_v29  ;;  %v13224_v29 = vld [vmem:[#allocation4 + $0x6a0] sm:$0xff] }
 0xf51   :  { %13336 = vmatpush1.bf16.msra.mxu0 %v13128_v13  ;;  %v13229_v13 = vld [vmem:[#allocation4 + $0x6c8] sm:$0xff] }
 0xf52   :  { %13337 = vmatprep.subr.bf16.mxu0 %v13133_v1  ;;  %v13228_v1 = vld [vmem:[#allocation4 + $0x6c0] sm:$0xff] }
 0xf55   :  { %13338 = vmatpush1.bf16.msra.mxu0 %v13132_v53  ;;  %v13233_v53 = vld [vmem:[#allocation4 + $0x6e8] sm:$0xff] }
 0xf56   :  { %13339 = vmatprep.subr.bf16.mxu0 %v13137_v42  ;;  %v13232_v42 = vld [vmem:[#allocation4 + $0x6e0] sm:$0xff] }
 0xf59   :  { %13340 = vmatpush1.bf16.msra.mxu0 %v13136_v36  ;;  %v13237_v36 = vld [vmem:[#allocation4 + $0x708] sm:$0xff] }
 0xf5a   :  { %13350 = vmatprep.subr.bf16.mxu0 %v13141_v58  ;;  %v13236_v58 = vld [vmem:[#allocation4 + $0x700] sm:$0xff] }
 0xf5c   :  { %13342 = vmatmul.mubr.bf16.vlgmr.msra.gmra.mrb[156].mxu0 %v20606_v2 }
 0xf5d   :  { %13351 = vmatpush1.bf16.msra.mxu0 %v13140_v16  ;;  %13382 = vmatprep.mubr.bf16.mxu0 %v20611_v18  ;;  %v13241_v16 = vld [vmem:[#allocation4 + $0x728] sm:$0xff] }
 0xf5e   :  { %13352 = vmatprep.subr.bf16.mxu0 %v13145_v11  ;;  %v13240_v11 = vld [vmem:[#allocation4 + $0x720] sm:$0xff] }
 0xf61   :  { %13353 = vmatpush1.bf16.msra.mxu0 %v13144_v39  ;;  %v13245_v39 = vld [vmem:[#allocation4 + $0x748] sm:$0xff] }
 0xf62   :  { %13354 = vmatprep.subr.bf16.mxu0 %v13149_v24  ;;  %v13244_v24 = vld [vmem:[#allocation4 + $0x740] sm:$0xff] }
 0xf65   :  { %13355 = vmatpush1.bf16.msra.mxu0 %v13148_v30  ;;  %v13249_v30 = vld [vmem:[#allocation4 + $0x768] sm:$0xff] }
 0xf66   :  { %13356 = vmatprep.subr.bf16.mxu0 %v13153_v62  ;;  %v13248_v62 = vld [vmem:[#allocation4 + $0x760] sm:$0xff] }
 0xf69   :  { %13357 = vmatpush1.bf16.msra.mxu0 %v13152_v43  ;;  %v13253_v43 = vld [vmem:[#allocation4 + $0x788] sm:$0xff] }
 0xf6a   :  { %13358 = vmatprep.subr.bf16.mxu0 %v13157_v19  ;;  %v13252_v19 = vld [vmem:[#allocation4 + $0x780] sm:$0xff] }
 0xf6d   :  { %13359 = vmatpush1.bf16.msra.mxu0 %v13156_v10  ;;  %v13257_v10 = vld [vmem:[#allocation4 + $0x7a8] sm:$0xff] }
 0xf6e   :  { %13360 = vmatprep.subr.bf16.mxu0 %v13161_v21  ;;  %v13256_v21 = vld [vmem:[#allocation4 + $0x7a0] sm:$0xff] }
 0xf71   :  { %13361 = vmatpush1.bf16.msra.mxu0 %v13160_v37  ;;  %v13261_v37 = vld [vmem:[#allocation4 + $0x7c8] sm:$0xff] }
 0xf72   :  { %13362 = vmatprep.subr.bf16.mxu0 %v13165_v48  ;;  %v13260_v48 = vld [vmem:[#allocation4 + $0x7c0] sm:$0xff] }
 0xf75   :  { %13363 = vmatpush1.bf16.msra.mxu0 %v13164_v38  ;;  %v13265_v38 = vld [vmem:[#allocation4 + $0x7e8] sm:$0xff] }
 0xf76   :  { %13364 = vmatprep.subr.bf16.mxu0 %v13169_v8  ;;  %v13264_v8 = vld [vmem:[#allocation4 + $0x7e0] sm:$0xff] }
 0xf79   :  { %13365 = vmatpush1.bf16.msra.mxu0 %v13168_v50  ;;  %v13015_v50 = vld [vmem:[#allocation4 + $0x18] sm:$0xff] }
 0xf7a   :  { %13366 = vmatprep.subr.bf16.mxu0 %v13173_v26  ;;  %v20630_v26 = vpack.c.bf16 %v12998_v17, %v12998_v17  ;;  %v13031_v17 = vld [vmem:[#allocation4 + $0x98] sm:$0xff] }
 0xf7d   :  { %13367 = vmatpush1.bf16.msra.mxu0 %v13172_v44  ;;  %v13014_v44 = vld [vmem:[#allocation4 + $0x10] sm:$0xff] }
 0xf7e   :  { %13368 = vmatprep.subr.bf16.mxu0 %v13177_v56  ;;  %v13019_v56 = vld [vmem:[#allocation4 + $0x38] sm:$0xff] }
 0xf81   :  { %13369 = vmatpush1.bf16.msra.mxu0 %v13176_v32  ;;  %v13018_v32 = vld [vmem:[#allocation4 + $0x30] sm:$0xff] }
 0xf82   :  { %13370 = vmatprep.subr.bf16.mxu0 %v13181_v54  ;;  %v13023_v54 = vld [vmem:[#allocation4 + $0x58] sm:$0xff] }
 0xf85   :  { %13371 = vmatpush1.bf16.msra.mxu0 %v13180_v20  ;;  %v13022_v20 = vld [vmem:[#allocation4 + $0x50] sm:$0xff] }
 0xf86   :  { %13372 = vmatprep.subr.bf16.mxu0 %v13185_v5  ;;  %v13027_v5 = vld [vmem:[#allocation4 + $0x78] sm:$0xff] }
 0xf89   :  { %13373 = vmatpush1.bf16.msra.mxu0 %v13184_v63  ;;  %v13030_v63 = vld [vmem:[#allocation4 + $0x90] sm:$0xff] }
 0xf8a   :  { %13374 = vmatprep.subr.bf16.mxu0 %v13189_v41  ;;  %v13035_v41 = vld [vmem:[#allocation4 + $0xb8] sm:$0xff] }
 0xf8d   :  { %13375 = vmatpush1.bf16.msra.mxu0 %v13188_v14  ;;  %v13034_v14 = vld [vmem:[#allocation4 + $0xb0] sm:$0xff] }
 0xf8e   :  { %13376 = vmatprep.subr.bf16.mxu0 %v13193_v22  ;;  %v13039_v22 = vld [vmem:[#allocation4 + $0xd8] sm:$0xff] }
 0xf91   :  { %13377 = vmatpush1.bf16.msra.mxu0 %v13192_v31  ;;  %v13043_v31 = vld [vmem:[#allocation4 + $0xf8] sm:$0xff] }
 0xf92   :  { %13378 = vmatprep.subr.bf16.mxu0 %v13197_v45  ;;  %v13042_v45 = vld [vmem:[#allocation4 + $0xf0] sm:$0xff] }
 0xf95   :  { %13379 = vmatpush1.bf16.msra.mxu0 %v13196_v55  ;;  %v13047_v55 = vld [vmem:[#allocation4 + $0x118] sm:$0xff] }
 0xf96   :  { %13380 = vmatprep.subr.bf16.mxu0 %v13201_v35  ;;  %v13046_v35 = vld [vmem:[#allocation4 + $0x110] sm:$0xff] }
 0xf99   :  { %13381 = vmatpush1.bf16.msra.mxu0 %v13200_v27  ;;  %v13051_v27 = vld [vmem:[#allocation4 + $0x138] sm:$0xff] }
 0xf9a   :  { %13391 = vmatprep.subr.bf16.mxu0 %v13205_v52  ;;  %v13050_v52 = vld [vmem:[#allocation4 + $0x130] sm:$0xff] }
 0xf9c   :  { %13383 = vmatmul.mubr.bf16.vlgmr.msra.gmra.mrb[156].mxu0 %v20618_v49 }
 0xf9d   :  { %13392 = vmatpush1.bf16.msra.mxu0 %v13204_v25  ;;  %13423 = vmatprep.mubr.bf16.mxu0 %v20623_v6  ;;  %v13055_v25 = vld [vmem:[#allocation4 + $0x158] sm:$0xff] }
 0xf9e   :  { %13393 = vmatprep.subr.bf16.mxu0 %v13209_v47  ;;  %v13054_v47 = vld [vmem:[#allocation4 + $0x150] sm:$0xff] }
 0xfa1   :  { %13394 = vmatpush1.bf16.msra.mxu0 %v13208_v40  ;;  %v13059_v40 = vld [vmem:[#allocation4 + $0x178] sm:$0xff] }
 0xfa2   :  { %13395 = vmatprep.subr.bf16.mxu0 %v13213_v4  ;;  %v13058_v4 = vld [vmem:[#allocation4 + $0x170] sm:$0xff] }
 0xfa5   :  { %13396 = vmatpush1.bf16.msra.mxu0 %v13212_v28  ;;  %v13063_v28 = vld [vmem:[#allocation4 + $0x198] sm:$0xff] }
 0xfa6   :  { %13397 = vmatprep.subr.bf16.mxu0 %v13217_v60  ;;  %v13062_v60 = vld [vmem:[#allocation4 + $0x190] sm:$0xff] }
 0xfa9   :  { %13398 = vmatpush1.bf16.msra.mxu0 %v13216_v34  ;;  %v13067_v34 = vld [vmem:[#allocation4 + $0x1b8] sm:$0xff] }
 0xfaa   :  { %13399 = vmatprep.subr.bf16.mxu0 %v13221_v7  ;;  %v13066_v7 = vld [vmem:[#allocation4 + $0x1b0] sm:$0xff] }
 0xfad   :  { %13400 = vmatpush1.bf16.msra.mxu0 %v13220_v3  ;;  %v13071_v3 = vld [vmem:[#allocation4 + $0x1d8] sm:$0xff] }
 0xfae   :  { %13401 = vmatprep.subr.bf16.mxu0 %v13225_v23  ;;  %v13070_v23 = vld [vmem:[#allocation4 + $0x1d0] sm:$0xff] }
 0xfb1   :  { %13402 = vmatpush1.bf16.msra.mxu0 %v13224_v29  ;;  %v13075_v29 = vld [vmem:[#allocation4 + $0x1f8] sm:$0xff] }
 0xfb2   :  { %13403 = vmatprep.subr.bf16.mxu0 %v13229_v13  ;;  %v13074_v13 = vld [vmem:[#allocation4 + $0x1f0] sm:$0xff] }
 0xfb5   :  { %13404 = vmatpush1.bf16.msra.mxu0 %v13228_v1  ;;  %v13079_v1 = vld [vmem:[#allocation4 + $0x218] sm:$0xff] }
 0xfb6   :  { %13405 = vmatprep.subr.bf16.mxu0 %v13233_v53  ;;  %v13078_v53 = vld [vmem:[#allocation4 + $0x210] sm:$0xff] }
 0xfb9   :  { %13406 = vmatpush1.bf16.msra.mxu0 %v13232_v42  ;;  %v13083_v42 = vld [vmem:[#allocation4 + $0x238] sm:$0xff] }
 0xfba   :  { %13407 = vmatprep.subr.bf16.mxu0 %v13237_v36  ;;  %v13082_v36 = vld [vmem:[#allocation4 + $0x230] sm:$0xff] }
 0xfbd   :  { %13408 = vmatpush1.bf16.msra.mxu0 %v13236_v58  ;;  %v13087_v58 = vld [vmem:[#allocation4 + $0x258] sm:$0xff] }
 0xfbe   :  { %13409 = vmatprep.subr.bf16.mxu0 %v13241_v16  ;;  %v13086_v16 = vld [vmem:[#allocation4 + $0x250] sm:$0xff] }
 0xfc1   :  { %13410 = vmatpush1.bf16.msra.mxu0 %v13240_v11  ;;  %v13091_v11 = vld [vmem:[#allocation4 + $0x278] sm:$0xff] }
 0xfc2   :  { %13411 = vmatprep.subr.bf16.mxu0 %v13245_v39  ;;  %v13090_v39 = vld [vmem:[#allocation4 + $0x270] sm:$0xff] }
 0xfc5   :  { %13412 = vmatpush1.bf16.msra.mxu0 %v13244_v24  ;;  %v13095_v24 = vld [vmem:[#allocation4 + $0x298] sm:$0xff] }
 0xfc6   :  { %13413 = vmatprep.subr.bf16.mxu0 %v13249_v30  ;;  %v13094_v30 = vld [vmem:[#allocation4 + $0x290] sm:$0xff] }
 0xfc9   :  { %13414 = vmatpush1.bf16.msra.mxu0 %v13248_v62  ;;  %v13099_v62 = vld [vmem:[#allocation4 + $0x2b8] sm:$0xff] }
 0xfca   :  { %13415 = vmatprep.subr.bf16.mxu0 %v13253_v43  ;;  %v13103_v43 = vld [vmem:[#allocation4 + $0x2d8] sm:$0xff] }
 0xfcd   :  { %13416 = vmatpush1.bf16.msra.mxu0 %v13252_v19  ;;  %v13107_v19 = vld [vmem:[#allocation4 + $0x2f8] sm:$0xff] }
 0xfce   :  { %13417 = vmatprep.subr.bf16.mxu0 %v13257_v10  ;;  %v13106_v10 = vld [vmem:[#allocation4 + $0x2f0] sm:$0xff] }
 0xfd1   :  { %13418 = vmatpush1.bf16.msra.mxu0 %v13256_v21  ;;  %v13111_v21 = vld [vmem:[#allocation4 + $0x318] sm:$0xff] }
 0xfd2   :  { %13419 = vmatprep.subr.bf16.mxu0 %v13261_v37  ;;  %v13110_v37 = vld [vmem:[#allocation4 + $0x310] sm:$0xff] }
 0xfd5   :  { %13420 = vmatpush1.bf16.msra.mxu0 %v13260_v48  ;;  %v13115_v48 = vld [vmem:[#allocation4 + $0x338] sm:$0xff] }
 0xfd6   :  { %13421 = vmatprep.subr.bf16.mxu0 %v13265_v38  ;;  %v13114_v38 = vld [vmem:[#allocation4 + $0x330] sm:$0xff] }
 0xfd9   :  { %13422 = vmatpush1.bf16.msra.mxu0 %v13264_v8  ;;  %v13119_v8 = vld [vmem:[#allocation4 + $0x358] sm:$0xff] }
 0xfda   :  { %13432 = vmatprep.subr.bf16.mxu0 %v13015_v50  ;;  %v13118_v50 = vld [vmem:[#allocation4 + $0x350] sm:$0xff] }
 0xfdc   :  { %13424 = vmatmul.mubr.bf16.vlgmr.msra.gmra.mrb[156].mxu0 %v20630_v26 }
 0xfdd   :  { %13433 = vmatpush1.bf16.msra.mxu0 %v13014_v44  ;;  %13464 = vmatprep.mubr.bf16.mxu0 %v20588_v59  ;;  %v13038_v59 = vld [vmem:[#allocation4 + $0xd0] sm:$0xff]  ;;  %v13123_v44 = vld [vmem:[#allocation4 + $0x378] sm:$0xff] }
 0xfde   :  { %13434 = vmatprep.subr.bf16.mxu0 %v13019_v56  ;;  %v13122_v56 = vld [vmem:[#allocation4 + $0x370] sm:$0xff] }
 0xfe1   :  { %13435 = vmatpush1.bf16.msra.mxu0 %v13018_v32  ;;  %v13127_v32 = vld [vmem:[#allocation4 + $0x398] sm:$0xff] }
 0xfe2   :  { %13436 = vmatprep.subr.bf16.mxu0 %v13023_v54  ;;  %v13126_v54 = vld [vmem:[#allocation4 + $0x390] sm:$0xff] }
 0xfe5   :  { %13437 = vmatpush1.bf16.msra.mxu0 %v13022_v20  ;;  %v13131_v20 = vld [vmem:[#allocation4 + $0x3b8] sm:$0xff] }
 0xfe6   :  { %13438 = vmatprep.subr.bf16.mxu0 %v13027_v5  ;;  %v13130_v5 = vld [vmem:[#allocation4 + $0x3b0] sm:$0xff] }
 0xfe9   :  { %13439 = vmatpush1.bf16.msra.mxu0 %v13026_v12  ;;  %v13135_v12 = vld [vmem:[#allocation4 + $0x3d8] sm:$0xff] }
 0xfea   :  { %13440 = vmatprep.subr.bf16.mxu0 %v13031_v17  ;;  %v13134_v17 = vld [vmem:[#allocation4 + $0x3d0] sm:$0xff] }
 0xfed   :  { %13441 = vmatpush1.bf16.msra.mxu0 %v13030_v63  ;;  %v13139_v63 = vld [vmem:[#allocation4 + $0x3f8] sm:$0xff] }
 0xfee   :  { %13442 = vmatprep.subr.bf16.mxu0 %v13035_v41  ;;  %v13138_v41 = vld [vmem:[#allocation4 + $0x3f0] sm:$0xff] }
 0xff1   :  { %13443 = vmatpush1.bf16.msra.mxu0 %v13034_v14  ;;  %v13143_v14 = vld [vmem:[#allocation4 + $0x418] sm:$0xff] }
 0xff2   :  { %13444 = vmatprep.subr.bf16.mxu0 %v13039_v22  ;;  %v13142_v22 = vld [vmem:[#allocation4 + $0x410] sm:$0xff] }
 0xff5   :  { %13445 = vmatpush1.bf16.msra.mxu0 %v13038_v59  ;;  %v13147_v59 = vld [vmem:[#allocation4 + $0x438] sm:$0xff] }
 0xff6   :  { %13446 = vmatprep.subr.bf16.mxu0 %v13043_v31  ;;  %v13146_v31 = vld [vmem:[#allocation4 + $0x430] sm:$0xff] }
 0xff9   :  { %13447 = vmatpush1.bf16.msra.mxu0 %v13042_v45  ;;  %v13151_v45 = vld [vmem:[#allocation4 + $0x458] sm:$0xff] }
 0xffa   :  { %13448 = vmatprep.subr.bf16.mxu0 %v13047_v55  ;;  %v13150_v55 = vld [vmem:[#allocation4 + $0x450] sm:$0xff] }
 0xffd   :  { %13449 = vmatpush1.bf16.msra.mxu0 %v13046_v35  ;;  %v13155_v35 = vld [vmem:[#allocation4 + $0x478] sm:$0xff] }
 0xffe   :  { %13450 = vmatprep.subr.bf16.mxu0 %v13051_v27  ;;  %v13154_v27 = vld [vmem:[#allocation4 + $0x470] sm:$0xff] }
0x1001   :  { %13451 = vmatpush1.bf16.msra.mxu0 %v13050_v52  ;;  %v13159_v52 = vld [vmem:[#allocation4 + $0x498] sm:$0xff] }
0x1002   :  { %13452 = vmatprep.subr.bf16.mxu0 %v13055_v25  ;;  %v13158_v25 = vld [vmem:[#allocation4 + $0x490] sm:$0xff] }
0x1005   :  { %13453 = vmatpush1.bf16.msra.mxu0 %v13054_v47  ;;  %v13163_v47 = vld [vmem:[#allocation4 + $0x4b8] sm:$0xff] }
0x1006   :  { %13454 = vmatprep.subr.bf16.mxu0 %v13059_v40  ;;  %v13167_v40 = vld [vmem:[#allocation4 + $0x4d8] sm:$0xff] }
0x1009   :  { %13455 = vmatpush1.bf16.msra.mxu0 %v13058_v4  ;;  %v13171_v4 = vld [vmem:[#allocation4 + $0x4f8] sm:$0xff] }
0x100a   :  { %13456 = vmatprep.subr.bf16.mxu0 %v13063_v28  ;;  %v13170_v28 = vld [vmem:[#allocation4 + $0x4f0] sm:$0xff] }
0x100d   :  { %13457 = vmatpush1.bf16.msra.mxu0 %v13062_v60  ;;  %v13175_v60 = vld [vmem:[#allocation4 + $0x518] sm:$0xff] }
0x100e   :  { %13458 = vmatprep.subr.bf16.mxu0 %v13067_v34  ;;  %v13174_v34 = vld [vmem:[#allocation4 + $0x510] sm:$0xff] }
0x1011   :  { %13459 = vmatpush1.bf16.msra.mxu0 %v13066_v7  ;;  %v13179_v7 = vld [vmem:[#allocation4 + $0x538] sm:$0xff] }
0x1012   :  { %13460 = vmatprep.subr.bf16.mxu0 %v13071_v3  ;;  %v13178_v3 = vld [vmem:[#allocation4 + $0x530] sm:$0xff] }
0x1015   :  { %13461 = vmatpush1.bf16.msra.mxu0 %v13070_v23  ;;  %v13183_v23 = vld [vmem:[#allocation4 + $0x558] sm:$0xff] }
0x1016   :  { %13462 = vmatprep.subr.bf16.mxu0 %v13075_v29  ;;  %v13182_v29 = vld [vmem:[#allocation4 + $0x550] sm:$0xff] }
0x1019   :  { %13463 = vmatpush1.bf16.msra.mxu0 %v13074_v13  ;;  %v13187_v13 = vld [vmem:[#allocation4 + $0x578] sm:$0xff] }
0x101a   :  { %13473 = vmatprep.subr.bf16.mxu0 %v13079_v1  ;;  %v13186_v1 = vld [vmem:[#allocation4 + $0x570] sm:$0xff] }
0x101c   :  { %13465 = vmatmul.mubr.bf16.vlgmr.msra.gmra.mrb[160].mxu0 %v20594_v51  ;;  %v13098_v51 = vld [vmem:[#allocation4 + $0x2b0] sm:$0xff] }
0x101d   :  { %13474 = vmatpush1.bf16.msra.mxu0 %v13078_v53  ;;  %13505 = vmatprep.mubr.bf16.mxu0 %v20599_v57  ;;  %v13102_v57 = vld [vmem:[#allocation4 + $0x2d0] sm:$0xff]  ;;  %v13191_v53 = vld [vmem:[#allocation4 + $0x598] sm:$0xff] }
0x101e   :  { %13475 = vmatprep.subr.bf16.mxu0 %v13083_v42  ;;  %v13190_v42 = vld [vmem:[#allocation4 + $0x590] sm:$0xff] }
0x1021   :  { %13476 = vmatpush1.bf16.msra.mxu0 %v13082_v36  ;;  %v13195_v36 = vld [vmem:[#allocation4 + $0x5b8] sm:$0xff] }
0x1022   :  { %13477 = vmatprep.subr.bf16.mxu0 %v13087_v58  ;;  %v13194_v58 = vld [vmem:[#allocation4 + $0x5b0] sm:$0xff] }
0x1025   :  { %13478 = vmatpush1.bf16.msra.mxu0 %v13086_v16  ;;  %v13199_v16 = vld [vmem:[#allocation4 + $0x5d8] sm:$0xff] }
0x1026   :  { %13479 = vmatprep.subr.bf16.mxu0 %v13091_v11  ;;  %v13198_v11 = vld [vmem:[#allocation4 + $0x5d0] sm:$0xff] }
0x1029   :  { %13480 = vmatpush1.bf16.msra.mxu0 %v13090_v39  ;;  %v13203_v39 = vld [vmem:[#allocation4 + $0x5f8] sm:$0xff] }
0x102a   :  { %13481 = vmatprep.subr.bf16.mxu0 %v13095_v24  ;;  %v13202_v24 = vld [vmem:[#allocation4 + $0x5f0] sm:$0xff] }
0x102d   :  { %13482 = vmatpush1.bf16.msra.mxu0 %v13094_v30  ;;  %v13207_v30 = vld [vmem:[#allocation4 + $0x618] sm:$0xff] }
0x102e   :  { %13483 = vmatprep.subr.bf16.mxu0 %v13099_v62  ;;  %v13206_v62 = vld [vmem:[#allocation4 + $0x610] sm:$0xff] }
0x1031   :  { %13484 = vmatpush1.bf16.msra.mxu0 %v13098_v51  ;;  %v13211_v51 = vld [vmem:[#allocation4 + $0x638] sm:$0xff] }
0x1032   :  { %13485 = vmatprep.subr.bf16.mxu0 %v13103_v43  ;;  %v13210_v43 = vld [vmem:[#allocation4 + $0x630] sm:$0xff] }
0x1035   :  { %13486 = vmatpush1.bf16.msra.mxu0 %v13102_v57  ;;  %v13215_v57 = vld [vmem:[#allocation4 + $0x658] sm:$0xff] }
0x1036   :  { %13487 = vmatprep.subr.bf16.mxu0 %v13107_v19  ;;  %v13214_v19 = vld [vmem:[#allocation4 + $0x650] sm:$0xff] }
0x1039   :  { %13488 = vmatpush1.bf16.msra.mxu0 %v13106_v10  ;;  %v13219_v10 = vld [vmem:[#allocation4 + $0x678] sm:$0xff] }
0x103a   :  { %13489 = vmatprep.subr.bf16.mxu0 %v13111_v21  ;;  %v13218_v21 = vld [vmem:[#allocation4 + $0x670] sm:$0xff] }
0x103d   :  { %13490 = vmatpush1.bf16.msra.mxu0 %v13110_v37  ;;  %v13223_v37 = vld [vmem:[#allocation4 + $0x698] sm:$0xff] }
0x103e   :  { %13491 = vmatprep.subr.bf16.mxu0 %v13115_v48  ;;  %v13222_v48 = vld [vmem:[#allocation4 + $0x690] sm:$0xff] }
0x1041   :  { %13492 = vmatpush1.bf16.msra.mxu0 %v13114_v38  ;;  %v13227_v38 = vld [vmem:[#allocation4 + $0x6b8] sm:$0xff] }
0x1042   :  { %13493 = vmatprep.subr.bf16.mxu0 %v13119_v8  ;;  %v20860_v8 = vld [vmem:[#allocation35_spill] sm:$0xff] }
0x1045   :  { %13494 = vmatpush1.bf16.msra.mxu0 %v13118_v50  ;;  %v13619_v50 = vrot.slane %v20851_v15, %v20816_v0 }
0x1046   :  { %13495 = vmatprep.subr.bf16.mxu0 %v13123_v44  ;;  %v13226_v44 = vld [vmem:[#allocation4 + $0x6b0] sm:$0xff] }
0x1049   :  { %13496 = vmatpush1.bf16.msra.mxu0 %v13122_v56 }
0x104a   :  { %13497 = vmatprep.subr.bf16.mxu0 %v13127_v32  ;;  %v13623_v32 = vrot.slane %v20852_v46, %v20816_v0 }
0x104d   :  { %13498 = vmatpush1.bf16.msra.mxu0 %v13126_v54  ;;  %v13231_v54 = vld [vmem:[#allocation4 + $0x6d8] sm:$0xff] }
0x104e   :  { %13499 = vmatprep.subr.bf16.mxu0 %v13131_v20 }
0x1051   :  { %13500 = vmatpush1.bf16.msra.mxu0 %v13130_v5 }
0x1052   :  { %13501 = vmatprep.subr.bf16.mxu0 %v13135_v12 }
0x1055   :  { %13502 = vmatpush1.bf16.msra.mxu0 %v13134_v17 }
0x1056   :  { %13503 = vmatprep.subr.bf16.mxu0 %v13139_v63 }
0x1059   :  { %13504 = vmatpush1.bf16.msra.mxu0 %v13138_v41 }
0x105a   :  { %13514 = vmatprep.subr.bf16.mxu0 %v13143_v14  ;;  %v13230_v14 = vld [vmem:[#allocation4 + $0x6d0] sm:$0xff] }
0x105c   :  { %13506 = vmatmul.mubr.bf16.vlgmr.msra.gmra.mrb[160].mxu0 %v20606_v2  ;;  %v13162_v2 = vld [vmem:[#allocation4 + $0x4b0] sm:$0xff] }
0x105d   :  { %13515 = vmatpush1.bf16.msra.mxu0 %v13142_v22  ;;  %13546 = vmatprep.mubr.bf16.mxu0 %v20611_v18  ;;  %v13166_v18 = vld [vmem:[#allocation4 + $0x4d0] sm:$0xff] }
0x105e   :  { %13516 = vmatprep.subr.bf16.mxu0 %v13147_v59  ;;  %v13235_v59 = vld [vmem:[#allocation4 + $0x6f8] sm:$0xff] }
0x1061   :  { %13517 = vmatpush1.bf16.msra.mxu0 %v13146_v31 }
0x1062   :  { %13518 = vmatprep.subr.bf16.mxu0 %v13151_v45 }
0x1065   :  { %13519 = vmatpush1.bf16.msra.mxu0 %v13150_v55  ;;  %v13234_v55 = vld [vmem:[#allocation4 + $0x6f0] sm:$0xff] }
0x1066   :  { %13520 = vmatprep.subr.bf16.mxu0 %v13155_v35  ;;  %v13238_v35 = vld [vmem:[#allocation4 + $0x710] sm:$0xff] }
0x1069   :  { %13521 = vmatpush1.bf16.msra.mxu0 %v13154_v27  ;;  %v13243_v27 = vld [vmem:[#allocation4 + $0x738] sm:$0xff] }
0x106a   :  { %13522 = vmatprep.subr.bf16.mxu0 %v13159_v52  ;;  %v13242_v52 = vld [vmem:[#allocation4 + $0x730] sm:$0xff] }
0x106d   :  { %13523 = vmatpush1.bf16.msra.mxu0 %v13158_v25  ;;  %v13247_v25 = vld [vmem:[#allocation4 + $0x758] sm:$0xff] }
0x106e   :  { %13524 = vmatprep.subr.bf16.mxu0 %v13163_v47  ;;  %v13246_v47 = vld [vmem:[#allocation4 + $0x750] sm:$0xff] }
0x1071   :  { %13525 = vmatpush1.bf16.msra.mxu0 %v13162_v2  ;;  %v13251_v2 = vld [vmem:[#allocation4 + $0x778] sm:$0xff] }
0x1072   :  { %13526 = vmatprep.subr.bf16.mxu0 %v13167_v40  ;;  %v13250_v40 = vld [vmem:[#allocation4 + $0x770] sm:$0xff] }
0x1075   :  { %13527 = vmatpush1.bf16.msra.mxu0 %v13166_v18  ;;  %v13255_v18 = vld [vmem:[#allocation4 + $0x798] sm:$0xff] }
0x1076   :  { %13528 = vmatprep.subr.bf16.mxu0 %v13171_v4  ;;  %v13254_v4 = vld [vmem:[#allocation4 + $0x790] sm:$0xff] }
0x1079   :  { %13529 = vmatpush1.bf16.msra.mxu0 %v13170_v28  ;;  %v13259_v28 = vld [vmem:[#allocation4 + $0x7b8] sm:$0xff] }
0x107a   :  { %13530 = vmatprep.subr.bf16.mxu0 %v13175_v60  ;;  %v13258_v60 = vld [vmem:[#allocation4 + $0x7b0] sm:$0xff] }
0x107d   :  { %13531 = vmatpush1.bf16.msra.mxu0 %v13174_v34  ;;  %v13263_v34 = vld [vmem:[#allocation4 + $0x7d8] sm:$0xff] }
0x107e   :  { %13532 = vmatprep.subr.bf16.mxu0 %v13179_v7  ;;  %v13262_v7 = vld [vmem:[#allocation4 + $0x7d0] sm:$0xff] }
0x1081   :  { %13533 = vmatpush1.bf16.msra.mxu0 %v13178_v3  ;;  %v13267_v3 = vld [vmem:[#allocation4 + $0x7f8] sm:$0xff] }
0x1082   :  { %13534 = vmatprep.subr.bf16.mxu0 %v13183_v23  ;;  %v13266_v23 = vld [vmem:[#allocation4 + $0x7f0] sm:$0xff] }
0x1085   :  { %13535 = vmatpush1.bf16.msra.mxu0 %v13182_v29  ;;  %v13607_v29 = vrot.slane %v20854_v61, %v20860_v8 }
0x1086   :  { %13536 = vmatprep.subr.bf16.mxu0 %v13187_v13  ;;  %v13611_v13 = vrot.slane %v20855_v33, %v20860_v8 }
0x1089   :  { %13537 = vmatpush1.bf16.msra.mxu0 %v13186_v1  ;;  %v13627_v1 = vrot.slane %v20854_v61, %v20816_v0 }
0x108a   :  { %13538 = vmatprep.subr.bf16.mxu0 %v13191_v53 }
0x108d   :  { %13539 = vmatpush1.bf16.msra.mxu0 %v13190_v42  ;;  %v13631_v42 = vrot.slane %v20855_v33, %v20816_v0 }
0x108e   :  { %13540 = vmatprep.subr.bf16.mxu0 %v13195_v36 }
0x1091   :  { %13541 = vmatpush1.bf16.msra.mxu0 %v13194_v58 }
0x1092   :  { %13542 = vmatprep.subr.bf16.mxu0 %v13199_v16 }
0x1095   :  { %13543 = vmatpush1.bf16.msra.mxu0 %v13198_v11 }
0x1096   :  { %13544 = vmatprep.subr.bf16.mxu0 %v13203_v39 }
0x1099   :  { %13545 = vmatpush1.bf16.msra.mxu0 %v13202_v24 }
0x109a   :  { %13555 = vmatprep.subr.bf16.mxu0 %v13207_v30 }
0x109c   :  { %13547 = vmatmul.mubr.bf16.vlgmr.msra.gmra.mrb[160].mxu0 %v20618_v49  ;;  %v13599_v49 = vrot.slane %v20851_v15, %v20860_v8 }
0x109d   :  { %13556 = vmatpush1.bf16.msra.mxu0 %v13206_v62  ;;  %13587 = vmatprep.mubr.bf16.mxu0 %v20623_v6  ;;  %v13603_v6 = vrot.slane %v20852_v46, %v20860_v8  ;;  %v13239_v46 = vld [vmem:[#allocation4 + $0x718] sm:$0xff] }
0x109e   :  { %13557 = vmatprep.subr.bf16.mxu0 %v13211_v51 }
0x10a1   :  { %13558 = vmatpush1.bf16.msra.mxu0 %v13210_v43 }
0x10a2   :  { %13559 = vmatprep.subr.bf16.mxu0 %v13215_v57 }
0x10a5   :  { %13560 = vmatpush1.bf16.msra.mxu0 %v13214_v19 }
0x10a6   :  { %13561 = vmatprep.subr.bf16.mxu0 %v13219_v10 }
0x10a9   :  { %13562 = vmatpush1.bf16.msra.mxu0 %v13218_v21 }
0x10aa   :  { %13563 = vmatprep.subr.bf16.mxu0 %v13223_v37 }
0x10ad   :  { %13564 = vmatpush1.bf16.msra.mxu0 %v13222_v48 }
0x10ae   :  { %13565 = vmatprep.subr.bf16.mxu0 %v13227_v38 }
0x10af   :  { %v13425_v56 = vpop.f32.mrb[156].mxu0 }
0x10b0   :  { %v13612_v20 = vmul.f32 %v13599_v49, %v13425_v56  ;;  %v13427_v5 = vpop.f32.mrb[157].mxu0 }
0x10b1   :  { %v13613_v12 = vmul.f32 %v13603_v6, %v13427_v5  ;;  %v13429_v17 = vpop.f32.mrb[158].mxu0  ;;  %13566 = vmatpush1.bf16.msra.mxu0 %v13226_v44 }
0x10b2   :  { %v20648_v63 = vadd.f32 %v13619_v50, %v13612_v20  ;;  %v13430_v41 = vpop.f32.mrb[159].mxu0  ;;  %13567 = vmatprep.subr.bf16.mxu0 %v13231_v54 }
0x10b3   :  { %v13633_v22 = vadd.f32 %v13623_v32, %v13613_v12 }
0x10b4   :  { %v13636_v31 = vmax.f32 %v20648_v63, 0.0 }
0x10b5   :  { %v13637_v45 = vmax.f32 %v13633_v22, 0.0  ;;  %13568 = vmatpush1.bf16.msra.mxu0 %v13230_v14 }
0x10b6   :  { %13569 = vmatprep.subr.bf16.mxu0 %v13235_v59 }
0x10b9   :  { %13570 = vmatpush1.bf16.msra.mxu0 %v13234_v55 }
0x10ba   :  { %13571 = vmatprep.subr.bf16.mxu0 %v13239_v46 }
0x10bd   :  { %13572 = vmatpush1.bf16.msra.mxu0 %v13238_v35 }
0x10be   :  { %13573 = vmatprep.subr.bf16.mxu0 %v13243_v27 }
0x10c1   :  { %13574 = vmatpush1.bf16.msra.mxu0 %v13242_v52 }
0x10c2   :  { %13575 = vmatprep.subr.bf16.mxu0 %v13247_v25 }
0x10c5   :  { %13576 = vmatpush1.bf16.msra.mxu0 %v13246_v47 }
0x10c6   :  { %13577 = vmatprep.subr.bf16.mxu0 %v13251_v2 }
0x10c9   :  { %13578 = vmatpush1.bf16.msra.mxu0 %v13250_v40 }
0x10ca   :  { %13579 = vmatprep.subr.bf16.mxu0 %v13255_v18 }
0x10cd   :  { %13580 = vmatpush1.bf16.msra.mxu0 %v13254_v4 }
0x10ce   :  { %13581 = vmatprep.subr.bf16.mxu0 %v13259_v28 }
0x10d1   :  { %13582 = vmatpush1.bf16.msra.mxu0 %v13258_v60 }
0x10d2   :  { %13583 = vmatprep.subr.bf16.mxu0 %v13263_v34 }
0x10d5   :  { %13584 = vmatpush1.bf16.msra.mxu0 %v13262_v7 }
0x10d6   :  { %13585 = vmatprep.subr.bf16.mxu0 %v13267_v3 }
0x10d9   :  { %13586 = vmatpush1.bf16.msra.mxu0 %v13266_v23 }
0x10dc   :  { %13588 = vmatmul.mubr.bf16.vlgmr.msra.gmra.mrb[160].mxu0 %v20630_v26 }
0x11af   :  { %v13589_v53 = vpop.f32.mrb[160].mxu0 }
0x11b0   :  { %v13614_v36 = vmul.f32 %v13607_v29, %v13589_v53  ;;  %v13591_v58 = vpop.f32.mrb[161].mxu0 }
0x11b1   :  { %v13615_v16 = vmul.f32 %v13611_v13, %v13591_v58  ;;  %v13593_v11 = vpop.f32.mrb[162].mxu0 }
0x11b2   :  { %v20660_v39 = vadd.f32 %v13627_v1, %v13614_v36  ;;  %v13594_v26 = vpop.f32.mrb[163].mxu0 }
0x11b3   :  { %v13635_v24 = vadd.f32 %v13631_v42, %v13615_v16 }
0x11b4   :  { %v13638_v30 = vmax.f32 %v20660_v39, 0.0 }
0x11b5   :  { %v13639_v62 = vmax.f32 %v13635_v24, 0.0 }
0x11b6   :  { %17184 = dma.done.wait [#allocation6 + $0x2], 4096 }
0x11b7   :  { %17185 = vsyncadd [#allocation6 + $0x2], 4294963200  ;;  %v13645_v51 = vpack.c.bf16 %v13637_v45, %v13637_v45  ;;  %v13656_v61 = vld [vmem:[#allocation5 + $0x40] sm:$0xff]  ;;  %v13657_v57 = vld [vmem:[#allocation5 + $0x48] sm:$0xff]  ;;  %v13644_v32 = vpack.c.bf16 %v13636_v31, %v13636_v31  ;;  %v13647_v54 = vpack.c.bf16 %v13639_v62, %v13639_v62  ;;  %v13646_v52 = vpack.c.bf16 %v13638_v30, %v13638_v30 }
0x11b8   :  { %v13648_v43 = vld [vmem:[#allocation5] sm:$0xff]  ;;  %14538 = vmatprep.subr.bf16.mxu0 %v13656_v61  ;;  %v13649_v0 = vld [vmem:[#allocation5 + $0x8] sm:$0xff]  ;;  %v13658_v33 = vld [vmem:[#allocation5 + $0x50] sm:$0xff]  ;;  %v17206_v25 = vmov 65   ;;  %v13683_v28 = vrot.slane %v20851_v15, %v20817_v9  ;;  %v20861_v60 = vlaneseq  ;;  %vm13768_vm3 = vcmask 1041408  }
0x11b9   :  { %13716 = vmatprep.mubr.bf16.mxu0 %v13645_v51  ;;  %14539 = vmatpush3.bf16.msra.mxu0 %v13648_v43  ;;  %v13650_v19 = vld [vmem:[#allocation5 + $0x10] sm:$0xff]  ;;  %v13659_v10 = vld [vmem:[#allocation5 + $0x58] sm:$0xff]  ;;  %v13660_v37 = vld [vmem:[#allocation5 + $0x60] sm:$0xff] }
0x11ba   :  { %14540 = vmatprep.subr.bf16.mxu0 %v13657_v57  ;;  %v13651_v21 = vld [vmem:[#allocation5 + $0x18] sm:$0xff]  ;;  %v13652_v48 = vld [vmem:[#allocation5 + $0x20] sm:$0xff]  ;;  %v13661_v38 = vld [vmem:[#allocation5 + $0x68] sm:$0xff]  ;;  %17102 = vset.pattern.permute.xlu1 %v17206_v25  ;;  %v13765_v34 = vand.u32 127, %v20861_v60 }
0x11bb   :  { %v13653_v8 = vld [vmem:[#allocation5 + $0x28] sm:$0xff]  ;;  %v13662_v49 = vld [vmem:[#allocation5 + $0x70] sm:$0xff]  ;;  %v13663_v50 = vld [vmem:[#allocation5 + $0x78] sm:$0xff]  ;;  %17103 = vset.pattern.permute.xlu0 %v17206_v25 }
0x11bc   :  { %v13654_v6 = vld [vmem:[#allocation5 + $0x30] sm:$0xff]  ;;  %v13655_v44 = vld [vmem:[#allocation5 + $0x38] sm:$0xff]  ;;  %v13672_v56 = vld [vmem:[#allocation5 + $0xc0] sm:$0xff]  ;;  %vm13766_vm2 = vcmp.lt.s32.totalorder %v13765_v34, 65  ;;  %vm13782_vm4 = vcmp.eq.s32.totalorder %v13765_v34, 65 }
0x11bd   :  { %14541 = vmatpush3.bf16.msra.mxu0 %v13649_v0  ;;  %v13664_v20 = vld [vmem:[#allocation5 + $0x80] sm:$0xff]  ;;  %v13673_v5 = vld [vmem:[#allocation5 + $0xc8] sm:$0xff]  ;;  %v13674_v17 = vld [vmem:[#allocation5 + $0xd0] sm:$0xff] }
0x11be   :  { %14542 = vmatprep.subr.bf16.mxu0 %v13658_v33  ;;  %v13665_v12 = vld [vmem:[#allocation5 + $0x88] sm:$0xff]  ;;  %v13666_v41 = vld [vmem:[#allocation5 + $0x90] sm:$0xff]  ;;  %v13675_v14 = vld [vmem:[#allocation5 + $0xd8] sm:$0xff] }
0x11bf   :  { %v13667_v63 = vld [vmem:[#allocation5 + $0x98] sm:$0xff]  ;;  %v13676_v22 = vld [vmem:[#allocation5 + $0xe0] sm:$0xff]  ;;  %v13677_v31 = vld [vmem:[#allocation5 + $0xe8] sm:$0xff] }
0x11c0   :  { %v13668_v59 = vld [vmem:[#allocation5 + $0xa0] sm:$0xff]  ;;  %v13669_v45 = vld [vmem:[#allocation5 + $0xa8] sm:$0xff]  ;;  %v13678_v55 = vld [vmem:[#allocation5 + $0xf0] sm:$0xff] }
0x11c1   :  { %14543 = vmatpush3.bf16.msra.mxu0 %v13650_v19  ;;  %v13670_v46 = vld [vmem:[#allocation5 + $0xb0] sm:$0xff]  ;;  %v13679_v35 = vld [vmem:[#allocation5 + $0xf8] sm:$0xff] }
0x11c2   :  { %14544 = vmatprep.subr.bf16.mxu0 %v13659_v10  ;;  %v13671_v27 = vld [vmem:[#allocation5 + $0xb8] sm:$0xff] }
0x11c5   :  { %14545 = vmatpush3.bf16.msra.mxu0 %v13651_v21 }
0x11c6   :  { %14546 = vmatprep.subr.bf16.mxu0 %v13660_v37 }
0x11c9   :  { %14547 = vmatpush3.bf16.msra.mxu0 %v13652_v48 }
0x11ca   :  { %14548 = vmatprep.subr.bf16.mxu0 %v13661_v38 }
0x11cd   :  { %14549 = vmatpush3.bf16.msra.mxu0 %v13653_v8 }
0x11ce   :  { %14550 = vmatprep.subr.bf16.mxu0 %v13662_v49 }
0x11d1   :  { %14551 = vmatpush3.bf16.msra.mxu0 %v13654_v6 }
0x11d2   :  { %14552 = vmatprep.subr.bf16.mxu0 %v13663_v50 }
0x11d5   :  { %14553 = vmatpush3.bf16.msra.mxu0 %v13655_v44 }
0x11d6   :  { %14560 = vmatprep.subr.bf16.mxu0 %v13672_v56 }
0x11d8   :  { %13717 = vmatmul.mubr.bf16.vlgmr.msra.gmra.mrb[164].mxu0 %v13644_v32 }
0x11d9   :  { %14561 = vmatpush3.bf16.msra.mxu0 %v13664_v20  ;;  %13756 = vmatprep.mubr.bf16.mxu0 %v13647_v54 }
0x11da   :  { %14562 = vmatprep.subr.bf16.mxu0 %v13673_v5 }
0x11dd   :  { %14563 = vmatpush3.bf16.msra.mxu0 %v13665_v12 }
0x11de   :  { %14564 = vmatprep.subr.bf16.mxu0 %v13674_v17 }
0x11e1   :  { %14565 = vmatpush3.bf16.msra.mxu0 %v13666_v41 }
0x11e2   :  { %14566 = vmatprep.subr.bf16.mxu0 %v13675_v14 }
0x11e5   :  { %14567 = vmatpush3.bf16.msra.mxu0 %v13667_v63 }
0x11e6   :  { %14568 = vmatprep.subr.bf16.mxu0 %v13676_v22 }
0x11e9   :  { %14569 = vmatpush3.bf16.msra.mxu0 %v13668_v59 }
0x11ea   :  { %14570 = vmatprep.subr.bf16.mxu0 %v13677_v31 }
0x11ed   :  { %14571 = vmatpush3.bf16.msra.mxu0 %v13669_v45 }
0x11ee   :  { %14572 = vmatprep.subr.bf16.mxu0 %v13678_v55 }
0x11f1   :  { %14573 = vmatpush3.bf16.msra.mxu0 %v13670_v46 }
0x11f2   :  { %14574 = vmatprep.subr.bf16.mxu0 %v13679_v35 }
0x11f5   :  { %14575 = vmatpush3.bf16.msra.mxu0 %v13671_v27 }
0x11f8   :  { %13757 = vmatmul.mubr.bf16.vlgmr.msra.gmra.mrb[168].mxu0 %v13646_v52 }
0x12ab   :  { %v14554_v47 = vpop.f32.mrb[164].mxu0 }
0x12ac   :  { %v14555_v2 = vpop.f32.mrb[165].mxu0 }
0x12ad   :  { %v14556_v40 = vadd.f32 %v14555_v2, %v14554_v47  ;;  %v14557_v18 = vpop.f32.mrb[166].mxu0 }
0x12ae   :  { %v14558_v4 = vpop.f32.mrb[167].mxu0 }
0x12af   :  { %v13719_v23 = vadd.f32 %v14556_v40, %v13683_v28 }
0x12cb   :  { %v14576_v7 = vpop.f32.mrb[168].mxu0 }
0x12cc   :  { %v14577_v3 = vpop.f32.mrb[169].mxu0 }
0x12cd   :  { %v14578_v29 = vadd.f32 %v14577_v3, %v14576_v7  ;;  %v14579_v13 = vpop.f32.mrb[170].mxu0 }
0x12ce   :  { %v14580_v1 = vpop.f32.mrb[171].mxu0 }
0x12cf   :  { %v13759_v53 = vadd.f32 %v14578_v29, %v13719_v23 }
0x12d1   :  { %17104 = vtanh.f32 %v13759_v53  ;;  %v13767_v42 = vsel %vm13766_vm2, %v13759_v53, -1e+30 }
0x12d2   :  { %v13769_v36 = vsel %vm13768_vm3, %v13767_v42, -inf }
0x12d3   :  { %13770 = vmax.xlane.f32.xlu0 %v13769_v36 }
0x12db   :  { %v17105_v58 = vpop.eup %17104 }
0x12dc   :  { %13785 = vperm.xlu1 %17102, %v17105_v58  }
0x135b   :  { %v13786_v51 = vpop.permute.xlu1 %13785 }
0x1360   :  { %v13771_v16 = vpop.xlane.xlu0 %13770 }
0x1361   :  { %v13772_v11 = vsub.f32 %v13767_v42, %v13771_v16 }
0x1363   :  { %v13773_v9 = vmul.f32 1.442695, %v13772_v11 }
0x1365   :  { %17106 = vpow2.f32 %v13773_v9 }
0x136f   :  { %v17107_v15 = vpop.eup %17106 }
0x1370   :  { %v13775_v39 = vsel %vm13766_vm2, %v17107_v15, 0.0 }
0x1371   :  { %v13776_v26 = vsel %vm13768_vm3, %v13775_v39, 0.0 }
0x1372   :  { %13777 = vadd.xlane.f32.xlu0 %v13776_v26 }
0x13ff   :  { %v13778_v24 = vpop.xlane.xlu0 %13777 }
0x1400   :  { %17108 = vrcp.f32 %v13778_v24 }
0x140a   :  { %v17109_v30 = vpop.eup %17108 }
0x140b   :  { %v13780_v62 = vmul.f32 %v17109_v30, %v13775_v39 }
0x140d   :  { %v13788_v61 = vsel %vm13782_vm4, %v13786_v51, %v13780_v62 }
0x140e   :  { %13789 = vst [vmem:[%s20683_s8] sm:$0x3] %v13788_v61 }
0x140f   :  { %13794 = vsyncpa [#allocation8], 1 }
0x1410   :  { %13795 = vsyncpa [#allocation10], 1 }
0x1411   :  { %13796 = vsyncmov [#allocation6] }
0x1414   :  { %s13797_s21 = vpop.sfrf %13796 }
0x1415   :  { %p14250_p10 = scmp.ne.s32.totalorder %s13797_s21, 0 }
0x1417   :  { %13801 = shalt.err (%p14250_p10)  }
0x1418   :  { %13803 = vsyncmov [#allocation6 + $0x1] }
0x141b   :  { %s13804_s22 = vpop.sfrf %13803 }
0x141c   :  { %p14251_p11 = scmp.ne.s32.totalorder %s13804_s22, 0 }
0x141e   :  { %13808 = shalt.err (%p14251_p11)  }
0x141f   :  { %13810 = vsyncmov [#allocation6 + $0x2] }
0x1422   :  { %s13811_s16 = vpop.sfrf %13810 }
0x1423   :  { %p14252_p12 = scmp.ne.s32.totalorder %s13811_s16, 0 }
0x1425   :  { %13815 = shalt.err (%p14252_p12)  }

</bundles_post_ra>
